<compile_context>
chip_gen: v7x
topology: tpu7x:2x2x1
jax: 0.10.0
libtpu: 0.0.40
codegen_flags: <defaults>
</compile_context>

<pallas_src>
import math

import jax
import jax.numpy as jnp
from jax import lax
from jax.experimental import pallas as pl
from jax.experimental.pallas import tpu as pltpu

# ---- model constants fixed by the PyTorch module definition -----------------
CIN = 96            # Conv1d in_channels
COUT = 32           # Conv1d out_channels (= LSTM input features)
K = 3               # Conv1d kernel size (padding = 1)
LIN = 1500          # input length ("lin")
POOL = 10           # MaxPool1d kernel == stride  (lin / lout)
LOUT = LIN // POOL  # 150 == LSTM seq_len
H = 10              # LSTM hidden size
NCLS = 9            # output classes
KWIN = POOL + K - 1 # 12: padded-input rows touched by one pooled output position


# ---------------------------------------------------------------------------
# The fused kernel
# ---------------------------------------------------------------------------
def _rnn_fused_kernel(xwin_ref, wbig_ref, bbig_ref, wih_ref, whh_ref, bl_ref,
                      w1r_ref, b1_ref, w2_ref, b2_ref, o_ref,
                      conv2_ref, xproj_ref, hs_ref):
    # xwin_ref : (150*B, 1152)   t-major im2col windows (row = t*B + b)
    # wbig_ref : (1152, 320)     block-banded conv weight (tap k in band j-p==k)
    # bbig_ref : (1, 320)        conv bias tiled over the 10 pool positions
    # wih_ref  : (D, 32, 40)     stacked LSTM input weights  (gate order i,f,g,o)
    # whh_ref  : (D, 10, 40)     stacked LSTM recurrent weights
    # bl_ref   : (D, 1, 40)      stacked LSTM bias (b_ih + b_hh folded)
    # w1r_ref  : (150*D, 10, 150) Linear1 weight regrouped per (t, direction)
    # b1_ref   : (1, 150), w2_ref: (150, 9), b2_ref: (1, 9)
    # o_ref    : (B, 9)
    # conv2_ref: VMEM (150*B, 320)    conv output scratch
    # xproj_ref: VMEM (D*150*B, 40)   hoisted x-projection, t-major per direction
    # hs_ref   : VMEM (D*150, B, 10)  per-step hidden states (written in the loop)
    bsz = o_ref.shape[0]
    d_dirs = wih_ref.shape[0]
    n_t = LOUT

    # ---- Stage 1: conv (one merged im2col matmul) + maxpool (static lane slices)
    #               + hoisted LSTM input projection, all batches at once ----------
    conv2_ref[...] = (
        jnp.dot(xwin_ref[...], wbig_ref[...], preferred_element_type=jnp.float32)
        + bbig_ref[...])
    # MaxPool1d(10): max over 10 static 32-lane windows of the (150*B, 320) tile.
    pooled = conv2_ref[:, 0:COUT]
    for p in range(1, POOL):
        pooled = jnp.maximum(pooled, conv2_ref[:, p * COUT:(p + 1) * COUT])
    # Hoisted input projection x_t @ W_ih + (b_ih + b_hh) for all steps/batches.
    for d in range(d_dirs):
        xproj_ref[pl.ds(d * n_t * bsz, n_t * bsz), :] = (
            jnp.dot(pooled, wih_ref[d], preferred_element_type=jnp.float32)
            + bl_ref[d])

    # ---- Stage 2: LSTM recurrence (only the h->c->h chain lives in the loop) -----
    UNROLL = 5  # 150 % 5 == 0; visible 5-step body for the LLO scheduler

    def run_direction(d, reverse):
        whh = whh_ref[d]                               # (10, 40), stays in vregs

        def chunk(s, carry):
            h, c = carry
            base = s * UNROLL
            for u in range(UNROLL):
                t = (n_t - 1 - (base + u)) if reverse else (base + u)
                # Contiguous per-step fetch of all batch rows (t-major layout).
                x_t = xproj_ref[pl.ds(d * n_t * bsz + t * bsz, bsz), :]   # (B, 40)
                gates = x_t + jnp.dot(h, whh, preferred_element_type=jnp.float32)
                sg = jax.nn.sigmoid(gates)             # one EUP pass covers i, f, o
                g_g = jnp.tanh(gates[:, 2 * H:3 * H])
                c = sg[:, H:2 * H] * c + sg[:, 0:H] * g_g
                h = sg[:, 3 * H:4 * H] * jnp.tanh(c)
                hs_ref[d * n_t + t] = h                # store; off the h->h chain
            return h, c

        h0 = jnp.zeros((bsz, H), jnp.float32)
        c0 = jnp.zeros((bsz, H), jnp.float32)
        lax.fori_loop(0, n_t // UNROLL, chunk, (h0, c0))

    run_direction(0, False)
    if d_dirs == 2:                                    # bidirectional path (D = 2)
        run_direction(1, True)

    # ---- Stage 3: Linear1 (post-loop, MXU-pipelined per-step dots), Linear2,
    #               Softmax(dim=1) -------------------------------------------------
    # The flattened (B, D*1500) activation is never materialized (it would need an
    # in-VMEM relayout); instead the contraction is kept as per-t (B,10)@(10,150)
    # dots, 10-way unrolled so the MXU pushes pipeline — all off the recurrence.
    L1_UNROLL = 10  # 150 % 10 == 0

    def l1_chunk(s, acc):
        base = s * L1_UNROLL
        for u in range(L1_UNROLL):
            t = base + u
            for d in range(d_dirs):
                acc = acc + jnp.dot(hs_ref[d * n_t + t], w1r_ref[t * d_dirs + d],
                                    preferred_element_type=jnp.float32)
        return acc

    y1 = lax.fori_loop(0, n_t // L1_UNROLL, l1_chunk,
                       jnp.zeros((bsz, LOUT), jnp.float32))
    y1 = y1 + b1_ref[...]                              # (B, 150)
    y2 = jnp.dot(y1, w2_ref[...], preferred_element_type=jnp.float32) + b2_ref[...]
    y2 = y2 - jnp.max(y2, axis=1, keepdims=True)
    e = jnp.exp(y2)
    o_ref[...] = e / jnp.sum(e, axis=1, keepdims=True)


# ---------------------------------------------------------------------------
# Wrapper-side preprocessing (pure layout work, done once per call / per params)
# ---------------------------------------------------------------------------
def prepare_input(x_ncw):
    """(B, 96, 1500) NCW -> t-major im2col windows (150*B, 12*96)."""
    bsz = x_ncw.shape[0]
    x_blc = jnp.transpose(x_ncw, (0, 2, 1))                       # (B, 1500, 96)
    pad_r = (LOUT + 1) * POOL - LIN - 1                           # 9 (conv pad + align)
    x_pad = jnp.pad(x_blc, ((0, 0), (1, pad_r), (0, 0)))          # (B, 1510, 96)
    xw = x_pad.reshape(bsz, LOUT + 1, POOL * CIN)                 # (B, 151, 960)
    xwin = jnp.concatenate(
        [xw[:, :LOUT, :], xw[:, 1:, :(KWIN - POOL) * CIN]], axis=-1)   # (B, 150, 1152)
    # t-major rows (row = t*B + b): per-step reads in the kernel become contiguous.
    return jnp.transpose(xwin, (1, 0, 2)).reshape(LOUT * bsz, KWIN * CIN)


def prepare_params(params):
    """Re-layout weights once: banded conv matrix, stacked gates, regrouped Linear1."""
    D = params["wih"].shape[0]
    w_conv, b_conv = params["w_conv"], params["b_conv"]

    wbig = jnp.zeros((KWIN * CIN, POOL * COUT), jnp.float32)
    for p in range(POOL):
        for k in range(K):
            j = p + k
            wbig = wbig.at[j * CIN:(j + 1) * CIN,
                           p * COUT:(p + 1) * COUT].set(w_conv[k])
    bbig = jnp.tile(b_conv, (1, POOL))                             # (1, 320)

    wih = jnp.transpose(params["wih"], (0, 2, 1, 3)).reshape(D, COUT, 4 * H)
    whh = jnp.transpose(params["whh"], (0, 2, 1, 3)).reshape(D, H, 4 * H)
    bl = jnp.transpose(params["b_lstm"], (0, 2, 1, 3)).reshape(D, 1, 4 * H)

    # fc index = t*D*H + d*H + h  ->  regroup W1 so the kernel reads block [t*D + d].
    w1r = params["w1"].reshape(LOUT, D, H, LOUT).reshape(LOUT * D, H, LOUT)

    return dict(D=D, wbig=wbig, bbig=bbig, wih=wih, whh=whh, bl=bl, w1r=w1r,
                b1=params["b1"], w2=params["w2"], b2=params["b2"])


def rnn_forward(x_ncw, prep):
    bsz = x_ncw.shape[0]
    D = prep["D"]
    xwin = prepare_input(x_ncw)
    return pl.pallas_call(
        _rnn_fused_kernel,
        out_shape=jax.ShapeDtypeStruct((bsz, NCLS), jnp.float32),
        in_specs=[pl.BlockSpec(memory_space=pltpu.MemorySpace.VMEM)] * 10,
        out_specs=pl.BlockSpec(memory_space=pltpu.MemorySpace.VMEM),
        scratch_shapes=[
            pltpu.VMEM((LOUT * bsz, POOL * COUT), jnp.float32),    # conv output tile
            pltpu.VMEM((D * LOUT * bsz, 4 * H), jnp.float32),      # hoisted x-projection
            pltpu.VMEM((D * LOUT, bsz, H), jnp.float32),           # per-step hidden states
        ],
        compiler_params=pltpu.CompilerParams(
            vmem_limit_bytes=32 * 1024 * 1024),                    # footprint ~8 MiB @ B=2
    )(xwin, prep["wbig"], prep["bbig"], prep["wih"], prep["whh"], prep["bl"],
      prep["w1r"], prep["b1"], prep["w2"], prep["b2"])


# ---------------------------------------------------------------------------
# Deterministic synthetic parameters (shapes from the module __init__)
# ---------------------------------------------------------------------------
def init_params(key, bidirectional=False):
    D = 2 if bidirectional else 1
    ks = jax.random.split(key, 9)

    def u(k, shape, fan_in):
        bound = 1.0 / math.sqrt(fan_in)
        return jax.random.uniform(k, shape, jnp.float32, -bound, bound)

    return {
        "w_conv": u(ks[0], (K, CIN, COUT), CIN * K),
        "b_conv": u(ks[1], (1, COUT), CIN * K),
        "wih":    u(ks[2], (D, 4, COUT, H), H),       # gate order i, f, g, o
        "whh":    u(ks[3], (D, 4, H, H), H),
        "b_lstm": u(ks[4], (D, 4, 1, H), H),          # b_ih + b_hh folded together
        "w1":     u(ks[5], (D * H * LOUT, LOUT), D * H * LOUT),
        "b1":     u(ks[6], (1, LOUT), D * H * LOUT),
        "w2":     u(ks[7], (LOUT, NCLS), LOUT),
        "b2":     u(ks[8], (1, NCLS), LOUT),
    }


# ---------------------------------------------------------------------------
# Pure-JAX reference for validation
# ---------------------------------------------------------------------------
def ref_forward(x_ncw, params, bidirectional=False):
    D = 2 if bidirectional else 1
    bsz = x_ncw.shape[0]
    x = jnp.transpose(x_ncw, (0, 2, 1))
    xp = jnp.pad(x, ((0, 0), (1, 1), (0, 0)))
    conv = sum(jnp.einsum("blc,cd->bld", xp[:, k:k + LIN, :], params["w_conv"][k])
               for k in range(K)) + params["b_conv"][None, :, :]
    pooled = conv.reshape(bsz, LOUT, POOL, COUT).max(axis=2)   # (B, T, C)
    x_tbf = jnp.transpose(pooled, (1, 0, 2))

    def run_dir(xs, wih, whh, b):
        def step(carry, x_t):
            h, c = carry
            pre = [x_t @ wih[g] + h @ whh[g] + b[g] for g in range(4)]
            i = jax.nn.sigmoid(pre[0]); f = jax.nn.sigmoid(pre[1])
            g = jnp.tanh(pre[2]);       o = jax.nn.sigmoid(pre[3])
            c = f * c + i * g
            h = o * jnp.tanh(c)
            return (h, c), h
        init = (jnp.zeros((bsz, H), jnp.float32), jnp.zeros((bsz, H), jnp.float32))
        _, hs = lax.scan(step, init, xs)
        return hs

    hs = [run_dir(x_tbf, params["wih"][0], params["whh"][0], params["b_lstm"][0])]
    if bidirectional:
        hs_r = run_dir(jnp.flip(x_tbf, 0),
                       params["wih"][1], params["whh"][1], params["b_lstm"][1])
        hs.append(jnp.flip(hs_r, 0))
    out = jnp.concatenate(hs, axis=-1)
    fc = jnp.transpose(out, (1, 0, 2)).reshape(bsz, LOUT * D * H)
    y = fc @ params["w1"] + params["b1"]
    y = y @ params["w2"] + params["b2"]
    return jax.nn.softmax(y, axis=1)


if __name__ == "__main__":
    key = jax.random.PRNGKey(0)
    kp, kx = jax.random.split(key)
    bidirectional = False                 # D = 1 (D = 2 path also implemented in-kernel)
    params = init_params(kp, bidirectional)
    prep = prepare_params(params)

    B = 2
    x = jax.random.normal(kx, (B, CIN, LIN), jnp.float32)   # PyTorch NCW input

    out = jax.block_until_ready(rnn_forward(x, prep))

    assert out.shape == (B, NCLS)
    assert bool(jnp.all(jnp.isfinite(out)))
    assert bool(jnp.allclose(jnp.sum(out, axis=1), 1.0, atol=1e-3))

    ref = ref_forward(x, params, bidirectional)
    assert bool(jnp.allclose(out, ref, atol=2e-3, rtol=1e-2)), \
        f"max abs diff = {float(jnp.max(jnp.abs(out - ref)))}"

    print("KERNEL_OK")
</pallas_src>

<mosaic_0001>
module attributes {stable_mosaic.version = 11 : i64} {
  func.func @_rnn_fused_kernel(%arg0: memref<300x1152xf32, #tpu.memory_space<vmem>>, %arg1: memref<1152x320xf32, #tpu.memory_space<vmem>>, %arg2: memref<1x320xf32, #tpu.memory_space<vmem>>, %arg3: memref<1x32x40xf32, #tpu.memory_space<vmem>>, %arg4: memref<1x10x40xf32, #tpu.memory_space<vmem>>, %arg5: memref<1x1x40xf32, #tpu.memory_space<vmem>>, %arg6: memref<150x10x150xf32, #tpu.memory_space<vmem>>, %arg7: memref<1x150xf32, #tpu.memory_space<vmem>>, %arg8: memref<150x9xf32, #tpu.memory_space<vmem>>, %arg9: memref<1x9xf32, #tpu.memory_space<vmem>>, %arg10: memref<2x9xf32, #tpu.memory_space<vmem>>, %arg11: memref<300x320xf32, #tpu.memory_space<vmem>>, %arg12: memref<300x40xf32, #tpu.memory_space<vmem>>, %arg13: memref<150x2x10xf32, #tpu.memory_space<vmem>>) attributes {dimension_semantics = [], scalar_prefetch = 0 : i64, scratch_operands = 3 : i64, tpu.core_type = #tpu.core_type<tc>} {
    %c0 = arith.constant 0 : index
    %c0_0 = arith.constant 0 : index
    %0 = vector.load %arg0[%c0, %c0_0] : memref<300x1152xf32, #tpu.memory_space<vmem>>, vector<300x1152xf32>
    %c0_1 = arith.constant 0 : index
    %c0_2 = arith.constant 0 : index
    %1 = vector.load %arg1[%c0_1, %c0_2] : memref<1152x320xf32, #tpu.memory_space<vmem>>, vector<1152x320xf32>
    %cst = arith.constant dense<0.000000e+00> : vector<300x320xf32>
    %2 = tpu.matmul %0, %1, %cst {dimension_numbers = #tpu.dot_dimension_numbers<[1], [0], [0], [1], [0, 0, 1, 1], [], []>} : vector<300x1152xf32>, vector<1152x320xf32>, vector<300x320xf32> -> vector<300x320xf32>
    %c0_3 = arith.constant 0 : index
    %c0_4 = arith.constant 0 : index
    %3 = vector.load %arg2[%c0_3, %c0_4] : memref<1x320xf32, #tpu.memory_space<vmem>>, vector<1x320xf32>
    %4 = vector.broadcast %3 : vector<1x320xf32> to vector<300x320xf32>
    %5 = arith.addf %2, %4 : vector<300x320xf32>
    %c0_5 = arith.constant 0 : index
    %c0_6 = arith.constant 0 : index
    %6 = vector.load %arg11[%c0_5, %c0_6] : memref<300x320xf32, #tpu.memory_space<vmem>>, vector<300x320xf32>
    tpu.vector_store %arg11[%c0_5, %c0_6], %5 {strides = array<i32>} : memref<300x320xf32, #tpu.memory_space<vmem>>, vector<300x320xf32>,
    %c0_7 = arith.constant 0 : index
    %c0_8 = arith.constant 0 : index
    %7 = vector.load %arg11[%c0_7, %c0_8] : memref<300x320xf32, #tpu.memory_space<vmem>>, vector<300x32xf32>
    %c0_9 = arith.constant 0 : index
    %c32 = arith.constant 32 : index
    %8 = vector.load %arg11[%c0_9, %c32] : memref<300x320xf32, #tpu.memory_space<vmem>>, vector<300x32xf32>
    %9 = arith.maximumf %7, %8 : vector<300x32xf32>
    %c0_10 = arith.constant 0 : index
    %c64 = arith.constant 64 : index
    %10 = vector.load %arg11[%c0_10, %c64] : memref<300x320xf32, #tpu.memory_space<vmem>>, vector<300x32xf32>
    %11 = arith.maximumf %9, %10 : vector<300x32xf32>
    %c0_11 = arith.constant 0 : index
    %c96 = arith.constant 96 : index
    %12 = vector.load %arg11[%c0_11, %c96] : memref<300x320xf32, #tpu.memory_space<vmem>>, vector<300x32xf32>
    %13 = arith.maximumf %11, %12 : vector<300x32xf32>
    %c0_12 = arith.constant 0 : index
    %c128 = arith.constant 128 : index
    %14 = vector.load %arg11[%c0_12, %c128] : memref<300x320xf32, #tpu.memory_space<vmem>>, vector<300x32xf32>
    %15 = arith.maximumf %13, %14 : vector<300x32xf32>
    %c0_13 = arith.constant 0 : index
    %c160 = arith.constant 160 : index
    %16 = vector.load %arg11[%c0_13, %c160] : memref<300x320xf32, #tpu.memory_space<vmem>>, vector<300x32xf32>
    %17 = arith.maximumf %15, %16 : vector<300x32xf32>
    %c0_14 = arith.constant 0 : index
    %c192 = arith.constant 192 : index
    %18 = vector.load %arg11[%c0_14, %c192] : memref<300x320xf32, #tpu.memory_space<vmem>>, vector<300x32xf32>
    %19 = arith.maximumf %17, %18 : vector<300x32xf32>
    %c0_15 = arith.constant 0 : index
    %c224 = arith.constant 224 : index
    %20 = vector.load %arg11[%c0_15, %c224] : memref<300x320xf32, #tpu.memory_space<vmem>>, vector<300x32xf32>
    %21 = arith.maximumf %19, %20 : vector<300x32xf32>
    %c0_16 = arith.constant 0 : index
    %c256 = arith.constant 256 : index
    %22 = vector.load %arg11[%c0_16, %c256] : memref<300x320xf32, #tpu.memory_space<vmem>>, vector<300x32xf32>
    %23 = arith.maximumf %21, %22 : vector<300x32xf32>
    %c0_17 = arith.constant 0 : index
    %c288 = arith.constant 288 : index
    %24 = vector.load %arg11[%c0_17, %c288] : memref<300x320xf32, #tpu.memory_space<vmem>>, vector<300x32xf32>
    %25 = arith.maximumf %23, %24 : vector<300x32xf32>
    %c0_18 = arith.constant 0 : index
    %c0_19 = arith.constant 0 : index
    %c0_20 = arith.constant 0 : index
    %26 = vector.load %arg3[%c0_18, %c0_19, %c0_20] : memref<1x32x40xf32, #tpu.memory_space<vmem>>, vector<1x32x40xf32>
    %27 = vector.shape_cast %26 : vector<1x32x40xf32> to vector<32x40xf32>
    %cst_21 = arith.constant dense<0.000000e+00> : vector<300x40xf32>
    %28 = tpu.matmul %25, %27, %cst_21 {dimension_numbers = #tpu.dot_dimension_numbers<[1], [0], [0], [1], [0, 0, 1, 1], [], []>} : vector<300x32xf32>, vector<32x40xf32>, vector<300x40xf32> -> vector<300x40xf32>
    %c0_22 = arith.constant 0 : index
    %c0_23 = arith.constant 0 : index
    %c0_24 = arith.constant 0 : index
    %29 = vector.load %arg5[%c0_22, %c0_23, %c0_24] : memref<1x1x40xf32, #tpu.memory_space<vmem>>, vector<1x1x40xf32>
    %30 = vector.shape_cast %29 : vector<1x1x40xf32> to vector<1x40xf32>
    %31 = vector.broadcast %30 : vector<1x40xf32> to vector<300x40xf32>
    %32 = arith.addf %28, %31 : vector<300x40xf32>
    %c0_25 = arith.constant 0 : index
    %c0_26 = arith.constant 0 : index
    %33 = vector.load %arg12[%c0_25, %c0_26] : memref<300x40xf32, #tpu.memory_space<vmem>>, vector<300x40xf32>
    tpu.vector_store %arg12[%c0_25, %c0_26], %32 {strides = array<i32>} : memref<300x40xf32, #tpu.memory_space<vmem>>, vector<300x40xf32>,
    %c0_27 = arith.constant 0 : index
    %c0_28 = arith.constant 0 : index
    %c0_29 = arith.constant 0 : index
    %34 = vector.load %arg4[%c0_27, %c0_28, %c0_29] : memref<1x10x40xf32, #tpu.memory_space<vmem>>, vector<1x10x40xf32>
    %35 = vector.shape_cast %34 : vector<1x10x40xf32> to vector<10x40xf32>
    %cst_30 = arith.constant 0.000000e+00 : f32
    %36 = vector.broadcast %cst_30 : f32 to vector<2x10xf32>
    %cst_31 = arith.constant 0.000000e+00 : f32
    %37 = vector.broadcast %cst_31 : f32 to vector<2x10xf32>
    %c0_i32 = arith.constant 0 : i32
    %c30_i32 = arith.constant 30 : i32
    %38 = arith.addi %c0_i32, %c30_i32 : i32
    %c1_i32 = arith.constant 1 : i32
    %39:2 = scf.for %arg14 = %c0_i32 to %38 step %c1_i32 iter_args(%arg15 = %36, %arg16 = %37) -> (vector<2x10xf32>, vector<2x10xf32>)  : i32 {
      %c5_i32 = arith.constant 5 : i32
      %61 = arith.muli %arg14, %c5_i32 : i32
      %c0_i32_48 = arith.constant 0 : i32
      %62 = arith.addi %61, %c0_i32_48 : i32
      %c2_i32 = arith.constant 2 : i32
      %63 = arith.muli %62, %c2_i32 : i32
      %c0_i32_49 = arith.constant 0 : i32
      %64 = arith.addi %c0_i32_49, %63 : i32
      %65 = arith.index_cast %64 : i32 to index
      %c0_50 = arith.constant 0 : index
      %66 = vector.load %arg12[%65, %c0_50] : memref<300x40xf32, #tpu.memory_space<vmem>>, vector<2x40xf32>
      %cst_51 = arith.constant dense<0.000000e+00> : vector<2x40xf32>
      %67 = tpu.matmul %arg15, %35, %cst_51 {dimension_numbers = #tpu.dot_dimension_numbers<[1], [0], [0], [1], [0, 0, 1, 1], [], []>} : vector<2x10xf32>, vector<10x40xf32>, vector<2x40xf32> -> vector<2x40xf32>
      %68 = arith.addf %66, %67 : vector<2x40xf32>
      %69 = arith.negf %68 : vector<2x40xf32>
      %70 = math.exp %69 : vector<2x40xf32>
      %cst_52 = arith.constant 1.000000e+00 : f32
      %71 = vector.broadcast %cst_52 : f32 to vector<2x40xf32>
      %72 = arith.addf %71, %70 : vector<2x40xf32>
      %73 = arith.divf %71, %72 : vector<2x40xf32>
      %74 = vector.extract_strided_slice %68 {offsets = [0, 20], sizes = [2, 10], strides = [1, 1]} : vector<2x40xf32> to vector<2x10xf32>
      %75 = math.tanh %74 : vector<2x10xf32>
      %76 = vector.extract_strided_slice %73 {offsets = [0, 10], sizes = [2, 10], strides = [1, 1]} : vector<2x40xf32> to vector<2x10xf32>
      %77 = arith.mulf %76, %arg16 : vector<2x10xf32>
      %78 = vector.extract_strided_slice %73 {offsets = [0, 0], sizes = [2, 10], strides = [1, 1]} : vector<2x40xf32> to vector<2x10xf32>
      %79 = arith.mulf %78, %75 : vector<2x10xf32>
      %80 = arith.addf %77, %79 : vector<2x10xf32>
      %81 = vector.extract_strided_slice %73 {offsets = [0, 30], sizes = [2, 10], strides = [1, 1]} : vector<2x40xf32> to vector<2x10xf32>
      %82 = math.tanh %80 : vector<2x10xf32>
      %83 = arith.mulf %81, %82 : vector<2x10xf32>
      %c0_i32_53 = arith.constant 0 : i32
      %84 = arith.addi %c0_i32_53, %62 : i32
      %85 = arith.index_cast %84 : i32 to index
      %c0_54 = arith.constant 0 : index
      %c0_55 = arith.constant 0 : index
      %86 = vector.load %arg13[%85, %c0_54, %c0_55] : memref<150x2x10xf32, #tpu.memory_space<vmem>>, vector<1x2x10xf32>
      %87 = vector.shape_cast %86 : vector<1x2x10xf32> to vector<2x10xf32>
      %88 = vector.shape_cast %83 : vector<2x10xf32> to vector<1x2x10xf32>
      tpu.vector_store %arg13[%85, %c0_54, %c0_55], %88 {strides = array<i32>} : memref<150x2x10xf32, #tpu.memory_space<vmem>>, vector<1x2x10xf32>,
      %c1_i32_56 = arith.constant 1 : i32
      %89 = arith.addi %61, %c1_i32_56 : i32
      %c2_i32_57 = arith.constant 2 : i32
      %90 = arith.muli %89, %c2_i32_57 : i32
      %c0_i32_58 = arith.constant 0 : i32
      %91 = arith.addi %c0_i32_58, %90 : i32
      %92 = arith.index_cast %91 : i32 to index
      %c0_59 = arith.constant 0 : index
      %93 = vector.load %arg12[%92, %c0_59] : memref<300x40xf32, #tpu.memory_space<vmem>>, vector<2x40xf32>
      %cst_60 = arith.constant dense<0.000000e+00> : vector<2x40xf32>
      %94 = tpu.matmul %83, %35, %cst_60 {dimension_numbers = #tpu.dot_dimension_numbers<[1], [0], [0], [1], [0, 0, 1, 1], [], []>} : vector<2x10xf32>, vector<10x40xf32>, vector<2x40xf32> -> vector<2x40xf32>
      %95 = arith.addf %93, %94 : vector<2x40xf32>
      %96 = arith.negf %95 : vector<2x40xf32>
      %97 = math.exp %96 : vector<2x40xf32>
      %cst_61 = arith.constant 1.000000e+00 : f32
      %98 = vector.broadcast %cst_61 : f32 to vector<2x40xf32>
      %99 = arith.addf %98, %97 : vector<2x40xf32>
      %100 = arith.divf %98, %99 : vector<2x40xf32>
      %101 = vector.extract_strided_slice %95 {offsets = [0, 20], sizes = [2, 10], strides = [1, 1]} : vector<2x40xf32> to vector<2x10xf32>
      %102 = math.tanh %101 : vector<2x10xf32>
      %103 = vector.extract_strided_slice %100 {offsets = [0, 10], sizes = [2, 10], strides = [1, 1]} : vector<2x40xf32> to vector<2x10xf32>
      %104 = arith.mulf %103, %80 : vector<2x10xf32>
      %105 = vector.extract_strided_slice %100 {offsets = [0, 0], sizes = [2, 10], strides = [1, 1]} : vector<2x40xf32> to vector<2x10xf32>
      %106 = arith.mulf %105, %102 : vector<2x10xf32>
      %107 = arith.addf %104, %106 : vector<2x10xf32>
      %108 = vector.extract_strided_slice %100 {offsets = [0, 30], sizes = [2, 10], strides = [1, 1]} : vector<2x40xf32> to vector<2x10xf32>
      %109 = math.tanh %107 : vector<2x10xf32>
      %110 = arith.mulf %108, %109 : vector<2x10xf32>
      %c0_i32_62 = arith.constant 0 : i32
      %111 = arith.addi %c0_i32_62, %89 : i32
      %112 = arith.index_cast %111 : i32 to index
      %c0_63 = arith.constant 0 : index
      %c0_64 = arith.constant 0 : index
      %113 = vector.load %arg13[%112, %c0_63, %c0_64] : memref<150x2x10xf32, #tpu.memory_space<vmem>>, vector<1x2x10xf32>
      %114 = vector.shape_cast %113 : vector<1x2x10xf32> to vector<2x10xf32>
      %115 = vector.shape_cast %110 : vector<2x10xf32> to vector<1x2x10xf32>
      tpu.vector_store %arg13[%112, %c0_63, %c0_64], %115 {strides = array<i32>} : memref<150x2x10xf32, #tpu.memory_space<vmem>>, vector<1x2x10xf32>,
      %c2_i32_65 = arith.constant 2 : i32
      %116 = arith.addi %61, %c2_i32_65 : i32
      %c2_i32_66 = arith.constant 2 : i32
      %117 = arith.muli %116, %c2_i32_66 : i32
      %c0_i32_67 = arith.constant 0 : i32
      %118 = arith.addi %c0_i32_67, %117 : i32
      %119 = arith.index_cast %118 : i32 to index
      %c0_68 = arith.constant 0 : index
      %120 = vector.load %arg12[%119, %c0_68] : memref<300x40xf32, #tpu.memory_space<vmem>>, vector<2x40xf32>
      %cst_69 = arith.constant dense<0.000000e+00> : vector<2x40xf32>
      %121 = tpu.matmul %110, %35, %cst_69 {dimension_numbers = #tpu.dot_dimension_numbers<[1], [0], [0], [1], [0, 0, 1, 1], [], []>} : vector<2x10xf32>, vector<10x40xf32>, vector<2x40xf32> -> vector<2x40xf32>
      %122 = arith.addf %120, %121 : vector<2x40xf32>
      %123 = arith.negf %122 : vector<2x40xf32>
      %124 = math.exp %123 : vector<2x40xf32>
      %cst_70 = arith.constant 1.000000e+00 : f32
      %125 = vector.broadcast %cst_70 : f32 to vector<2x40xf32>
      %126 = arith.addf %125, %124 : vector<2x40xf32>
      %127 = arith.divf %125, %126 : vector<2x40xf32>
      %128 = vector.extract_strided_slice %122 {offsets = [0, 20], sizes = [2, 10], strides = [1, 1]} : vector<2x40xf32> to vector<2x10xf32>
      %129 = math.tanh %128 : vector<2x10xf32>
      %130 = vector.extract_strided_slice %127 {offsets = [0, 10], sizes = [2, 10], strides = [1, 1]} : vector<2x40xf32> to vector<2x10xf32>
      %131 = arith.mulf %130, %107 : vector<2x10xf32>
      %132 = vector.extract_strided_slice %127 {offsets = [0, 0], sizes = [2, 10], strides = [1, 1]} : vector<2x40xf32> to vector<2x10xf32>
      %133 = arith.mulf %132, %129 : vector<2x10xf32>
      %134 = arith.addf %131, %133 : vector<2x10xf32>
      %135 = vector.extract_strided_slice %127 {offsets = [0, 30], sizes = [2, 10], strides = [1, 1]} : vector<2x40xf32> to vector<2x10xf32>
      %136 = math.tanh %134 : vector<2x10xf32>
      %137 = arith.mulf %135, %136 : vector<2x10xf32>
      %c0_i32_71 = arith.constant 0 : i32
      %138 = arith.addi %c0_i32_71, %116 : i32
      %139 = arith.index_cast %138 : i32 to index
      %c0_72 = arith.constant 0 : index
      %c0_73 = arith.constant 0 : index
      %140 = vector.load %arg13[%139, %c0_72, %c0_73] : memref<150x2x10xf32, #tpu.memory_space<vmem>>, vector<1x2x10xf32>
      %141 = vector.shape_cast %140 : vector<1x2x10xf32> to vector<2x10xf32>
      %142 = vector.shape_cast %137 : vector<2x10xf32> to vector<1x2x10xf32>
      tpu.vector_store %arg13[%139, %c0_72, %c0_73], %142 {strides = array<i32>} : memref<150x2x10xf32, #tpu.memory_space<vmem>>, vector<1x2x10xf32>,
      %c3_i32 = arith.constant 3 : i32
      %143 = arith.addi %61, %c3_i32 : i32
      %c2_i32_74 = arith.constant 2 : i32
      %144 = arith.muli %143, %c2_i32_74 : i32
      %c0_i32_75 = arith.constant 0 : i32
      %145 = arith.addi %c0_i32_75, %144 : i32
      %146 = arith.index_cast %145 : i32 to index
      %c0_76 = arith.constant 0 : index
      %147 = vector.load %arg12[%146, %c0_76] : memref<300x40xf32, #tpu.memory_space<vmem>>, vector<2x40xf32>
      %cst_77 = arith.constant dense<0.000000e+00> : vector<2x40xf32>
      %148 = tpu.matmul %137, %35, %cst_77 {dimension_numbers = #tpu.dot_dimension_numbers<[1], [0], [0], [1], [0, 0, 1, 1], [], []>} : vector<2x10xf32>, vector<10x40xf32>, vector<2x40xf32> -> vector<2x40xf32>
      %149 = arith.addf %147, %148 : vector<2x40xf32>
      %150 = arith.negf %149 : vector<2x40xf32>
      %151 = math.exp %150 : vector<2x40xf32>
      %cst_78 = arith.constant 1.000000e+00 : f32
      %152 = vector.broadcast %cst_78 : f32 to vector<2x40xf32>
      %153 = arith.addf %152, %151 : vector<2x40xf32>
      %154 = arith.divf %152, %153 : vector<2x40xf32>
      %155 = vector.extract_strided_slice %149 {offsets = [0, 20], sizes = [2, 10], strides = [1, 1]} : vector<2x40xf32> to vector<2x10xf32>
      %156 = math.tanh %155 : vector<2x10xf32>
      %157 = vector.extract_strided_slice %154 {offsets = [0, 10], sizes = [2, 10], strides = [1, 1]} : vector<2x40xf32> to vector<2x10xf32>
      %158 = arith.mulf %157, %134 : vector<2x10xf32>
      %159 = vector.extract_strided_slice %154 {offsets = [0, 0], sizes = [2, 10], strides = [1, 1]} : vector<2x40xf32> to vector<2x10xf32>
      %160 = arith.mulf %159, %156 : vector<2x10xf32>
      %161 = arith.addf %158, %160 : vector<2x10xf32>
      %162 = vector.extract_strided_slice %154 {offsets = [0, 30], sizes = [2, 10], strides = [1, 1]} : vector<2x40xf32> to vector<2x10xf32>
      %163 = math.tanh %161 : vector<2x10xf32>
      %164 = arith.mulf %162, %163 : vector<2x10xf32>
      %c0_i32_79 = arith.constant 0 : i32
      %165 = arith.addi %c0_i32_79, %143 : i32
      %166 = arith.index_cast %165 : i32 to index
      %c0_80 = arith.constant 0 : index
      %c0_81 = arith.constant 0 : index
      %167 = vector.load %arg13[%166, %c0_80, %c0_81] : memref<150x2x10xf32, #tpu.memory_space<vmem>>, vector<1x2x10xf32>
      %168 = vector.shape_cast %167 : vector<1x2x10xf32> to vector<2x10xf32>
      %169 = vector.shape_cast %164 : vector<2x10xf32> to vector<1x2x10xf32>
      tpu.vector_store %arg13[%166, %c0_80, %c0_81], %169 {strides = array<i32>} : memref<150x2x10xf32, #tpu.memory_space<vmem>>, vector<1x2x10xf32>,
      %c4_i32 = arith.constant 4 : i32
      %170 = arith.addi %61, %c4_i32 : i32
      %c2_i32_82 = arith.constant 2 : i32
      %171 = arith.muli %170, %c2_i32_82 : i32
      %c0_i32_83 = arith.constant 0 : i32
      %172 = arith.addi %c0_i32_83, %171 : i32
      %173 = arith.index_cast %172 : i32 to index
      %c0_84 = arith.constant 0 : index
      %174 = vector.load %arg12[%173, %c0_84] : memref<300x40xf32, #tpu.memory_space<vmem>>, vector<2x40xf32>
      %cst_85 = arith.constant dense<0.000000e+00> : vector<2x40xf32>
      %175 = tpu.matmul %164, %35, %cst_85 {dimension_numbers = #tpu.dot_dimension_numbers<[1], [0], [0], [1], [0, 0, 1, 1], [], []>} : vector<2x10xf32>, vector<10x40xf32>, vector<2x40xf32> -> vector<2x40xf32>
      %176 = arith.addf %174, %175 : vector<2x40xf32>
      %177 = arith.negf %176 : vector<2x40xf32>
      %178 = math.exp %177 : vector<2x40xf32>
      %cst_86 = arith.constant 1.000000e+00 : f32
      %179 = vector.broadcast %cst_86 : f32 to vector<2x40xf32>
      %180 = arith.addf %179, %178 : vector<2x40xf32>
      %181 = arith.divf %179, %180 : vector<2x40xf32>
      %182 = vector.extract_strided_slice %176 {offsets = [0, 20], sizes = [2, 10], strides = [1, 1]} : vector<2x40xf32> to vector<2x10xf32>
      %183 = math.tanh %182 : vector<2x10xf32>
      %184 = vector.extract_strided_slice %181 {offsets = [0, 10], sizes = [2, 10], strides = [1, 1]} : vector<2x40xf32> to vector<2x10xf32>
      %185 = arith.mulf %184, %161 : vector<2x10xf32>
      %186 = vector.extract_strided_slice %181 {offsets = [0, 0], sizes = [2, 10], strides = [1, 1]} : vector<2x40xf32> to vector<2x10xf32>
      %187 = arith.mulf %186, %183 : vector<2x10xf32>
      %188 = arith.addf %185, %187 : vector<2x10xf32>
      %189 = vector.extract_strided_slice %181 {offsets = [0, 30], sizes = [2, 10], strides = [1, 1]} : vector<2x40xf32> to vector<2x10xf32>
      %190 = math.tanh %188 : vector<2x10xf32>
      %191 = arith.mulf %189, %190 : vector<2x10xf32>
      %c0_i32_87 = arith.constant 0 : i32
      %192 = arith.addi %c0_i32_87, %170 : i32
      %193 = arith.index_cast %192 : i32 to index
      %c0_88 = arith.constant 0 : index
      %c0_89 = arith.constant 0 : index
      %194 = vector.load %arg13[%193, %c0_88, %c0_89] : memref<150x2x10xf32, #tpu.memory_space<vmem>>, vector<1x2x10xf32>
      %195 = vector.shape_cast %194 : vector<1x2x10xf32> to vector<2x10xf32>
      %196 = vector.shape_cast %191 : vector<2x10xf32> to vector<1x2x10xf32>
      tpu.vector_store %arg13[%193, %c0_88, %c0_89], %196 {strides = array<i32>} : memref<150x2x10xf32, #tpu.memory_space<vmem>>, vector<1x2x10xf32>,
      scf.yield %191, %188 : vector<2x10xf32>, vector<2x10xf32>
    }
    %c30_i32_32 = arith.constant 30 : i32
    %cst_33 = arith.constant 0.000000e+00 : f32
    %40 = vector.broadcast %cst_33 : f32 to vector<2x150xf32>
    %c0_i32_34 = arith.constant 0 : i32
    %c15_i32 = arith.constant 15 : i32
    %41 = arith.addi %c0_i32_34, %c15_i32 : i32
    %c1_i32_35 = arith.constant 1 : i32
    %42 = scf.for %arg14 = %c0_i32_34 to %41 step %c1_i32_35 iter_args(%arg15 = %40) -> (vector<2x150xf32>)  : i32 {
      %c10_i32 = arith.constant 10 : i32
      %61 = arith.muli %arg14, %c10_i32 : i32
      %c0_i32_48 = arith.constant 0 : i32
      %62 = arith.addi %61, %c0_i32_48 : i32
      %c0_i32_49 = arith.constant 0 : i32
      %63 = arith.addi %c0_i32_49, %62 : i32
      %64 = arith.index_cast %63 : i32 to index
      %c0_50 = arith.constant 0 : index
      %c0_51 = arith.constant 0 : index
      %65 = vector.load %arg13[%64, %c0_50, %c0_51] : memref<150x2x10xf32, #tpu.memory_space<vmem>>, vector<1x2x10xf32>
      %66 = vector.shape_cast %65 : vector<1x2x10xf32> to vector<2x10xf32>
      %c1_i32_52 = arith.constant 1 : i32
      %67 = arith.muli %62, %c1_i32_52 : i32
      %c0_i32_53 = arith.constant 0 : i32
      %68 = arith.addi %67, %c0_i32_53 : i32
      %69 = arith.index_cast %68 : i32 to index
      %c0_54 = arith.constant 0 : index
      %c0_55 = arith.constant 0 : index
      %70 = vector.load %arg6[%69, %c0_54, %c0_55] : memref<150x10x150xf32, #tpu.memory_space<vmem>>, vector<1x10x150xf32>
      %71 = vector.shape_cast %70 : vector<1x10x150xf32> to vector<10x150xf32>
      %cst_56 = arith.constant dense<0.000000e+00> : vector<2x150xf32>
      %72 = tpu.matmul %66, %71, %cst_56 {dimension_numbers = #tpu.dot_dimension_numbers<[1], [0], [0], [1], [0, 0, 1, 1], [], []>} : vector<2x10xf32>, vector<10x150xf32>, vector<2x150xf32> -> vector<2x150xf32>
      %73 = arith.addf %arg15, %72 : vector<2x150xf32>
      %c1_i32_57 = arith.constant 1 : i32
      %74 = arith.addi %61, %c1_i32_57 : i32
      %c0_i32_58 = arith.constant 0 : i32
      %75 = arith.addi %c0_i32_58, %74 : i32
      %76 = arith.index_cast %75 : i32 to index
      %c0_59 = arith.constant 0 : index
      %c0_60 = arith.constant 0 : index
      %77 = vector.load %arg13[%76, %c0_59, %c0_60] : memref<150x2x10xf32, #tpu.memory_space<vmem>>, vector<1x2x10xf32>
      %78 = vector.shape_cast %77 : vector<1x2x10xf32> to vector<2x10xf32>
      %c1_i32_61 = arith.constant 1 : i32
      %79 = arith.muli %74, %c1_i32_61 : i32
      %c0_i32_62 = arith.constant 0 : i32
      %80 = arith.addi %79, %c0_i32_62 : i32
      %81 = arith.index_cast %80 : i32 to index
      %c0_63 = arith.constant 0 : index
      %c0_64 = arith.constant 0 : index
      %82 = vector.load %arg6[%81, %c0_63, %c0_64] : memref<150x10x150xf32, #tpu.memory_space<vmem>>, vector<1x10x150xf32>
      %83 = vector.shape_cast %82 : vector<1x10x150xf32> to vector<10x150xf32>
      %cst_65 = arith.constant dense<0.000000e+00> : vector<2x150xf32>
      %84 = tpu.matmul %78, %83, %cst_65 {dimension_numbers = #tpu.dot_dimension_numbers<[1], [0], [0], [1], [0, 0, 1, 1], [], []>} : vector<2x10xf32>, vector<10x150xf32>, vector<2x150xf32> -> vector<2x150xf32>
      %85 = arith.addf %73, %84 : vector<2x150xf32>
      %c2_i32 = arith.constant 2 : i32
      %86 = arith.addi %61, %c2_i32 : i32
      %c0_i32_66 = arith.constant 0 : i32
      %87 = arith.addi %c0_i32_66, %86 : i32
      %88 = arith.index_cast %87 : i32 to index
      %c0_67 = arith.constant 0 : index
      %c0_68 = arith.constant 0 : index
      %89 = vector.load %arg13[%88, %c0_67, %c0_68] : memref<150x2x10xf32, #tpu.memory_space<vmem>>, vector<1x2x10xf32>
      %90 = vector.shape_cast %89 : vector<1x2x10xf32> to vector<2x10xf32>
      %c1_i32_69 = arith.constant 1 : i32
      %91 = arith.muli %86, %c1_i32_69 : i32
      %c0_i32_70 = arith.constant 0 : i32
      %92 = arith.addi %91, %c0_i32_70 : i32
      %93 = arith.index_cast %92 : i32 to index
      %c0_71 = arith.constant 0 : index
      %c0_72 = arith.constant 0 : index
      %94 = vector.load %arg6[%93, %c0_71, %c0_72] : memref<150x10x150xf32, #tpu.memory_space<vmem>>, vector<1x10x150xf32>
      %95 = vector.shape_cast %94 : vector<1x10x150xf32> to vector<10x150xf32>
      %cst_73 = arith.constant dense<0.000000e+00> : vector<2x150xf32>
      %96 = tpu.matmul %90, %95, %cst_73 {dimension_numbers = #tpu.dot_dimension_numbers<[1], [0], [0], [1], [0, 0, 1, 1], [], []>} : vector<2x10xf32>, vector<10x150xf32>, vector<2x150xf32> -> vector<2x150xf32>
      %97 = arith.addf %85, %96 : vector<2x150xf32>
      %c3_i32 = arith.constant 3 : i32
      %98 = arith.addi %61, %c3_i32 : i32
      %c0_i32_74 = arith.constant 0 : i32
      %99 = arith.addi %c0_i32_74, %98 : i32
      %100 = arith.index_cast %99 : i32 to index
      %c0_75 = arith.constant 0 : index
      %c0_76 = arith.constant 0 : index
      %101 = vector.load %arg13[%100, %c0_75, %c0_76] : memref<150x2x10xf32, #tpu.memory_space<vmem>>, vector<1x2x10xf32>
      %102 = vector.shape_cast %101 : vector<1x2x10xf32> to vector<2x10xf32>
      %c1_i32_77 = arith.constant 1 : i32
      %103 = arith.muli %98, %c1_i32_77 : i32
      %c0_i32_78 = arith.constant 0 : i32
      %104 = arith.addi %103, %c0_i32_78 : i32
      %105 = arith.index_cast %104 : i32 to index
      %c0_79 = arith.constant 0 : index
      %c0_80 = arith.constant 0 : index
      %106 = vector.load %arg6[%105, %c0_79, %c0_80] : memref<150x10x150xf32, #tpu.memory_space<vmem>>, vector<1x10x150xf32>
      %107 = vector.shape_cast %106 : vector<1x10x150xf32> to vector<10x150xf32>
      %cst_81 = arith.constant dense<0.000000e+00> : vector<2x150xf32>
      %108 = tpu.matmul %102, %107, %cst_81 {dimension_numbers = #tpu.dot_dimension_numbers<[1], [0], [0], [1], [0, 0, 1, 1], [], []>} : vector<2x10xf32>, vector<10x150xf32>, vector<2x150xf32> -> vector<2x150xf32>
      %109 = arith.addf %97, %108 : vector<2x150xf32>
      %c4_i32 = arith.constant 4 : i32
      %110 = arith.addi %61, %c4_i32 : i32
      %c0_i32_82 = arith.constant 0 : i32
      %111 = arith.addi %c0_i32_82, %110 : i32
      %112 = arith.index_cast %111 : i32 to index
      %c0_83 = arith.constant 0 : index
      %c0_84 = arith.constant 0 : index
      %113 = vector.load %arg13[%112, %c0_83, %c0_84] : memref<150x2x10xf32, #tpu.memory_space<vmem>>, vector<1x2x10xf32>
      %114 = vector.shape_cast %113 : vector<1x2x10xf32> to vector<2x10xf32>
      %c1_i32_85 = arith.constant 1 : i32
      %115 = arith.muli %110, %c1_i32_85 : i32
      %c0_i32_86 = arith.constant 0 : i32
      %116 = arith.addi %115, %c0_i32_86 : i32
      %117 = arith.index_cast %116 : i32 to index
      %c0_87 = arith.constant 0 : index
      %c0_88 = arith.constant 0 : index
      %118 = vector.load %arg6[%117, %c0_87, %c0_88] : memref<150x10x150xf32, #tpu.memory_space<vmem>>, vector<1x10x150xf32>
      %119 = vector.shape_cast %118 : vector<1x10x150xf32> to vector<10x150xf32>
      %cst_89 = arith.constant dense<0.000000e+00> : vector<2x150xf32>
      %120 = tpu.matmul %114, %119, %cst_89 {dimension_numbers = #tpu.dot_dimension_numbers<[1], [0], [0], [1], [0, 0, 1, 1], [], []>} : vector<2x10xf32>, vector<10x150xf32>, vector<2x150xf32> -> vector<2x150xf32>
      %121 = arith.addf %109, %120 : vector<2x150xf32>
      %c5_i32 = arith.constant 5 : i32
      %122 = arith.addi %61, %c5_i32 : i32
      %c0_i32_90 = arith.constant 0 : i32
      %123 = arith.addi %c0_i32_90, %122 : i32
      %124 = arith.index_cast %123 : i32 to index
      %c0_91 = arith.constant 0 : index
      %c0_92 = arith.constant 0 : index
      %125 = vector.load %arg13[%124, %c0_91, %c0_92] : memref<150x2x10xf32, #tpu.memory_space<vmem>>, vector<1x2x10xf32>
      %126 = vector.shape_cast %125 : vector<1x2x10xf32> to vector<2x10xf32>
      %c1_i32_93 = arith.constant 1 : i32
      %127 = arith.muli %122, %c1_i32_93 : i32
      %c0_i32_94 = arith.constant 0 : i32
      %128 = arith.addi %127, %c0_i32_94 : i32
      %129 = arith.index_cast %128 : i32 to index
      %c0_95 = arith.constant 0 : index
      %c0_96 = arith.constant 0 : index
      %130 = vector.load %arg6[%129, %c0_95, %c0_96] : memref<150x10x150xf32, #tpu.memory_space<vmem>>, vector<1x10x150xf32>
      %131 = vector.shape_cast %130 : vector<1x10x150xf32> to vector<10x150xf32>
      %cst_97 = arith.constant dense<0.000000e+00> : vector<2x150xf32>
      %132 = tpu.matmul %126, %131, %cst_97 {dimension_numbers = #tpu.dot_dimension_numbers<[1], [0], [0], [1], [0, 0, 1, 1], [], []>} : vector<2x10xf32>, vector<10x150xf32>, vector<2x150xf32> -> vector<2x150xf32>
      %133 = arith.addf %121, %132 : vector<2x150xf32>
      %c6_i32 = arith.constant 6 : i32
      %134 = arith.addi %61, %c6_i32 : i32
      %c0_i32_98 = arith.constant 0 : i32
      %135 = arith.addi %c0_i32_98, %134 : i32
      %136 = arith.index_cast %135 : i32 to index
      %c0_99 = arith.constant 0 : index
      %c0_100 = arith.constant 0 : index
      %137 = vector.load %arg13[%136, %c0_99, %c0_100] : memref<150x2x10xf32, #tpu.memory_space<vmem>>, vector<1x2x10xf32>
      %138 = vector.shape_cast %137 : vector<1x2x10xf32> to vector<2x10xf32>
      %c1_i32_101 = arith.constant 1 : i32
      %139 = arith.muli %134, %c1_i32_101 : i32
      %c0_i32_102 = arith.constant 0 : i32
      %140 = arith.addi %139, %c0_i32_102 : i32
      %141 = arith.index_cast %140 : i32 to index
      %c0_103 = arith.constant 0 : index
      %c0_104 = arith.constant 0 : index
      %142 = vector.load %arg6[%141, %c0_103, %c0_104] : memref<150x10x150xf32, #tpu.memory_space<vmem>>, vector<1x10x150xf32>
      %143 = vector.shape_cast %142 : vector<1x10x150xf32> to vector<10x150xf32>
      %cst_105 = arith.constant dense<0.000000e+00> : vector<2x150xf32>
      %144 = tpu.matmul %138, %143, %cst_105 {dimension_numbers = #tpu.dot_dimension_numbers<[1], [0], [0], [1], [0, 0, 1, 1], [], []>} : vector<2x10xf32>, vector<10x150xf32>, vector<2x150xf32> -> vector<2x150xf32>
      %145 = arith.addf %133, %144 : vector<2x150xf32>
      %c7_i32 = arith.constant 7 : i32
      %146 = arith.addi %61, %c7_i32 : i32
      %c0_i32_106 = arith.constant 0 : i32
      %147 = arith.addi %c0_i32_106, %146 : i32
      %148 = arith.index_cast %147 : i32 to index
      %c0_107 = arith.constant 0 : index
      %c0_108 = arith.constant 0 : index
      %149 = vector.load %arg13[%148, %c0_107, %c0_108] : memref<150x2x10xf32, #tpu.memory_space<vmem>>, vector<1x2x10xf32>
      %150 = vector.shape_cast %149 : vector<1x2x10xf32> to vector<2x10xf32>
      %c1_i32_109 = arith.constant 1 : i32
      %151 = arith.muli %146, %c1_i32_109 : i32
      %c0_i32_110 = arith.constant 0 : i32
      %152 = arith.addi %151, %c0_i32_110 : i32
      %153 = arith.index_cast %152 : i32 to index
      %c0_111 = arith.constant 0 : index
      %c0_112 = arith.constant 0 : index
      %154 = vector.load %arg6[%153, %c0_111, %c0_112] : memref<150x10x150xf32, #tpu.memory_space<vmem>>, vector<1x10x150xf32>
      %155 = vector.shape_cast %154 : vector<1x10x150xf32> to vector<10x150xf32>
      %cst_113 = arith.constant dense<0.000000e+00> : vector<2x150xf32>
      %156 = tpu.matmul %150, %155, %cst_113 {dimension_numbers = #tpu.dot_dimension_numbers<[1], [0], [0], [1], [0, 0, 1, 1], [], []>} : vector<2x10xf32>, vector<10x150xf32>, vector<2x150xf32> -> vector<2x150xf32>
      %157 = arith.addf %145, %156 : vector<2x150xf32>
      %c8_i32 = arith.constant 8 : i32
      %158 = arith.addi %61, %c8_i32 : i32
      %c0_i32_114 = arith.constant 0 : i32
      %159 = arith.addi %c0_i32_114, %158 : i32
      %160 = arith.index_cast %159 : i32 to index
      %c0_115 = arith.constant 0 : index
      %c0_116 = arith.constant 0 : index
      %161 = vector.load %arg13[%160, %c0_115, %c0_116] : memref<150x2x10xf32, #tpu.memory_space<vmem>>, vector<1x2x10xf32>
      %162 = vector.shape_cast %161 : vector<1x2x10xf32> to vector<2x10xf32>
      %c1_i32_117 = arith.constant 1 : i32
      %163 = arith.muli %158, %c1_i32_117 : i32
      %c0_i32_118 = arith.constant 0 : i32
      %164 = arith.addi %163, %c0_i32_118 : i32
      %165 = arith.index_cast %164 : i32 to index
      %c0_119 = arith.constant 0 : index
      %c0_120 = arith.constant 0 : index
      %166 = vector.load %arg6[%165, %c0_119, %c0_120] : memref<150x10x150xf32, #tpu.memory_space<vmem>>, vector<1x10x150xf32>
      %167 = vector.shape_cast %166 : vector<1x10x150xf32> to vector<10x150xf32>
      %cst_121 = arith.constant dense<0.000000e+00> : vector<2x150xf32>
      %168 = tpu.matmul %162, %167, %cst_121 {dimension_numbers = #tpu.dot_dimension_numbers<[1], [0], [0], [1], [0, 0, 1, 1], [], []>} : vector<2x10xf32>, vector<10x150xf32>, vector<2x150xf32> -> vector<2x150xf32>
      %169 = arith.addf %157, %168 : vector<2x150xf32>
      %c9_i32 = arith.constant 9 : i32
      %170 = arith.addi %61, %c9_i32 : i32
      %c0_i32_122 = arith.constant 0 : i32
      %171 = arith.addi %c0_i32_122, %170 : i32
      %172 = arith.index_cast %171 : i32 to index
      %c0_123 = arith.constant 0 : index
      %c0_124 = arith.constant 0 : index
      %173 = vector.load %arg13[%172, %c0_123, %c0_124] : memref<150x2x10xf32, #tpu.memory_space<vmem>>, vector<1x2x10xf32>
      %174 = vector.shape_cast %173 : vector<1x2x10xf32> to vector<2x10xf32>
      %c1_i32_125 = arith.constant 1 : i32
      %175 = arith.muli %170, %c1_i32_125 : i32
      %c0_i32_126 = arith.constant 0 : i32
      %176 = arith.addi %175, %c0_i32_126 : i32
      %177 = arith.index_cast %176 : i32 to index
      %c0_127 = arith.constant 0 : index
      %c0_128 = arith.constant 0 : index
      %178 = vector.load %arg6[%177, %c0_127, %c0_128] : memref<150x10x150xf32, #tpu.memory_space<vmem>>, vector<1x10x150xf32>
      %179 = vector.shape_cast %178 : vector<1x10x150xf32> to vector<10x150xf32>
      %cst_129 = arith.constant dense<0.000000e+00> : vector<2x150xf32>
      %180 = tpu.matmul %174, %179, %cst_129 {dimension_numbers = #tpu.dot_dimension_numbers<[1], [0], [0], [1], [0, 0, 1, 1], [], []>} : vector<2x10xf32>, vector<10x150xf32>, vector<2x150xf32> -> vector<2x150xf32>
      %181 = arith.addf %169, %180 : vector<2x150xf32>
      scf.yield %181 : vector<2x150xf32>
    }
    %c15_i32_36 = arith.constant 15 : i32
    %c0_37 = arith.constant 0 : index
    %c0_38 = arith.constant 0 : index
    %43 = vector.load %arg7[%c0_37, %c0_38] : memref<1x150xf32, #tpu.memory_space<vmem>>, vector<1x150xf32>
    %44 = vector.broadcast %43 : vector<1x150xf32> to vector<2x150xf32>
    %45 = arith.addf %42, %44 : vector<2x150xf32>
    %c0_39 = arith.constant 0 : index
    %c0_40 = arith.constant 0 : index
    %46 = vector.load %arg8[%c0_39, %c0_40] : memref<150x9xf32, #tpu.memory_space<vmem>>, vector<150x9xf32>
    %cst_41 = arith.constant dense<0.000000e+00> : vector<2x9xf32>
    %47 = tpu.matmul %45, %46, %cst_41 {dimension_numbers = #tpu.dot_dimension_numbers<[1], [0], [0], [1], [0, 0, 1, 1], [], []>} : vector<2x150xf32>, vector<150x9xf32>, vector<2x9xf32> -> vector<2x9xf32>
    %c0_42 = arith.constant 0 : index
    %c0_43 = arith.constant 0 : index
    %48 = vector.load %arg9[%c0_42, %c0_43] : memref<1x9xf32, #tpu.memory_space<vmem>>, vector<1x9xf32>
    %49 = vector.broadcast %48 : vector<1x9xf32> to vector<2x9xf32>
    %50 = arith.addf %47, %49 : vector<2x9xf32>
    %cst_44 = arith.constant dense<0xFF800000> : vector<2xf32>
    %51 = vector.multi_reduction <maximumf>, %50, %cst_44 [1] : vector<2x9xf32> to vector<2xf32>
    %52 = vector.shape_cast %51 : vector<2xf32> to vector<2x1xf32>
    %53 = vector.broadcast %52 : vector<2x1xf32> to vector<2x9xf32>
    %54 = arith.subf %50, %53 : vector<2x9xf32>
    %55 = math.exp %54 : vector<2x9xf32>
    %cst_45 = arith.constant dense<0.000000e+00> : vector<2xf32>
    %56 = vector.multi_reduction <add>, %55, %cst_45 [1] : vector<2x9xf32> to vector<2xf32>
    %57 = vector.shape_cast %56 : vector<2xf32> to vector<2x1xf32>
    %58 = vector.broadcast %57 : vector<2x1xf32> to vector<2x9xf32>
    %59 = arith.divf %55, %58 : vector<2x9xf32>
    %c0_46 = arith.constant 0 : index
    %c0_47 = arith.constant 0 : index
    %60 = vector.load %arg10[%c0_46, %c0_47] : memref<2x9xf32, #tpu.memory_space<vmem>>, vector<2x9xf32>
    tpu.vector_store %arg10[%c0_46, %c0_47], %59 {strides = array<i32>} : memref<2x9xf32, #tpu.memory_space<vmem>>, vector<2x9xf32>,
    return
  }
}

</mosaic_0001>

<bundles_post_ra>
// kernel: tpu_custom_call.1
= control target key start
LH: loop header
LB: loop body
LE: loop exit
PB: predicated region body
PF: predicated region fallthrough
CT: control target
= control target key end

     0   :  { %15 = vsyncpa [#allocation6], 0  ;;  %v13745_v2 = vmov 0.0|0.0   ;;  %vm3569_vm0 = vcmask 523264   ;;  %s9246_s12 = smov 64   ;;  %s9247_s13 = smov 32   ;;  %s13731_s0 = inlined_call_operand.vmem [shape: f32[300,1152], index: 0, kind: input, shape index: {}]   ;;  %s13732_s1 = inlined_call_operand.vmem [shape: f32[1152,320], index: 1, kind: input, shape index: {}]   ;;  %s13733_s2 = inlined_call_operand.vmem [shape: f32[1,320], index: 2, kind: input, shape index: {}]   ;;  %s13734_s3 = inlined_call_operand.vmem [shape: f32[1,32,40], index: 3, kind: input, shape index: {}]   ;;  %s13735_s4 = inlined_call_operand.vmem [shape: f32[1,10,40], index: 4, kind: input, shape index: {}]   ;;  %s13736_s5 = inlined_call_operand.vmem [shape: f32[1,1,40], index: 5, kind: input, shape index: {}]   ;;  %s13737_s6 = inlined_call_operand.vmem [shape: f32[150,10,150], index: 6, kind: input, shape index: {}]   ;;  %s13738_s7 = inlined_call_operand.vmem [shape: f32[1,150], index: 7, kind: input, shape index: {}]   ;;  %s13739_s8 = inlined_call_operand.vmem [shape: f32[150,9], index: 8, kind: input, shape index: {}]   ;;  %s13740_s9 = inlined_call_operand.vmem [shape: f32[1,9], index: 9, kind: input, shape index: {}]   ;;  %s13741_s10 = inlined_call_operand.hbm [shape: f32[2,9], index: 10, kind: output, shape index: {}]  }
   0x1   :  { %v379_v0 = vld [vmem:[%s13732_s1 + $0x8] sm:$0xff]  ;;  %v382_v1 = vld [vmem:[%s13732_s1 + $0x20] sm:$0xff]  ;;  %8005 = vmatprep.subr.bf16.mxu1 %v13745_v2  ;;  %v380_v4 = vld [vmem:[%s13732_s1 + $0x10] sm:$0xff]  ;;  %vm3681_vm1 = vcmask 519168   ;;  %vm5062_vm2 = vcmask 261120   ;;  %vm5432_vm3 = vcmask 326656  }
   0x2   :  { %v7717_v3 = vpack.c.bf16 %v382_v1, %v379_v0  ;;  %v383_v5 = vld [vmem:[%s13732_s1 + $0x28] sm:$0xff]  ;;  %v378_v6 = vld [vmem:[%s13732_s1] sm:$0xff]  ;;  %v381_v8 = vld [vmem:[%s13732_s1 + $0x18] sm:$0xff]  ;;  %vm5470_vm4 = vcmask 322560  }
   0x3   :  { %v8006_v7 = vpack.c.bf16 %v383_v5, %v380_v4  ;;  %v385_v9 = vld [vmem:[%s13732_s1 + $0x38] sm:$0xff]  ;;  %v388_v10 = vld [vmem:[%s13732_s1 + $0x50] sm:$0xff]  ;;  %v7719_v11 = vpack.c.bf16 %v381_v8, %v378_v6  ;;  %v386_v13 = vld [vmem:[%s13732_s1 + $0x40] sm:$0xff] }
   0x4   :  { %7718 = vmatprep.subr.bf16.mxu0 %v7717_v3  ;;  %v7721_v12 = vpack.c.bf16 %v388_v10, %v385_v9  ;;  %v389_v14 = vld [vmem:[%s13732_s1 + $0x58] sm:$0xff]  ;;  %v384_v15 = vld [vmem:[%s13732_s1 + $0x30] sm:$0xff]  ;;  %v387_v17 = vld [vmem:[%s13732_s1 + $0x48] sm:$0xff] }
   0x5   :  { %8007 = vmatpush1.bf16.msra.mxu1 %v8006_v7  ;;  %v8009_v16 = vpack.c.bf16 %v389_v14, %v386_v13  ;;  %v391_v18 = vld [vmem:[%s13732_s1 + $0x68] sm:$0xff]  ;;  %v394_v19 = vld [vmem:[%s13732_s1 + $0x80] sm:$0xff]  ;;  %7720 = vmatpush1.bf16.msra.mxu0 %v7719_v11  ;;  %v7723_v20 = vpack.c.bf16 %v387_v17, %v384_v15  ;;  %v392_v21 = vld [vmem:[%s13732_s1 + $0x70] sm:$0xff] }
   0x6   :  { %8008 = vmatprep.subr.bf16.mxu1 %v13745_v2  ;;  %v395_v22 = vld [vmem:[%s13732_s1 + $0x88] sm:$0xff]  ;;  %7722 = vmatprep.subr.bf16.mxu0 %v7721_v12  ;;  %v7725_v23 = vpack.c.bf16 %v394_v19, %v391_v18  ;;  %v390_v24 = vld [vmem:[%s13732_s1 + $0x60] sm:$0xff]  ;;  %v393_v25 = vld [vmem:[%s13732_s1 + $0x78] sm:$0xff] }
   0x7   :  { %v397_v26 = vld [vmem:[%s13732_s1 + $0x98] sm:$0xff]  ;;  %v400_v27 = vld [vmem:[%s13732_s1 + $0xb0] sm:$0xff]  ;;  %v8012_v28 = vpack.c.bf16 %v395_v22, %v392_v21  ;;  %v7727_v29 = vpack.c.bf16 %v393_v25, %v390_v24  ;;  %v398_v30 = vld [vmem:[%s13732_s1 + $0xa0] sm:$0xff] }
   0x8   :  { %v401_v31 = vld [vmem:[%s13732_s1 + $0xb8] sm:$0xff]  ;;  %v7729_v32 = vpack.c.bf16 %v400_v27, %v397_v26  ;;  %v396_v33 = vld [vmem:[%s13732_s1 + $0x90] sm:$0xff]  ;;  %v399_v34 = vld [vmem:[%s13732_s1 + $0xa8] sm:$0xff] }
   0x9   :  { %8010 = vmatpush1.bf16.msra.mxu1 %v8009_v16  ;;  %7724 = vmatpush1.bf16.msra.mxu0 %v7723_v20  ;;  %v403_v35 = vld [vmem:[%s13732_s1 + $0xc8] sm:$0xff]  ;;  %v406_v36 = vld [vmem:[%s13732_s1 + $0xe0] sm:$0xff]  ;;  %v8015_v37 = vpack.c.bf16 %v401_v31, %v398_v30  ;;  %v7731_v38 = vpack.c.bf16 %v399_v34, %v396_v33  ;;  %v404_v39 = vld [vmem:[%s13732_s1 + $0xd0] sm:$0xff] }
   0xa   :  { %8011 = vmatprep.subr.bf16.mxu1 %v13745_v2  ;;  %7726 = vmatprep.subr.bf16.mxu0 %v7725_v23  ;;  %v407_v40 = vld [vmem:[%s13732_s1 + $0xe8] sm:$0xff]  ;;  %v7733_v41 = vpack.c.bf16 %v406_v36, %v403_v35  ;;  %v402_v42 = vld [vmem:[%s13732_s1 + $0xc0] sm:$0xff]  ;;  %v405_v43 = vld [vmem:[%s13732_s1 + $0xd8] sm:$0xff] }
   0xb   :  { %v409_v44 = vld [vmem:[%s13732_s1 + $0xf8] sm:$0xff]  ;;  %v412_v45 = vld [vmem:[%s13732_s1 + $0x110] sm:$0xff]  ;;  %v8018_v46 = vpack.c.bf16 %v407_v40, %v404_v39  ;;  %v7735_v47 = vpack.c.bf16 %v405_v43, %v402_v42  ;;  %v410_v48 = vld [vmem:[%s13732_s1 + $0x100] sm:$0xff] }
   0xc   :  { %v413_v49 = vld [vmem:[%s13732_s1 + $0x118] sm:$0xff]  ;;  %v7737_v50 = vpack.c.bf16 %v412_v45, %v409_v44  ;;  %v408_v51 = vld [vmem:[%s13732_s1 + $0xf0] sm:$0xff]  ;;  %v411_v52 = vld [vmem:[%s13732_s1 + $0x108] sm:$0xff] }
   0xd   :  { %8013 = vmatpush1.bf16.msra.mxu1 %v8012_v28  ;;  %7728 = vmatpush1.bf16.msra.mxu0 %v7727_v29  ;;  %v415_v53 = vld [vmem:[%s13732_s1 + $0x128] sm:$0xff]  ;;  %v418_v54 = vld [vmem:[%s13732_s1 + $0x140] sm:$0xff]  ;;  %v8021_v55 = vpack.c.bf16 %v413_v49, %v410_v48  ;;  %v7739_v56 = vpack.c.bf16 %v411_v52, %v408_v51  ;;  %v416_v57 = vld [vmem:[%s13732_s1 + $0x130] sm:$0xff] }
   0xe   :  { %8014 = vmatprep.subr.bf16.mxu1 %v13745_v2  ;;  %7730 = vmatprep.subr.bf16.mxu0 %v7729_v32  ;;  %v419_v58 = vld [vmem:[%s13732_s1 + $0x148] sm:$0xff]  ;;  %v7741_v59 = vpack.c.bf16 %v418_v54, %v415_v53  ;;  %v414_v60 = vld [vmem:[%s13732_s1 + $0x120] sm:$0xff]  ;;  %v417_v61 = vld [vmem:[%s13732_s1 + $0x138] sm:$0xff] }
   0xf   :  { %v421_v62 = vld [vmem:[%s13732_s1 + $0x158] sm:$0xff]  ;;  %v424_v63 = vld [vmem:[%s13732_s1 + $0x170] sm:$0xff]  ;;  %v8024_v0 = vpack.c.bf16 %v419_v58, %v416_v57  ;;  %v7743_v1 = vpack.c.bf16 %v417_v61, %v414_v60  ;;  %v422_v3 = vld [vmem:[%s13732_s1 + $0x160] sm:$0xff] }
  0x10   :  { %v425_v4 = vld [vmem:[%s13732_s1 + $0x178] sm:$0xff]  ;;  %v7745_v5 = vpack.c.bf16 %v424_v63, %v421_v62  ;;  %v420_v6 = vld [vmem:[%s13732_s1 + $0x150] sm:$0xff]  ;;  %v423_v7 = vld [vmem:[%s13732_s1 + $0x168] sm:$0xff] }
  0x11   :  { %8016 = vmatpush1.bf16.msra.mxu1 %v8015_v37  ;;  %7732 = vmatpush1.bf16.msra.mxu0 %v7731_v38  ;;  %v427_v8 = vld [vmem:[%s13732_s1 + $0x188] sm:$0xff]  ;;  %v430_v9 = vld [vmem:[%s13732_s1 + $0x1a0] sm:$0xff]  ;;  %v8027_v10 = vpack.c.bf16 %v425_v4, %v422_v3  ;;  %v7747_v11 = vpack.c.bf16 %v423_v7, %v420_v6  ;;  %v428_v12 = vld [vmem:[%s13732_s1 + $0x190] sm:$0xff] }
  0x12   :  { %8017 = vmatprep.subr.bf16.mxu1 %v13745_v2  ;;  %7734 = vmatprep.subr.bf16.mxu0 %v7733_v41  ;;  %v431_v13 = vld [vmem:[%s13732_s1 + $0x1a8] sm:$0xff]  ;;  %v7749_v14 = vpack.c.bf16 %v430_v9, %v427_v8  ;;  %v426_v15 = vld [vmem:[%s13732_s1 + $0x180] sm:$0xff]  ;;  %v429_v16 = vld [vmem:[%s13732_s1 + $0x198] sm:$0xff] }
  0x13   :  { %v433_v17 = vld [vmem:[%s13732_s1 + $0x1b8] sm:$0xff]  ;;  %v436_v18 = vld [vmem:[%s13732_s1 + $0x1d0] sm:$0xff]  ;;  %v8030_v19 = vpack.c.bf16 %v431_v13, %v428_v12  ;;  %v37_v20 = vld [vmem:[%s13731_s0 + $0x8] sm:$0xff]  ;;  %v7751_v21 = vpack.c.bf16 %v429_v16, %v426_v15 }
  0x14   :  { %v434_v22 = vld [vmem:[%s13732_s1 + $0x1c0] sm:$0xff]  ;;  %v437_v23 = vld [vmem:[%s13732_s1 + $0x1d8] sm:$0xff]  ;;  %v7753_v24 = vpack.c.bf16 %v436_v18, %v433_v17  ;;  %v432_v25 = vld [vmem:[%s13732_s1 + $0x1b0] sm:$0xff]  ;;  %2356 = vmatprep.mubr.f32.mxu1 %v37_v20  ;;  %891 = vmatprep.mubr.f32.mxu0 %v37_v20 }
  0x15   :  { %8019 = vmatpush1.bf16.msra.mxu1 %v8018_v46  ;;  %7736 = vmatpush1.bf16.msra.mxu0 %v7735_v47  ;;  %v435_v26 = vld [vmem:[%s13732_s1 + $0x1c8] sm:$0xff]  ;;  %v442_v28 = vld [vmem:[%s13732_s1 + $0x200] sm:$0xff]  ;;  %v8033_v29 = vpack.c.bf16 %v437_v23, %v434_v22  ;;  %v440_v31 = vld [vmem:[%s13732_s1 + $0x1f0] sm:$0xff] }
  0x16   :  { %8020 = vmatprep.subr.bf16.mxu1 %v13745_v2  ;;  %7738 = vmatprep.subr.bf16.mxu0 %v7737_v50  ;;  %v439_v27 = vld [vmem:[%s13732_s1 + $0x1e8] sm:$0xff]  ;;  %v7755_v30 = vpack.c.bf16 %v435_v26, %v432_v25  ;;  %v438_v34 = vld [vmem:[%s13732_s1 + $0x1e0] sm:$0xff]  ;;  %v441_v35 = vld [vmem:[%s13732_s1 + $0x1f8] sm:$0xff] }
  0x17   :  { %v443_v32 = vld [vmem:[%s13732_s1 + $0x208] sm:$0xff]  ;;  %v7757_v33 = vpack.c.bf16 %v442_v28, %v439_v27  ;;  %v445_v36 = vld [vmem:[%s13732_s1 + $0x218] sm:$0xff]  ;;  %v448_v37 = vld [vmem:[%s13732_s1 + $0x230] sm:$0xff]  ;;  %v7759_v39 = vpack.c.bf16 %v441_v35, %v438_v34 }
  0x18   :  { %v8036_v38 = vpack.c.bf16 %v443_v32, %v440_v31  ;;  %v446_v40 = vld [vmem:[%s13732_s1 + $0x220] sm:$0xff]  ;;  %v449_v41 = vld [vmem:[%s13732_s1 + $0x238] sm:$0xff]  ;;  %v7761_v42 = vpack.c.bf16 %v448_v37, %v445_v36  ;;  %v444_v43 = vld [vmem:[%s13732_s1 + $0x210] sm:$0xff] }
  0x19   :  { %8022 = vmatpush1.bf16.msra.mxu1 %v8021_v55  ;;  %7740 = vmatpush1.bf16.msra.mxu0 %v7739_v56  ;;  %v447_v44 = vld [vmem:[%s13732_s1 + $0x228] sm:$0xff]  ;;  %v454_v46 = vld [vmem:[%s13732_s1 + $0x260] sm:$0xff]  ;;  %v8039_v47 = vpack.c.bf16 %v449_v41, %v446_v40  ;;  %v452_v49 = vld [vmem:[%s13732_s1 + $0x250] sm:$0xff] }
  0x1a   :  { %8023 = vmatprep.subr.bf16.mxu1 %v13745_v2  ;;  %7742 = vmatprep.subr.bf16.mxu0 %v7741_v59  ;;  %v451_v45 = vld [vmem:[%s13732_s1 + $0x248] sm:$0xff]  ;;  %v7763_v48 = vpack.c.bf16 %v447_v44, %v444_v43  ;;  %v450_v52 = vld [vmem:[%s13732_s1 + $0x240] sm:$0xff]  ;;  %v453_v53 = vld [vmem:[%s13732_s1 + $0x258] sm:$0xff] }
  0x1b   :  { %v455_v50 = vld [vmem:[%s13732_s1 + $0x268] sm:$0xff]  ;;  %v7765_v51 = vpack.c.bf16 %v454_v46, %v451_v45  ;;  %v457_v54 = vld [vmem:[%s13732_s1 + $0x278] sm:$0xff]  ;;  %v460_v55 = vld [vmem:[%s13732_s1 + $0x290] sm:$0xff]  ;;  %v7767_v57 = vpack.c.bf16 %v453_v53, %v450_v52 }
  0x1c   :  { %v8042_v56 = vpack.c.bf16 %v455_v50, %v452_v49  ;;  %v458_v58 = vld [vmem:[%s13732_s1 + $0x280] sm:$0xff]  ;;  %v461_v59 = vld [vmem:[%s13732_s1 + $0x298] sm:$0xff]  ;;  %v7769_v60 = vpack.c.bf16 %v460_v55, %v457_v54  ;;  %v456_v61 = vld [vmem:[%s13732_s1 + $0x270] sm:$0xff] }
  0x1d   :  { %8025 = vmatpush1.bf16.msra.mxu1 %v8024_v0  ;;  %7744 = vmatpush1.bf16.msra.mxu0 %v7743_v1  ;;  %v459_v62 = vld [vmem:[%s13732_s1 + $0x288] sm:$0xff]  ;;  %v466_v0 = vld [vmem:[%s13732_s1 + $0x2c0] sm:$0xff]  ;;  %v8045_v1 = vpack.c.bf16 %v461_v59, %v458_v58  ;;  %v464_v4 = vld [vmem:[%s13732_s1 + $0x2b0] sm:$0xff] }
  0x1e   :  { %8026 = vmatprep.subr.bf16.mxu1 %v13745_v2  ;;  %7746 = vmatprep.subr.bf16.mxu0 %v7745_v5  ;;  %v463_v63 = vld [vmem:[%s13732_s1 + $0x2a8] sm:$0xff]  ;;  %v7771_v3 = vpack.c.bf16 %v459_v62, %v456_v61  ;;  %v462_v7 = vld [vmem:[%s13732_s1 + $0x2a0] sm:$0xff]  ;;  %v465_v8 = vld [vmem:[%s13732_s1 + $0x2b8] sm:$0xff] }
  0x1f   :  { %v467_v5 = vld [vmem:[%s13732_s1 + $0x2c8] sm:$0xff]  ;;  %v7773_v6 = vpack.c.bf16 %v466_v0, %v463_v63  ;;  %v469_v9 = vld [vmem:[%s13732_s1 + $0x2d8] sm:$0xff]  ;;  %v7775_v12 = vpack.c.bf16 %v465_v8, %v462_v7  ;;  %v470_v13 = vld [vmem:[%s13732_s1 + $0x2e0] sm:$0xff] }
  0x20   :  { %v468_v16 = vld [vmem:[%s13732_s1 + $0x2d0] sm:$0xff]  ;;  %v471_v17 = vld [vmem:[%s13732_s1 + $0x2e8] sm:$0xff]  ;;  %v474_v22 = vld [vmem:[%s13732_s1 + $0x300] sm:$0xff] }
  0x21   :  { %8028 = vmatpush1.bf16.msra.mxu1 %v8027_v10  ;;  %7748 = vmatpush1.bf16.msra.mxu0 %v7747_v11  ;;  %v472_v10 = vld [vmem:[%s13732_s1 + $0x2f0] sm:$0xff]  ;;  %v8048_v11 = vpack.c.bf16 %v467_v5, %v464_v4  ;;  %v475_v18 = vld [vmem:[%s13732_s1 + $0x308] sm:$0xff]  ;;  %v481_v27 = vld [vmem:[%s13732_s1 + $0x338] sm:$0xff] }
  0x22   :  { %8029 = vmatprep.subr.bf16.mxu1 %v13745_v2  ;;  %7750 = vmatprep.subr.bf16.mxu0 %v7749_v14  ;;  %v473_v14 = vld [vmem:[%s13732_s1 + $0x2f8] sm:$0xff]  ;;  %v7777_v15 = vpack.c.bf16 %v472_v10, %v469_v9  ;;  %v476_v25 = vld [vmem:[%s13732_s1 + $0x310] sm:$0xff]  ;;  %v479_v26 = vld [vmem:[%s13732_s1 + $0x328] sm:$0xff] }
  0x23   :  { %v8051_v20 = vpack.c.bf16 %v473_v14, %v470_v13  ;;  %v484_v28 = vld [vmem:[%s13732_s1 + $0x350] sm:$0xff]  ;;  %v8054_v32 = vpack.c.bf16 %v479_v26, %v476_v25  ;;  %v483_v35 = vld [vmem:[%s13732_s1 + $0x348] sm:$0xff]  ;;  %v482_v36 = vld [vmem:[%s13732_s1 + $0x340] sm:$0xff] }
  0x24   :  { %v46_v31 = vld [vmem:[%s13731_s0 + $0x50] sm:$0xff]  ;;  %v485_v37 = vld [vmem:[%s13732_s1 + $0x358] sm:$0xff]  ;;  %v45_v40 = vld [vmem:[%s13731_s0 + $0x48] sm:$0xff] }
  0x25   :  { %8031 = vmatpush1.bf16.msra.mxu1 %v8030_v19  ;;  %7752 = vmatpush1.bf16.msra.mxu0 %v7751_v21  ;;  %v478_v19 = vld [vmem:[%s13732_s1 + $0x320] sm:$0xff]  ;;  %v7779_v21 = vpack.c.bf16 %v471_v17, %v468_v16  ;;  %v480_v34 = vld [vmem:[%s13732_s1 + $0x330] sm:$0xff]  ;;  %v55_v41 = vld [vmem:[%s13731_s0 + $0x98] sm:$0xff]  ;;  %v8057_v43 = vpack.c.bf16 %v485_v37, %v482_v36 }
  0x26   :  { %8032 = vmatprep.subr.bf16.mxu1 %v13745_v2  ;;  %7754 = vmatprep.subr.bf16.mxu0 %v7753_v24  ;;  %v7781_v23 = vpack.c.bf16 %v478_v19, %v475_v18  ;;  %v477_v24 = vld [vmem:[%s13732_s1 + $0x318] sm:$0xff]  ;;  %v486_v45 = vld [vmem:[%s13732_s1 + $0x360] sm:$0xff]  ;;  %v496_v50 = vld [vmem:[%s13732_s1 + $0x3b0] sm:$0xff] }
  0x27   :  { %v489_v46 = vld [vmem:[%s13732_s1 + $0x378] sm:$0xff]  ;;  %v64_v52 = vld [vmem:[%s13731_s0 + $0xe0] sm:$0xff]  ;;  %v73_v63 = vld [vmem:[%s13731_s0 + $0x128] sm:$0xff] }
  0x28   :  { %v493_v49 = vld [vmem:[%s13732_s1 + $0x398] sm:$0xff]  ;;  %v7791_v53 = vpack.c.bf16 %v489_v46, %v486_v45  ;;  %v494_v58 = vld [vmem:[%s13732_s1 + $0x3a0] sm:$0xff]  ;;  %v503_v7 = vld [vmem:[%s13732_s1 + $0x3e8] sm:$0xff] }
  0x29   :  { %8034 = vmatpush1.bf16.msra.mxu1 %v8033_v29  ;;  %7756 = vmatpush1.bf16.msra.mxu0 %v7755_v30  ;;  %v36_v29 = vld [vmem:[%s13731_s0] sm:$0xff]  ;;  %v7783_v30 = vpack.c.bf16 %v477_v24, %v474_v22  ;;  %v7793_v55 = vpack.c.bf16 %v496_v50, %v493_v49  ;;  %v497_v59 = vld [vmem:[%s13732_s1 + $0x3b8] sm:$0xff]  ;;  %v508_v9 = vld [vmem:[%s13732_s1 + $0x410] sm:$0xff] }
  0x2a   :  { %8035 = vmatprep.subr.bf16.mxu1 %v13745_v2  ;;  %7758 = vmatprep.subr.bf16.mxu0 %v7757_v33  ;;  %v7785_v33 = vpack.c.bf16 %v484_v28, %v481_v27  ;;  %v502_v61 = vld [vmem:[%s13732_s1 + $0x3e0] sm:$0xff]  ;;  %v63_v62 = vld [vmem:[%s13731_s0 + $0xd8] sm:$0xff]  ;;  %v507_v16 = vld [vmem:[%s13732_s1 + $0x408] sm:$0xff] }
  0x2b   :  { %v498_v4 = vld [vmem:[%s13732_s1 + $0x3c0] sm:$0xff]  ;;  %v501_v5 = vld [vmem:[%s13732_s1 + $0x3d8] sm:$0xff]  ;;  %v511_v19 = vld [vmem:[%s13732_s1 + $0x428] sm:$0xff] }
  0x2c   :  { %v505_v8 = vld [vmem:[%s13732_s1 + $0x3f8] sm:$0xff]  ;;  %v72_v10 = vld [vmem:[%s13731_s0 + $0x120] sm:$0xff]  ;;  %v512_v28 = vld [vmem:[%s13732_s1 + $0x430] sm:$0xff] }
  0x2d   :  { %8037 = vmatpush1.bf16.msra.mxu1 %v8036_v38  ;;  %7760 = vmatpush1.bf16.msra.mxu0 %v7759_v39  ;;  %v487_v38 = vld [vmem:[%s13732_s1 + $0x368] sm:$0xff]  ;;  %v490_v39 = vld [vmem:[%s13732_s1 + $0x380] sm:$0xff]  ;;  %v7801_v14 = vpack.c.bf16 %v508_v9, %v505_v8  ;;  %v509_v18 = vld [vmem:[%s13732_s1 + $0x418] sm:$0xff] }
  0x2e   :  { %8038 = vmatprep.subr.bf16.mxu1 %v13745_v2  ;;  %7762 = vmatprep.subr.bf16.mxu0 %v7761_v42  ;;  %v7787_v42 = vpack.c.bf16 %v483_v35, %v480_v34  ;;  %v7789_v44 = vpack.c.bf16 %v490_v39, %v487_v38  ;;  %v506_v17 = vld [vmem:[%s13732_s1 + $0x400] sm:$0xff]  ;;  %v91_v22 = vld [vmem:[%s13731_s0 + $0x1b8] sm:$0xff]  ;;  %v516_v37 = vld [vmem:[%s13732_s1 + $0x450] sm:$0xff] }
  0x2f   :  { %v8069_v24 = vpack.c.bf16 %v509_v18, %v506_v17  ;;  %v510_v26 = vld [vmem:[%s13732_s1 + $0x420] sm:$0xff]  ;;  %v513_v27 = vld [vmem:[%s13732_s1 + $0x438] sm:$0xff]  ;;  %v519_v38 = vld [vmem:[%s13732_s1 + $0x468] sm:$0xff] }
  0x30   :  { %v7807_v34 = vpack.c.bf16 %v513_v27, %v510_v26  ;;  %v518_v39 = vld [vmem:[%s13732_s1 + $0x460] sm:$0xff]  ;;  %v7811_v45 = vpack.c.bf16 %v519_v38, %v516_v37  ;;  %v525_v49 = vld [vmem:[%s13732_s1 + $0x498] sm:$0xff]  ;;  %v524_v50 = vld [vmem:[%s13732_s1 + $0x490] sm:$0xff] }
  0x31   :  { %8040 = vmatpush1.bf16.msra.mxu1 %v8039_v47  ;;  %7764 = vmatpush1.bf16.msra.mxu0 %v7763_v48  ;;  %v488_v47 = vld [vmem:[%s13732_s1 + $0x370] sm:$0xff]  ;;  %v491_v48 = vld [vmem:[%s13732_s1 + $0x388] sm:$0xff]  ;;  %v537_v8 = vld [vmem:[%s13732_s1 + $0x4f8] sm:$0xff] }
  0x32   :  { %8041 = vmatprep.subr.bf16.mxu1 %v13745_v2  ;;  %7766 = vmatprep.subr.bf16.mxu0 %v7765_v51  ;;  %v54_v51 = vld [vmem:[%s13731_s0 + $0x90] sm:$0xff]  ;;  %v8060_v54 = vpack.c.bf16 %v491_v48, %v488_v47  ;;  %v522_v48 = vld [vmem:[%s13732_s1 + $0x480] sm:$0xff] }
  0x33   :  { %v536_v9 = vld [vmem:[%s13732_s1 + $0x4f0] sm:$0xff] }
  0x34   :  { %v540_v18 = vld [vmem:[%s13732_s1 + $0x510] sm:$0xff] }
  0x35   :  { %8043 = vmatpush1.bf16.msra.mxu1 %v8042_v56  ;;  %7768 = vmatpush1.bf16.msra.mxu0 %v7767_v57  ;;  %v492_v56 = vld [vmem:[%s13732_s1 + $0x390] sm:$0xff]  ;;  %v495_v57 = vld [vmem:[%s13732_s1 + $0x3a8] sm:$0xff] }
  0x36   :  { %8044 = vmatprep.subr.bf16.mxu1 %v13745_v2  ;;  %7770 = vmatprep.subr.bf16.mxu0 %v7769_v60  ;;  %v499_v60 = vld [vmem:[%s13732_s1 + $0x3c8] sm:$0xff]  ;;  %v7795_v0 = vpack.c.bf16 %v495_v57, %v492_v56  ;;  %v7815_v56 = vpack.c.bf16 %v525_v49, %v522_v48 }
  0x39   :  { %8046 = vmatpush1.bf16.msra.mxu1 %v8045_v1  ;;  %7772 = vmatpush1.bf16.msra.mxu0 %v7771_v3  ;;  %v8063_v1 = vpack.c.bf16 %v497_v59, %v494_v58  ;;  %v7797_v3 = vpack.c.bf16 %v502_v61, %v499_v60  ;;  %v528_v59 = vld [vmem:[%s13732_s1 + $0x4b0] sm:$0xff]  ;;  %v531_v60 = vld [vmem:[%s13732_s1 + $0x4c8] sm:$0xff]  ;;  %v530_v61 = vld [vmem:[%s13732_s1 + $0x4c0] sm:$0xff] }
  0x3a   :  { %8047 = vmatprep.subr.bf16.mxu1 %v13745_v2  ;;  %7774 = vmatprep.subr.bf16.mxu0 %v7773_v6  ;;  %v500_v6 = vld [vmem:[%s13732_s1 + $0x3d0] sm:$0xff] }
  0x3b   :  { %v8066_v13 = vpack.c.bf16 %v503_v7, %v500_v6  ;;  %v534_v7 = vld [vmem:[%s13732_s1 + $0x4e0] sm:$0xff] }
  0x3d   :  { %8049 = vmatpush1.bf16.msra.mxu1 %v8048_v11  ;;  %7776 = vmatpush1.bf16.msra.mxu0 %v7775_v12  ;;  %v82_v11 = vld [vmem:[%s13731_s0 + $0x170] sm:$0xff]  ;;  %v7799_v12 = vpack.c.bf16 %v501_v5, %v498_v4  ;;  %v7819_v4 = vpack.c.bf16 %v531_v60, %v528_v59 }
  0x3e   :  { %8050 = vmatprep.subr.bf16.mxu1 %v13745_v2  ;;  %7778 = vmatprep.subr.bf16.mxu0 %v7777_v15  ;;  %v504_v15 = vld [vmem:[%s13732_s1 + $0x3f0] sm:$0xff] }
  0x41   :  { %8052 = vmatpush1.bf16.msra.mxu1 %v8051_v20  ;;  %7780 = vmatpush1.bf16.msra.mxu0 %v7779_v21  ;;  %v514_v20 = vld [vmem:[%s13732_s1 + $0x440] sm:$0xff]  ;;  %v81_v21 = vld [vmem:[%s13731_s0 + $0x168] sm:$0xff] }
  0x42   :  { %8053 = vmatprep.subr.bf16.mxu1 %v13745_v2  ;;  %7782 = vmatprep.subr.bf16.mxu0 %v7781_v23  ;;  %v7803_v23 = vpack.c.bf16 %v507_v16, %v504_v15  ;;  %v7805_v25 = vpack.c.bf16 %v514_v20, %v511_v19  ;;  %v7823_v15 = vpack.c.bf16 %v537_v8, %v534_v7  ;;  %v543_v19 = vld [vmem:[%s13732_s1 + $0x528] sm:$0xff]  ;;  %v542_v20 = vld [vmem:[%s13732_s1 + $0x520] sm:$0xff] }
  0x43   :  { %v7827_v26 = vpack.c.bf16 %v543_v19, %v540_v18  ;;  %v216_v18 = vld [vmem:[%s13731_s0 + $0x5a0] sm:$0xff]  ;;  %v226_v19 = vld [vmem:[%s13731_s0 + $0x5f0] sm:$0xff] }
  0x44   :  { %2357 = vmatmul.mubr.f32.vlgmr.msra.gmra.mrb[0].mxu1 %v36_v29  ;;  %892 = vmatmul.mubr.f32.vlgmr.msra.gmra.mrb[0].mxu0 %v36_v29  ;;  %v515_v29 = vld [vmem:[%s13732_s1 + $0x448] sm:$0xff] }
  0x45   :  { %2361 = vmatprep.mubr.f32.mxu1 %v46_v31  ;;  %7784 = vmatpush1.bf16.msra.mxu0 %v7783_v30  ;;  %v517_v30 = vld [vmem:[%s13732_s1 + $0x458] sm:$0xff]  ;;  %v8072_v35 = vpack.c.bf16 %v515_v29, %v512_v28  ;;  %v546_v29 = vld [vmem:[%s13732_s1 + $0x540] sm:$0xff] }
  0x46   :  { %8055 = vmatpush1.bf16.msra.mxu1 %v8054_v32  ;;  %897 = vmatprep.mubr.f32.mxu0 %v46_v31  ;;  %v520_v31 = vld [vmem:[%s13732_s1 + $0x470] sm:$0xff] }
  0x47   :  { %7786 = vmatprep.subr.bf16.mxu0 %v7785_v33  ;;  %8056 = vmatprep.subr.bf16.mxu1 %v13745_v2  ;;  %v90_v32 = vld [vmem:[%s13731_s0 + $0x1b0] sm:$0xff]  ;;  %v100_v33 = vld [vmem:[%s13731_s0 + $0x200] sm:$0xff]  ;;  %v7809_v36 = vpack.c.bf16 %v520_v31, %v517_v30  ;;  %v549_v30 = vld [vmem:[%s13732_s1 + $0x558] sm:$0xff] }
  0x48   :  { %2362 = vmatmul.mubr.f32.gmra.mrb[2].mxu1 %v45_v40  ;;  %898 = vmatmul.mubr.f32.gmra.mrb[2].mxu0 %v45_v40  ;;  %v521_v40 = vld [vmem:[%s13732_s1 + $0x478] sm:$0xff]  ;;  %v548_v31 = vld [vmem:[%s13732_s1 + $0x550] sm:$0xff]  ;;  %v7831_v37 = vpack.c.bf16 %v549_v30, %v546_v29 }
  0x49   :  { %2366 = vmatprep.mubr.f32.mxu1 %v55_v41  ;;  %903 = vmatprep.mubr.f32.mxu0 %v55_v41  ;;  %v523_v41 = vld [vmem:[%s13732_s1 + $0x488] sm:$0xff]  ;;  %v8075_v46 = vpack.c.bf16 %v521_v40, %v518_v39  ;;  %v552_v40 = vld [vmem:[%s13732_s1 + $0x570] sm:$0xff]  ;;  %v271_v29 = vld [vmem:[%s13731_s0 + $0x758] sm:$0xff] }
  0x4a   :  { %7788 = vmatpush1.bf16.msra.mxu0 %v7787_v42  ;;  %8058 = vmatpush1.bf16.msra.mxu1 %v8057_v43  ;;  %v526_v42 = vld [vmem:[%s13732_s1 + $0x4a0] sm:$0xff]  ;;  %v99_v43 = vld [vmem:[%s13731_s0 + $0x1f8] sm:$0xff]  ;;  %v270_v30 = vld [vmem:[%s13731_s0 + $0x750] sm:$0xff] }
  0x4b   :  { %7790 = vmatprep.subr.bf16.mxu0 %v7789_v44  ;;  %8059 = vmatprep.subr.bf16.mxu1 %v13745_v2  ;;  %v109_v44 = vld [vmem:[%s13731_s0 + $0x248] sm:$0xff]  ;;  %v7813_v47 = vpack.c.bf16 %v526_v42, %v523_v41  ;;  %v554_v42 = vld [vmem:[%s13732_s1 + $0x580] sm:$0xff] }
  0x4c   :  { %2367 = vmatmul.mubr.f32.gmra.mrb[4].mxu1 %v54_v51  ;;  %904 = vmatmul.mubr.f32.gmra.mrb[4].mxu0 %v54_v51  ;;  %v527_v51 = vld [vmem:[%s13732_s1 + $0x4a8] sm:$0xff] }
  0x4d   :  { %2371 = vmatprep.mubr.f32.mxu1 %v64_v52  ;;  %909 = vmatprep.mubr.f32.mxu0 %v64_v52  ;;  %v529_v52 = vld [vmem:[%s13732_s1 + $0x4b8] sm:$0xff]  ;;  %v8078_v57 = vpack.c.bf16 %v527_v51, %v524_v50  ;;  %v555_v41 = vld [vmem:[%s13732_s1 + $0x588] sm:$0xff]  ;;  %v558_v51 = vld [vmem:[%s13732_s1 + $0x5a0] sm:$0xff] }
  0x4e   :  { %7792 = vmatpush1.bf16.msra.mxu0 %v7791_v53  ;;  %8061 = vmatpush1.bf16.msra.mxu1 %v8060_v54  ;;  %v532_v53 = vld [vmem:[%s13732_s1 + $0x4d0] sm:$0xff]  ;;  %v108_v54 = vld [vmem:[%s13731_s0 + $0x240] sm:$0xff]  ;;  %v7835_v48 = vpack.c.bf16 %v555_v41, %v552_v40  ;;  %v315_v40 = vld [vmem:[%s13731_s0 + $0x8b8] sm:$0xff] }
  0x4f   :  { %7794 = vmatprep.subr.bf16.mxu0 %v7793_v55  ;;  %8062 = vmatprep.subr.bf16.mxu1 %v13745_v2  ;;  %v118_v55 = vld [vmem:[%s13731_s0 + $0x290] sm:$0xff]  ;;  %v7817_v58 = vpack.c.bf16 %v532_v53, %v529_v52  ;;  %v561_v52 = vld [vmem:[%s13732_s1 + $0x5b8] sm:$0xff]  ;;  %v325_v41 = vld [vmem:[%s13731_s0 + $0x908] sm:$0xff] }
  0x50   :  { %2372 = vmatmul.mubr.f32.gmra.mrb[6].mxu1 %v63_v62  ;;  %910 = vmatmul.mubr.f32.gmra.mrb[6].mxu0 %v63_v62  ;;  %v533_v62 = vld [vmem:[%s13732_s1 + $0x4d8] sm:$0xff]  ;;  %v560_v53 = vld [vmem:[%s13732_s1 + $0x5b0] sm:$0xff]  ;;  %v7839_v59 = vpack.c.bf16 %v561_v52, %v558_v51  ;;  %v369_v52 = vld [vmem:[%s13731_s0 + $0xa68] sm:$0xf] }
  0x51   :  { %2376 = vmatprep.mubr.f32.mxu1 %v73_v63  ;;  %915 = vmatprep.mubr.f32.mxu0 %v73_v63  ;;  %v535_v63 = vld [vmem:[%s13732_s1 + $0x4e8] sm:$0xff]  ;;  %v8081_v5 = vpack.c.bf16 %v533_v62, %v530_v61  ;;  %v564_v62 = vld [vmem:[%s13732_s1 + $0x5d0] sm:$0xff] }
  0x52   :  { %7796 = vmatpush1.bf16.msra.mxu0 %v7795_v0  ;;  %8064 = vmatpush1.bf16.msra.mxu1 %v8063_v1  ;;  %v538_v0 = vld [vmem:[%s13732_s1 + $0x500] sm:$0xff]  ;;  %v117_v1 = vld [vmem:[%s13731_s0 + $0x288] sm:$0xff]  ;;  %v370_v51 = vld [vmem:[%s13731_s0 + $0xa70] sm:$0xf] }
  0x53   :  { %7798 = vmatprep.subr.bf16.mxu0 %v7797_v3  ;;  %8065 = vmatprep.subr.bf16.mxu1 %v13745_v2  ;;  %v127_v3 = vld [vmem:[%s13731_s0 + $0x2d8] sm:$0xff]  ;;  %v7821_v6 = vpack.c.bf16 %v538_v0, %v535_v63  ;;  %v567_v63 = vld [vmem:[%s13732_s1 + $0x5e8] sm:$0xff]  ;;  %v566_v0 = vld [vmem:[%s13732_s1 + $0x5e0] sm:$0xff] }
  0x54   :  { %2377 = vmatmul.mubr.f32.gmra.mrb[8].mxu1 %v72_v10  ;;  %916 = vmatmul.mubr.f32.gmra.mrb[8].mxu0 %v72_v10  ;;  %v539_v10 = vld [vmem:[%s13732_s1 + $0x508] sm:$0xff]  ;;  %v7843_v7 = vpack.c.bf16 %v567_v63, %v564_v62  ;;  %v48_v62 = vld [vmem:[%s13731_s0 + $0x60] sm:$0xff] }
  0x55   :  { %2381 = vmatprep.mubr.f32.mxu1 %v82_v11  ;;  %921 = vmatprep.mubr.f32.mxu0 %v82_v11  ;;  %v541_v11 = vld [vmem:[%s13732_s1 + $0x518] sm:$0xff]  ;;  %v8084_v16 = vpack.c.bf16 %v539_v10, %v536_v9  ;;  %v180_v10 = vld [vmem:[%s13731_s0 + $0x480] sm:$0xff] }
  0x56   :  { %7800 = vmatpush1.bf16.msra.mxu0 %v7799_v12  ;;  %8067 = vmatpush1.bf16.msra.mxu1 %v8066_v13  ;;  %v544_v12 = vld [vmem:[%s13732_s1 + $0x530] sm:$0xff] }
  0x57   :  { %7802 = vmatprep.subr.bf16.mxu0 %v7801_v14  ;;  %8068 = vmatprep.subr.bf16.mxu1 %v13745_v2  ;;  %v126_v13 = vld [vmem:[%s13731_s0 + $0x2d0] sm:$0xff]  ;;  %v136_v14 = vld [vmem:[%s13731_s0 + $0x320] sm:$0xff]  ;;  %v7825_v17 = vpack.c.bf16 %v544_v12, %v541_v11  ;;  %v189_v12 = vld [vmem:[%s13731_s0 + $0x4c8] sm:$0xff] }
  0x58   :  { %2382 = vmatmul.mubr.f32.gmra.mrb[10].mxu1 %v81_v21  ;;  %922 = vmatmul.mubr.f32.gmra.mrb[10].mxu0 %v81_v21  ;;  %v545_v21 = vld [vmem:[%s13732_s1 + $0x538] sm:$0xff]  ;;  %v190_v11 = vld [vmem:[%s13731_s0 + $0x4d0] sm:$0xff] }
  0x59   :  { %2386 = vmatprep.mubr.f32.mxu1 %v91_v22  ;;  %927 = vmatprep.mubr.f32.mxu0 %v91_v22  ;;  %v547_v22 = vld [vmem:[%s13732_s1 + $0x548] sm:$0xff]  ;;  %v8087_v27 = vpack.c.bf16 %v545_v21, %v542_v20  ;;  %v235_v21 = vld [vmem:[%s13731_s0 + $0x638] sm:$0xff] }
  0x5a   :  { %7804 = vmatpush1.bf16.msra.mxu0 %v7803_v23  ;;  %8070 = vmatpush1.bf16.msra.mxu1 %v8069_v24  ;;  %v550_v23 = vld [vmem:[%s13732_s1 + $0x560] sm:$0xff]  ;;  %v135_v24 = vld [vmem:[%s13731_s0 + $0x318] sm:$0xff]  ;;  %v225_v20 = vld [vmem:[%s13731_s0 + $0x5e8] sm:$0xff] }
  0x5b   :  { %7806 = vmatprep.subr.bf16.mxu0 %v7805_v25  ;;  %8071 = vmatprep.subr.bf16.mxu1 %v13745_v2  ;;  %v145_v25 = vld [vmem:[%s13731_s0 + $0x368] sm:$0xff]  ;;  %v7829_v28 = vpack.c.bf16 %v550_v23, %v547_v22  ;;  %v234_v22 = vld [vmem:[%s13731_s0 + $0x630] sm:$0xff]  ;;  %v244_v23 = vld [vmem:[%s13731_s0 + $0x680] sm:$0xff] }
  0x5c   :  { %2387 = vmatmul.mubr.f32.gmra.mrb[12].mxu1 %v90_v32  ;;  %928 = vmatmul.mubr.f32.gmra.mrb[12].mxu0 %v90_v32  ;;  %v551_v32 = vld [vmem:[%s13732_s1 + $0x568] sm:$0xff] }
  0x5d   :  { %2391 = vmatprep.mubr.f32.mxu1 %v100_v33  ;;  %933 = vmatprep.mubr.f32.mxu0 %v100_v33  ;;  %v553_v33 = vld [vmem:[%s13732_s1 + $0x578] sm:$0xff]  ;;  %v8090_v38 = vpack.c.bf16 %v551_v32, %v548_v31  ;;  %v280_v31 = vld [vmem:[%s13731_s0 + $0x7a0] sm:$0xff] }
  0x5e   :  { %7808 = vmatpush1.bf16.msra.mxu0 %v7807_v34  ;;  %8073 = vmatpush1.bf16.msra.mxu1 %v8072_v35  ;;  %v556_v34 = vld [vmem:[%s13732_s1 + $0x590] sm:$0xff]  ;;  %v144_v35 = vld [vmem:[%s13731_s0 + $0x360] sm:$0xff]  ;;  %v279_v32 = vld [vmem:[%s13731_s0 + $0x798] sm:$0xff] }
  0x5f   :  { %7810 = vmatprep.subr.bf16.mxu0 %v7809_v36  ;;  %8074 = vmatprep.subr.bf16.mxu1 %v13745_v2  ;;  %v154_v36 = vld [vmem:[%s13731_s0 + $0x3b0] sm:$0xff]  ;;  %v7833_v39 = vpack.c.bf16 %v556_v34, %v553_v33  ;;  %v289_v33 = vld [vmem:[%s13731_s0 + $0x7e8] sm:$0xff]  ;;  %v288_v34 = vld [vmem:[%s13731_s0 + $0x7e0] sm:$0xff] }
  0x60   :  { %2392 = vmatmul.mubr.f32.gmra.mrb[14].mxu1 %v99_v43  ;;  %934 = vmatmul.mubr.f32.gmra.mrb[14].mxu0 %v99_v43  ;;  %v557_v43 = vld [vmem:[%s13732_s1 + $0x598] sm:$0xff] }
  0x61   :  { %2396 = vmatprep.mubr.f32.mxu1 %v109_v44  ;;  %939 = vmatprep.mubr.f32.mxu0 %v109_v44  ;;  %v559_v44 = vld [vmem:[%s13732_s1 + $0x5a8] sm:$0xff]  ;;  %v8093_v49 = vpack.c.bf16 %v557_v43, %v554_v42  ;;  %v324_v42 = vld [vmem:[%s13731_s0 + $0x900] sm:$0xff]  ;;  %v334_v43 = vld [vmem:[%s13731_s0 + $0x950] sm:$0xff] }
  0x62   :  { %7812 = vmatpush1.bf16.msra.mxu0 %v7811_v45  ;;  %8076 = vmatpush1.bf16.msra.mxu1 %v8075_v46  ;;  %v562_v45 = vld [vmem:[%s13732_s1 + $0x5c0] sm:$0xff]  ;;  %v153_v46 = vld [vmem:[%s13731_s0 + $0x3a8] sm:$0xff] }
  0x63   :  { %7814 = vmatprep.subr.bf16.mxu0 %v7813_v47  ;;  %8077 = vmatprep.subr.bf16.mxu1 %v13745_v2  ;;  %v163_v47 = vld [vmem:[%s13731_s0 + $0x3f8] sm:$0xff]  ;;  %v7837_v50 = vpack.c.bf16 %v562_v45, %v559_v44  ;;  %v333_v44 = vld [vmem:[%s13731_s0 + $0x948] sm:$0xff] }
  0x64   :  { %2397 = vmatmul.mubr.f32.gmra.mrb[16].mxu1 %v108_v54  ;;  %940 = vmatmul.mubr.f32.gmra.mrb[16].mxu0 %v108_v54  ;;  %v563_v54 = vld [vmem:[%s13732_s1 + $0x5c8] sm:$0xff]  ;;  %v343_v45 = vld [vmem:[%s13731_s0 + $0x998] sm:$0xff] }
  0x65   :  { %2401 = vmatprep.mubr.f32.mxu1 %v118_v55  ;;  %945 = vmatprep.mubr.f32.mxu0 %v118_v55  ;;  %v565_v55 = vld [vmem:[%s13732_s1 + $0x5d8] sm:$0xff]  ;;  %v8096_v60 = vpack.c.bf16 %v563_v54, %v560_v53  ;;  %v570_v54 = vld [vmem:[%s13732_s1 + $0x600] sm:$0xff] }
  0x66   :  { %7816 = vmatpush1.bf16.msra.mxu0 %v7815_v56  ;;  %8079 = vmatpush1.bf16.msra.mxu1 %v8078_v57  ;;  %v568_v56 = vld [vmem:[%s13732_s1 + $0x5f0] sm:$0xff]  ;;  %v39_v53 = vld [vmem:[%s13731_s0 + $0x18] sm:$0xff] }
  0x67   :  { %7818 = vmatprep.subr.bf16.mxu0 %v7817_v58  ;;  %8080 = vmatprep.subr.bf16.mxu1 %v13745_v2  ;;  %v162_v57 = vld [vmem:[%s13731_s0 + $0x3f0] sm:$0xff]  ;;  %v172_v58 = vld [vmem:[%s13731_s0 + $0x440] sm:$0xff]  ;;  %v7841_v61 = vpack.c.bf16 %v568_v56, %v565_v55  ;;  %v573_v55 = vld [vmem:[%s13732_s1 + $0x618] sm:$0xff] }
  0x68   :  { %2402 = vmatmul.mubr.f32.gmra.mrb[18].mxu1 %v117_v1  ;;  %946 = vmatmul.mubr.f32.gmra.mrb[18].mxu0 %v117_v1  ;;  %v569_v1 = vld [vmem:[%s13732_s1 + $0x5f8] sm:$0xff]  ;;  %v572_v56 = vld [vmem:[%s13732_s1 + $0x610] sm:$0xff] }
  0x69   :  { %2406 = vmatprep.mubr.f32.mxu1 %v127_v3  ;;  %951 = vmatprep.mubr.f32.mxu0 %v127_v3  ;;  %v571_v3 = vld [vmem:[%s13732_s1 + $0x608] sm:$0xff]  ;;  %v8099_v8 = vpack.c.bf16 %v569_v1, %v566_v0  ;;  %v576_v1 = vld [vmem:[%s13732_s1 + $0x630] sm:$0xff] }
  0x6a   :  { %7820 = vmatpush1.bf16.msra.mxu0 %v7819_v4  ;;  %8082 = vmatpush1.bf16.msra.mxu1 %v8081_v5  ;;  %v574_v4 = vld [vmem:[%s13732_s1 + $0x620] sm:$0xff]  ;;  %v171_v5 = vld [vmem:[%s13731_s0 + $0x438] sm:$0xff] }
  0x6b   :  { %7822 = vmatprep.subr.bf16.mxu0 %v7821_v6  ;;  %8083 = vmatprep.subr.bf16.mxu1 %v13745_v2  ;;  %v181_v6 = vld [vmem:[%s13731_s0 + $0x488] sm:$0xff]  ;;  %v7845_v9 = vpack.c.bf16 %v574_v4, %v571_v3  ;;  %v578_v4 = vld [vmem:[%s13732_s1 + $0x640] sm:$0xff] }
  0x6c   :  { %2407 = vmatmul.mubr.f32.gmra.mrb[20].mxu1 %v126_v13  ;;  %952 = vmatmul.mubr.f32.gmra.mrb[20].mxu0 %v126_v13  ;;  %v199_v13 = vld [vmem:[%s13731_s0 + $0x518] sm:$0xff]  ;;  %v579_v3 = vld [vmem:[%s13732_s1 + $0x648] sm:$0xff] }
  0x6d   :  { %2411 = vmatprep.mubr.f32.mxu1 %v136_v14  ;;  %957 = vmatprep.mubr.f32.mxu0 %v136_v14  ;;  %v198_v14 = vld [vmem:[%s13731_s0 + $0x510] sm:$0xff] }
  0x6e   :  { %7824 = vmatpush1.bf16.msra.mxu0 %v7823_v15  ;;  %8085 = vmatpush1.bf16.msra.mxu1 %v8084_v16  ;;  %v208_v15 = vld [vmem:[%s13731_s0 + $0x560] sm:$0xff]  ;;  %v207_v16 = vld [vmem:[%s13731_s0 + $0x558] sm:$0xff] }
  0x6f   :  { %7826 = vmatprep.subr.bf16.mxu0 %v7825_v17  ;;  %8086 = vmatprep.subr.bf16.mxu1 %v13745_v2  ;;  %v217_v17 = vld [vmem:[%s13731_s0 + $0x5a8] sm:$0xff] }
  0x70   :  { %2412 = vmatmul.mubr.f32.gmra.mrb[22].mxu1 %v135_v24  ;;  %958 = vmatmul.mubr.f32.gmra.mrb[22].mxu0 %v135_v24  ;;  %v243_v24 = vld [vmem:[%s13731_s0 + $0x678] sm:$0xff] }
  0x71   :  { %2416 = vmatprep.mubr.f32.mxu1 %v145_v25  ;;  %963 = vmatprep.mubr.f32.mxu0 %v145_v25  ;;  %v253_v25 = vld [vmem:[%s13731_s0 + $0x6c8] sm:$0xff] }
  0x72   :  { %7828 = vmatpush1.bf16.msra.mxu0 %v7827_v26  ;;  %8088 = vmatpush1.bf16.msra.mxu1 %v8087_v27  ;;  %v252_v26 = vld [vmem:[%s13731_s0 + $0x6c0] sm:$0xff]  ;;  %v262_v27 = vld [vmem:[%s13731_s0 + $0x710] sm:$0xff] }
  0x73   :  { %7830 = vmatprep.subr.bf16.mxu0 %v7829_v28  ;;  %8089 = vmatprep.subr.bf16.mxu1 %v13745_v2  ;;  %v261_v28 = vld [vmem:[%s13731_s0 + $0x708] sm:$0xff] }
  0x74   :  { %2417 = vmatmul.mubr.f32.gmra.mrb[24].mxu1 %v144_v35  ;;  %964 = vmatmul.mubr.f32.gmra.mrb[24].mxu0 %v144_v35  ;;  %v298_v35 = vld [vmem:[%s13731_s0 + $0x830] sm:$0xff] }
  0x75   :  { %2421 = vmatprep.mubr.f32.mxu1 %v154_v36  ;;  %969 = vmatprep.mubr.f32.mxu0 %v154_v36  ;;  %v297_v36 = vld [vmem:[%s13731_s0 + $0x828] sm:$0xff] }
  0x76   :  { %7832 = vmatpush1.bf16.msra.mxu0 %v7831_v37  ;;  %8091 = vmatpush1.bf16.msra.mxu1 %v8090_v38  ;;  %v307_v37 = vld [vmem:[%s13731_s0 + $0x878] sm:$0xff]  ;;  %v306_v38 = vld [vmem:[%s13731_s0 + $0x870] sm:$0xff] }
  0x77   :  { %7834 = vmatprep.subr.bf16.mxu0 %v7833_v39  ;;  %8092 = vmatprep.subr.bf16.mxu1 %v13745_v2  ;;  %v316_v39 = vld [vmem:[%s13731_s0 + $0x8c0] sm:$0xff] }
  0x78   :  { %2422 = vmatmul.mubr.f32.gmra.mrb[26].mxu1 %v153_v46  ;;  %970 = vmatmul.mubr.f32.gmra.mrb[26].mxu0 %v153_v46  ;;  %v342_v46 = vld [vmem:[%s13731_s0 + $0x990] sm:$0xff] }
  0x79   :  { %2426 = vmatprep.mubr.f32.mxu1 %v163_v47  ;;  %975 = vmatprep.mubr.f32.mxu0 %v163_v47  ;;  %v352_v47 = vld [vmem:[%s13731_s0 + $0x9e0] sm:$0xff] }
  0x7a   :  { %7836 = vmatpush1.bf16.msra.mxu0 %v7835_v48  ;;  %8094 = vmatpush1.bf16.msra.mxu1 %v8093_v49  ;;  %v351_v48 = vld [vmem:[%s13731_s0 + $0x9d8] sm:$0xff]  ;;  %v361_v49 = vld [vmem:[%s13731_s0 + $0xa28] sm:$0xff] }
  0x7b   :  { %7838 = vmatprep.subr.bf16.mxu0 %v7837_v50  ;;  %8095 = vmatprep.subr.bf16.mxu1 %v13745_v2  ;;  %v360_v50 = vld [vmem:[%s13731_s0 + $0xa20] sm:$0xff] }
  0x7c   :  { %2427 = vmatmul.mubr.f32.gmra.mrb[28].mxu1 %v162_v57  ;;  %976 = vmatmul.mubr.f32.gmra.mrb[28].mxu0 %v162_v57  ;;  %v575_v57 = vld [vmem:[%s13732_s1 + $0x628] sm:$0xff] }
  0x7d   :  { %2431 = vmatprep.mubr.f32.mxu1 %v172_v58  ;;  %981 = vmatprep.mubr.f32.mxu0 %v172_v58  ;;  %v577_v58 = vld [vmem:[%s13732_s1 + $0x638] sm:$0xff]  ;;  %v8102_v63 = vpack.c.bf16 %v575_v57, %v572_v56  ;;  %v606_v57 = vld [vmem:[%s13732_s1 + $0x720] sm:$0xff] }
  0x7e   :  { %7840 = vmatpush1.bf16.msra.mxu0 %v7839_v59  ;;  %8097 = vmatpush1.bf16.msra.mxu1 %v8096_v60  ;;  %v580_v59 = vld [vmem:[%s13732_s1 + $0x650] sm:$0xff] }
  0x7f   :  { %7842 = vmatprep.subr.bf16.mxu0 %v7841_v61  ;;  %8098 = vmatprep.subr.bf16.mxu1 %v13745_v2  ;;  %v38_v60 = vld [vmem:[%s13731_s0 + $0x10] sm:$0xff]  ;;  %v7847_v61 = vpack.c.bf16 %v573_v55, %v570_v54  ;;  %v7849_v0 = vpack.c.bf16 %v580_v59, %v577_v58  ;;  %v609_v58 = vld [vmem:[%s13732_s1 + $0x738] sm:$0xff] }
  0x80   :  { %2432 = vmatmul.mubr.f32.gmra.mrb[30].mxu1 %v171_v5  ;;  %982 = vmatmul.mubr.f32.gmra.mrb[30].mxu0 %v171_v5  ;;  %v581_v5 = vld [vmem:[%s13732_s1 + $0x658] sm:$0xff]  ;;  %v608_v59 = vld [vmem:[%s13732_s1 + $0x730] sm:$0xff] }
  0x81   :  { %2436 = vmatprep.mubr.f32.mxu1 %v181_v6  ;;  %987 = vmatprep.mubr.f32.mxu0 %v181_v6  ;;  %v583_v6 = vld [vmem:[%s13732_s1 + $0x668] sm:$0xff] }
  0x82   :  { %7844 = vmatpush1.bf16.msra.mxu0 %v7843_v7  ;;  %8100 = vmatpush1.bf16.msra.mxu1 %v8099_v8  ;;  %v586_v7 = vld [vmem:[%s13732_s1 + $0x680] sm:$0xff]  ;;  %v47_v8 = vld [vmem:[%s13731_s0 + $0x58] sm:$0xff] }
  0x83   :  { %7846 = vmatprep.subr.bf16.mxu0 %v7845_v9  ;;  %8101 = vmatprep.subr.bf16.mxu1 %v13745_v2  ;;  %v57_v9 = vld [vmem:[%s13731_s0 + $0xa8] sm:$0xff] }
  0x84   :  { %2437 = vmatmul.mubr.f32.gmra.mrb[32].mxu1 %v180_v10  ;;  %988 = vmatmul.mubr.f32.gmra.mrb[32].mxu0 %v180_v10  ;;  %v7851_v10 = vpack.c.bf16 %v579_v3, %v576_v1  ;;  %v7871_v1 = vpack.c.bf16 %v609_v58, %v606_v57 }
  0x85   :  { %2441 = vmatprep.mubr.f32.mxu1 %v190_v11  ;;  %993 = vmatprep.mubr.f32.mxu0 %v190_v11  ;;  %v8105_v11 = vpack.c.bf16 %v581_v5, %v578_v4  ;;  %v612_v5 = vld [vmem:[%s13732_s1 + $0x750] sm:$0xff] }
  0x88   :  { %2442 = vmatmul.mubr.f32.gmra.mrb[34].mxu1 %v189_v12  ;;  %994 = vmatmul.mubr.f32.gmra.mrb[34].mxu0 %v189_v12  ;;  %v7853_v12 = vpack.c.bf16 %v586_v7, %v583_v6  ;;  %v615_v6 = vld [vmem:[%s13732_s1 + $0x768] sm:$0xff]  ;;  %v614_v7 = vld [vmem:[%s13732_s1 + $0x760] sm:$0xff] }
  0x89   :  { %2446 = vmatprep.mubr.f32.mxu1 %v199_v13  ;;  %999 = vmatprep.mubr.f32.mxu0 %v199_v13  ;;  %v582_v13 = vld [vmem:[%s13732_s1 + $0x660] sm:$0xff] }
  0x8c   :  { %2447 = vmatmul.mubr.f32.gmra.mrb[36].mxu1 %v198_v14  ;;  %1000 = vmatmul.mubr.f32.gmra.mrb[36].mxu0 %v198_v14  ;;  %v585_v14 = vld [vmem:[%s13732_s1 + $0x678] sm:$0xff] }
  0x8d   :  { %2451 = vmatprep.mubr.f32.mxu1 %v208_v15  ;;  %1005 = vmatprep.mubr.f32.mxu0 %v208_v15  ;;  %v584_v15 = vld [vmem:[%s13732_s1 + $0x670] sm:$0xff] }
  0x90   :  { %2452 = vmatmul.mubr.f32.gmra.mrb[38].mxu1 %v207_v16  ;;  %1006 = vmatmul.mubr.f32.gmra.mrb[38].mxu0 %v207_v16  ;;  %v587_v16 = vld [vmem:[%s13732_s1 + $0x688] sm:$0xff] }
  0x91   :  { %2456 = vmatprep.mubr.f32.mxu1 %v217_v17  ;;  %1011 = vmatprep.mubr.f32.mxu0 %v217_v17  ;;  %v589_v17 = vld [vmem:[%s13732_s1 + $0x698] sm:$0xff] }
  0x94   :  { %2457 = vmatmul.mubr.f32.gmra.mrb[40].mxu1 %v216_v18  ;;  %1012 = vmatmul.mubr.f32.gmra.mrb[40].mxu0 %v216_v18  ;;  %v592_v18 = vld [vmem:[%s13732_s1 + $0x6b0] sm:$0xff] }
  0x95   :  { %2461 = vmatprep.mubr.f32.mxu1 %v226_v19  ;;  %1017 = vmatprep.mubr.f32.mxu0 %v226_v19  ;;  %v56_v19 = vld [vmem:[%s13731_s0 + $0xa0] sm:$0xff] }
  0x98   :  { %2462 = vmatmul.mubr.f32.gmra.mrb[42].mxu1 %v225_v20  ;;  %1018 = vmatmul.mubr.f32.gmra.mrb[42].mxu0 %v225_v20  ;;  %v66_v20 = vld [vmem:[%s13731_s0 + $0xf0] sm:$0xff] }
  0x99   :  { %2466 = vmatprep.mubr.f32.mxu1 %v235_v21  ;;  %1023 = vmatprep.mubr.f32.mxu0 %v235_v21  ;;  %v7855_v21 = vpack.c.bf16 %v585_v14, %v582_v13  ;;  %v7875_v13 = vpack.c.bf16 %v615_v6, %v612_v5 }
  0x9c   :  { %2467 = vmatmul.mubr.f32.gmra.mrb[44].mxu1 %v234_v22  ;;  %1024 = vmatmul.mubr.f32.gmra.mrb[44].mxu0 %v234_v22  ;;  %v8108_v22 = vpack.c.bf16 %v587_v16, %v584_v15  ;;  %v618_v16 = vld [vmem:[%s13732_s1 + $0x780] sm:$0xff] }
  0x9d   :  { %2471 = vmatprep.mubr.f32.mxu1 %v244_v23  ;;  %1029 = vmatprep.mubr.f32.mxu0 %v244_v23  ;;  %v7857_v23 = vpack.c.bf16 %v592_v18, %v589_v17  ;;  %v621_v17 = vld [vmem:[%s13732_s1 + $0x798] sm:$0xff]  ;;  %v620_v18 = vld [vmem:[%s13732_s1 + $0x790] sm:$0xff] }
  0xa0   :  { %2472 = vmatmul.mubr.f32.gmra.mrb[46].mxu1 %v243_v24  ;;  %1030 = vmatmul.mubr.f32.gmra.mrb[46].mxu0 %v243_v24  ;;  %v588_v24 = vld [vmem:[%s13732_s1 + $0x690] sm:$0xff] }
  0xa1   :  { %2476 = vmatprep.mubr.f32.mxu1 %v253_v25  ;;  %1035 = vmatprep.mubr.f32.mxu0 %v253_v25  ;;  %v591_v25 = vld [vmem:[%s13732_s1 + $0x6a8] sm:$0xff] }
  0xa4   :  { %2477 = vmatmul.mubr.f32.gmra.mrb[48].mxu1 %v252_v26  ;;  %1036 = vmatmul.mubr.f32.gmra.mrb[48].mxu0 %v252_v26  ;;  %v590_v26 = vld [vmem:[%s13732_s1 + $0x6a0] sm:$0xff] }
  0xa5   :  { %2481 = vmatprep.mubr.f32.mxu1 %v262_v27  ;;  %1041 = vmatprep.mubr.f32.mxu0 %v262_v27  ;;  %v593_v27 = vld [vmem:[%s13732_s1 + $0x6b8] sm:$0xff] }
  0xa8   :  { %2482 = vmatmul.mubr.f32.gmra.mrb[50].mxu1 %v261_v28  ;;  %1042 = vmatmul.mubr.f32.gmra.mrb[50].mxu0 %v261_v28  ;;  %v595_v28 = vld [vmem:[%s13732_s1 + $0x6c8] sm:$0xff] }
  0xa9   :  { %2486 = vmatprep.mubr.f32.mxu1 %v271_v29  ;;  %1047 = vmatprep.mubr.f32.mxu0 %v271_v29  ;;  %v598_v29 = vld [vmem:[%s13732_s1 + $0x6e0] sm:$0xff] }
  0xac   :  { %2487 = vmatmul.mubr.f32.gmra.mrb[52].mxu1 %v270_v30  ;;  %1048 = vmatmul.mubr.f32.gmra.mrb[52].mxu0 %v270_v30  ;;  %v65_v30 = vld [vmem:[%s13731_s0 + $0xe8] sm:$0xff] }
  0xad   :  { %2491 = vmatprep.mubr.f32.mxu1 %v280_v31  ;;  %1053 = vmatprep.mubr.f32.mxu0 %v280_v31  ;;  %v75_v31 = vld [vmem:[%s13731_s0 + $0x138] sm:$0xff] }
  0xb0   :  { %2492 = vmatmul.mubr.f32.gmra.mrb[54].mxu1 %v279_v32  ;;  %1054 = vmatmul.mubr.f32.gmra.mrb[54].mxu0 %v279_v32  ;;  %v7859_v32 = vpack.c.bf16 %v591_v25, %v588_v24  ;;  %v7879_v24 = vpack.c.bf16 %v621_v17, %v618_v16 }
  0xb1   :  { %2496 = vmatprep.mubr.f32.mxu1 %v289_v33  ;;  %1059 = vmatprep.mubr.f32.mxu0 %v289_v33  ;;  %v8111_v33 = vpack.c.bf16 %v593_v27, %v590_v26  ;;  %v624_v27 = vld [vmem:[%s13732_s1 + $0x7b0] sm:$0xff] }
  0xb4   :  { %2497 = vmatmul.mubr.f32.gmra.mrb[56].mxu1 %v288_v34  ;;  %1060 = vmatmul.mubr.f32.gmra.mrb[56].mxu0 %v288_v34  ;;  %v7861_v34 = vpack.c.bf16 %v598_v29, %v595_v28  ;;  %v627_v28 = vld [vmem:[%s13732_s1 + $0x7c8] sm:$0xff]  ;;  %v626_v29 = vld [vmem:[%s13732_s1 + $0x7c0] sm:$0xff] }
  0xb5   :  { %2501 = vmatprep.mubr.f32.mxu1 %v298_v35  ;;  %1065 = vmatprep.mubr.f32.mxu0 %v298_v35  ;;  %v594_v35 = vld [vmem:[%s13732_s1 + $0x6c0] sm:$0xff] }
  0xb8   :  { %2502 = vmatmul.mubr.f32.gmra.mrb[58].mxu1 %v297_v36  ;;  %1066 = vmatmul.mubr.f32.gmra.mrb[58].mxu0 %v297_v36  ;;  %v597_v36 = vld [vmem:[%s13732_s1 + $0x6d8] sm:$0xff] }
  0xb9   :  { %2506 = vmatprep.mubr.f32.mxu1 %v307_v37  ;;  %1071 = vmatprep.mubr.f32.mxu0 %v307_v37  ;;  %v596_v37 = vld [vmem:[%s13732_s1 + $0x6d0] sm:$0xff] }
  0xbc   :  { %2507 = vmatmul.mubr.f32.gmra.mrb[60].mxu1 %v306_v38  ;;  %1072 = vmatmul.mubr.f32.gmra.mrb[60].mxu0 %v306_v38  ;;  %v599_v38 = vld [vmem:[%s13732_s1 + $0x6e8] sm:$0xff] }
  0xbd   :  { %2511 = vmatprep.mubr.f32.mxu1 %v316_v39  ;;  %1077 = vmatprep.mubr.f32.mxu0 %v316_v39  ;;  %v601_v39 = vld [vmem:[%s13732_s1 + $0x6f8] sm:$0xff] }
  0xc0   :  { %2512 = vmatmul.mubr.f32.gmra.mrb[62].mxu1 %v315_v40  ;;  %1078 = vmatmul.mubr.f32.gmra.mrb[62].mxu0 %v315_v40  ;;  %v604_v40 = vld [vmem:[%s13732_s1 + $0x710] sm:$0xff] }
  0xc1   :  { %2516 = vmatprep.mubr.f32.mxu1 %v325_v41  ;;  %1083 = vmatprep.mubr.f32.mxu0 %v325_v41  ;;  %v74_v41 = vld [vmem:[%s13731_s0 + $0x130] sm:$0xff] }
  0xc4   :  { %2517 = vmatmul.mubr.f32.gmra.mrb[64].mxu1 %v324_v42  ;;  %1084 = vmatmul.mubr.f32.gmra.mrb[64].mxu0 %v324_v42  ;;  %v84_v42 = vld [vmem:[%s13731_s0 + $0x180] sm:$0xff] }
  0xc5   :  { %2521 = vmatprep.mubr.f32.mxu1 %v334_v43  ;;  %1089 = vmatprep.mubr.f32.mxu0 %v334_v43  ;;  %v7863_v43 = vpack.c.bf16 %v597_v36, %v594_v35  ;;  %v7883_v35 = vpack.c.bf16 %v627_v28, %v624_v27 }
  0xc8   :  { %2522 = vmatmul.mubr.f32.gmra.mrb[66].mxu1 %v333_v44  ;;  %1090 = vmatmul.mubr.f32.gmra.mrb[66].mxu0 %v333_v44  ;;  %v8114_v44 = vpack.c.bf16 %v599_v38, %v596_v37  ;;  %v630_v38 = vld [vmem:[%s13732_s1 + $0x7e0] sm:$0xff] }
  0xc9   :  { %2526 = vmatprep.mubr.f32.mxu1 %v343_v45  ;;  %1095 = vmatprep.mubr.f32.mxu0 %v343_v45  ;;  %v7865_v45 = vpack.c.bf16 %v604_v40, %v601_v39  ;;  %v633_v39 = vld [vmem:[%s13732_s1 + $0x7f8] sm:$0xff]  ;;  %v632_v40 = vld [vmem:[%s13732_s1 + $0x7f0] sm:$0xff] }
  0xcc   :  { %2527 = vmatmul.mubr.f32.gmra.mrb[68].mxu1 %v342_v46  ;;  %1096 = vmatmul.mubr.f32.gmra.mrb[68].mxu0 %v342_v46  ;;  %v600_v46 = vld [vmem:[%s13732_s1 + $0x6f0] sm:$0xff] }
  0xcd   :  { %2531 = vmatprep.mubr.f32.mxu1 %v352_v47  ;;  %1101 = vmatprep.mubr.f32.mxu0 %v352_v47  ;;  %v603_v47 = vld [vmem:[%s13732_s1 + $0x708] sm:$0xff] }
  0xce   :  { %v7867_v54 = vpack.c.bf16 %v603_v47, %v600_v46  ;;  %v7887_v46 = vpack.c.bf16 %v633_v39, %v630_v38 }
  0xd0   :  { %2532 = vmatmul.mubr.f32.gmra.mrb[70].mxu1 %v351_v48  ;;  %1102 = vmatmul.mubr.f32.gmra.mrb[70].mxu0 %v351_v48  ;;  %v602_v48 = vld [vmem:[%s13732_s1 + $0x700] sm:$0xff] }
  0xd1   :  { %2536 = vmatprep.mubr.f32.mxu1 %v361_v49  ;;  %1107 = vmatprep.mubr.f32.mxu0 %v361_v49  ;;  %v605_v49 = vld [vmem:[%s13732_s1 + $0x718] sm:$0xff] }
  0xd2   :  { %v8117_v55 = vpack.c.bf16 %v605_v49, %v602_v48  ;;  %v636_v49 = vld [vmem:[%s13732_s1 + $0x810] sm:$0xff] }
  0xd4   :  { %2537 = vmatmul.mubr.f32.gmra.mrb[72].mxu1 %v360_v50  ;;  %1108 = vmatmul.mubr.f32.gmra.mrb[72].mxu0 %v360_v50  ;;  %v607_v50 = vld [vmem:[%s13732_s1 + $0x728] sm:$0xff] }
  0xd5   :  { %2541 = vmatprep.mubr.f32.mxu1 %v370_v51  ;;  %1113 = vmatprep.mubr.f32.mxu0 %v370_v51  ;;  %v610_v51 = vld [vmem:[%s13732_s1 + $0x740] sm:$0xff] }
  0xd6   :  { %v7869_v56 = vpack.c.bf16 %v610_v51, %v607_v50  ;;  %v639_v50 = vld [vmem:[%s13732_s1 + $0x828] sm:$0xff]  ;;  %v638_v51 = vld [vmem:[%s13732_s1 + $0x820] sm:$0xff] }
  0xd7   :  { %v7891_v57 = vpack.c.bf16 %v639_v50, %v636_v49  ;;  %v218_v49 = vld [vmem:[%s13731_s0 + $0x5b0] sm:$0xff]  ;;  %v228_v50 = vld [vmem:[%s13731_s0 + $0x600] sm:$0xff] }
  0xd8   :  { %2542 = vmatmul.mubr.f32.gmra.mrb[74].mxu1 %v369_v52  ;;  %1114 = vmatmul.mubr.f32.gmra.mrb[74].mxu0 %v369_v52  ;;  %v83_v52 = vld [vmem:[%s13731_s0 + $0x178] sm:$0xff] }
  0xd9   :  { %2611 = vmatprep.mubr.f32.mxu1 %v39_v53  ;;  %1184 = vmatprep.mubr.f32.mxu0 %v39_v53  ;;  %v93_v53 = vld [vmem:[%s13731_s0 + $0x1c8] sm:$0xff] }
  0xdc   :  { %2612 = vmatmul.mubr.f32.vlgmr.msra.gmra.mrb[0].mxu1 %v38_v60  ;;  %1185 = vmatmul.mubr.f32.vlgmr.msra.gmra.mrb[0].mxu0 %v38_v60  ;;  %v611_v60 = vld [vmem:[%s13732_s1 + $0x748] sm:$0xff] }
  0xdd   :  { %2616 = vmatprep.mubr.f32.mxu1 %v48_v62  ;;  %7848 = vmatpush1.bf16.msra.mxu0 %v7847_v61  ;;  %v613_v61 = vld [vmem:[%s13732_s1 + $0x758] sm:$0xff]  ;;  %v8120_v3 = vpack.c.bf16 %v611_v60, %v608_v59  ;;  %v642_v60 = vld [vmem:[%s13732_s1 + $0x840] sm:$0xff] }
  0xde   :  { %8103 = vmatpush1.bf16.msra.mxu1 %v8102_v63  ;;  %1190 = vmatprep.mubr.f32.mxu0 %v48_v62  ;;  %v616_v62 = vld [vmem:[%s13732_s1 + $0x770] sm:$0xff]  ;;  %v92_v63 = vld [vmem:[%s13731_s0 + $0x1c0] sm:$0xff] }
  0xdf   :  { %7850 = vmatprep.subr.bf16.mxu0 %v7849_v0  ;;  %8104 = vmatprep.subr.bf16.mxu1 %v13745_v2  ;;  %v102_v0 = vld [vmem:[%s13731_s0 + $0x210] sm:$0xff]  ;;  %v7873_v4 = vpack.c.bf16 %v616_v62, %v613_v61  ;;  %v645_v61 = vld [vmem:[%s13732_s1 + $0x858] sm:$0xff] }
  0xe0   :  { %2617 = vmatmul.mubr.f32.gmra.mrb[2].mxu1 %v47_v8  ;;  %1191 = vmatmul.mubr.f32.gmra.mrb[2].mxu0 %v47_v8  ;;  %v617_v8 = vld [vmem:[%s13732_s1 + $0x778] sm:$0xff]  ;;  %v644_v62 = vld [vmem:[%s13732_s1 + $0x850] sm:$0xff]  ;;  %v7895_v5 = vpack.c.bf16 %v645_v61, %v642_v60  ;;  %v273_v60 = vld [vmem:[%s13731_s0 + $0x768] sm:$0xff] }
  0xe1   :  { %2621 = vmatprep.mubr.f32.mxu1 %v57_v9  ;;  %1196 = vmatprep.mubr.f32.mxu0 %v57_v9  ;;  %v619_v9 = vld [vmem:[%s13732_s1 + $0x788] sm:$0xff]  ;;  %v8123_v14 = vpack.c.bf16 %v617_v8, %v614_v7  ;;  %v648_v8 = vld [vmem:[%s13732_s1 + $0x870] sm:$0xff]  ;;  %v272_v61 = vld [vmem:[%s13731_s0 + $0x760] sm:$0xff] }
  0xe2   :  { %7852 = vmatpush1.bf16.msra.mxu0 %v7851_v10  ;;  %8106 = vmatpush1.bf16.msra.mxu1 %v8105_v11  ;;  %v622_v10 = vld [vmem:[%s13732_s1 + $0x7a0] sm:$0xff]  ;;  %v101_v11 = vld [vmem:[%s13731_s0 + $0x208] sm:$0xff] }
  0xe3   :  { %7854 = vmatprep.subr.bf16.mxu0 %v7853_v12  ;;  %8107 = vmatprep.subr.bf16.mxu1 %v13745_v2  ;;  %v111_v12 = vld [vmem:[%s13731_s0 + $0x258] sm:$0xff]  ;;  %v7877_v15 = vpack.c.bf16 %v622_v10, %v619_v9  ;;  %v651_v9 = vld [vmem:[%s13732_s1 + $0x888] sm:$0xff]  ;;  %v650_v10 = vld [vmem:[%s13732_s1 + $0x880] sm:$0xff] }
  0xe4   :  { %2622 = vmatmul.mubr.f32.gmra.mrb[4].mxu1 %v56_v19  ;;  %1197 = vmatmul.mubr.f32.gmra.mrb[4].mxu0 %v56_v19  ;;  %v623_v19 = vld [vmem:[%s13732_s1 + $0x7a8] sm:$0xff]  ;;  %v7899_v16 = vpack.c.bf16 %v651_v9, %v648_v8  ;;  %v327_v9 = vld [vmem:[%s13731_s0 + $0x918] sm:$0xff] }
  0xe5   :  { %2626 = vmatprep.mubr.f32.mxu1 %v66_v20  ;;  %1202 = vmatprep.mubr.f32.mxu0 %v66_v20  ;;  %v625_v20 = vld [vmem:[%s13732_s1 + $0x7b8] sm:$0xff]  ;;  %v8126_v25 = vpack.c.bf16 %v623_v19, %v620_v18  ;;  %v654_v19 = vld [vmem:[%s13732_s1 + $0x8a0] sm:$0xff]  ;;  %v317_v8 = vld [vmem:[%s13731_s0 + $0x8c8] sm:$0xff] }
  0xe6   :  { %7856 = vmatpush1.bf16.msra.mxu0 %v7855_v21  ;;  %8109 = vmatpush1.bf16.msra.mxu1 %v8108_v22  ;;  %v628_v21 = vld [vmem:[%s13732_s1 + $0x7d0] sm:$0xff] }
  0xe7   :  { %7858 = vmatprep.subr.bf16.mxu0 %v7857_v23  ;;  %8110 = vmatprep.subr.bf16.mxu1 %v13745_v2  ;;  %v110_v22 = vld [vmem:[%s13731_s0 + $0x250] sm:$0xff]  ;;  %v120_v23 = vld [vmem:[%s13731_s0 + $0x2a0] sm:$0xff]  ;;  %v7881_v26 = vpack.c.bf16 %v628_v21, %v625_v20  ;;  %v657_v20 = vld [vmem:[%s13732_s1 + $0x8b8] sm:$0xff] }
  0xe8   :  { %2627 = vmatmul.mubr.f32.gmra.mrb[6].mxu1 %v65_v30  ;;  %1203 = vmatmul.mubr.f32.gmra.mrb[6].mxu0 %v65_v30  ;;  %v629_v30 = vld [vmem:[%s13732_s1 + $0x7d8] sm:$0xff]  ;;  %v656_v21 = vld [vmem:[%s13732_s1 + $0x8b0] sm:$0xff]  ;;  %v7903_v27 = vpack.c.bf16 %v657_v20, %v654_v19  ;;  %v372_v19 = vld [vmem:[%s13731_s0 + $0xa80] sm:$0xf] }
  0xe9   :  { %2631 = vmatprep.mubr.f32.mxu1 %v75_v31  ;;  %1208 = vmatprep.mubr.f32.mxu0 %v75_v31  ;;  %v631_v31 = vld [vmem:[%s13732_s1 + $0x7e8] sm:$0xff]  ;;  %v8129_v36 = vpack.c.bf16 %v629_v30, %v626_v29  ;;  %v660_v30 = vld [vmem:[%s13732_s1 + $0x8d0] sm:$0xff]  ;;  %v371_v20 = vld [vmem:[%s13731_s0 + $0xa78] sm:$0xf] }
  0xea   :  { %7860 = vmatpush1.bf16.msra.mxu0 %v7859_v32  ;;  %8112 = vmatpush1.bf16.msra.mxu1 %v8111_v33  ;;  %v634_v32 = vld [vmem:[%s13732_s1 + $0x800] sm:$0xff]  ;;  %v119_v33 = vld [vmem:[%s13731_s0 + $0x298] sm:$0xff] }
  0xeb   :  { %7862 = vmatprep.subr.bf16.mxu0 %v7861_v34  ;;  %8113 = vmatprep.subr.bf16.mxu1 %v13745_v2  ;;  %v129_v34 = vld [vmem:[%s13731_s0 + $0x2e8] sm:$0xff]  ;;  %v7885_v37 = vpack.c.bf16 %v634_v32, %v631_v31  ;;  %v662_v32 = vld [vmem:[%s13732_s1 + $0x8e0] sm:$0xff] }
  0xec   :  { %2632 = vmatmul.mubr.f32.gmra.mrb[8].mxu1 %v74_v41  ;;  %1209 = vmatmul.mubr.f32.gmra.mrb[8].mxu0 %v74_v41  ;;  %v635_v41 = vld [vmem:[%s13732_s1 + $0x808] sm:$0xff] }
  0xed   :  { %2636 = vmatprep.mubr.f32.mxu1 %v84_v42  ;;  %1214 = vmatprep.mubr.f32.mxu0 %v84_v42  ;;  %v637_v42 = vld [vmem:[%s13732_s1 + $0x818] sm:$0xff]  ;;  %v8132_v47 = vpack.c.bf16 %v635_v41, %v632_v40  ;;  %v663_v31 = vld [vmem:[%s13732_s1 + $0x8e8] sm:$0xff]  ;;  %v182_v41 = vld [vmem:[%s13731_s0 + $0x490] sm:$0xff] }
  0xee   :  { %7864 = vmatpush1.bf16.msra.mxu0 %v7863_v43  ;;  %8115 = vmatpush1.bf16.msra.mxu1 %v8114_v44  ;;  %v640_v43 = vld [vmem:[%s13732_s1 + $0x830] sm:$0xff]  ;;  %v128_v44 = vld [vmem:[%s13731_s0 + $0x2e0] sm:$0xff]  ;;  %v7907_v38 = vpack.c.bf16 %v663_v31, %v660_v30 }
  0xef   :  { %7866 = vmatprep.subr.bf16.mxu0 %v7865_v45  ;;  %8116 = vmatprep.subr.bf16.mxu1 %v13745_v2  ;;  %v138_v45 = vld [vmem:[%s13731_s0 + $0x330] sm:$0xff]  ;;  %v7889_v48 = vpack.c.bf16 %v640_v43, %v637_v42  ;;  %v192_v42 = vld [vmem:[%s13731_s0 + $0x4e0] sm:$0xff]  ;;  %v191_v43 = vld [vmem:[%s13731_s0 + $0x4d8] sm:$0xff] }
  0xf0   :  { %2637 = vmatmul.mubr.f32.gmra.mrb[10].mxu1 %v83_v52  ;;  %1215 = vmatmul.mubr.f32.gmra.mrb[10].mxu0 %v83_v52  ;;  %v641_v52 = vld [vmem:[%s13732_s1 + $0x838] sm:$0xff]  ;;  %v50_v30 = vld [vmem:[%s13731_s0 + $0x70] sm:$0xff] }
  0xf1   :  { %2641 = vmatprep.mubr.f32.mxu1 %v93_v53  ;;  %1220 = vmatprep.mubr.f32.mxu0 %v93_v53  ;;  %v643_v53 = vld [vmem:[%s13732_s1 + $0x848] sm:$0xff]  ;;  %v8135_v58 = vpack.c.bf16 %v641_v52, %v638_v51  ;;  %v227_v51 = vld [vmem:[%s13731_s0 + $0x5f8] sm:$0xff] }
  0xf2   :  { %7868 = vmatpush1.bf16.msra.mxu0 %v7867_v54  ;;  %8118 = vmatpush1.bf16.msra.mxu1 %v8117_v55  ;;  %v646_v54 = vld [vmem:[%s13732_s1 + $0x860] sm:$0xff]  ;;  %v137_v55 = vld [vmem:[%s13731_s0 + $0x328] sm:$0xff] }
  0xf3   :  { %7870 = vmatprep.subr.bf16.mxu0 %v7869_v56  ;;  %8119 = vmatprep.subr.bf16.mxu1 %v13745_v2  ;;  %v147_v56 = vld [vmem:[%s13731_s0 + $0x378] sm:$0xff]  ;;  %v7893_v59 = vpack.c.bf16 %v646_v54, %v643_v53  ;;  %v237_v52 = vld [vmem:[%s13731_s0 + $0x648] sm:$0xff]  ;;  %v236_v53 = vld [vmem:[%s13731_s0 + $0x640] sm:$0xff] }
  0xf4   :  { %2642 = vmatmul.mubr.f32.gmra.mrb[12].mxu1 %v92_v63  ;;  %1221 = vmatmul.mubr.f32.gmra.mrb[12].mxu0 %v92_v63  ;;  %v647_v63 = vld [vmem:[%s13732_s1 + $0x868] sm:$0xff]  ;;  %v246_v54 = vld [vmem:[%s13731_s0 + $0x690] sm:$0xff] }
  0xf5   :  { %2646 = vmatprep.mubr.f32.mxu1 %v102_v0  ;;  %1226 = vmatprep.mubr.f32.mxu0 %v102_v0  ;;  %v649_v0 = vld [vmem:[%s13732_s1 + $0x878] sm:$0xff]  ;;  %v8138_v6 = vpack.c.bf16 %v647_v63, %v644_v62  ;;  %v282_v62 = vld [vmem:[%s13731_s0 + $0x7b0] sm:$0xff]  ;;  %v281_v63 = vld [vmem:[%s13731_s0 + $0x7a8] sm:$0xff] }
  0xf6   :  { %7872 = vmatpush1.bf16.msra.mxu0 %v7871_v1  ;;  %8121 = vmatpush1.bf16.msra.mxu1 %v8120_v3  ;;  %v652_v1 = vld [vmem:[%s13732_s1 + $0x890] sm:$0xff] }
  0xf7   :  { %7874 = vmatprep.subr.bf16.mxu0 %v7873_v4  ;;  %8122 = vmatprep.subr.bf16.mxu1 %v13745_v2  ;;  %v146_v3 = vld [vmem:[%s13731_s0 + $0x370] sm:$0xff]  ;;  %v156_v4 = vld [vmem:[%s13731_s0 + $0x3c0] sm:$0xff]  ;;  %v7897_v7 = vpack.c.bf16 %v652_v1, %v649_v0  ;;  %v291_v0 = vld [vmem:[%s13731_s0 + $0x7f8] sm:$0xff] }
  0xf8   :  { %2647 = vmatmul.mubr.f32.gmra.mrb[14].mxu1 %v101_v11  ;;  %1227 = vmatmul.mubr.f32.gmra.mrb[14].mxu0 %v101_v11  ;;  %v653_v11 = vld [vmem:[%s13732_s1 + $0x898] sm:$0xff]  ;;  %v290_v1 = vld [vmem:[%s13731_s0 + $0x7f0] sm:$0xff] }
  0xf9   :  { %2651 = vmatprep.mubr.f32.mxu1 %v111_v12  ;;  %1232 = vmatprep.mubr.f32.mxu0 %v111_v12  ;;  %v655_v12 = vld [vmem:[%s13732_s1 + $0x8a8] sm:$0xff]  ;;  %v8141_v17 = vpack.c.bf16 %v653_v11, %v650_v10  ;;  %v326_v10 = vld [vmem:[%s13731_s0 + $0x910] sm:$0xff]  ;;  %v336_v11 = vld [vmem:[%s13731_s0 + $0x960] sm:$0xff] }
  0xfa   :  { %7876 = vmatpush1.bf16.msra.mxu0 %v7875_v13  ;;  %8124 = vmatpush1.bf16.msra.mxu1 %v8123_v14  ;;  %v658_v13 = vld [vmem:[%s13732_s1 + $0x8c0] sm:$0xff]  ;;  %v155_v14 = vld [vmem:[%s13731_s0 + $0x3b8] sm:$0xff] }
  0xfb   :  { %7878 = vmatprep.subr.bf16.mxu0 %v7877_v15  ;;  %8125 = vmatprep.subr.bf16.mxu1 %v13745_v2  ;;  %v165_v15 = vld [vmem:[%s13731_s0 + $0x408] sm:$0xff]  ;;  %v7901_v18 = vpack.c.bf16 %v658_v13, %v655_v12  ;;  %v335_v12 = vld [vmem:[%s13731_s0 + $0x958] sm:$0xff] }
  0xfc   :  { %2652 = vmatmul.mubr.f32.gmra.mrb[16].mxu1 %v110_v22  ;;  %1233 = vmatmul.mubr.f32.gmra.mrb[16].mxu0 %v110_v22  ;;  %v659_v22 = vld [vmem:[%s13732_s1 + $0x8c8] sm:$0xff] }
  0xfd   :  { %2656 = vmatprep.mubr.f32.mxu1 %v120_v23  ;;  %1238 = vmatprep.mubr.f32.mxu0 %v120_v23  ;;  %v661_v23 = vld [vmem:[%s13732_s1 + $0x8d8] sm:$0xff]  ;;  %v8144_v28 = vpack.c.bf16 %v659_v22, %v656_v21  ;;  %v345_v13 = vld [vmem:[%s13731_s0 + $0x9a8] sm:$0xff]  ;;  %v666_v22 = vld [vmem:[%s13732_s1 + $0x900] sm:$0xff] }
  0xfe   :  { %7880 = vmatpush1.bf16.msra.mxu0 %v7879_v24  ;;  %8127 = vmatpush1.bf16.msra.mxu1 %v8126_v25  ;;  %v664_v24 = vld [vmem:[%s13732_s1 + $0x8f0] sm:$0xff]  ;;  %v164_v25 = vld [vmem:[%s13731_s0 + $0x400] sm:$0xff]  ;;  %v41_v21 = vld [vmem:[%s13731_s0 + $0x28] sm:$0xff] }
  0xff   :  { %7882 = vmatprep.subr.bf16.mxu0 %v7881_v26  ;;  %8128 = vmatprep.subr.bf16.mxu1 %v13745_v2  ;;  %v174_v26 = vld [vmem:[%s13731_s0 + $0x450] sm:$0xff]  ;;  %v7905_v29 = vpack.c.bf16 %v664_v24, %v661_v23  ;;  %v669_v23 = vld [vmem:[%s13732_s1 + $0x918] sm:$0xff] }
 0x100   :  { %2657 = vmatmul.mubr.f32.gmra.mrb[18].mxu1 %v119_v33  ;;  %1239 = vmatmul.mubr.f32.gmra.mrb[18].mxu0 %v119_v33  ;;  %v665_v33 = vld [vmem:[%s13732_s1 + $0x8f8] sm:$0xff]  ;;  %v668_v24 = vld [vmem:[%s13732_s1 + $0x910] sm:$0xff] }
 0x101   :  { %2661 = vmatprep.mubr.f32.mxu1 %v129_v34  ;;  %1244 = vmatprep.mubr.f32.mxu0 %v129_v34  ;;  %v667_v34 = vld [vmem:[%s13732_s1 + $0x908] sm:$0xff]  ;;  %v8147_v39 = vpack.c.bf16 %v665_v33, %v662_v32  ;;  %v672_v33 = vld [vmem:[%s13732_s1 + $0x930] sm:$0xff] }
 0x102   :  { %7884 = vmatpush1.bf16.msra.mxu0 %v7883_v35  ;;  %8130 = vmatpush1.bf16.msra.mxu1 %v8129_v36  ;;  %v670_v35 = vld [vmem:[%s13732_s1 + $0x920] sm:$0xff]  ;;  %v173_v36 = vld [vmem:[%s13731_s0 + $0x448] sm:$0xff] }
 0x103   :  { %7886 = vmatprep.subr.bf16.mxu0 %v7885_v37  ;;  %8131 = vmatprep.subr.bf16.mxu1 %v13745_v2  ;;  %v183_v37 = vld [vmem:[%s13731_s0 + $0x498] sm:$0xff]  ;;  %v7909_v40 = vpack.c.bf16 %v670_v35, %v667_v34  ;;  %v675_v34 = vld [vmem:[%s13732_s1 + $0x948] sm:$0xff]  ;;  %v674_v35 = vld [vmem:[%s13732_s1 + $0x940] sm:$0xff] }
 0x104   :  { %2662 = vmatmul.mubr.f32.gmra.mrb[20].mxu1 %v128_v44  ;;  %1245 = vmatmul.mubr.f32.gmra.mrb[20].mxu0 %v128_v44  ;;  %v201_v44 = vld [vmem:[%s13731_s0 + $0x528] sm:$0xff] }
 0x105   :  { %2666 = vmatprep.mubr.f32.mxu1 %v138_v45  ;;  %1250 = vmatprep.mubr.f32.mxu0 %v138_v45  ;;  %v200_v45 = vld [vmem:[%s13731_s0 + $0x520] sm:$0xff] }
 0x106   :  { %7888 = vmatpush1.bf16.msra.mxu0 %v7887_v46  ;;  %8133 = vmatpush1.bf16.msra.mxu1 %v8132_v47  ;;  %v210_v46 = vld [vmem:[%s13731_s0 + $0x570] sm:$0xff]  ;;  %v209_v47 = vld [vmem:[%s13731_s0 + $0x568] sm:$0xff] }
 0x107   :  { %7890 = vmatprep.subr.bf16.mxu0 %v7889_v48  ;;  %8134 = vmatprep.subr.bf16.mxu1 %v13745_v2  ;;  %v219_v48 = vld [vmem:[%s13731_s0 + $0x5b8] sm:$0xff] }
 0x108   :  { %2667 = vmatmul.mubr.f32.gmra.mrb[22].mxu1 %v137_v55  ;;  %1251 = vmatmul.mubr.f32.gmra.mrb[22].mxu0 %v137_v55  ;;  %v245_v55 = vld [vmem:[%s13731_s0 + $0x688] sm:$0xff] }
 0x109   :  { %2671 = vmatprep.mubr.f32.mxu1 %v147_v56  ;;  %1256 = vmatprep.mubr.f32.mxu0 %v147_v56  ;;  %v255_v56 = vld [vmem:[%s13731_s0 + $0x6d8] sm:$0xff] }
 0x10a   :  { %7892 = vmatpush1.bf16.msra.mxu0 %v7891_v57  ;;  %8136 = vmatpush1.bf16.msra.mxu1 %v8135_v58  ;;  %v254_v57 = vld [vmem:[%s13731_s0 + $0x6d0] sm:$0xff]  ;;  %v264_v58 = vld [vmem:[%s13731_s0 + $0x720] sm:$0xff] }
 0x10b   :  { %7894 = vmatprep.subr.bf16.mxu0 %v7893_v59  ;;  %8137 = vmatprep.subr.bf16.mxu1 %v13745_v2  ;;  %v263_v59 = vld [vmem:[%s13731_s0 + $0x718] sm:$0xff] }
 0x10c   :  { %2672 = vmatmul.mubr.f32.gmra.mrb[24].mxu1 %v146_v3  ;;  %1257 = vmatmul.mubr.f32.gmra.mrb[24].mxu0 %v146_v3  ;;  %v300_v3 = vld [vmem:[%s13731_s0 + $0x840] sm:$0xff] }
 0x10d   :  { %2676 = vmatprep.mubr.f32.mxu1 %v156_v4  ;;  %1262 = vmatprep.mubr.f32.mxu0 %v156_v4  ;;  %v299_v4 = vld [vmem:[%s13731_s0 + $0x838] sm:$0xff] }
 0x10e   :  { %7896 = vmatpush1.bf16.msra.mxu0 %v7895_v5  ;;  %8139 = vmatpush1.bf16.msra.mxu1 %v8138_v6  ;;  %v309_v5 = vld [vmem:[%s13731_s0 + $0x888] sm:$0xff]  ;;  %v308_v6 = vld [vmem:[%s13731_s0 + $0x880] sm:$0xff] }
 0x10f   :  { %7898 = vmatprep.subr.bf16.mxu0 %v7897_v7  ;;  %8140 = vmatprep.subr.bf16.mxu1 %v13745_v2  ;;  %v318_v7 = vld [vmem:[%s13731_s0 + $0x8d0] sm:$0xff] }
 0x110   :  { %2677 = vmatmul.mubr.f32.gmra.mrb[26].mxu1 %v155_v14  ;;  %1263 = vmatmul.mubr.f32.gmra.mrb[26].mxu0 %v155_v14  ;;  %v344_v14 = vld [vmem:[%s13731_s0 + $0x9a0] sm:$0xff] }
 0x111   :  { %2681 = vmatprep.mubr.f32.mxu1 %v165_v15  ;;  %1268 = vmatprep.mubr.f32.mxu0 %v165_v15  ;;  %v354_v15 = vld [vmem:[%s13731_s0 + $0x9f0] sm:$0xff] }
 0x112   :  { %7900 = vmatpush1.bf16.msra.mxu0 %v7899_v16  ;;  %8142 = vmatpush1.bf16.msra.mxu1 %v8141_v17  ;;  %v353_v16 = vld [vmem:[%s13731_s0 + $0x9e8] sm:$0xff]  ;;  %v363_v17 = vld [vmem:[%s13731_s0 + $0xa38] sm:$0xff] }
 0x113   :  { %7902 = vmatprep.subr.bf16.mxu0 %v7901_v18  ;;  %8143 = vmatprep.subr.bf16.mxu1 %v13745_v2  ;;  %v362_v18 = vld [vmem:[%s13731_s0 + $0xa30] sm:$0xff] }
 0x114   :  { %2682 = vmatmul.mubr.f32.gmra.mrb[28].mxu1 %v164_v25  ;;  %1269 = vmatmul.mubr.f32.gmra.mrb[28].mxu0 %v164_v25  ;;  %v671_v25 = vld [vmem:[%s13732_s1 + $0x928] sm:$0xff] }
 0x115   :  { %2686 = vmatprep.mubr.f32.mxu1 %v174_v26  ;;  %1274 = vmatprep.mubr.f32.mxu0 %v174_v26  ;;  %v673_v26 = vld [vmem:[%s13732_s1 + $0x938] sm:$0xff]  ;;  %v8150_v31 = vpack.c.bf16 %v671_v25, %v668_v24  ;;  %v702_v25 = vld [vmem:[%s13732_s1 + $0xa20] sm:$0xff] }
 0x116   :  { %7904 = vmatpush1.bf16.msra.mxu0 %v7903_v27  ;;  %8145 = vmatpush1.bf16.msra.mxu1 %v8144_v28  ;;  %v676_v27 = vld [vmem:[%s13732_s1 + $0x950] sm:$0xff]  ;;  %v40_v28 = vld [vmem:[%s13731_s0 + $0x20] sm:$0xff] }
 0x117   :  { %7906 = vmatprep.subr.bf16.mxu0 %v7905_v29  ;;  %8146 = vmatprep.subr.bf16.mxu1 %v13745_v2  ;;  %v7911_v29 = vpack.c.bf16 %v669_v23, %v666_v22  ;;  %v7913_v32 = vpack.c.bf16 %v676_v27, %v673_v26  ;;  %v705_v26 = vld [vmem:[%s13732_s1 + $0xa38] sm:$0xff]  ;;  %v704_v27 = vld [vmem:[%s13732_s1 + $0xa30] sm:$0xff] }
 0x118   :  { %2687 = vmatmul.mubr.f32.gmra.mrb[30].mxu1 %v173_v36  ;;  %1275 = vmatmul.mubr.f32.gmra.mrb[30].mxu0 %v173_v36  ;;  %v677_v36 = vld [vmem:[%s13732_s1 + $0x958] sm:$0xff] }
 0x119   :  { %2691 = vmatprep.mubr.f32.mxu1 %v183_v37  ;;  %1280 = vmatprep.mubr.f32.mxu0 %v183_v37  ;;  %v679_v37 = vld [vmem:[%s13732_s1 + $0x968] sm:$0xff] }
 0x11a   :  { %7908 = vmatpush1.bf16.msra.mxu0 %v7907_v38  ;;  %8148 = vmatpush1.bf16.msra.mxu1 %v8147_v39  ;;  %v682_v38 = vld [vmem:[%s13732_s1 + $0x980] sm:$0xff]  ;;  %v49_v39 = vld [vmem:[%s13731_s0 + $0x68] sm:$0xff] }
 0x11b   :  { %7910 = vmatprep.subr.bf16.mxu0 %v7909_v40  ;;  %8149 = vmatprep.subr.bf16.mxu1 %v13745_v2  ;;  %v59_v40 = vld [vmem:[%s13731_s0 + $0xb8] sm:$0xff] }
 0x11c   :  { %2692 = vmatmul.mubr.f32.gmra.mrb[32].mxu1 %v182_v41  ;;  %1281 = vmatmul.mubr.f32.gmra.mrb[32].mxu0 %v182_v41  ;;  %v7915_v41 = vpack.c.bf16 %v675_v34, %v672_v33  ;;  %v7935_v33 = vpack.c.bf16 %v705_v26, %v702_v25 }
 0x11d   :  { %2696 = vmatprep.mubr.f32.mxu1 %v192_v42  ;;  %1286 = vmatprep.mubr.f32.mxu0 %v192_v42  ;;  %v8153_v42 = vpack.c.bf16 %v677_v36, %v674_v35  ;;  %v708_v36 = vld [vmem:[%s13732_s1 + $0xa50] sm:$0xff] }
 0x120   :  { %2697 = vmatmul.mubr.f32.gmra.mrb[34].mxu1 %v191_v43  ;;  %1287 = vmatmul.mubr.f32.gmra.mrb[34].mxu0 %v191_v43  ;;  %v7917_v43 = vpack.c.bf16 %v682_v38, %v679_v37  ;;  %v711_v37 = vld [vmem:[%s13732_s1 + $0xa68] sm:$0xff]  ;;  %v710_v38 = vld [vmem:[%s13732_s1 + $0xa60] sm:$0xff] }
 0x121   :  { %2701 = vmatprep.mubr.f32.mxu1 %v201_v44  ;;  %1292 = vmatprep.mubr.f32.mxu0 %v201_v44  ;;  %v678_v44 = vld [vmem:[%s13732_s1 + $0x960] sm:$0xff] }
 0x124   :  { %2702 = vmatmul.mubr.f32.gmra.mrb[36].mxu1 %v200_v45  ;;  %1293 = vmatmul.mubr.f32.gmra.mrb[36].mxu0 %v200_v45  ;;  %v681_v45 = vld [vmem:[%s13732_s1 + $0x978] sm:$0xff] }
 0x125   :  { %2706 = vmatprep.mubr.f32.mxu1 %v210_v46  ;;  %1298 = vmatprep.mubr.f32.mxu0 %v210_v46  ;;  %v680_v46 = vld [vmem:[%s13732_s1 + $0x970] sm:$0xff] }
 0x128   :  { %2707 = vmatmul.mubr.f32.gmra.mrb[38].mxu1 %v209_v47  ;;  %1299 = vmatmul.mubr.f32.gmra.mrb[38].mxu0 %v209_v47  ;;  %v683_v47 = vld [vmem:[%s13732_s1 + $0x988] sm:$0xff] }
 0x129   :  { %2711 = vmatprep.mubr.f32.mxu1 %v219_v48  ;;  %1304 = vmatprep.mubr.f32.mxu0 %v219_v48  ;;  %v685_v48 = vld [vmem:[%s13732_s1 + $0x998] sm:$0xff] }
 0x12c   :  { %2712 = vmatmul.mubr.f32.gmra.mrb[40].mxu1 %v218_v49  ;;  %1305 = vmatmul.mubr.f32.gmra.mrb[40].mxu0 %v218_v49  ;;  %v688_v49 = vld [vmem:[%s13732_s1 + $0x9b0] sm:$0xff] }
 0x12d   :  { %2716 = vmatprep.mubr.f32.mxu1 %v228_v50  ;;  %1310 = vmatprep.mubr.f32.mxu0 %v228_v50  ;;  %v58_v50 = vld [vmem:[%s13731_s0 + $0xb0] sm:$0xff] }
 0x130   :  { %2717 = vmatmul.mubr.f32.gmra.mrb[42].mxu1 %v227_v51  ;;  %1311 = vmatmul.mubr.f32.gmra.mrb[42].mxu0 %v227_v51  ;;  %v68_v51 = vld [vmem:[%s13731_s0 + $0x100] sm:$0xff] }
 0x131   :  { %2721 = vmatprep.mubr.f32.mxu1 %v237_v52  ;;  %1316 = vmatprep.mubr.f32.mxu0 %v237_v52  ;;  %v7919_v52 = vpack.c.bf16 %v681_v45, %v678_v44  ;;  %v7939_v44 = vpack.c.bf16 %v711_v37, %v708_v36 }
 0x134   :  { %2722 = vmatmul.mubr.f32.gmra.mrb[44].mxu1 %v236_v53  ;;  %1317 = vmatmul.mubr.f32.gmra.mrb[44].mxu0 %v236_v53  ;;  %v8156_v53 = vpack.c.bf16 %v683_v47, %v680_v46  ;;  %v714_v47 = vld [vmem:[%s13732_s1 + $0xa80] sm:$0xff] }
 0x135   :  { %2726 = vmatprep.mubr.f32.mxu1 %v246_v54  ;;  %1322 = vmatprep.mubr.f32.mxu0 %v246_v54  ;;  %v7921_v54 = vpack.c.bf16 %v688_v49, %v685_v48  ;;  %v717_v48 = vld [vmem:[%s13732_s1 + $0xa98] sm:$0xff]  ;;  %v716_v49 = vld [vmem:[%s13732_s1 + $0xa90] sm:$0xff] }
 0x138   :  { %2727 = vmatmul.mubr.f32.gmra.mrb[46].mxu1 %v245_v55  ;;  %1323 = vmatmul.mubr.f32.gmra.mrb[46].mxu0 %v245_v55  ;;  %v684_v55 = vld [vmem:[%s13732_s1 + $0x990] sm:$0xff] }
 0x139   :  { %2731 = vmatprep.mubr.f32.mxu1 %v255_v56  ;;  %1328 = vmatprep.mubr.f32.mxu0 %v255_v56  ;;  %v687_v56 = vld [vmem:[%s13732_s1 + $0x9a8] sm:$0xff] }
 0x13c   :  { %2732 = vmatmul.mubr.f32.gmra.mrb[48].mxu1 %v254_v57  ;;  %1329 = vmatmul.mubr.f32.gmra.mrb[48].mxu0 %v254_v57  ;;  %v686_v57 = vld [vmem:[%s13732_s1 + $0x9a0] sm:$0xff] }
 0x13d   :  { %2736 = vmatprep.mubr.f32.mxu1 %v264_v58  ;;  %1334 = vmatprep.mubr.f32.mxu0 %v264_v58  ;;  %v689_v58 = vld [vmem:[%s13732_s1 + $0x9b8] sm:$0xff] }
 0x140   :  { %2737 = vmatmul.mubr.f32.gmra.mrb[50].mxu1 %v263_v59  ;;  %1335 = vmatmul.mubr.f32.gmra.mrb[50].mxu0 %v263_v59  ;;  %v691_v59 = vld [vmem:[%s13732_s1 + $0x9c8] sm:$0xff] }
 0x141   :  { %2741 = vmatprep.mubr.f32.mxu1 %v273_v60  ;;  %1340 = vmatprep.mubr.f32.mxu0 %v273_v60  ;;  %v694_v60 = vld [vmem:[%s13732_s1 + $0x9e0] sm:$0xff] }
 0x144   :  { %2742 = vmatmul.mubr.f32.gmra.mrb[52].mxu1 %v272_v61  ;;  %1341 = vmatmul.mubr.f32.gmra.mrb[52].mxu0 %v272_v61  ;;  %v67_v61 = vld [vmem:[%s13731_s0 + $0xf8] sm:$0xff] }
 0x145   :  { %2746 = vmatprep.mubr.f32.mxu1 %v282_v62  ;;  %1346 = vmatprep.mubr.f32.mxu0 %v282_v62  ;;  %v77_v62 = vld [vmem:[%s13731_s0 + $0x148] sm:$0xff] }
 0x148   :  { %2747 = vmatmul.mubr.f32.gmra.mrb[54].mxu1 %v281_v63  ;;  %1347 = vmatmul.mubr.f32.gmra.mrb[54].mxu0 %v281_v63  ;;  %v7923_v63 = vpack.c.bf16 %v687_v56, %v684_v55  ;;  %v7943_v55 = vpack.c.bf16 %v717_v48, %v714_v47 }
 0x149   :  { %2751 = vmatprep.mubr.f32.mxu1 %v291_v0  ;;  %1352 = vmatprep.mubr.f32.mxu0 %v291_v0  ;;  %v8159_v0 = vpack.c.bf16 %v689_v58, %v686_v57  ;;  %v720_v58 = vld [vmem:[%s13732_s1 + $0xab0] sm:$0xff] }
 0x14c   :  { %2752 = vmatmul.mubr.f32.gmra.mrb[56].mxu1 %v290_v1  ;;  %1353 = vmatmul.mubr.f32.gmra.mrb[56].mxu0 %v290_v1  ;;  %v7925_v1 = vpack.c.bf16 %v694_v60, %v691_v59  ;;  %v723_v59 = vld [vmem:[%s13732_s1 + $0xac8] sm:$0xff]  ;;  %v722_v60 = vld [vmem:[%s13732_s1 + $0xac0] sm:$0xff] }
 0x14d   :  { %2756 = vmatprep.mubr.f32.mxu1 %v300_v3  ;;  %1358 = vmatprep.mubr.f32.mxu0 %v300_v3  ;;  %v690_v3 = vld [vmem:[%s13732_s1 + $0x9c0] sm:$0xff] }
 0x150   :  { %2757 = vmatmul.mubr.f32.gmra.mrb[58].mxu1 %v299_v4  ;;  %1359 = vmatmul.mubr.f32.gmra.mrb[58].mxu0 %v299_v4  ;;  %v693_v4 = vld [vmem:[%s13732_s1 + $0x9d8] sm:$0xff] }
 0x151   :  { %2761 = vmatprep.mubr.f32.mxu1 %v309_v5  ;;  %1364 = vmatprep.mubr.f32.mxu0 %v309_v5  ;;  %v692_v5 = vld [vmem:[%s13732_s1 + $0x9d0] sm:$0xff] }
 0x154   :  { %2762 = vmatmul.mubr.f32.gmra.mrb[60].mxu1 %v308_v6  ;;  %1365 = vmatmul.mubr.f32.gmra.mrb[60].mxu0 %v308_v6  ;;  %v695_v6 = vld [vmem:[%s13732_s1 + $0x9e8] sm:$0xff] }
 0x155   :  { %2766 = vmatprep.mubr.f32.mxu1 %v318_v7  ;;  %1370 = vmatprep.mubr.f32.mxu0 %v318_v7  ;;  %v697_v7 = vld [vmem:[%s13732_s1 + $0x9f8] sm:$0xff] }
 0x158   :  { %2767 = vmatmul.mubr.f32.gmra.mrb[62].mxu1 %v317_v8  ;;  %1371 = vmatmul.mubr.f32.gmra.mrb[62].mxu0 %v317_v8  ;;  %v700_v8 = vld [vmem:[%s13732_s1 + $0xa10] sm:$0xff] }
 0x159   :  { %2771 = vmatprep.mubr.f32.mxu1 %v327_v9  ;;  %1376 = vmatprep.mubr.f32.mxu0 %v327_v9  ;;  %v76_v9 = vld [vmem:[%s13731_s0 + $0x140] sm:$0xff] }
 0x15c   :  { %2772 = vmatmul.mubr.f32.gmra.mrb[64].mxu1 %v326_v10  ;;  %1377 = vmatmul.mubr.f32.gmra.mrb[64].mxu0 %v326_v10  ;;  %v86_v10 = vld [vmem:[%s13731_s0 + $0x190] sm:$0xff] }
 0x15d   :  { %2776 = vmatprep.mubr.f32.mxu1 %v336_v11  ;;  %1382 = vmatprep.mubr.f32.mxu0 %v336_v11  ;;  %v7927_v11 = vpack.c.bf16 %v693_v4, %v690_v3  ;;  %v7947_v3 = vpack.c.bf16 %v723_v59, %v720_v58 }
 0x160   :  { %2777 = vmatmul.mubr.f32.gmra.mrb[66].mxu1 %v335_v12  ;;  %1383 = vmatmul.mubr.f32.gmra.mrb[66].mxu0 %v335_v12  ;;  %v8162_v12 = vpack.c.bf16 %v695_v6, %v692_v5  ;;  %v726_v6 = vld [vmem:[%s13732_s1 + $0xae0] sm:$0xff] }
 0x161   :  { %2781 = vmatprep.mubr.f32.mxu1 %v345_v13  ;;  %1388 = vmatprep.mubr.f32.mxu0 %v345_v13  ;;  %v7929_v13 = vpack.c.bf16 %v700_v8, %v697_v7  ;;  %v729_v7 = vld [vmem:[%s13732_s1 + $0xaf8] sm:$0xff]  ;;  %v728_v8 = vld [vmem:[%s13732_s1 + $0xaf0] sm:$0xff] }
 0x164   :  { %2782 = vmatmul.mubr.f32.gmra.mrb[68].mxu1 %v344_v14  ;;  %1389 = vmatmul.mubr.f32.gmra.mrb[68].mxu0 %v344_v14  ;;  %v696_v14 = vld [vmem:[%s13732_s1 + $0x9f0] sm:$0xff] }
 0x165   :  { %2786 = vmatprep.mubr.f32.mxu1 %v354_v15  ;;  %1394 = vmatprep.mubr.f32.mxu0 %v354_v15  ;;  %v699_v15 = vld [vmem:[%s13732_s1 + $0xa08] sm:$0xff] }
 0x166   :  { %v7931_v22 = vpack.c.bf16 %v699_v15, %v696_v14  ;;  %v7951_v14 = vpack.c.bf16 %v729_v7, %v726_v6  ;;  %v767_v6 = vld [vmem:[%s13732_s1 + $0xc28] sm:$0xff] }
 0x167   :  { %v185_v7 = vld [vmem:[%s13731_s0 + $0x4a8] sm:$0xff] }
 0x168   :  { %2787 = vmatmul.mubr.f32.gmra.mrb[70].mxu1 %v353_v16  ;;  %1395 = vmatmul.mubr.f32.gmra.mrb[70].mxu0 %v353_v16  ;;  %v698_v16 = vld [vmem:[%s13732_s1 + $0xa00] sm:$0xff] }
 0x169   :  { %2791 = vmatprep.mubr.f32.mxu1 %v363_v17  ;;  %1400 = vmatprep.mubr.f32.mxu0 %v363_v17  ;;  %v701_v17 = vld [vmem:[%s13732_s1 + $0xa18] sm:$0xff] }
 0x16a   :  { %v8165_v23 = vpack.c.bf16 %v701_v17, %v698_v16  ;;  %v732_v17 = vld [vmem:[%s13732_s1 + $0xb10] sm:$0xff] }
 0x16c   :  { %2792 = vmatmul.mubr.f32.gmra.mrb[72].mxu1 %v362_v18  ;;  %1401 = vmatmul.mubr.f32.gmra.mrb[72].mxu0 %v362_v18  ;;  %v703_v18 = vld [vmem:[%s13732_s1 + $0xa28] sm:$0xff] }
 0x16d   :  { %2796 = vmatprep.mubr.f32.mxu1 %v372_v19  ;;  %1406 = vmatprep.mubr.f32.mxu0 %v372_v19  ;;  %v706_v19 = vld [vmem:[%s13732_s1 + $0xa40] sm:$0xff] }
 0x16e   :  { %v7933_v24 = vpack.c.bf16 %v706_v19, %v703_v18  ;;  %v735_v18 = vld [vmem:[%s13732_s1 + $0xb28] sm:$0xff]  ;;  %v734_v19 = vld [vmem:[%s13732_s1 + $0xb20] sm:$0xff] }
 0x16f   :  { %v7955_v25 = vpack.c.bf16 %v735_v18, %v732_v17  ;;  %v212_v17 = vld [vmem:[%s13731_s0 + $0x580] sm:$0xff]  ;;  %v211_v18 = vld [vmem:[%s13731_s0 + $0x578] sm:$0xff] }
 0x170   :  { %2797 = vmatmul.mubr.f32.gmra.mrb[74].mxu1 %v371_v20  ;;  %1407 = vmatmul.mubr.f32.gmra.mrb[74].mxu0 %v371_v20  ;;  %v85_v20 = vld [vmem:[%s13731_s0 + $0x188] sm:$0xff] }
 0x171   :  { %2866 = vmatprep.mubr.f32.mxu1 %v41_v21  ;;  %1477 = vmatprep.mubr.f32.mxu0 %v41_v21  ;;  %v95_v21 = vld [vmem:[%s13731_s0 + $0x1d8] sm:$0xff] }
 0x174   :  { %2867 = vmatmul.mubr.f32.vlgmr.msra.gmra.mrb[0].mxu1 %v40_v28  ;;  %1478 = vmatmul.mubr.f32.vlgmr.msra.gmra.mrb[0].mxu0 %v40_v28  ;;  %v707_v28 = vld [vmem:[%s13732_s1 + $0xa48] sm:$0xff] }
 0x175   :  { %2871 = vmatprep.mubr.f32.mxu1 %v50_v30  ;;  %7912 = vmatpush1.bf16.msra.mxu0 %v7911_v29  ;;  %v709_v29 = vld [vmem:[%s13732_s1 + $0xa58] sm:$0xff]  ;;  %v8168_v34 = vpack.c.bf16 %v707_v28, %v704_v27  ;;  %v738_v28 = vld [vmem:[%s13732_s1 + $0xb40] sm:$0xff] }
 0x176   :  { %8151 = vmatpush1.bf16.msra.mxu1 %v8150_v31  ;;  %1483 = vmatprep.mubr.f32.mxu0 %v50_v30  ;;  %v712_v30 = vld [vmem:[%s13732_s1 + $0xa70] sm:$0xff] }
 0x177   :  { %7914 = vmatprep.subr.bf16.mxu0 %v7913_v32  ;;  %8152 = vmatprep.subr.bf16.mxu1 %v13745_v2  ;;  %v94_v31 = vld [vmem:[%s13731_s0 + $0x1d0] sm:$0xff]  ;;  %v104_v32 = vld [vmem:[%s13731_s0 + $0x220] sm:$0xff]  ;;  %v7937_v35 = vpack.c.bf16 %v712_v30, %v709_v29  ;;  %v741_v29 = vld [vmem:[%s13732_s1 + $0xb58] sm:$0xff] }
 0x178   :  { %2872 = vmatmul.mubr.f32.gmra.mrb[2].mxu1 %v49_v39  ;;  %1484 = vmatmul.mubr.f32.gmra.mrb[2].mxu0 %v49_v39  ;;  %v713_v39 = vld [vmem:[%s13732_s1 + $0xa78] sm:$0xff]  ;;  %v740_v30 = vld [vmem:[%s13732_s1 + $0xb50] sm:$0xff]  ;;  %v7959_v36 = vpack.c.bf16 %v741_v29, %v738_v28  ;;  %v256_v28 = vld [vmem:[%s13731_s0 + $0x6e0] sm:$0xff] }
 0x179   :  { %2876 = vmatprep.mubr.f32.mxu1 %v59_v40  ;;  %1489 = vmatprep.mubr.f32.mxu0 %v59_v40  ;;  %v715_v40 = vld [vmem:[%s13732_s1 + $0xa88] sm:$0xff]  ;;  %v8171_v45 = vpack.c.bf16 %v713_v39, %v710_v38  ;;  %v744_v39 = vld [vmem:[%s13732_s1 + $0xb70] sm:$0xff] }
 0x17a   :  { %7916 = vmatpush1.bf16.msra.mxu0 %v7915_v41  ;;  %8154 = vmatpush1.bf16.msra.mxu1 %v8153_v42  ;;  %v718_v41 = vld [vmem:[%s13732_s1 + $0xaa0] sm:$0xff]  ;;  %v103_v42 = vld [vmem:[%s13731_s0 + $0x218] sm:$0xff]  ;;  %v266_v29 = vld [vmem:[%s13731_s0 + $0x730] sm:$0xff] }
 0x17b   :  { %7918 = vmatprep.subr.bf16.mxu0 %v7917_v43  ;;  %8155 = vmatprep.subr.bf16.mxu1 %v13745_v2  ;;  %v113_v43 = vld [vmem:[%s13731_s0 + $0x268] sm:$0xff]  ;;  %v7941_v46 = vpack.c.bf16 %v718_v41, %v715_v40  ;;  %v746_v41 = vld [vmem:[%s13732_s1 + $0xb80] sm:$0xff] }
 0x17c   :  { %2877 = vmatmul.mubr.f32.gmra.mrb[4].mxu1 %v58_v50  ;;  %1490 = vmatmul.mubr.f32.gmra.mrb[4].mxu0 %v58_v50  ;;  %v719_v50 = vld [vmem:[%s13732_s1 + $0xaa8] sm:$0xff] }
 0x17d   :  { %2881 = vmatprep.mubr.f32.mxu1 %v68_v51  ;;  %1495 = vmatprep.mubr.f32.mxu0 %v68_v51  ;;  %v721_v51 = vld [vmem:[%s13732_s1 + $0xab8] sm:$0xff]  ;;  %v8174_v56 = vpack.c.bf16 %v719_v50, %v716_v49  ;;  %v747_v40 = vld [vmem:[%s13732_s1 + $0xb88] sm:$0xff]  ;;  %v750_v50 = vld [vmem:[%s13732_s1 + $0xba0] sm:$0xff] }
 0x17e   :  { %7920 = vmatpush1.bf16.msra.mxu0 %v7919_v52  ;;  %8157 = vmatpush1.bf16.msra.mxu1 %v8156_v53  ;;  %v724_v52 = vld [vmem:[%s13732_s1 + $0xad0] sm:$0xff]  ;;  %v112_v53 = vld [vmem:[%s13731_s0 + $0x260] sm:$0xff]  ;;  %v7963_v47 = vpack.c.bf16 %v747_v40, %v744_v39  ;;  %v311_v39 = vld [vmem:[%s13731_s0 + $0x898] sm:$0xff] }
 0x17f   :  { %7922 = vmatprep.subr.bf16.mxu0 %v7921_v54  ;;  %8158 = vmatprep.subr.bf16.mxu1 %v13745_v2  ;;  %v122_v54 = vld [vmem:[%s13731_s0 + $0x2b0] sm:$0xff]  ;;  %v7945_v57 = vpack.c.bf16 %v724_v52, %v721_v51  ;;  %v753_v51 = vld [vmem:[%s13732_s1 + $0xbb8] sm:$0xff] }
 0x180   :  { %2882 = vmatmul.mubr.f32.gmra.mrb[6].mxu1 %v67_v61  ;;  %1496 = vmatmul.mubr.f32.gmra.mrb[6].mxu0 %v67_v61  ;;  %v725_v61 = vld [vmem:[%s13732_s1 + $0xad8] sm:$0xff]  ;;  %v752_v52 = vld [vmem:[%s13732_s1 + $0xbb0] sm:$0xff]  ;;  %v7967_v58 = vpack.c.bf16 %v753_v51, %v750_v50  ;;  %v365_v51 = vld [vmem:[%s13731_s0 + $0xa48] sm:$0xff] }
 0x181   :  { %2886 = vmatprep.mubr.f32.mxu1 %v77_v62  ;;  %1501 = vmatprep.mubr.f32.mxu0 %v77_v62  ;;  %v727_v62 = vld [vmem:[%s13732_s1 + $0xae8] sm:$0xff]  ;;  %v8177_v4 = vpack.c.bf16 %v725_v61, %v722_v60  ;;  %v756_v61 = vld [vmem:[%s13732_s1 + $0xbd0] sm:$0xff]  ;;  %v355_v50 = vld [vmem:[%s13731_s0 + $0x9f8] sm:$0xff] }
 0x182   :  { %7924 = vmatpush1.bf16.msra.mxu0 %v7923_v63  ;;  %8160 = vmatpush1.bf16.msra.mxu1 %v8159_v0  ;;  %v730_v63 = vld [vmem:[%s13732_s1 + $0xb00] sm:$0xff]  ;;  %v121_v0 = vld [vmem:[%s13731_s0 + $0x2a8] sm:$0xff]  ;;  %v310_v40 = vld [vmem:[%s13731_s0 + $0x890] sm:$0xff] }
 0x183   :  { %7926 = vmatprep.subr.bf16.mxu0 %v7925_v1  ;;  %8161 = vmatprep.subr.bf16.mxu1 %v13745_v2  ;;  %v131_v1 = vld [vmem:[%s13731_s0 + $0x2f8] sm:$0xff]  ;;  %v7949_v5 = vpack.c.bf16 %v730_v63, %v727_v62  ;;  %v759_v62 = vld [vmem:[%s13732_s1 + $0xbe8] sm:$0xff]  ;;  %v758_v63 = vld [vmem:[%s13732_s1 + $0xbe0] sm:$0xff] }
 0x184   :  { %2887 = vmatmul.mubr.f32.gmra.mrb[8].mxu1 %v76_v9  ;;  %1502 = vmatmul.mubr.f32.gmra.mrb[8].mxu0 %v76_v9  ;;  %v731_v9 = vld [vmem:[%s13732_s1 + $0xb08] sm:$0xff] }
 0x185   :  { %2891 = vmatprep.mubr.f32.mxu1 %v86_v10  ;;  %1507 = vmatprep.mubr.f32.mxu0 %v86_v10  ;;  %v733_v10 = vld [vmem:[%s13732_s1 + $0xb18] sm:$0xff]  ;;  %v8180_v15 = vpack.c.bf16 %v731_v9, %v728_v8  ;;  %v7971_v8 = vpack.c.bf16 %v759_v62, %v756_v61  ;;  %v770_v61 = vld [vmem:[%s13732_s1 + $0xc40] sm:$0xff] }
 0x186   :  { %7928 = vmatpush1.bf16.msra.mxu0 %v7927_v11  ;;  %8163 = vmatpush1.bf16.msra.mxu1 %v8162_v12  ;;  %v736_v11 = vld [vmem:[%s13732_s1 + $0xb30] sm:$0xff]  ;;  %v773_v62 = vld [vmem:[%s13732_s1 + $0xc58] sm:$0xff] }
 0x187   :  { %7930 = vmatprep.subr.bf16.mxu0 %v7929_v13  ;;  %8164 = vmatprep.subr.bf16.mxu1 %v13745_v2  ;;  %v130_v12 = vld [vmem:[%s13731_s0 + $0x2f0] sm:$0xff]  ;;  %v140_v13 = vld [vmem:[%s13731_s0 + $0x340] sm:$0xff]  ;;  %v7953_v16 = vpack.c.bf16 %v736_v11, %v733_v10 }
 0x188   :  { %2892 = vmatmul.mubr.f32.gmra.mrb[10].mxu1 %v85_v20  ;;  %1508 = vmatmul.mubr.f32.gmra.mrb[10].mxu0 %v85_v20  ;;  %v737_v20 = vld [vmem:[%s13732_s1 + $0xb38] sm:$0xff] }
 0x189   :  { %2896 = vmatprep.mubr.f32.mxu1 %v95_v21  ;;  %1513 = vmatprep.mubr.f32.mxu0 %v95_v21  ;;  %v739_v21 = vld [vmem:[%s13732_s1 + $0xb48] sm:$0xff]  ;;  %v8183_v26 = vpack.c.bf16 %v737_v20, %v734_v19  ;;  %v220_v20 = vld [vmem:[%s13731_s0 + $0x5c0] sm:$0xff] }
 0x18a   :  { %7932 = vmatpush1.bf16.msra.mxu0 %v7931_v22  ;;  %8166 = vmatpush1.bf16.msra.mxu1 %v8165_v23  ;;  %v742_v22 = vld [vmem:[%s13732_s1 + $0xb60] sm:$0xff]  ;;  %v139_v23 = vld [vmem:[%s13731_s0 + $0x338] sm:$0xff]  ;;  %v221_v19 = vld [vmem:[%s13731_s0 + $0x5c8] sm:$0xff] }
 0x18b   :  { %7934 = vmatprep.subr.bf16.mxu0 %v7933_v24  ;;  %8167 = vmatprep.subr.bf16.mxu1 %v13745_v2  ;;  %v149_v24 = vld [vmem:[%s13731_s0 + $0x388] sm:$0xff]  ;;  %v7957_v27 = vpack.c.bf16 %v742_v22, %v739_v21  ;;  %v230_v21 = vld [vmem:[%s13731_s0 + $0x610] sm:$0xff] }
 0x18c   :  { %2897 = vmatmul.mubr.f32.gmra.mrb[12].mxu1 %v94_v31  ;;  %1514 = vmatmul.mubr.f32.gmra.mrb[12].mxu0 %v94_v31  ;;  %v743_v31 = vld [vmem:[%s13732_s1 + $0xb68] sm:$0xff] }
 0x18d   :  { %2901 = vmatprep.mubr.f32.mxu1 %v104_v32  ;;  %1519 = vmatprep.mubr.f32.mxu0 %v104_v32  ;;  %v745_v32 = vld [vmem:[%s13732_s1 + $0xb78] sm:$0xff]  ;;  %v8186_v37 = vpack.c.bf16 %v743_v31, %v740_v30  ;;  %v229_v22 = vld [vmem:[%s13731_s0 + $0x608] sm:$0xff] }
 0x18e   :  { %7936 = vmatpush1.bf16.msra.mxu0 %v7935_v33  ;;  %8169 = vmatpush1.bf16.msra.mxu1 %v8168_v34  ;;  %v748_v33 = vld [vmem:[%s13732_s1 + $0xb90] sm:$0xff]  ;;  %v148_v34 = vld [vmem:[%s13731_s0 + $0x380] sm:$0xff]  ;;  %v265_v30 = vld [vmem:[%s13731_s0 + $0x728] sm:$0xff] }
 0x18f   :  { %7938 = vmatprep.subr.bf16.mxu0 %v7937_v35  ;;  %8170 = vmatprep.subr.bf16.mxu1 %v13745_v2  ;;  %v158_v35 = vld [vmem:[%s13731_s0 + $0x3d0] sm:$0xff]  ;;  %v7961_v38 = vpack.c.bf16 %v748_v33, %v745_v32  ;;  %v275_v31 = vld [vmem:[%s13731_s0 + $0x778] sm:$0xff]  ;;  %v284_v33 = vld [vmem:[%s13731_s0 + $0x7c0] sm:$0xff] }
 0x190   :  { %2902 = vmatmul.mubr.f32.gmra.mrb[14].mxu1 %v103_v42  ;;  %1520 = vmatmul.mubr.f32.gmra.mrb[14].mxu0 %v103_v42  ;;  %v749_v42 = vld [vmem:[%s13732_s1 + $0xb98] sm:$0xff]  ;;  %v274_v32 = vld [vmem:[%s13731_s0 + $0x770] sm:$0xff] }
 0x191   :  { %2906 = vmatprep.mubr.f32.mxu1 %v113_v43  ;;  %1525 = vmatprep.mubr.f32.mxu0 %v113_v43  ;;  %v751_v43 = vld [vmem:[%s13732_s1 + $0xba8] sm:$0xff]  ;;  %v8189_v48 = vpack.c.bf16 %v749_v42, %v746_v41  ;;  %v320_v41 = vld [vmem:[%s13731_s0 + $0x8e0] sm:$0xff]  ;;  %v319_v42 = vld [vmem:[%s13731_s0 + $0x8d8] sm:$0xff] }
 0x192   :  { %7940 = vmatpush1.bf16.msra.mxu0 %v7939_v44  ;;  %8172 = vmatpush1.bf16.msra.mxu1 %v8171_v45  ;;  %v754_v44 = vld [vmem:[%s13732_s1 + $0xbc0] sm:$0xff]  ;;  %v157_v45 = vld [vmem:[%s13731_s0 + $0x3c8] sm:$0xff] }
 0x193   :  { %7942 = vmatprep.subr.bf16.mxu0 %v7941_v46  ;;  %8173 = vmatprep.subr.bf16.mxu1 %v13745_v2  ;;  %v167_v46 = vld [vmem:[%s13731_s0 + $0x418] sm:$0xff]  ;;  %v7965_v49 = vpack.c.bf16 %v754_v44, %v751_v43  ;;  %v329_v43 = vld [vmem:[%s13731_s0 + $0x928] sm:$0xff]  ;;  %v328_v44 = vld [vmem:[%s13731_s0 + $0x920] sm:$0xff] }
 0x194   :  { %2907 = vmatmul.mubr.f32.gmra.mrb[16].mxu1 %v112_v53  ;;  %1526 = vmatmul.mubr.f32.gmra.mrb[16].mxu0 %v112_v53  ;;  %v755_v53 = vld [vmem:[%s13732_s1 + $0xbc8] sm:$0xff] }
 0x195   :  { %2911 = vmatprep.mubr.f32.mxu1 %v122_v54  ;;  %1531 = vmatprep.mubr.f32.mxu0 %v122_v54  ;;  %v757_v54 = vld [vmem:[%s13732_s1 + $0xbd8] sm:$0xff]  ;;  %v8192_v59 = vpack.c.bf16 %v755_v53, %v752_v52  ;;  %v364_v52 = vld [vmem:[%s13731_s0 + $0xa40] sm:$0xff]  ;;  %v374_v53 = vld [vmem:[%s13731_s0 + $0xa90] sm:$0xf] }
 0x196   :  { %7944 = vmatpush1.bf16.msra.mxu0 %v7943_v55  ;;  %8175 = vmatpush1.bf16.msra.mxu1 %v8174_v56  ;;  %v760_v55 = vld [vmem:[%s13732_s1 + $0xbf0] sm:$0xff] }
 0x197   :  { %7946 = vmatprep.subr.bf16.mxu0 %v7945_v57  ;;  %8176 = vmatprep.subr.bf16.mxu1 %v13745_v2  ;;  %v166_v56 = vld [vmem:[%s13731_s0 + $0x410] sm:$0xff]  ;;  %v176_v57 = vld [vmem:[%s13731_s0 + $0x460] sm:$0xff]  ;;  %v7969_v60 = vpack.c.bf16 %v760_v55, %v757_v54  ;;  %v373_v54 = vld [vmem:[%s13731_s0 + $0xa88] sm:$0xf] }
 0x198   :  { %2912 = vmatmul.mubr.f32.gmra.mrb[18].mxu1 %v121_v0  ;;  %1532 = vmatmul.mubr.f32.gmra.mrb[18].mxu0 %v121_v0  ;;  %v761_v0 = vld [vmem:[%s13732_s1 + $0xbf8] sm:$0xff] }
 0x199   :  { %2916 = vmatprep.mubr.f32.mxu1 %v131_v1  ;;  %1537 = vmatprep.mubr.f32.mxu0 %v131_v1  ;;  %v763_v1 = vld [vmem:[%s13732_s1 + $0xc08] sm:$0xff]  ;;  %v8195_v9 = vpack.c.bf16 %v761_v0, %v758_v63  ;;  %v43_v55 = vld [vmem:[%s13731_s0 + $0x38] sm:$0xff]  ;;  %v52_v0 = vld [vmem:[%s13731_s0 + $0x80] sm:$0xff] }
 0x19a   :  { %7948 = vmatpush1.bf16.msra.mxu0 %v7947_v3  ;;  %8178 = vmatpush1.bf16.msra.mxu1 %v8177_v4  ;;  %v766_v3 = vld [vmem:[%s13732_s1 + $0xc20] sm:$0xff]  ;;  %v175_v4 = vld [vmem:[%s13731_s0 + $0x458] sm:$0xff] }
 0x19b   :  { %7950 = vmatprep.subr.bf16.mxu0 %v7949_v5  ;;  %8179 = vmatprep.subr.bf16.mxu1 %v13745_v2  ;;  %v764_v5 = vld [vmem:[%s13732_s1 + $0xc10] sm:$0xff]  ;;  %v7973_v10 = vpack.c.bf16 %v766_v3, %v763_v1 }
 0x19c   :  { %2917 = vmatmul.mubr.f32.gmra.mrb[20].mxu1 %v130_v12  ;;  %1538 = vmatmul.mubr.f32.gmra.mrb[20].mxu0 %v130_v12  ;;  %v11096_v11 = vpack.c.bf16 %v767_v6, %v764_v5  ;;  %v184_v12 = vld [vmem:[%s13731_s0 + $0x4a0] sm:$0xff]  ;;  %v768_v3 = vld [vmem:[%s13732_s1 + $0xc30] sm:$0xff]  ;;  %v8201_v5 = vpack.c.bf16 %v773_v62, %v770_v61  ;;  %v775_v6 = vld [vmem:[%s13732_s1 + $0xc68] sm:$0xff] }
 0x19d   :  { %2921 = vmatprep.mubr.f32.mxu1 %v140_v13  ;;  %1543 = vmatprep.mubr.f32.mxu0 %v140_v13  ;;  %v194_v13 = vld [vmem:[%s13731_s0 + $0x4f0] sm:$0xff]  ;;  %v805_v61 = vld [vmem:[%s13732_s1 + $0xd58] sm:$0xff] }
 0x19e   :  { %7952 = vmatpush1.bf16.msra.mxu0 %v7951_v14  ;;  %8181 = vmatpush1.bf16.msra.mxu1 %v8180_v15  ;;  %v193_v14 = vld [vmem:[%s13731_s0 + $0x4e8] sm:$0xff]  ;;  %v203_v15 = vld [vmem:[%s13731_s0 + $0x538] sm:$0xff]  ;;  %v808_v62 = vld [vmem:[%s13732_s1 + $0xd70] sm:$0xff] }
 0x19f   :  { %7954 = vmatprep.subr.bf16.mxu0 %v7953_v16  ;;  %8182 = vmatprep.subr.bf16.mxu1 %v13745_v2  ;;  %v202_v16 = vld [vmem:[%s13731_s0 + $0x530] sm:$0xff] }
 0x1a0   :  { %2922 = vmatmul.mubr.f32.gmra.mrb[22].mxu1 %v139_v23  ;;  %1544 = vmatmul.mubr.f32.gmra.mrb[22].mxu0 %v139_v23  ;;  %v239_v23 = vld [vmem:[%s13731_s0 + $0x658] sm:$0xff] }
 0x1a1   :  { %2926 = vmatprep.mubr.f32.mxu1 %v149_v24  ;;  %1549 = vmatprep.mubr.f32.mxu0 %v149_v24  ;;  %v238_v24 = vld [vmem:[%s13731_s0 + $0x650] sm:$0xff] }
 0x1a2   :  { %7956 = vmatpush1.bf16.msra.mxu0 %v7955_v25  ;;  %8184 = vmatpush1.bf16.msra.mxu1 %v8183_v26  ;;  %v248_v25 = vld [vmem:[%s13731_s0 + $0x6a0] sm:$0xff]  ;;  %v247_v26 = vld [vmem:[%s13731_s0 + $0x698] sm:$0xff] }
 0x1a3   :  { %7958 = vmatprep.subr.bf16.mxu0 %v7957_v27  ;;  %8185 = vmatprep.subr.bf16.mxu1 %v13745_v2  ;;  %v257_v27 = vld [vmem:[%s13731_s0 + $0x6e8] sm:$0xff] }
 0x1a4   :  { %2927 = vmatmul.mubr.f32.gmra.mrb[24].mxu1 %v148_v34  ;;  %1550 = vmatmul.mubr.f32.gmra.mrb[24].mxu0 %v148_v34  ;;  %v283_v34 = vld [vmem:[%s13731_s0 + $0x7b8] sm:$0xff] }
 0x1a5   :  { %2931 = vmatprep.mubr.f32.mxu1 %v158_v35  ;;  %1555 = vmatprep.mubr.f32.mxu0 %v158_v35  ;;  %v293_v35 = vld [vmem:[%s13731_s0 + $0x808] sm:$0xff] }
 0x1a6   :  { %7960 = vmatpush1.bf16.msra.mxu0 %v7959_v36  ;;  %8187 = vmatpush1.bf16.msra.mxu1 %v8186_v37  ;;  %v292_v36 = vld [vmem:[%s13731_s0 + $0x800] sm:$0xff]  ;;  %v302_v37 = vld [vmem:[%s13731_s0 + $0x850] sm:$0xff] }
 0x1a7   :  { %7962 = vmatprep.subr.bf16.mxu0 %v7961_v38  ;;  %8188 = vmatprep.subr.bf16.mxu1 %v13745_v2  ;;  %v301_v38 = vld [vmem:[%s13731_s0 + $0x848] sm:$0xff] }
 0x1a8   :  { %2932 = vmatmul.mubr.f32.gmra.mrb[26].mxu1 %v157_v45  ;;  %1556 = vmatmul.mubr.f32.gmra.mrb[26].mxu0 %v157_v45  ;;  %v338_v45 = vld [vmem:[%s13731_s0 + $0x970] sm:$0xff] }
 0x1a9   :  { %2936 = vmatprep.mubr.f32.mxu1 %v167_v46  ;;  %1561 = vmatprep.mubr.f32.mxu0 %v167_v46  ;;  %v337_v46 = vld [vmem:[%s13731_s0 + $0x968] sm:$0xff] }
 0x1aa   :  { %7964 = vmatpush1.bf16.msra.mxu0 %v7963_v47  ;;  %8190 = vmatpush1.bf16.msra.mxu1 %v8189_v48  ;;  %v347_v47 = vld [vmem:[%s13731_s0 + $0x9b8] sm:$0xff]  ;;  %v346_v48 = vld [vmem:[%s13731_s0 + $0x9b0] sm:$0xff] }
 0x1ab   :  { %7966 = vmatprep.subr.bf16.mxu0 %v7965_v49  ;;  %8191 = vmatprep.subr.bf16.mxu1 %v13745_v2  ;;  %v356_v49 = vld [vmem:[%s13731_s0 + $0xa00] sm:$0xff] }
 0x1ac   :  { %2937 = vmatmul.mubr.f32.gmra.mrb[28].mxu1 %v166_v56  ;;  %1562 = vmatmul.mubr.f32.gmra.mrb[28].mxu0 %v166_v56  ;;  %v762_v56 = vld [vmem:[%s13732_s1 + $0xc00] sm:$0xff] }
 0x1ad   :  { %2941 = vmatprep.mubr.f32.mxu1 %v176_v57  ;;  %1567 = vmatprep.mubr.f32.mxu0 %v176_v57  ;;  %v765_v57 = vld [vmem:[%s13732_s1 + $0xc18] sm:$0xff] }
 0x1ae   :  { %7968 = vmatpush1.bf16.msra.mxu0 %v7967_v58  ;;  %8193 = vmatpush1.bf16.msra.mxu1 %v8192_v59  ;;  %v769_v58 = vld [vmem:[%s13732_s1 + $0xc38] sm:$0xff]  ;;  %v772_v59 = vld [vmem:[%s13732_s1 + $0xc50] sm:$0xff]  ;;  %v7975_v63 = vpack.c.bf16 %v765_v57, %v762_v56 }
 0x1af   :  { %7970 = vmatprep.subr.bf16.mxu0 %v7969_v60  ;;  %8194 = vmatprep.subr.bf16.mxu1 %v13745_v2  ;;  %v42_v60 = vld [vmem:[%s13731_s0 + $0x30] sm:$0xff]  ;;  %v7977_v1 = vpack.c.bf16 %v772_v59, %v769_v58  ;;  %v798_v58 = vld [vmem:[%s13732_s1 + $0xd20] sm:$0xff]  ;;  %v801_v59 = vld [vmem:[%s13732_s1 + $0xd38] sm:$0xff] }
 0x1b0   :  { %2942 = vmatmul.mubr.f32.gmra.mrb[30].mxu1 %v175_v4  ;;  %1568 = vmatmul.mubr.f32.gmra.mrb[30].mxu0 %v175_v4  ;;  %v771_v4 = vld [vmem:[%s13732_s1 + $0xc48] sm:$0xff] }
 0x1b1   :  { %2946 = vmatprep.mubr.f32.mxu1 %v185_v7  ;;  %1573 = vmatprep.mubr.f32.mxu0 %v185_v7  ;;  %v778_v7 = vld [vmem:[%s13732_s1 + $0xc80] sm:$0xff] }
 0x1b2   :  { %7972 = vmatpush1.bf16.msra.mxu0 %v7971_v8  ;;  %8196 = vmatpush1.bf16.msra.mxu1 %v8195_v9  ;;  %v51_v8 = vld [vmem:[%s13731_s0 + $0x78] sm:$0xff]  ;;  %v776_v9 = vld [vmem:[%s13732_s1 + $0xc70] sm:$0xff] }
 0x1b3   :  { %7974 = vmatprep.subr.bf16.mxu0 %v7973_v10  ;;  %8198 = vmatprep.subr.bf16.mxu1 %v11096_v11  ;;  %v779_v10 = vld [vmem:[%s13732_s1 + $0xc88] sm:$0xff] }
 0x1b4   :  { %2947 = vmatmul.mubr.f32.gmra.mrb[32].mxu1 %v184_v12  ;;  %1574 = vmatmul.mubr.f32.gmra.mrb[32].mxu0 %v184_v12  ;;  %v61_v12 = vld [vmem:[%s13731_s0 + $0xc8] sm:$0xff] }
 0x1b5   :  { %2951 = vmatprep.mubr.f32.mxu1 %v194_v13  ;;  %1579 = vmatprep.mubr.f32.mxu0 %v194_v13  ;;  %v7979_v13 = vpack.c.bf16 %v771_v4, %v768_v3  ;;  %v106_v3 = vld [vmem:[%s13731_s0 + $0x230] sm:$0xff]  ;;  %v7999_v4 = vpack.c.bf16 %v801_v59, %v798_v58  ;;  %v321_v58 = vld [vmem:[%s13731_s0 + $0x8e8] sm:$0xff]  ;;  %v331_v59 = vld [vmem:[%s13731_s0 + $0x938] sm:$0xff] }
 0x1b8   :  { %2952 = vmatmul.mubr.f32.gmra.mrb[34].mxu1 %v193_v14  ;;  %1580 = vmatmul.mubr.f32.gmra.mrb[34].mxu0 %v193_v14  ;;  %v7981_v14 = vpack.c.bf16 %v778_v7, %v775_v6  ;;  %v804_v6 = vld [vmem:[%s13732_s1 + $0xd50] sm:$0xff]  ;;  %v807_v7 = vld [vmem:[%s13732_s1 + $0xd68] sm:$0xff] }
 0x1b9   :  { %2956 = vmatprep.mubr.f32.mxu1 %v203_v15  ;;  %1585 = vmatprep.mubr.f32.mxu0 %v203_v15  ;;  %v774_v15 = vld [vmem:[%s13732_s1 + $0xc60] sm:$0xff] }
 0x1bc   :  { %2957 = vmatmul.mubr.f32.gmra.mrb[36].mxu1 %v202_v16  ;;  %1586 = vmatmul.mubr.f32.gmra.mrb[36].mxu0 %v202_v16  ;;  %v777_v16 = vld [vmem:[%s13732_s1 + $0xc78] sm:$0xff] }
 0x1bd   :  { %2961 = vmatprep.mubr.f32.mxu1 %v212_v17  ;;  %1591 = vmatprep.mubr.f32.mxu0 %v212_v17  ;;  %v8205_v17 = vpack.c.bf16 %v779_v10, %v776_v9  ;;  %v105_v9 = vld [vmem:[%s13731_s0 + $0x228] sm:$0xff]  ;;  %v115_v10 = vld [vmem:[%s13731_s0 + $0x278] sm:$0xff] }
 0x1c0   :  { %2962 = vmatmul.mubr.f32.gmra.mrb[38].mxu1 %v211_v18  ;;  %1592 = vmatmul.mubr.f32.gmra.mrb[38].mxu0 %v211_v18  ;;  %v784_v18 = vld [vmem:[%s13732_s1 + $0xcb0] sm:$0xff] }
 0x1c1   :  { %2966 = vmatprep.mubr.f32.mxu1 %v221_v19  ;;  %1597 = vmatprep.mubr.f32.mxu0 %v221_v19  ;;  %v60_v19 = vld [vmem:[%s13731_s0 + $0xc0] sm:$0xff] }
 0x1c4   :  { %2967 = vmatmul.mubr.f32.gmra.mrb[40].mxu1 %v220_v20  ;;  %1598 = vmatmul.mubr.f32.gmra.mrb[40].mxu0 %v220_v20  ;;  %v782_v20 = vld [vmem:[%s13732_s1 + $0xca0] sm:$0xff] }
 0x1c5   :  { %2971 = vmatprep.mubr.f32.mxu1 %v230_v21  ;;  %1603 = vmatprep.mubr.f32.mxu0 %v230_v21  ;;  %v785_v21 = vld [vmem:[%s13732_s1 + $0xcb8] sm:$0xff] }
 0x1c8   :  { %2972 = vmatmul.mubr.f32.gmra.mrb[42].mxu1 %v229_v22  ;;  %1604 = vmatmul.mubr.f32.gmra.mrb[42].mxu0 %v229_v22  ;;  %v70_v22 = vld [vmem:[%s13731_s0 + $0x110] sm:$0xff] }
 0x1c9   :  { %2976 = vmatprep.mubr.f32.mxu1 %v239_v23  ;;  %1609 = vmatprep.mubr.f32.mxu0 %v239_v23  ;;  %v7983_v23 = vpack.c.bf16 %v777_v16, %v774_v15  ;;  %v123_v15 = vld [vmem:[%s13731_s0 + $0x2b8] sm:$0xff]  ;;  %v133_v16 = vld [vmem:[%s13731_s0 + $0x308] sm:$0xff] }
 0x1cc   :  { %2977 = vmatmul.mubr.f32.gmra.mrb[44].mxu1 %v238_v24  ;;  %1610 = vmatmul.mubr.f32.gmra.mrb[44].mxu0 %v238_v24 }
 0x1cd   :  { %2981 = vmatprep.mubr.f32.mxu1 %v248_v25  ;;  %1615 = vmatprep.mubr.f32.mxu0 %v248_v25  ;;  %v780_v25 = vld [vmem:[%s13732_s1 + $0xc90] sm:$0xff] }
 0x1d0   :  { %2982 = vmatmul.mubr.f32.gmra.mrb[46].mxu1 %v247_v26  ;;  %1616 = vmatmul.mubr.f32.gmra.mrb[46].mxu0 %v247_v26  ;;  %v783_v26 = vld [vmem:[%s13732_s1 + $0xca8] sm:$0xff] }
 0x1d1   :  { %2986 = vmatprep.mubr.f32.mxu1 %v257_v27  ;;  %1621 = vmatprep.mubr.f32.mxu0 %v257_v27  ;;  %v8209_v27 = vpack.c.bf16 %v785_v21, %v782_v20  ;;  %v150_v20 = vld [vmem:[%s13731_s0 + $0x390] sm:$0xff]  ;;  %v160_v21 = vld [vmem:[%s13731_s0 + $0x3e0] sm:$0xff] }
 0x1d4   :  { %2987 = vmatmul.mubr.f32.gmra.mrb[48].mxu1 %v256_v28  ;;  %1622 = vmatmul.mubr.f32.gmra.mrb[48].mxu0 %v256_v28  ;;  %v787_v28 = vld [vmem:[%s13732_s1 + $0xcc8] sm:$0xff] }
 0x1d5   :  { %2991 = vmatprep.mubr.f32.mxu1 %v266_v29  ;;  %1627 = vmatprep.mubr.f32.mxu0 %v266_v29  ;;  %v790_v29 = vld [vmem:[%s13732_s1 + $0xce0] sm:$0xff] }
 0x1d8   :  { %2992 = vmatmul.mubr.f32.gmra.mrb[50].mxu1 %v265_v30  ;;  %1628 = vmatmul.mubr.f32.gmra.mrb[50].mxu0 %v265_v30  ;;  %v69_v30 = vld [vmem:[%s13731_s0 + $0x108] sm:$0xff] }
 0x1d9   :  { %2996 = vmatprep.mubr.f32.mxu1 %v275_v31  ;;  %1633 = vmatprep.mubr.f32.mxu0 %v275_v31  ;;  %v788_v31 = vld [vmem:[%s13732_s1 + $0xcd0] sm:$0xff] }
 0x1dc   :  { %2997 = vmatmul.mubr.f32.gmra.mrb[52].mxu1 %v274_v32  ;;  %1634 = vmatmul.mubr.f32.gmra.mrb[52].mxu0 %v274_v32  ;;  %v791_v32 = vld [vmem:[%s13732_s1 + $0xce8] sm:$0xff] }
 0x1dd   :  { %3001 = vmatprep.mubr.f32.mxu1 %v284_v33  ;;  %1639 = vmatprep.mubr.f32.mxu0 %v284_v33  ;;  %v79_v33 = vld [vmem:[%s13731_s0 + $0x158] sm:$0xff] }
 0x1e0   :  { %3002 = vmatmul.mubr.f32.gmra.mrb[54].mxu1 %v283_v34  ;;  %1640 = vmatmul.mubr.f32.gmra.mrb[54].mxu0 %v283_v34  ;;  %v7987_v34 = vpack.c.bf16 %v783_v26, %v780_v25  ;;  %v178_v25 = vld [vmem:[%s13731_s0 + $0x470] sm:$0xff]  ;;  %v177_v26 = vld [vmem:[%s13731_s0 + $0x468] sm:$0xff] }
 0x1e1   :  { %3006 = vmatprep.mubr.f32.mxu1 %v293_v35  ;;  %1645 = vmatprep.mubr.f32.mxu0 %v293_v35  ;;  %v7989_v35 = vpack.c.bf16 %v790_v29, %v787_v28  ;;  %v186_v28 = vld [vmem:[%s13731_s0 + $0x4b0] sm:$0xff]  ;;  %v196_v29 = vld [vmem:[%s13731_s0 + $0x500] sm:$0xff] }
 0x1e4   :  { %3007 = vmatmul.mubr.f32.gmra.mrb[56].mxu1 %v292_v36  ;;  %1646 = vmatmul.mubr.f32.gmra.mrb[56].mxu0 %v292_v36  ;;  %v786_v36 = vld [vmem:[%s13732_s1 + $0xcc0] sm:$0xff] }
 0x1e5   :  { %3011 = vmatprep.mubr.f32.mxu1 %v302_v37  ;;  %1651 = vmatprep.mubr.f32.mxu0 %v302_v37  ;;  %v789_v37 = vld [vmem:[%s13732_s1 + $0xcd8] sm:$0xff] }
 0x1e8   :  { %3012 = vmatmul.mubr.f32.gmra.mrb[58].mxu1 %v301_v38  ;;  %1652 = vmatmul.mubr.f32.gmra.mrb[58].mxu0 %v301_v38  ;;  %v8213_v38 = vpack.c.bf16 %v791_v32, %v788_v31  ;;  %v205_v31 = vld [vmem:[%s13731_s0 + $0x548] sm:$0xff]  ;;  %v204_v32 = vld [vmem:[%s13731_s0 + $0x540] sm:$0xff] }
 0x1e9   :  { %3016 = vmatprep.mubr.f32.mxu1 %v311_v39  ;;  %1657 = vmatprep.mubr.f32.mxu0 %v311_v39  ;;  %v793_v39 = vld [vmem:[%s13732_s1 + $0xcf8] sm:$0xff] }
 0x1ec   :  { %3017 = vmatmul.mubr.f32.gmra.mrb[60].mxu1 %v310_v40  ;;  %1658 = vmatmul.mubr.f32.gmra.mrb[60].mxu0 %v310_v40  ;;  %v796_v40 = vld [vmem:[%s13732_s1 + $0xd10] sm:$0xff] }
 0x1ed   :  { %3021 = vmatprep.mubr.f32.mxu1 %v320_v41  ;;  %1663 = vmatprep.mubr.f32.mxu0 %v320_v41  ;;  %v78_v41 = vld [vmem:[%s13731_s0 + $0x150] sm:$0xff] }
 0x1f0   :  { %3022 = vmatmul.mubr.f32.gmra.mrb[62].mxu1 %v319_v42  ;;  %1664 = vmatmul.mubr.f32.gmra.mrb[62].mxu0 %v319_v42  ;;  %v794_v42 = vld [vmem:[%s13732_s1 + $0xd00] sm:$0xff] }
 0x1f1   :  { %3026 = vmatprep.mubr.f32.mxu1 %v329_v43  ;;  %1669 = vmatprep.mubr.f32.mxu0 %v329_v43  ;;  %v797_v43 = vld [vmem:[%s13732_s1 + $0xd18] sm:$0xff] }
 0x1f4   :  { %3027 = vmatmul.mubr.f32.gmra.mrb[64].mxu1 %v328_v44  ;;  %1670 = vmatmul.mubr.f32.gmra.mrb[64].mxu0 %v328_v44  ;;  %v88_v44 = vld [vmem:[%s13731_s0 + $0x1a0] sm:$0xff] }
 0x1f5   :  { %3031 = vmatprep.mubr.f32.mxu1 %v338_v45  ;;  %1675 = vmatprep.mubr.f32.mxu0 %v338_v45  ;;  %v7991_v45 = vpack.c.bf16 %v789_v37, %v786_v36  ;;  %v222_v36 = vld [vmem:[%s13731_s0 + $0x5d0] sm:$0xff]  ;;  %v232_v37 = vld [vmem:[%s13731_s0 + $0x620] sm:$0xff] }
 0x1f8   :  { %3032 = vmatmul.mubr.f32.gmra.mrb[66].mxu1 %v337_v46  ;;  %1676 = vmatmul.mubr.f32.gmra.mrb[66].mxu0 %v337_v46  ;;  %v7993_v46 = vpack.c.bf16 %v796_v40, %v793_v39  ;;  %v241_v39 = vld [vmem:[%s13731_s0 + $0x668] sm:$0xff]  ;;  %v240_v40 = vld [vmem:[%s13731_s0 + $0x660] sm:$0xff] }
 0x1f9   :  { %3036 = vmatprep.mubr.f32.mxu1 %v347_v47  ;;  %1681 = vmatprep.mubr.f32.mxu0 %v347_v47  ;;  %v792_v47 = vld [vmem:[%s13732_s1 + $0xcf0] sm:$0xff] }
 0x1fc   :  { %3037 = vmatmul.mubr.f32.gmra.mrb[68].mxu1 %v346_v48  ;;  %1682 = vmatmul.mubr.f32.gmra.mrb[68].mxu0 %v346_v48  ;;  %v795_v48 = vld [vmem:[%s13732_s1 + $0xd08] sm:$0xff] }
 0x1fd   :  { %3041 = vmatprep.mubr.f32.mxu1 %v356_v49  ;;  %1687 = vmatprep.mubr.f32.mxu0 %v356_v49  ;;  %v8217_v49 = vpack.c.bf16 %v797_v43, %v794_v42  ;;  %v7995_v56 = vpack.c.bf16 %v795_v48, %v792_v47  ;;  %v249_v42 = vld [vmem:[%s13731_s0 + $0x6a8] sm:$0xff]  ;;  %v259_v43 = vld [vmem:[%s13731_s0 + $0x6f8] sm:$0xff]  ;;  %v276_v48 = vld [vmem:[%s13731_s0 + $0x780] sm:$0xff] }
 0x1fe   :  { %v277_v47 = vld [vmem:[%s13731_s0 + $0x788] sm:$0xff] }
 0x200   :  { %3042 = vmatmul.mubr.f32.gmra.mrb[70].mxu1 %v355_v50  ;;  %1688 = vmatmul.mubr.f32.gmra.mrb[70].mxu0 %v355_v50  ;;  %v799_v50 = vld [vmem:[%s13732_s1 + $0xd28] sm:$0xff] }
 0x201   :  { %3046 = vmatprep.mubr.f32.mxu1 %v365_v51  ;;  %1693 = vmatprep.mubr.f32.mxu0 %v365_v51  ;;  %v802_v51 = vld [vmem:[%s13732_s1 + $0xd40] sm:$0xff] }
 0x202   :  { %v7997_v57 = vpack.c.bf16 %v802_v51, %v799_v50  ;;  %v285_v50 = vld [vmem:[%s13731_s0 + $0x7c8] sm:$0xff]  ;;  %v295_v51 = vld [vmem:[%s13731_s0 + $0x818] sm:$0xff] }
 0x204   :  { %3047 = vmatmul.mubr.f32.gmra.mrb[72].mxu1 %v364_v52  ;;  %1694 = vmatmul.mubr.f32.gmra.mrb[72].mxu0 %v364_v52  ;;  %v87_v52 = vld [vmem:[%s13731_s0 + $0x198] sm:$0xff] }
 0x205   :  { %3051 = vmatprep.mubr.f32.mxu1 %v374_v53  ;;  %1699 = vmatprep.mubr.f32.mxu0 %v374_v53  ;;  %v800_v53 = vld [vmem:[%s13732_s1 + $0xd30] sm:$0xff] }
 0x208   :  { %3052 = vmatmul.mubr.f32.gmra.mrb[74].mxu1 %v373_v54  ;;  %1700 = vmatmul.mubr.f32.gmra.mrb[74].mxu0 %v373_v54  ;;  %v803_v54 = vld [vmem:[%s13732_s1 + $0xd48] sm:$0xff] }
 0x209   :  { %3121 = vmatprep.mubr.f32.mxu1 %v43_v55  ;;  %1770 = vmatprep.mubr.f32.mxu0 %v43_v55  ;;  %v97_v55 = vld [vmem:[%s13731_s0 + $0x1e8] sm:$0xff] }
 0x20c   :  { %3122 = vmatmul.mubr.f32.vlgmr.msra.gmra.mrb[0].mxu1 %v42_v60  ;;  %1771 = vmatmul.mubr.f32.vlgmr.msra.gmra.mrb[0].mxu0 %v42_v60  ;;  %v8221_v60 = vpack.c.bf16 %v803_v54, %v800_v53  ;;  %v304_v53 = vld [vmem:[%s13731_s0 + $0x860] sm:$0xff]  ;;  %v303_v54 = vld [vmem:[%s13731_s0 + $0x858] sm:$0xff] }
 0x20d   :  { %3126 = vmatprep.mubr.f32.mxu1 %v52_v0  ;;  %7976 = vmatpush1.bf16.msra.mxu0 %v7975_v63  ;;  %v96_v63 = vld [vmem:[%s13731_s0 + $0x1e0] sm:$0xff] }
 0x20e   :  { %8200 = vmatpush3.bf16.msra.mxu1 %v11096_v11  ;;  %1776 = vmatprep.mubr.f32.mxu0 %v52_v0  ;;  %v781_v11 = vld [vmem:[%s13732_s1 + $0xc98] sm:$0xff]  ;;  %v806_v0 = vld [vmem:[%s13732_s1 + $0xd60] sm:$0xff] }
 0x20f   :  { %7978 = vmatprep.subr.bf16.mxu0 %v7977_v1  ;;  %8202 = vmatprep.subr.bf16.mxu1 %v8201_v5  ;;  %v7985_v24 = vpack.c.bf16 %v784_v18, %v781_v11  ;;  %v809_v1 = vld [vmem:[%s13732_s1 + $0xd78] sm:$0xff]  ;;  %v142_v11 = vld [vmem:[%s13731_s0 + $0x350] sm:$0xff]  ;;  %v141_v18 = vld [vmem:[%s13731_s0 + $0x348] sm:$0xff] }
 0x210   :  { %3127 = vmatmul.mubr.f32.gmra.mrb[2].mxu1 %v51_v8  ;;  %1777 = vmatmul.mubr.f32.gmra.mrb[2].mxu0 %v51_v8  ;;  %v8225_v8 = vpack.c.bf16 %v809_v1, %v806_v0  ;;  %v348_v0 = vld [vmem:[%s13731_s0 + $0x9c0] sm:$0xff]  ;;  %v358_v1 = vld [vmem:[%s13731_s0 + $0xa10] sm:$0xff] }
 0x211   :  { %3131 = vmatprep.mubr.f32.mxu1 %v61_v12  ;;  %1782 = vmatprep.mubr.f32.mxu0 %v61_v12  ;;  %v8003_v12 = vpack.c.bf16 %v807_v7, %v804_v6  ;;  %v376_v6 = vld [vmem:[%s13731_s0 + $0xaa0] sm:$0xf]  ;;  %v375_v7 = vld [vmem:[%s13731_s0 + $0xa98] sm:$0xf] }
 0x212   :  { %7980 = vmatpush1.bf16.msra.mxu0 %v7979_v13  ;;  %8204 = vmatpush3.bf16.msra.mxu1 %v8201_v5  ;;  %v8001_v5 = vpack.c.bf16 %v808_v62, %v805_v61  ;;  %v114_v13 = vld [vmem:[%s13731_s0 + $0x270] sm:$0xff]  ;;  %v340_v61 = vld [vmem:[%s13731_s0 + $0x980] sm:$0xff]  ;;  %v339_v62 = vld [vmem:[%s13731_s0 + $0x978] sm:$0xff] }
 0x213   :  { %7982 = vmatprep.subr.bf16.mxu0 %v7981_v14  ;;  %8206 = vmatprep.subr.bf16.mxu1 %v8205_v17  ;;  %v124_v14 = vld [vmem:[%s13731_s0 + $0x2c0] sm:$0xff] }
 0x214   :  { %3132 = vmatmul.mubr.f32.gmra.mrb[4].mxu1 %v60_v19  ;;  %1783 = vmatmul.mubr.f32.gmra.mrb[4].mxu0 %v60_v19  ;;  %v151_v19 = vld [vmem:[%s13731_s0 + $0x398] sm:$0xff] }
 0x215   :  { %3136 = vmatprep.mubr.f32.mxu1 %v70_v22  ;;  %1788 = vmatprep.mubr.f32.mxu0 %v70_v22  ;;  %v159_v22 = vld [vmem:[%s13731_s0 + $0x3d8] sm:$0xff] }
 0x216   :  { %7984 = vmatpush1.bf16.msra.mxu0 %v7983_v23  ;;  %8208 = vmatpush3.bf16.msra.mxu1 %v8205_v17  ;;  %v132_v17 = vld [vmem:[%s13731_s0 + $0x300] sm:$0xff]  ;;  %v169_v23 = vld [vmem:[%s13731_s0 + $0x428] sm:$0xff] }
 0x217   :  { %7986 = vmatprep.subr.bf16.mxu0 %v7985_v24  ;;  %8210 = vmatprep.subr.bf16.mxu1 %v8209_v27  ;;  %v168_v24 = vld [vmem:[%s13731_s0 + $0x420] sm:$0xff] }
 0x218   :  { %3137 = vmatmul.mubr.f32.gmra.mrb[6].mxu1 %v69_v30  ;;  %1789 = vmatmul.mubr.f32.gmra.mrb[6].mxu0 %v69_v30  ;;  %v195_v30 = vld [vmem:[%s13731_s0 + $0x4f8] sm:$0xff] }
 0x219   :  { %3141 = vmatprep.mubr.f32.mxu1 %v79_v33  ;;  %1794 = vmatprep.mubr.f32.mxu0 %v79_v33  ;;  %v214_v33 = vld [vmem:[%s13731_s0 + $0x590] sm:$0xff] }
 0x21a   :  { %7988 = vmatpush1.bf16.msra.mxu0 %v7987_v34  ;;  %8212 = vmatpush3.bf16.msra.mxu1 %v8209_v27  ;;  %v187_v27 = vld [vmem:[%s13731_s0 + $0x4b8] sm:$0xff]  ;;  %v213_v34 = vld [vmem:[%s13731_s0 + $0x588] sm:$0xff] }
 0x21b   :  { %7990 = vmatprep.subr.bf16.mxu0 %v7989_v35  ;;  %8214 = vmatprep.subr.bf16.mxu1 %v8213_v38  ;;  %v223_v35 = vld [vmem:[%s13731_s0 + $0x5d8] sm:$0xff] }
 0x21c   :  { %3142 = vmatmul.mubr.f32.gmra.mrb[8].mxu1 %v78_v41  ;;  %1795 = vmatmul.mubr.f32.gmra.mrb[8].mxu0 %v78_v41  ;;  %v250_v41 = vld [vmem:[%s13731_s0 + $0x6b0] sm:$0xff] }
 0x21d   :  { %3146 = vmatprep.mubr.f32.mxu1 %v88_v44  ;;  %1800 = vmatprep.mubr.f32.mxu0 %v88_v44  ;;  %v258_v44 = vld [vmem:[%s13731_s0 + $0x6f0] sm:$0xff] }
 0x21e   :  { %7992 = vmatpush1.bf16.msra.mxu0 %v7991_v45  ;;  %8216 = vmatpush3.bf16.msra.mxu1 %v8213_v38  ;;  %v231_v38 = vld [vmem:[%s13731_s0 + $0x618] sm:$0xff]  ;;  %v268_v45 = vld [vmem:[%s13731_s0 + $0x740] sm:$0xff] }
 0x21f   :  { %7994 = vmatprep.subr.bf16.mxu0 %v7993_v46  ;;  %8218 = vmatprep.subr.bf16.mxu1 %v8217_v49  ;;  %v267_v46 = vld [vmem:[%s13731_s0 + $0x738] sm:$0xff] }
 0x220   :  { %3147 = vmatmul.mubr.f32.gmra.mrb[10].mxu1 %v87_v52  ;;  %1801 = vmatmul.mubr.f32.gmra.mrb[10].mxu0 %v87_v52  ;;  %v294_v52 = vld [vmem:[%s13731_s0 + $0x810] sm:$0xff] }
 0x221   :  { %3151 = vmatprep.mubr.f32.mxu1 %v97_v55  ;;  %1806 = vmatprep.mubr.f32.mxu0 %v97_v55  ;;  %v313_v55 = vld [vmem:[%s13731_s0 + $0x8a8] sm:$0xff] }
 0x222   :  { %7996 = vmatpush1.bf16.msra.mxu0 %v7995_v56  ;;  %8220 = vmatpush3.bf16.msra.mxu1 %v8217_v49  ;;  %v286_v49 = vld [vmem:[%s13731_s0 + $0x7d0] sm:$0xff]  ;;  %v312_v56 = vld [vmem:[%s13731_s0 + $0x8a0] sm:$0xff] }
 0x223   :  { %7998 = vmatprep.subr.bf16.mxu0 %v7997_v57  ;;  %8222 = vmatprep.subr.bf16.mxu1 %v8221_v60  ;;  %v322_v57 = vld [vmem:[%s13731_s0 + $0x8f0] sm:$0xff] }
 0x224   :  { %3152 = vmatmul.mubr.f32.gmra.mrb[12].mxu1 %v96_v63  ;;  %1807 = vmatmul.mubr.f32.gmra.mrb[12].mxu0 %v96_v63  ;;  %v349_v63 = vld [vmem:[%s13731_s0 + $0x9c8] sm:$0xff] }
 0x225   :  { %3156 = vmatprep.mubr.f32.mxu1 %v106_v3  ;;  %1812 = vmatprep.mubr.f32.mxu0 %v106_v3  ;;  %v357_v3 = vld [vmem:[%s13731_s0 + $0xa08] sm:$0xff] }
 0x226   :  { %8000 = vmatpush1.bf16.msra.mxu0 %v7999_v4  ;;  %8224 = vmatpush3.bf16.msra.mxu1 %v8221_v60  ;;  %v330_v60 = vld [vmem:[%s13731_s0 + $0x930] sm:$0xff]  ;;  %v367_v4 = vld [vmem:[%s13731_s0 + $0xa58] sm:$0xff] }
 0x227   :  { %8002 = vmatprep.subr.bf16.mxu0 %v8001_v5  ;;  %8226 = vmatprep.subr.bf16.mxu1 %v8225_v8  ;;  %v366_v5 = vld [vmem:[%s13731_s0 + $0xa50] sm:$0xff] }
 0x228   :  { %3157 = vmatmul.mubr.f32.gmra.mrb[14].mxu1 %v105_v9  ;;  %1813 = vmatmul.mubr.f32.gmra.mrb[14].mxu0 %v105_v9  ;;  %v53_v9 = vld [vmem:[%s13731_s0 + $0x88] sm:$0xff] }
 0x229   :  { %3161 = vmatprep.mubr.f32.mxu1 %v115_v10  ;;  %1818 = vmatprep.mubr.f32.mxu0 %v115_v10  ;;  %v13742_v10 = vmov 0.0  }
 0x22a   :  { %8004 = vmatpush1.bf16.msra.mxu0 %v8003_v12  ;;  %8228 = vmatpush3.bf16.msra.mxu1 %v8225_v8  ;;  %v44_v8 = vld [vmem:[%s13731_s0 + $0x40] sm:$0xff]  ;;  %v62_v12 = vld [vmem:[%s13731_s0 + $0xd0] sm:$0xff] }
 0x22c   :  { %3162 = vmatmul.mubr.f32.gmra.mrb[16].mxu1 %v114_v13  ;;  %1819 = vmatmul.mubr.f32.gmra.mrb[16].mxu0 %v114_v13  ;;  %v71_v13 = vld [vmem:[%s13731_s0 + $0x118] sm:$0xff] }
 0x22d   :  { %3166 = vmatprep.mubr.f32.mxu1 %v124_v14  ;;  %1824 = vmatprep.mubr.f32.mxu0 %v124_v14  ;;  %v80_v14 = vld [vmem:[%s13731_s0 + $0x160] sm:$0xff] }
 0x230   :  { %3167 = vmatmul.mubr.f32.gmra.mrb[18].mxu1 %v123_v15  ;;  %1825 = vmatmul.mubr.f32.gmra.mrb[18].mxu0 %v123_v15  ;;  %v89_v15 = vld [vmem:[%s13731_s0 + $0x1a8] sm:$0xff] }
 0x231   :  { %3171 = vmatprep.mubr.f32.mxu1 %v133_v16  ;;  %1830 = vmatprep.mubr.f32.mxu0 %v133_v16  ;;  %v98_v16 = vld [vmem:[%s13731_s0 + $0x1f0] sm:$0xff] }
 0x234   :  { %3172 = vmatmul.mubr.f32.gmra.mrb[20].mxu1 %v132_v17  ;;  %1831 = vmatmul.mubr.f32.gmra.mrb[20].mxu0 %v132_v17  ;;  %v107_v17 = vld [vmem:[%s13731_s0 + $0x238] sm:$0xff] }
 0x235   :  { %3176 = vmatprep.mubr.f32.mxu1 %v142_v11  ;;  %1836 = vmatprep.mubr.f32.mxu0 %v142_v11  ;;  %v116_v11 = vld [vmem:[%s13731_s0 + $0x280] sm:$0xff] }
 0x238   :  { %3177 = vmatmul.mubr.f32.gmra.mrb[22].mxu1 %v141_v18  ;;  %1837 = vmatmul.mubr.f32.gmra.mrb[22].mxu0 %v141_v18  ;;  %v125_v18 = vld [vmem:[%s13731_s0 + $0x2c8] sm:$0xff] }
 0x239   :  { %3181 = vmatprep.mubr.f32.mxu1 %v151_v19  ;;  %1842 = vmatprep.mubr.f32.mxu0 %v151_v19  ;;  %v134_v19 = vld [vmem:[%s13731_s0 + $0x310] sm:$0xff] }
 0x23c   :  { %3182 = vmatmul.mubr.f32.gmra.mrb[24].mxu1 %v150_v20  ;;  %1843 = vmatmul.mubr.f32.gmra.mrb[24].mxu0 %v150_v20  ;;  %v143_v20 = vld [vmem:[%s13731_s0 + $0x358] sm:$0xff] }
 0x23d   :  { %3186 = vmatprep.mubr.f32.mxu1 %v160_v21  ;;  %1848 = vmatprep.mubr.f32.mxu0 %v160_v21  ;;  %v152_v21 = vld [vmem:[%s13731_s0 + $0x3a0] sm:$0xff] }
 0x240   :  { %3187 = vmatmul.mubr.f32.gmra.mrb[26].mxu1 %v159_v22  ;;  %1849 = vmatmul.mubr.f32.gmra.mrb[26].mxu0 %v159_v22  ;;  %v161_v22 = vld [vmem:[%s13731_s0 + $0x3e8] sm:$0xff] }
 0x241   :  { %3191 = vmatprep.mubr.f32.mxu1 %v169_v23  ;;  %1854 = vmatprep.mubr.f32.mxu0 %v169_v23  ;;  %v170_v23 = vld [vmem:[%s13731_s0 + $0x430] sm:$0xff] }
 0x244   :  { %3192 = vmatmul.mubr.f32.gmra.mrb[28].mxu1 %v168_v24  ;;  %1855 = vmatmul.mubr.f32.gmra.mrb[28].mxu0 %v168_v24  ;;  %v179_v24 = vld [vmem:[%s13731_s0 + $0x478] sm:$0xff] }
 0x245   :  { %3196 = vmatprep.mubr.f32.mxu1 %v178_v25  ;;  %1860 = vmatprep.mubr.f32.mxu0 %v178_v25  ;;  %v188_v25 = vld [vmem:[%s13731_s0 + $0x4c0] sm:$0xff] }
 0x248   :  { %3197 = vmatmul.mubr.f32.gmra.mrb[30].mxu1 %v177_v26  ;;  %1861 = vmatmul.mubr.f32.gmra.mrb[30].mxu0 %v177_v26  ;;  %v11651_v26 = vld [vmem:[%s13731_s0 + $0x508] sm:$0xff] }
 0x249   :  { %3201 = vmatprep.mubr.f32.mxu1 %v187_v27  ;;  %1866 = vmatprep.mubr.f32.mxu0 %v187_v27  ;;  %v11657_v27 = vld [vmem:[%s13731_s0 + $0x550] sm:$0xff] }
 0x24c   :  { %3202 = vmatmul.mubr.f32.gmra.mrb[32].mxu1 %v186_v28  ;;  %1867 = vmatmul.mubr.f32.gmra.mrb[32].mxu0 %v186_v28  ;;  %v11664_v28 = vld [vmem:[%s13731_s0 + $0x598] sm:$0xff] }
 0x24d   :  { %3206 = vmatprep.mubr.f32.mxu1 %v196_v29  ;;  %1872 = vmatprep.mubr.f32.mxu0 %v196_v29  ;;  %v11670_v29 = vld [vmem:[%s13731_s0 + $0x5e0] sm:$0xff] }
 0x250   :  { %3207 = vmatmul.mubr.f32.gmra.mrb[34].mxu1 %v195_v30  ;;  %1873 = vmatmul.mubr.f32.gmra.mrb[34].mxu0 %v195_v30  ;;  %v11677_v30 = vld [vmem:[%s13731_s0 + $0x628] sm:$0xff] }
 0x251   :  { %3211 = vmatprep.mubr.f32.mxu1 %v205_v31  ;;  %1878 = vmatprep.mubr.f32.mxu0 %v205_v31  ;;  %v11683_v31 = vld [vmem:[%s13731_s0 + $0x670] sm:$0xff] }
 0x254   :  { %3212 = vmatmul.mubr.f32.gmra.mrb[36].mxu1 %v204_v32  ;;  %1879 = vmatmul.mubr.f32.gmra.mrb[36].mxu0 %v204_v32  ;;  %v11690_v32 = vld [vmem:[%s13731_s0 + $0x6b8] sm:$0xff] }
 0x255   :  { %3216 = vmatprep.mubr.f32.mxu1 %v214_v33  ;;  %1884 = vmatprep.mubr.f32.mxu0 %v214_v33  ;;  %v11696_v33 = vld [vmem:[%s13731_s0 + $0x700] sm:$0xff] }
 0x258   :  { %3217 = vmatmul.mubr.f32.gmra.mrb[38].mxu1 %v213_v34  ;;  %1885 = vmatmul.mubr.f32.gmra.mrb[38].mxu0 %v213_v34  ;;  %v11703_v34 = vld [vmem:[%s13731_s0 + $0x748] sm:$0xff] }
 0x259   :  { %3221 = vmatprep.mubr.f32.mxu1 %v223_v35  ;;  %1890 = vmatprep.mubr.f32.mxu0 %v223_v35  ;;  %v11709_v35 = vld [vmem:[%s13731_s0 + $0x790] sm:$0xff] }
 0x25c   :  { %3222 = vmatmul.mubr.f32.gmra.mrb[40].mxu1 %v222_v36  ;;  %1891 = vmatmul.mubr.f32.gmra.mrb[40].mxu0 %v222_v36  ;;  %v11716_v36 = vld [vmem:[%s13731_s0 + $0x7d8] sm:$0xff] }
 0x25d   :  { %3226 = vmatprep.mubr.f32.mxu1 %v232_v37  ;;  %1896 = vmatprep.mubr.f32.mxu0 %v232_v37  ;;  %v11722_v37 = vld [vmem:[%s13731_s0 + $0x820] sm:$0xff] }
 0x260   :  { %3227 = vmatmul.mubr.f32.gmra.mrb[42].mxu1 %v231_v38  ;;  %1897 = vmatmul.mubr.f32.gmra.mrb[42].mxu0 %v231_v38  ;;  %v11729_v38 = vld [vmem:[%s13731_s0 + $0x868] sm:$0xff] }
 0x261   :  { %3231 = vmatprep.mubr.f32.mxu1 %v241_v39  ;;  %1902 = vmatprep.mubr.f32.mxu0 %v241_v39  ;;  %v11735_v39 = vld [vmem:[%s13731_s0 + $0x8b0] sm:$0xff] }
 0x264   :  { %3232 = vmatmul.mubr.f32.gmra.mrb[44].mxu1 %v240_v40  ;;  %1903 = vmatmul.mubr.f32.gmra.mrb[44].mxu0 %v240_v40  ;;  %v11742_v40 = vld [vmem:[%s13731_s0 + $0x8f8] sm:$0xff] }
 0x265   :  { %3236 = vmatprep.mubr.f32.mxu1 %v250_v41  ;;  %1908 = vmatprep.mubr.f32.mxu0 %v250_v41  ;;  %v11748_v41 = vld [vmem:[%s13731_s0 + $0x940] sm:$0xff] }
 0x268   :  { %3237 = vmatmul.mubr.f32.gmra.mrb[46].mxu1 %v249_v42  ;;  %1909 = vmatmul.mubr.f32.gmra.mrb[46].mxu0 %v249_v42 }
 0x269   :  { %3241 = vmatprep.mubr.f32.mxu1 %v259_v43  ;;  %1914 = vmatprep.mubr.f32.mxu0 %v259_v43 }
 0x26c   :  { %3242 = vmatmul.mubr.f32.gmra.mrb[48].mxu1 %v258_v44  ;;  %1915 = vmatmul.mubr.f32.gmra.mrb[48].mxu0 %v258_v44  ;;  %v11757_v44 = vld [vmem:[%s13731_s0 + $0x988] sm:$0xff] }
 0x26d   :  { %3246 = vmatprep.mubr.f32.mxu1 %v268_v45  ;;  %1920 = vmatprep.mubr.f32.mxu0 %v268_v45  ;;  %v11763_v45 = vld [vmem:[%s13731_s0 + $0x9d0] sm:$0xff] }
 0x270   :  { %3247 = vmatmul.mubr.f32.gmra.mrb[50].mxu1 %v267_v46  ;;  %1921 = vmatmul.mubr.f32.gmra.mrb[50].mxu0 %v267_v46 }
 0x271   :  { %3251 = vmatprep.mubr.f32.mxu1 %v277_v47  ;;  %1926 = vmatprep.mubr.f32.mxu0 %v277_v47 }
 0x274   :  { %3252 = vmatmul.mubr.f32.gmra.mrb[52].mxu1 %v276_v48  ;;  %1927 = vmatmul.mubr.f32.gmra.mrb[52].mxu0 %v276_v48  ;;  %v11772_v48 = vld [vmem:[%s13731_s0 + $0xa18] sm:$0xff] }
 0x275   :  { %3256 = vmatprep.mubr.f32.mxu1 %v286_v49  ;;  %1932 = vmatprep.mubr.f32.mxu0 %v286_v49  ;;  %v11778_v49 = vld [vmem:[%s13731_s0 + $0xa60] sm:$0xff] }
 0x278   :  { %3257 = vmatmul.mubr.f32.gmra.mrb[54].mxu1 %v285_v50  ;;  %1933 = vmatmul.mubr.f32.gmra.mrb[54].mxu0 %v285_v50 }
 0x279   :  { %3261 = vmatprep.mubr.f32.mxu1 %v295_v51  ;;  %1938 = vmatprep.mubr.f32.mxu0 %v295_v51 }
 0x27c   :  { %3262 = vmatmul.mubr.f32.gmra.mrb[56].mxu1 %v294_v52  ;;  %1939 = vmatmul.mubr.f32.gmra.mrb[56].mxu0 %v294_v52  ;;  %v11788_v52 = vld [vmem:[%s13731_s0 + $0xaa8] sm:$0xf] }
 0x27d   :  { %3266 = vmatprep.mubr.f32.mxu1 %v304_v53  ;;  %1944 = vmatprep.mubr.f32.mxu0 %v304_v53 }
 0x280   :  { %3267 = vmatmul.mubr.f32.gmra.mrb[58].mxu1 %v303_v54  ;;  %1945 = vmatmul.mubr.f32.gmra.mrb[58].mxu0 %v303_v54 }
 0x281   :  { %3271 = vmatprep.mubr.f32.mxu1 %v313_v55  ;;  %1950 = vmatprep.mubr.f32.mxu0 %v313_v55 }
 0x284   :  { %3272 = vmatmul.mubr.f32.gmra.mrb[60].mxu1 %v312_v56  ;;  %1951 = vmatmul.mubr.f32.gmra.mrb[60].mxu0 %v312_v56 }
 0x285   :  { %3276 = vmatprep.mubr.f32.mxu1 %v322_v57  ;;  %1956 = vmatprep.mubr.f32.mxu0 %v322_v57 }
 0x288   :  { %3277 = vmatmul.mubr.f32.gmra.mrb[62].mxu1 %v321_v58  ;;  %1957 = vmatmul.mubr.f32.gmra.mrb[62].mxu0 %v321_v58 }
 0x289   :  { %3281 = vmatprep.mubr.f32.mxu1 %v331_v59  ;;  %1962 = vmatprep.mubr.f32.mxu0 %v331_v59 }
 0x28c   :  { %3282 = vmatmul.mubr.f32.gmra.mrb[64].mxu1 %v330_v60  ;;  %1963 = vmatmul.mubr.f32.gmra.mrb[64].mxu0 %v330_v60 }
 0x28d   :  { %3286 = vmatprep.mubr.f32.mxu1 %v340_v61  ;;  %1968 = vmatprep.mubr.f32.mxu0 %v340_v61 }
 0x290   :  { %3287 = vmatmul.mubr.f32.gmra.mrb[66].mxu1 %v339_v62  ;;  %1969 = vmatmul.mubr.f32.gmra.mrb[66].mxu0 %v339_v62 }
 0x291   :  { %3291 = vmatprep.mubr.f32.mxu1 %v349_v63  ;;  %1974 = vmatprep.mubr.f32.mxu0 %v349_v63 }
 0x294   :  { %3292 = vmatmul.mubr.f32.gmra.mrb[68].mxu1 %v348_v0  ;;  %1975 = vmatmul.mubr.f32.gmra.mrb[68].mxu0 %v348_v0 }
 0x295   :  { %3296 = vmatprep.mubr.f32.mxu1 %v358_v1  ;;  %1980 = vmatprep.mubr.f32.mxu0 %v358_v1 }
 0x298   :  { %3297 = vmatmul.mubr.f32.gmra.mrb[70].mxu1 %v357_v3  ;;  %1981 = vmatmul.mubr.f32.gmra.mrb[70].mxu0 %v357_v3 }
 0x299   :  { %3301 = vmatprep.mubr.f32.mxu1 %v367_v4  ;;  %1986 = vmatprep.mubr.f32.mxu0 %v367_v4 }
 0x29c   :  { %3302 = vmatmul.mubr.f32.gmra.mrb[72].mxu1 %v366_v5  ;;  %1987 = vmatmul.mubr.f32.gmra.mrb[72].mxu0 %v366_v5 }
 0x29d   :  { %3306 = vmatprep.mubr.f32.mxu1 %v376_v6  ;;  %1992 = vmatprep.mubr.f32.mxu0 %v376_v6 }
 0x2a0   :  { %3307 = vmatmul.mubr.f32.gmra.mrb[74].mxu1 %v375_v7  ;;  %1993 = vmatmul.mubr.f32.gmra.mrb[74].mxu0 %v375_v7 }
 0x2a1   :  { %7560 = vmatprep.mubr.f32.mxu1 %v44_v8  ;;  %2063 = vmatprep.mubr.f32.mxu0 %v13742_v10 }
 0x2a4   :  { %7561 = vmatmul.mubr.f32.vlgmr.msra.gmra.mrb[76].mxu1 %v53_v9  ;;  %2064 = vmatmul.mubr.f32.vlgmr.msra.gmra.mrb[0].mxu0 %v44_v8 }
 0x2a5   :  { %7563 = vmatprep.mubr.f32.mxu1 %v62_v12  ;;  %2069 = vmatprep.mubr.f32.mxu0 %v13742_v10 }
 0x2a8   :  { %7564 = vmatmul.mubr.f32.gmra.mrb[78].mxu1 %v71_v13  ;;  %2070 = vmatmul.mubr.f32.gmra.mrb[2].mxu0 %v53_v9 }
 0x2a9   :  { %7566 = vmatprep.mubr.f32.mxu1 %v80_v14  ;;  %2075 = vmatprep.mubr.f32.mxu0 %v13742_v10 }
 0x2ac   :  { %7567 = vmatmul.mubr.f32.gmra.mrb[80].mxu1 %v89_v15  ;;  %2076 = vmatmul.mubr.f32.gmra.mrb[4].mxu0 %v62_v12 }
 0x2ad   :  { %7569 = vmatprep.mubr.f32.mxu1 %v98_v16  ;;  %2081 = vmatprep.mubr.f32.mxu0 %v13742_v10 }
 0x2b0   :  { %7570 = vmatmul.mubr.f32.gmra.mrb[82].mxu1 %v107_v17  ;;  %2082 = vmatmul.mubr.f32.gmra.mrb[6].mxu0 %v71_v13 }
 0x2b1   :  { %7572 = vmatprep.mubr.f32.mxu1 %v116_v11  ;;  %2087 = vmatprep.mubr.f32.mxu0 %v13742_v10 }
 0x2b4   :  { %7573 = vmatmul.mubr.f32.gmra.mrb[84].mxu1 %v125_v18  ;;  %2088 = vmatmul.mubr.f32.gmra.mrb[8].mxu0 %v80_v14 }
 0x2b5   :  { %7575 = vmatprep.mubr.f32.mxu1 %v134_v19  ;;  %2093 = vmatprep.mubr.f32.mxu0 %v13742_v10 }
 0x2b8   :  { %7576 = vmatmul.mubr.f32.gmra.mrb[86].mxu1 %v143_v20  ;;  %2094 = vmatmul.mubr.f32.gmra.mrb[10].mxu0 %v89_v15 }
 0x2b9   :  { %7578 = vmatprep.mubr.f32.mxu1 %v152_v21  ;;  %2099 = vmatprep.mubr.f32.mxu0 %v13742_v10 }
 0x2bc   :  { %7579 = vmatmul.mubr.f32.gmra.mrb[88].mxu1 %v161_v22  ;;  %2100 = vmatmul.mubr.f32.gmra.mrb[12].mxu0 %v98_v16 }
 0x2bd   :  { %7581 = vmatprep.mubr.f32.mxu1 %v170_v23  ;;  %2105 = vmatprep.mubr.f32.mxu0 %v13742_v10 }
 0x2c0   :  { %7582 = vmatmul.mubr.f32.gmra.mrb[90].mxu1 %v179_v24  ;;  %2106 = vmatmul.mubr.f32.gmra.mrb[14].mxu0 %v107_v17 }
 0x2c1   :  { %7584 = vmatprep.mubr.f32.mxu1 %v188_v25  ;;  %2111 = vmatprep.mubr.f32.mxu0 %v13742_v10 }
 0x2c4   :  { %7585 = vmatmul.mubr.f32.gmra.mrb[92].mxu1 %v11651_v26  ;;  %2112 = vmatmul.mubr.f32.gmra.mrb[16].mxu0 %v116_v11 }
 0x2c5   :  { %7587 = vmatprep.mubr.f32.mxu1 %v11657_v27  ;;  %2117 = vmatprep.mubr.f32.mxu0 %v13742_v10 }
 0x2c8   :  { %7588 = vmatmul.mubr.f32.gmra.mrb[94].mxu1 %v11664_v28  ;;  %2118 = vmatmul.mubr.f32.gmra.mrb[18].mxu0 %v125_v18 }
 0x2c9   :  { %7590 = vmatprep.mubr.f32.mxu1 %v11670_v29  ;;  %2123 = vmatprep.mubr.f32.mxu0 %v13742_v10 }
 0x2cc   :  { %7591 = vmatmul.mubr.f32.gmra.mrb[96].mxu1 %v11677_v30  ;;  %2124 = vmatmul.mubr.f32.gmra.mrb[20].mxu0 %v134_v19 }
 0x2cd   :  { %7593 = vmatprep.mubr.f32.mxu1 %v11683_v31  ;;  %2129 = vmatprep.mubr.f32.mxu0 %v13742_v10 }
 0x2d0   :  { %7594 = vmatmul.mubr.f32.gmra.mrb[98].mxu1 %v11690_v32  ;;  %2130 = vmatmul.mubr.f32.gmra.mrb[22].mxu0 %v143_v20 }
 0x2d1   :  { %7596 = vmatprep.mubr.f32.mxu1 %v11696_v33  ;;  %2135 = vmatprep.mubr.f32.mxu0 %v13742_v10 }
 0x2d4   :  { %7597 = vmatmul.mubr.f32.gmra.mrb[100].mxu1 %v11703_v34  ;;  %2136 = vmatmul.mubr.f32.gmra.mrb[24].mxu0 %v152_v21 }
 0x2d5   :  { %7599 = vmatprep.mubr.f32.mxu1 %v11709_v35  ;;  %2141 = vmatprep.mubr.f32.mxu0 %v13742_v10 }
 0x2d8   :  { %7600 = vmatmul.mubr.f32.gmra.mrb[102].mxu1 %v11716_v36  ;;  %2142 = vmatmul.mubr.f32.gmra.mrb[26].mxu0 %v161_v22 }
 0x2d9   :  { %7602 = vmatprep.mubr.f32.mxu1 %v11722_v37  ;;  %2147 = vmatprep.mubr.f32.mxu0 %v13742_v10 }
 0x2dc   :  { %7603 = vmatmul.mubr.f32.gmra.mrb[104].mxu1 %v11729_v38  ;;  %2148 = vmatmul.mubr.f32.gmra.mrb[28].mxu0 %v170_v23 }
 0x2dd   :  { %7605 = vmatprep.mubr.f32.mxu1 %v11735_v39  ;;  %2153 = vmatprep.mubr.f32.mxu0 %v13742_v10 }
 0x2df   :  { %v11750_v42 = vpop.f32.mrb[0].mxu1 }
 0x2e0   :  { %v3125_v43 = vpop.f32.mrb[1].mxu1  ;;  %7606 = vmatmul.mubr.f32.gmra.mrb[106].mxu1 %v11742_v40  ;;  %2154 = vmatmul.mubr.f32.gmra.mrb[30].mxu0 %v179_v24 }
 0x2e1   :  { %7608 = vmatprep.mubr.f32.mxu1 %v11748_v41  ;;  %2159 = vmatprep.mubr.f32.mxu0 %v13742_v10 }
 0x2e3   :  { %v11765_v46 = vpop.f32.mrb[2].mxu1 }
 0x2e4   :  { %v3130_v47 = vpop.f32.mrb[3].mxu1  ;;  %7609 = vmatmul.mubr.f32.gmra.mrb[108].mxu1 %v11757_v44  ;;  %2160 = vmatmul.mubr.f32.gmra.mrb[32].mxu0 %v188_v25 }
 0x2e5   :  { %7611 = vmatprep.mubr.f32.mxu1 %v11763_v45  ;;  %2165 = vmatprep.mubr.f32.mxu0 %v13742_v10 }
 0x2e7   :  { %v11780_v50 = vpop.f32.mrb[4].mxu1 }
 0x2e8   :  { %v3135_v51 = vpop.f32.mrb[5].mxu1  ;;  %7612 = vmatmul.mubr.f32.gmra.mrb[110].mxu1 %v11772_v48  ;;  %2166 = vmatmul.mubr.f32.gmra.mrb[34].mxu0 %v11651_v26 }
 0x2e9   :  { %7614 = vmatprep.mubr.f32.mxu1 %v11778_v49  ;;  %2171 = vmatprep.mubr.f32.mxu0 %v13742_v10 }
 0x2eb   :  { %v11791_v53 = vpop.f32.mrb[6].mxu1 }
 0x2ec   :  { %v3140_v54 = vpop.f32.mrb[7].mxu1  ;;  %7615 = vmatmul.mubr.f32.gmra.mrb[112].mxu1 %v11788_v52  ;;  %2172 = vmatmul.mubr.f32.gmra.mrb[36].mxu0 %v11657_v27 }
 0x2ed   :  { %2177 = vmatprep.mubr.f32.mxu0 %v13742_v10 }
 0x2ef   :  { %v11796_v55 = vpop.f32.mrb[8].mxu1 }
 0x2f0   :  { %v3145_v56 = vpop.f32.mrb[9].mxu1  ;;  %2178 = vmatmul.mubr.f32.gmra.mrb[38].mxu0 %v11664_v28 }
 0x2f1   :  { %2183 = vmatprep.mubr.f32.mxu0 %v13742_v10 }
 0x2f3   :  { %v11800_v57 = vpop.f32.mrb[10].mxu1 }
 0x2f4   :  { %v3150_v58 = vpop.f32.mrb[11].mxu1  ;;  %2184 = vmatmul.mubr.f32.gmra.mrb[40].mxu0 %v11670_v29 }
 0x2f5   :  { %2189 = vmatprep.mubr.f32.mxu0 %v13742_v10 }
 0x2f7   :  { %v11804_v59 = vpop.f32.mrb[12].mxu1 }
 0x2f8   :  { %v3155_v60 = vpop.f32.mrb[13].mxu1  ;;  %2190 = vmatmul.mubr.f32.gmra.mrb[42].mxu0 %v11677_v30 }
 0x2f9   :  { %2195 = vmatprep.mubr.f32.mxu0 %v13742_v10  ;;  %v812_v60 = vlaneseq }
 0x2fb   :  { %v11808_v61 = vpop.f32.mrb[14].mxu1 }
 0x2fc   :  { %v3160_v62 = vpop.f32.mrb[15].mxu1  ;;  %2196 = vmatmul.mubr.f32.gmra.mrb[44].mxu0 %v11683_v31 }
 0x2fd   :  { %2201 = vmatprep.mubr.f32.mxu0 %v13742_v10 }
 0x2ff   :  { %v11812_v63 = vpop.f32.mrb[16].mxu1 }
 0x300   :  { %v3165_v0 = vpop.f32.mrb[17].mxu1  ;;  %2202 = vmatmul.mubr.f32.gmra.mrb[46].mxu0 %v11690_v32 }
 0x301   :  { %2207 = vmatprep.mubr.f32.mxu0 %v13742_v10 }
 0x303   :  { %v11816_v1 = vpop.f32.mrb[18].mxu1 }
 0x304   :  { %v3170_v3 = vpop.f32.mrb[19].mxu1  ;;  %2208 = vmatmul.mubr.f32.gmra.mrb[48].mxu0 %v11696_v33 }
 0x305   :  { %2213 = vmatprep.mubr.f32.mxu0 %v13742_v10  ;;  %v11895_v3 = vshrl.u32 %v812_v60, 7 }
 0x307   :  { %v11820_v4 = vpop.f32.mrb[20].mxu1  ;;  %13767 = vst [vmem:[#allocation8_spill] sm:$0xff] %v11895_v3 }
 0x308   :  { %v3175_v5 = vpop.f32.mrb[21].mxu1  ;;  %2214 = vmatmul.mubr.f32.gmra.mrb[50].mxu0 %v11703_v34 }
 0x309   :  { %2219 = vmatprep.mubr.f32.mxu0 %v13742_v10 }
 0x30b   :  { %v11824_v6 = vpop.f32.mrb[22].mxu1 }
 0x30c   :  { %v3180_v7 = vpop.f32.mrb[23].mxu1  ;;  %2220 = vmatmul.mubr.f32.gmra.mrb[52].mxu0 %v11709_v35 }
 0x30d   :  { %2225 = vmatprep.mubr.f32.mxu0 %v13742_v10 }
 0x30f   :  { %v11828_v8 = vpop.f32.mrb[24].mxu1 }
 0x310   :  { %v3185_v9 = vpop.f32.mrb[25].mxu1  ;;  %2226 = vmatmul.mubr.f32.gmra.mrb[54].mxu0 %v11716_v36 }
 0x311   :  { %2231 = vmatprep.mubr.f32.mxu0 %v13742_v10  ;;  %v822_v9 = vsub.s32 2, %v11895_v3 }
 0x313   :  { %v11832_v12 = vpop.f32.mrb[26].mxu1 }
 0x314   :  { %v3190_v13 = vpop.f32.mrb[27].mxu1  ;;  %2232 = vmatmul.mubr.f32.gmra.mrb[56].mxu0 %v11722_v37 }
 0x315   :  { %2237 = vmatprep.mubr.f32.mxu0 %v13742_v10 }
 0x317   :  { %v11836_v14 = vpop.f32.mrb[28].mxu1 }
 0x318   :  { %v3195_v15 = vpop.f32.mrb[29].mxu1  ;;  %2238 = vmatmul.mubr.f32.gmra.mrb[58].mxu0 %v11729_v38 }
 0x319   :  { %2243 = vmatprep.mubr.f32.mxu0 %v13742_v10  ;;  %v810_v15 = vld [vmem:[%s13733_s2] sm:$0x7]  ;;  %s9245_s2 = smov 96  }
 0x31b   :  { %v11840_v16 = vpop.f32.mrb[30].mxu1 }
 0x31c   :  { %v3200_v17 = vpop.f32.mrb[31].mxu1  ;;  %2244 = vmatmul.mubr.f32.gmra.mrb[60].mxu0 %v11735_v39 }
 0x31d   :  { %2249 = vmatprep.mubr.f32.mxu0 %v13742_v10 }
 0x31f   :  { %v11844_v11 = vpop.f32.mrb[32].mxu1 }
 0x320   :  { %v3205_v18 = vpop.f32.mrb[33].mxu1  ;;  %2250 = vmatmul.mubr.f32.gmra.mrb[62].mxu0 %v11742_v40 }
 0x321   :  { %2255 = vmatprep.mubr.f32.mxu0 %v13742_v10  ;;  %v13743_v18 = vsub.s32 0, %v11895_v3 }
 0x323   :  { %v11848_v19 = vpop.f32.mrb[34].mxu1 }
 0x324   :  { %v3210_v20 = vpop.f32.mrb[35].mxu1  ;;  %2256 = vmatmul.mubr.f32.gmra.mrb[64].mxu0 %v11748_v41 }
 0x325   :  { %2261 = vmatprep.mubr.f32.mxu0 %v13742_v10  ;;  %v13744_v20 = vsub.s32 1, %v11895_v3 }
 0x327   :  { %v11852_v21 = vpop.f32.mrb[36].mxu1 }
 0x328   :  { %v3215_v22 = vpop.f32.mrb[37].mxu1  ;;  %2262 = vmatmul.mubr.f32.gmra.mrb[66].mxu0 %v11757_v44 }
 0x329   :  { %2267 = vmatprep.mubr.f32.mxu0 %v13742_v10  ;;  %v11907_v22 = vrot.slane %v810_v15, %v822_v9 }
 0x32b   :  { %v11856_v23 = vpop.f32.mrb[38].mxu1 }
 0x32c   :  { %v3220_v24 = vpop.f32.mrb[39].mxu1  ;;  %2268 = vmatmul.mubr.f32.gmra.mrb[68].mxu0 %v11763_v45 }
 0x32d   :  { %2273 = vmatprep.mubr.f32.mxu0 %v13742_v10 }
 0x32f   :  { %v11860_v25 = vpop.f32.mrb[40].mxu1 }
 0x330   :  { %v3225_v26 = vpop.f32.mrb[41].mxu1  ;;  %2274 = vmatmul.mubr.f32.gmra.mrb[70].mxu0 %v11772_v48 }
 0x331   :  { %2279 = vmatprep.mubr.f32.mxu0 %v13742_v10 }
 0x333   :  { %v11864_v27 = vpop.f32.mrb[42].mxu1 }
 0x334   :  { %v3230_v28 = vpop.f32.mrb[43].mxu1  ;;  %2280 = vmatmul.mubr.f32.gmra.mrb[72].mxu0 %v11778_v49 }
 0x335   :  { %2285 = vmatprep.mubr.f32.mxu0 %v13742_v10  ;;  %v11913_v28 = vrot.slane %v810_v15, %v13743_v18 }
 0x337   :  { %v11868_v29 = vpop.f32.mrb[44].mxu1 }
 0x338   :  { %v3235_v30 = vpop.f32.mrb[45].mxu1  ;;  %2286 = vmatmul.mubr.f32.gmra.mrb[74].mxu0 %v11788_v52 }
 0x339   :  { %v8421_v30 = vadd.f32 %v11765_v46, %v11907_v22  ;;  %v8423_v46 = vadd.f32 %v11791_v53, %v11907_v22 }
 0x33b   :  { %v11871_v31 = vpop.f32.mrb[46].mxu1 }
 0x33c   :  { %v3240_v32 = vpop.f32.mrb[47].mxu1 }
 0x33d   :  { %v11919_v32 = vrot.slane %v810_v15, %v13744_v20 }
 0x33f   :  { %v11873_v33 = vpop.f32.mrb[48].mxu1 }
 0x340   :  { %v3245_v34 = vpop.f32.mrb[49].mxu1 }
 0x341   :  { %v8420_v34 = vadd.f32 %v11750_v42, %v11907_v22  ;;  %v8422_v42 = vadd.f32 %v11780_v50, %v11907_v22 }
 0x343   :  { %v11875_v35 = vpop.f32.mrb[50].mxu1 }
 0x344   :  { %v3250_v36 = vpop.f32.mrb[51].mxu1 }
 0x347   :  { %v11877_v37 = vpop.f32.mrb[52].mxu1 }
 0x348   :  { %v3255_v38 = vpop.f32.mrb[53].mxu1 }
 0x34b   :  { %v11879_v39 = vpop.f32.mrb[54].mxu1 }
 0x34c   :  { %v3260_v40 = vpop.f32.mrb[55].mxu1 }
 0x34f   :  { %v11881_v41 = vpop.f32.mrb[56].mxu1 }
 0x350   :  { %v3265_v43 = vpop.f32.mrb[57].mxu1 }
 0x353   :  { %v11883_v44 = vpop.f32.mrb[58].mxu1 }
 0x354   :  { %v3270_v45 = vpop.f32.mrb[59].mxu1 }
 0x357   :  { %v11885_v47 = vpop.f32.mrb[60].mxu1 }
 0x358   :  { %v3275_v48 = vpop.f32.mrb[61].mxu1 }
 0x35b   :  { %v11887_v49 = vpop.f32.mrb[62].mxu1 }
 0x35c   :  { %v3280_v51 = vpop.f32.mrb[63].mxu1 }
 0x35f   :  { %v11889_v52 = vpop.f32.mrb[64].mxu1 }
 0x360   :  { %v3285_v54 = vpop.f32.mrb[65].mxu1 }
 0x363   :  { %v11891_v56 = vpop.f32.mrb[66].mxu1 }
 0x364   :  { %v3290_v58 = vpop.f32.mrb[67].mxu1 }
 0x367   :  { %v11893_v62 = vpop.f32.mrb[68].mxu1 }
 0x368   :  { %v3295_v0 = vpop.f32.mrb[69].mxu1 }
 0x36b   :  { %v11897_v5 = vpop.f32.mrb[70].mxu1 }
 0x36c   :  { %v3300_v7 = vpop.f32.mrb[71].mxu1 }
 0x36f   :  { %v11900_v13 = vpop.f32.mrb[72].mxu1 }
 0x370   :  { %v3305_v17 = vpop.f32.mrb[73].mxu1 }
 0x371   :  { %v8425_v17 = vadd.f32 %v11800_v57, %v11907_v22 }
 0x373   :  { %v11909_v24 = vpop.f32.mrb[74].mxu1 }
 0x374   :  { %v3310_v26 = vpop.f32.mrb[75].mxu1 }
 0x375   :  { %v8424_v26 = vadd.f32 %v11796_v55, %v11907_v22  ;;  %v8427_v55 = vadd.f32 %v11808_v61, %v11907_v22 }
 0x377   :  { %v7562_v36 = vpop.f32.mrb[76].mxu1  ;;  %v2065_v40 = vpop.f32.mrb[0].mxu0 }
 0x378   :  { %v3384_v38 = vadd.f32 %v8421_v30, %v7562_v36  ;;  %v3378_v43 = vpop.f32.mrb[77].mxu1  ;;  %v11924_v45 = vadd.f32 %v2065_v40, %v11913_v28  ;;  %v2067_v51 = vpop.f32.mrb[1].mxu0 }
 0x379   :  { %v3379_v48 = vadd.f32 %v8420_v34, %v3378_v43  ;;  %v11930_v54 = vadd.f32 %v2067_v51, %v11919_v32 }
 0x37a   :  { %3573 = vst.msk [vmem:[#allocation2 + $0x28] sm:$0xff] %vm3569_vm0, %v3384_v38  ;;  %3759 = vrot.lane.b32.xlu0 %v11924_v45, %s9245_s2 }
 0x37b   :  { %3570 = vst.msk [vmem:[#allocation2 + $0x10] sm:$0xff] %vm3569_vm0, %v3379_v48  ;;  %v7565_v58 = vpop.f32.mrb[78].mxu1  ;;  %v2071_v0 = vpop.f32.mrb[2].mxu0 }
 0x37c   :  { %v3394_v60 = vadd.f32 %v8423_v46, %v7565_v58  ;;  %v3388_v7 = vpop.f32.mrb[79].mxu1  ;;  %v11938_v53 = vadd.f32 %v2071_v0, %v11913_v28  ;;  %v2073_v15 = vpop.f32.mrb[3].mxu0  ;;  %v8426_v46 = vadd.f32 %v11804_v59, %v11907_v22 }
 0x37d   :  { %v3389_v9 = vadd.f32 %v8422_v42, %v3388_v7  ;;  %v11944_v50 = vadd.f32 %v2073_v15, %v11919_v32  ;;  %v8429_v15 = vadd.f32 %v11816_v1, %v11907_v22 }
 0x37e   :  { %3579 = vst.msk [vmem:[#allocation2 + $0x58] sm:$0xff] %vm3569_vm0, %v3394_v60  ;;  %3911 = vrot.lane.b32.xlu0 %v11924_v45, %s9246_s12 }
 0x37f   :  { %3576 = vst.msk [vmem:[#allocation2 + $0x40] sm:$0xff] %vm3569_vm0, %v3389_v9  ;;  %v7568_v30 = vpop.f32.mrb[80].mxu1  ;;  %v2077_v36 = vpop.f32.mrb[4].mxu0 }
 0x380   :  { %v3404_v34 = vadd.f32 %v8425_v17, %v7568_v30  ;;  %v3398_v38 = vpop.f32.mrb[81].mxu1  ;;  %v11952_v57 = vadd.f32 %v2077_v36, %v11913_v28  ;;  %v2079_v43 = vpop.f32.mrb[5].mxu0 }
 0x381   :  { %v3399_v40 = vadd.f32 %v8424_v26, %v3398_v38  ;;  %v11954_v48 = vld [vmem:[#allocation2 + $0x28] sm:$0xff]  ;;  %v11960_v51 = vadd.f32 %v2079_v43, %v11919_v32  ;;  %v8428_v26 = vadd.f32 %v11812_v63, %v11907_v22 }
 0x382   :  { %3585 = vst.msk [vmem:[#allocation2 + $0x88] sm:$0xff] %vm3569_vm0, %v3404_v34  ;;  %4901 = vrot.lane.b32.xlu1 %v11954_v48, %s9245_s2  ;;  %4063 = vrot.lane.b32.xlu0 %v11924_v45, %s9247_s13  ;;  %v11980_v17 = vld [vmem:[#allocation2 + $0x10] sm:$0xff] }
 0x383   :  { %3582 = vst.msk [vmem:[#allocation2 + $0x70] sm:$0xff] %vm3569_vm0, %v3399_v40  ;;  %v7571_v42 = vpop.f32.mrb[82].mxu1  ;;  %v2083_v61 = vpop.f32.mrb[6].mxu0 }
 0x384   :  { %v3414_v58 = vadd.f32 %v8427_v55, %v7571_v42  ;;  %v3408_v60 = vpop.f32.mrb[83].mxu1  ;;  %v11970_v0 = vadd.f32 %v2083_v61, %v11913_v28  ;;  %v2085_v9 = vpop.f32.mrb[7].mxu0  ;;  %v8430_v42 = vadd.f32 %v11820_v4, %v11907_v22  ;;  %v5052_v4 = vld [vmem:[%s13734_s3 + $0x8] sm:$0xff] }
 0x385   :  { %v3409_v7 = vadd.f32 %v8426_v46, %v3408_v60  ;;  %v11976_v59 = vadd.f32 %v2085_v9, %v11919_v32  ;;  %v11990_v55 = vld [vmem:[#allocation2 + $0x58] sm:$0xff]  ;;  %v8431_v46 = vadd.f32 %v11824_v6, %v11907_v22 }
 0x386   :  { %3591 = vst.msk [vmem:[#allocation2 + $0xb8] sm:$0xff] %vm3569_vm0, %v3414_v58  ;;  %4633 = vrot.lane.b32.xlu1 %v11930_v54, %s9247_s13  ;;  %4899 = vrot.lane.b32.xlu0 %v11980_v17, %s9245_s2 }
 0x387   :  { %3588 = vst.msk [vmem:[#allocation2 + $0xa0] sm:$0xff] %vm3569_vm0, %v3409_v7  ;;  %v7574_v30 = vpop.f32.mrb[84].mxu1  ;;  %v2089_v34 = vpop.f32.mrb[8].mxu0 }
 0x388   :  { %v3424_v1 = vadd.f32 %v8429_v15, %v7574_v30  ;;  %v3418_v36 = vpop.f32.mrb[85].mxu1  ;;  %v11988_v38 = vadd.f32 %v2089_v34, %v11913_v28  ;;  %v2091_v43 = vpop.f32.mrb[9].mxu0  ;;  %v8433_v30 = vadd.f32 %v11832_v12, %v11907_v22 }
 0x389   :  { %v3419_v40 = vadd.f32 %v8428_v26, %v3418_v36  ;;  %v11996_v63 = vadd.f32 %v2091_v43, %v11919_v32  ;;  %v5051_v26 = vld [vmem:[%s13734_s3] sm:$0xff]  ;;  %v8432_v36 = vadd.f32 %v11828_v8, %v11907_v22  ;;  %v5053_v8 = vld [vmem:[%s13734_s3 + $0x10] sm:$0xff] }
 0x38a   :  { %3597 = vst.msk [vmem:[#allocation2 + $0xe8] sm:$0xff] %vm3569_vm0, %v3424_v1  ;;  %4905 = vrot.lane.b32.xlu1 %v11990_v55, %s9245_s2  ;;  %4329 = vrot.lane.b32.xlu0 %v11930_v54, %s9245_s2  ;;  %v8229_v34 = vpack.c.bf16 %v5052_v4, %v5051_v26  ;;  %v8434_v26 = vadd.f32 %v11836_v14, %v11907_v22 }
 0x38b   :  { %3594 = vst.msk [vmem:[#allocation2 + $0xd0] sm:$0xff] %vm3569_vm0, %v3419_v40  ;;  %v7577_v58 = vpop.f32.mrb[86].mxu1  ;;  %v2095_v60 = vpop.f32.mrb[10].mxu0  ;;  %v8437_v14 = vadd.f32 %v11848_v19, %v11907_v22 }
 0x38c   :  { %v3434_v61 = vadd.f32 %v8431_v46, %v7577_v58  ;;  %v3428_v6 = vpop.f32.mrb[87].mxu1  ;;  %v12006_v7 = vadd.f32 %v2095_v60, %v11913_v28  ;;  %v2097_v15 = vpop.f32.mrb[11].mxu0  ;;  %8230 = vmatprep.subr.bf16.mxu1 %v8229_v34  ;;  %v5054_v60 = vld [vmem:[%s13734_s3 + $0x18] sm:$0xff] }
 0x38d   :  { %v3429_v9 = vadd.f32 %v8430_v42, %v3428_v6  ;;  %v12018_v1 = vadd.f32 %v2097_v15, %v11919_v32  ;;  %8232 = vmatpush3.bf16.msra.mxu1 %v8229_v34  ;;  %v8435_v6 = vadd.f32 %v11840_v16, %v11907_v22  ;;  %v8233_v15 = vpack.c.bf16 %v5054_v60, %v5053_v8 }
 0x38e   :  { %3603 = vst.msk [vmem:[#allocation2 + $0x118] sm:$0xff] %vm3569_vm0, %v3434_v61  ;;  %3913 = vrot.lane.b32.xlu1 %v11938_v53, %s9246_s12  ;;  %3583 = vst [vmem:[#allocation2 + $0x78] sm:$0xff] %v12006_v7  ;;  %4481 = vrot.lane.b32.xlu0 %v11930_v54, %s9246_s12 }
 0x38f   :  { %3600 = vst.msk [vmem:[#allocation2 + $0x100] sm:$0xff] %vm3569_vm0, %v3429_v9  ;;  %v7580_v40 = vpop.f32.mrb[88].mxu1  ;;  %3584 = vst [vmem:[#allocation2 + $0x80] sm:$0xff] %v12018_v1  ;;  %v2101_v43 = vpop.f32.mrb[12].mxu0  ;;  %8234 = vmatprep.subr.bf16.mxu1 %v8233_v15 }
 0x390   :  { %v3444_v12 = vadd.f32 %v8433_v30, %v7580_v40  ;;  %v3438_v46 = vpop.f32.mrb[89].mxu1  ;;  %v12030_v42 = vadd.f32 %v2101_v43, %v11913_v28  ;;  %v2103_v61 = vpop.f32.mrb[13].mxu0 }
 0x391   :  { %v3439_v58 = vadd.f32 %v8432_v36, %v3438_v46  ;;  %v12042_v9 = vadd.f32 %v2103_v61, %v11919_v32  ;;  %8236 = vmatpush3.bf16.msra.mxu1 %v8233_v15  ;;  %v12064_v46 = vld [vmem:[#allocation2 + $0x40] sm:$0xff] }
 0x392   :  { %3609 = vst.msk [vmem:[#allocation2 + $0x148] sm:$0xff] %vm3569_vm0, %v3444_v12  ;;  %4065 = vrot.lane.b32.xlu1 %v11938_v53, %s9247_s13  ;;  %3586 = vst [vmem:[#allocation2 + $0x90] sm:$0xff] %v12030_v42  ;;  %3761 = vrot.lane.b32.xlu0 %v11938_v53, %s9245_s2 }
 0x393   :  { %3606 = vst.msk [vmem:[#allocation2 + $0x130] sm:$0xff] %vm3569_vm0, %v3439_v58  ;;  %v7583_v4 = vpop.f32.mrb[90].mxu1  ;;  %3587 = vst [vmem:[#allocation2 + $0x98] sm:$0xff] %v12042_v9  ;;  %v2107_v30 = vpop.f32.mrb[14].mxu0  ;;  %v8436_v58 = vadd.f32 %v11844_v11, %v11907_v22  ;;  %v8439_v11 = vadd.f32 %v11856_v23, %v11907_v22 }
 0x394   :  { %v3454_v16 = vadd.f32 %v8435_v6, %v7583_v4  ;;  %v3448_v34 = vpop.f32.mrb[91].mxu1  ;;  %v12054_v36 = vadd.f32 %v2107_v30, %v11913_v28  ;;  %v2109_v12 = vpop.f32.mrb[15].mxu0 }
 0x395   :  { %v3449_v40 = vadd.f32 %v8434_v26, %v3448_v34  ;;  %v12060_v43 = vadd.f32 %v2109_v12, %v11919_v32  ;;  %v12317_v18 = vld [vmem:[#allocation2 + $0x118] sm:$0xff] }
 0x396   :  { %3615 = vst.msk [vmem:[#allocation2 + $0x178] sm:$0xff] %vm3569_vm0, %v3454_v16  ;;  %4331 = vrot.lane.b32.xlu1 %v11944_v50, %s9245_s2  ;;  %3589 = vst [vmem:[#allocation2 + $0xa8] sm:$0xff] %v12054_v36  ;;  %4903 = vrot.lane.b32.xlu0 %v12064_v46, %s9245_s2  ;;  %v8438_v16 = vadd.f32 %v11852_v21, %v11907_v22  ;;  %v8441_v21 = vadd.f32 %v11864_v27, %v11907_v22 }
 0x397   :  { %3612 = vst.msk [vmem:[#allocation2 + $0x160] sm:$0xff] %vm3569_vm0, %v3449_v40  ;;  %v7586_v61 = vpop.f32.mrb[92].mxu1  ;;  %3590 = vst [vmem:[#allocation2 + $0xb0] sm:$0xff] %v12060_v43  ;;  %v2113_v8 = vpop.f32.mrb[16].mxu0 }
 0x398   :  { %v3464_v19 = vadd.f32 %v8437_v14, %v7586_v61  ;;  %v3458_v60 = vpop.f32.mrb[93].mxu1  ;;  %v12074_v6 = vadd.f32 %v2113_v8, %v11913_v28  ;;  %v2115_v26 = vpop.f32.mrb[17].mxu0  ;;  %13772 = vst [vmem:[#allocation13_spill] sm:$0xff] %v12317_v18 }
 0x399   :  { %v3459_v15 = vadd.f32 %v8436_v58, %v3458_v60  ;;  %v12080_v4 = vadd.f32 %v2115_v26, %v11919_v32 }
 0x39a   :  { %3621 = vst.msk [vmem:[#allocation2 + $0x1a8] sm:$0xff] %vm3569_vm0, %v3464_v19  ;;  %4483 = vrot.lane.b32.xlu1 %v11944_v50, %s9246_s12  ;;  %3592 = vst [vmem:[#allocation2 + $0xc0] sm:$0xff] %v12074_v6  ;;  %3915 = vrot.lane.b32.xlu0 %v11952_v57, %s9246_s12  ;;  %v8440_v19 = vadd.f32 %v11860_v25, %v11907_v22  ;;  %v8443_v25 = vadd.f32 %v11871_v31, %v11907_v22 }
 0x39b   :  { %3618 = vst.msk [vmem:[#allocation2 + $0x190] sm:$0xff] %vm3569_vm0, %v3459_v15  ;;  %v7589_v30 = vpop.f32.mrb[94].mxu1  ;;  %3593 = vst [vmem:[#allocation2 + $0xc8] sm:$0xff] %v12080_v4  ;;  %v2119_v34 = vpop.f32.mrb[18].mxu0 }
 0x39c   :  { %v3474_v23 = vadd.f32 %v8439_v11, %v7589_v30  ;;  %v3468_v40 = vpop.f32.mrb[95].mxu1  ;;  %v12092_v12 = vadd.f32 %v2119_v34, %v11913_v28  ;;  %v2121_v58 = vpop.f32.mrb[19].mxu0  ;;  %v12112_v30 = vld [vmem:[#allocation2 + $0x88] sm:$0xff]  ;;  %v12122_v34 = vld [vmem:[#allocation2 + $0x70] sm:$0xff] }
 0x39d   :  { %v3469_v14 = vadd.f32 %v8438_v16, %v3468_v40  ;;  %v12098_v61 = vadd.f32 %v2121_v58, %v11919_v32  ;;  %v8442_v40 = vadd.f32 %v11868_v29, %v11907_v22  ;;  %v8445_v29 = vadd.f32 %v11875_v35, %v11907_v22 }
 0x39e   :  { %3627 = vst.msk [vmem:[#allocation2 + $0x1d8] sm:$0xff] %vm3569_vm0, %v3474_v23  ;;  %4635 = vrot.lane.b32.xlu1 %v11944_v50, %s9247_s13  ;;  %3595 = vst [vmem:[#allocation2 + $0xd8] sm:$0xff] %v12092_v12  ;;  %4067 = vrot.lane.b32.xlu0 %v11952_v57, %s9247_s13 }
 0x39f   :  { %3624 = vst.msk [vmem:[#allocation2 + $0x1c0] sm:$0xff] %vm3569_vm0, %v3469_v14  ;;  %v7592_v8 = vpop.f32.mrb[96].mxu1  ;;  %3596 = vst [vmem:[#allocation2 + $0xe0] sm:$0xff] %v12098_v61  ;;  %v2125_v60 = vpop.f32.mrb[20].mxu0 }
 0x3a0   :  { %v3484_v27 = vadd.f32 %v8441_v21, %v7592_v8  ;;  %v3478_v15 = vpop.f32.mrb[97].mxu1  ;;  %v12110_v26 = vadd.f32 %v2125_v60, %v11913_v28  ;;  %v2127_v16 = vpop.f32.mrb[21].mxu0 }
 0x3a1   :  { %v3479_v11 = vadd.f32 %v8440_v19, %v3478_v15  ;;  %v12118_v23 = vadd.f32 %v2127_v16, %v11919_v32  ;;  %v8444_v15 = vadd.f32 %v11873_v33, %v11907_v22  ;;  %v8447_v33 = vadd.f32 %v11879_v39, %v11907_v22 }
 0x3a2   :  { %3633 = vst.msk [vmem:[#allocation2 + $0x208] sm:$0xff] %vm3569_vm0, %v3484_v27  ;;  %4909 = vrot.lane.b32.xlu1 %v12112_v30, %s9245_s2  ;;  %3598 = vst [vmem:[#allocation2 + $0xf0] sm:$0xff] %v12110_v26  ;;  %4907 = vrot.lane.b32.xlu0 %v12122_v34, %s9245_s2 }
 0x3a3   :  { %3630 = vst.msk [vmem:[#allocation2 + $0x1f0] sm:$0xff] %vm3569_vm0, %v3479_v11  ;;  %v7595_v14 = vpop.f32.mrb[98].mxu1  ;;  %3599 = vst [vmem:[#allocation2 + $0xf8] sm:$0xff] %v12118_v23  ;;  %v2131_v58 = vpop.f32.mrb[22].mxu0 }
 0x3a4   :  { %v3494_v31 = vadd.f32 %v8443_v25, %v7595_v14  ;;  %v3488_v21 = vpop.f32.mrb[99].mxu1  ;;  %v12132_v19 = vadd.f32 %v2131_v58, %v11913_v28  ;;  %v2133_v27 = vpop.f32.mrb[23].mxu0 }
 0x3a5   :  { %v3489_v8 = vadd.f32 %v8442_v40, %v3488_v21  ;;  %v12138_v60 = vadd.f32 %v2133_v27, %v11919_v32  ;;  %v8446_v21 = vadd.f32 %v11877_v37, %v11907_v22  ;;  %v8449_v37 = vadd.f32 %v11883_v44, %v11907_v22 }
 0x3a6   :  { %3639 = vst.msk [vmem:[#allocation2 + $0x238] sm:$0xff] %vm3569_vm0, %v3494_v31  ;;  %3763 = vrot.lane.b32.xlu1 %v11952_v57, %s9245_s2  ;;  %3601 = vst [vmem:[#allocation2 + $0x108] sm:$0xff] %v12132_v19  ;;  %4333 = vrot.lane.b32.xlu0 %v11960_v51, %s9245_s2 }
 0x3a7   :  { %3636 = vst.msk [vmem:[#allocation2 + $0x220] sm:$0xff] %vm3569_vm0, %v3489_v8  ;;  %v7598_v11 = vpop.f32.mrb[100].mxu1  ;;  %3602 = vst [vmem:[#allocation2 + $0x110] sm:$0xff] %v12138_v60  ;;  %v2137_v16 = vpop.f32.mrb[24].mxu0 }
 0x3a8   :  { %v3504_v35 = vadd.f32 %v8445_v29, %v7598_v11  ;;  %v3498_v25 = vpop.f32.mrb[101].mxu1  ;;  %v12150_v40 = vadd.f32 %v2137_v16, %v11913_v28  ;;  %v2139_v31 = vpop.f32.mrb[25].mxu0  ;;  %v12170_v16 = vld [vmem:[#allocation2 + $0xb8] sm:$0xff] }
 0x3a9   :  { %v3499_v14 = vadd.f32 %v8444_v15, %v3498_v25  ;;  %v12156_v58 = vadd.f32 %v2139_v31, %v11919_v32 }
 0x3aa   :  { %3645 = vst.msk [vmem:[#allocation2 + $0x268] sm:$0xff] %vm3569_vm0, %v3504_v35  ;;  %4637 = vrot.lane.b32.xlu1 %v11960_v51, %s9247_s13  ;;  %3604 = vst [vmem:[#allocation2 + $0x120] sm:$0xff] %v12150_v40  ;;  %4485 = vrot.lane.b32.xlu0 %v11960_v51, %s9246_s12 }
 0x3ab   :  { %3642 = vst.msk [vmem:[#allocation2 + $0x250] sm:$0xff] %vm3569_vm0, %v3499_v14  ;;  %v7601_v8 = vpop.f32.mrb[102].mxu1  ;;  %3605 = vst [vmem:[#allocation2 + $0x128] sm:$0xff] %v12156_v58  ;;  %v2143_v27 = vpop.f32.mrb[26].mxu0  ;;  %v8448_v14 = vadd.f32 %v11881_v41, %v11907_v22  ;;  %v8451_v41 = vadd.f32 %v11887_v49, %v11907_v22 }
 0x3ac   :  { %v3514_v39 = vadd.f32 %v8447_v33, %v7601_v8  ;;  %v3508_v29 = vpop.f32.mrb[103].mxu1  ;;  %v12168_v15 = vadd.f32 %v2143_v27, %v11913_v28  ;;  %v2145_v35 = vpop.f32.mrb[27].mxu0 }
 0x3ad   :  { %v3509_v11 = vadd.f32 %v8446_v21, %v3508_v29  ;;  %v12176_v25 = vadd.f32 %v2145_v35, %v11919_v32 }
 0x3ae   :  { %3651 = vst.msk [vmem:[#allocation2 + $0x298] sm:$0xff] %vm3569_vm0, %v3514_v39  ;;  %4913 = vrot.lane.b32.xlu1 %v12170_v16, %s9245_s2  ;;  %3607 = vst [vmem:[#allocation2 + $0x138] sm:$0xff] %v12168_v15  ;;  %4335 = vrot.lane.b32.xlu0 %v11976_v59, %s9245_s2 }
 0x3af   :  { %3648 = vst.msk [vmem:[#allocation2 + $0x280] sm:$0xff] %vm3569_vm0, %v3509_v11  ;;  %v7604_v31 = vpop.f32.mrb[104].mxu1  ;;  %3608 = vst [vmem:[#allocation2 + $0x140] sm:$0xff] %v12176_v25  ;;  %v2149_v33 = vpop.f32.mrb[28].mxu0  ;;  %v8450_v11 = vadd.f32 %v11885_v47, %v11907_v22  ;;  %v8453_v47 = vadd.f32 %v11891_v56, %v11907_v22 }
 0x3b0   :  { %v3524_v44 = vadd.f32 %v8449_v37, %v7604_v31  ;;  %v3518_v21 = vpop.f32.mrb[105].mxu1  ;;  %v12188_v8 = vadd.f32 %v2149_v33, %v11913_v28  ;;  %v2151_v27 = vpop.f32.mrb[29].mxu0 }
 0x3b1   :  { %v3519_v39 = vadd.f32 %v8448_v14, %v3518_v21  ;;  %v12194_v29 = vadd.f32 %v2151_v27, %v11919_v32 }
 0x3b2   :  { %3657 = vst.msk [vmem:[#allocation2 + $0x2c8] sm:$0xff] %vm3569_vm0, %v3524_v44  ;;  %3765 = vrot.lane.b32.xlu1 %v11970_v0, %s9245_s2  ;;  %3610 = vst [vmem:[#allocation2 + $0x150] sm:$0xff] %v12188_v8  ;;  %4639 = vrot.lane.b32.xlu0 %v11976_v59, %s9247_s13 }
 0x3b3   :  { %3654 = vst.msk [vmem:[#allocation2 + $0x2b0] sm:$0xff] %vm3569_vm0, %v3519_v39  ;;  %v7607_v35 = vpop.f32.mrb[106].mxu1  ;;  %3611 = vst [vmem:[#allocation2 + $0x158] sm:$0xff] %v12194_v29  ;;  %v2155_v37 = vpop.f32.mrb[30].mxu0  ;;  %v8452_v39 = vadd.f32 %v11889_v52, %v11907_v22  ;;  %v8455_v52 = vadd.f32 %v11897_v5, %v11907_v22 }
 0x3b4   :  { %v3534_v49 = vadd.f32 %v8451_v41, %v7607_v35  ;;  %v3528_v14 = vpop.f32.mrb[107].mxu1  ;;  %v12206_v31 = vadd.f32 %v2155_v37, %v11913_v28  ;;  %v2157_v33 = vpop.f32.mrb[31].mxu0 }
 0x3b5   :  { %v3529_v44 = vadd.f32 %v8450_v11, %v3528_v14  ;;  %v12212_v21 = vadd.f32 %v2157_v33, %v11919_v32 }
 0x3b6   :  { %3663 = vst.msk [vmem:[#allocation2 + $0x2f8] sm:$0xff] %vm3569_vm0, %v3534_v49  ;;  %3917 = vrot.lane.b32.xlu1 %v11970_v0, %s9246_s12  ;;  %3613 = vst [vmem:[#allocation2 + $0x168] sm:$0xff] %v12206_v31  ;;  %3767 = vrot.lane.b32.xlu0 %v11988_v38, %s9245_s2 }
 0x3b7   :  { %3660 = vst.msk [vmem:[#allocation2 + $0x2e0] sm:$0xff] %vm3569_vm0, %v3529_v44  ;;  %v7610_v27 = vpop.f32.mrb[108].mxu1  ;;  %3614 = vst [vmem:[#allocation2 + $0x170] sm:$0xff] %v12212_v21  ;;  %v2161_v41 = vpop.f32.mrb[32].mxu0  ;;  %v8454_v44 = vadd.f32 %v11893_v62, %v11907_v22  ;;  %v8457_v62 = vadd.f32 %v11909_v24, %v11907_v22 }
 0x3b8   :  { %v3544_v56 = vadd.f32 %v8453_v47, %v7610_v27  ;;  %v3538_v11 = vpop.f32.mrb[109].mxu1  ;;  %v12224_v35 = vadd.f32 %v2161_v41, %v11913_v28  ;;  %v2163_v37 = vpop.f32.mrb[33].mxu0 }
 0x3b9   :  { %v3539_v49 = vadd.f32 %v8452_v39, %v3538_v11  ;;  %v12230_v14 = vadd.f32 %v2163_v37, %v11919_v32  ;;  %v12244_v11 = vld [vmem:[#allocation2 + $0xa0] sm:$0xff]  ;;  %v8456_v37 = vadd.f32 %v11900_v13, %v11907_v22 }
 0x3ba   :  { %3669 = vst.msk [vmem:[#allocation2 + $0x328] sm:$0xff] %vm3569_vm0, %v3544_v56  ;;  %4069 = vrot.lane.b32.xlu1 %v11970_v0, %s9247_s13  ;;  %3616 = vst [vmem:[#allocation2 + $0x180] sm:$0xff] %v12224_v35  ;;  %3919 = vrot.lane.b32.xlu0 %v11988_v38, %s9246_s12 }
 0x3bb   :  { %3666 = vst.msk [vmem:[#allocation2 + $0x310] sm:$0xff] %vm3569_vm0, %v3539_v49  ;;  %v7613_v33 = vpop.f32.mrb[110].mxu1  ;;  %3617 = vst [vmem:[#allocation2 + $0x188] sm:$0xff] %v12230_v14  ;;  %v2167_v47 = vpop.f32.mrb[34].mxu0 }
 0x3bc   :  { %v3554_v5 = vadd.f32 %v8455_v52, %v7613_v33  ;;  %v3548_v39 = vpop.f32.mrb[111].mxu1  ;;  %v12242_v27 = vadd.f32 %v2167_v47, %v11913_v28  ;;  %v2169_v41 = vpop.f32.mrb[35].mxu0 }
 0x3bd   :  { %v3549_v56 = vadd.f32 %v8454_v44, %v3548_v39  ;;  %v12250_v49 = vadd.f32 %v2169_v41, %v11919_v32 }
 0x3be   :  { %3675 = vst.msk [vmem:[#allocation2 + $0x358] sm:$0xff] %vm3569_vm0, %v3554_v5  ;;  %4911 = vrot.lane.b32.xlu1 %v12244_v11, %s9245_s2  ;;  %3619 = vst [vmem:[#allocation2 + $0x198] sm:$0xff] %v12242_v27  ;;  %4071 = vrot.lane.b32.xlu0 %v11988_v38, %s9247_s13 }
 0x3bf   :  { %3672 = vst.msk [vmem:[#allocation2 + $0x340] sm:$0xff] %vm3569_vm0, %v3549_v56  ;;  %v7616_v52 = vpop.f32.mrb[112].mxu1  ;;  %3620 = vst [vmem:[#allocation2 + $0x1a0] sm:$0xff] %v12250_v49  ;;  %v2173_v44 = vpop.f32.mrb[36].mxu0 }
 0x3c0   :  { %v3564_v24 = vadd.f32 %v8457_v62, %v7616_v52  ;;  %v3558_v33 = vpop.f32.mrb[113].mxu1  ;;  %v12262_v5 = vadd.f32 %v2173_v44, %v11913_v28  ;;  %v2175_v39 = vpop.f32.mrb[37].mxu0  ;;  %v12277_v62 = vld [vmem:[#allocation2 + $0xe8] sm:$0xff] }
 0x3c1   :  { %v3559_v47 = vadd.f32 %v8456_v37, %v3558_v33  ;;  %v12265_v13 = vadd.f32 %v2175_v39, %v11919_v32  ;;  %13768 = vst [vmem:[#allocation9_spill] sm:$0xff] %v12277_v62  ;;  %v12291_v33 = vld [vmem:[#allocation2 + $0xd0] sm:$0xff] }
 0x3c2   :  { %3682 = vst.msk [vmem:[#allocation2 + $0x388] sm:$0xf] %vm3681_vm1, %v3564_v24  ;;  %4487 = vrot.lane.b32.xlu1 %v11976_v59, %s9246_s12  ;;  %3622 = vst [vmem:[#allocation2 + $0x1b0] sm:$0xff] %v12262_v5  ;;  %4337 = vrot.lane.b32.xlu0 %v11996_v63, %s9245_s2 }
 0x3c3   :  { %3678 = vst.msk [vmem:[#allocation2 + $0x370] sm:$0xff] %vm3569_vm0, %v3559_v47  ;;  %3623 = vst [vmem:[#allocation2 + $0x1b8] sm:$0xff] %v12265_v13  ;;  %v2179_v22 = vpop.f32.mrb[38].mxu0 }
 0x3c4   :  { %v12275_v56 = vadd.f32 %v2179_v22, %v11913_v28  ;;  %v2181_v41 = vpop.f32.mrb[39].mxu0 }
 0x3c5   :  { %v12280_v37 = vadd.f32 %v2181_v41, %v11919_v32 }
 0x3c6   :  { %4917 = vrot.lane.b32.xlu1 %v12277_v62, %s9245_s2  ;;  %3625 = vst [vmem:[#allocation2 + $0x1c8] sm:$0xff] %v12275_v56  ;;  %4489 = vrot.lane.b32.xlu0 %v11996_v63, %s9246_s12  ;;  %v12356_v62 = vld [vmem:[#allocation2 + $0x100] sm:$0xff] }
 0x3c7   :  { %3626 = vst [vmem:[#allocation2 + $0x1d0] sm:$0xff] %v12280_v37  ;;  %v2185_v52 = vpop.f32.mrb[40].mxu0  ;;  %13777 = vst [vmem:[#allocation18_spill] sm:$0xff] %v12356_v62 }
 0x3c8   :  { %v12289_v24 = vadd.f32 %v2185_v52, %v11913_v28  ;;  %v2187_v44 = vpop.f32.mrb[41].mxu0 }
 0x3c9   :  { %v12294_v47 = vadd.f32 %v2187_v44, %v11919_v32 }
 0x3ca   :  { %4915 = vrot.lane.b32.xlu1 %v12291_v33, %s9245_s2  ;;  %3628 = vst [vmem:[#allocation2 + $0x1e0] sm:$0xff] %v12289_v24  ;;  %4643 = vrot.lane.b32.xlu0 %v12018_v1, %s9247_s13 }
 0x3cb   :  { %3629 = vst [vmem:[#allocation2 + $0x1e8] sm:$0xff] %v12294_v47  ;;  %v2191_v39 = vpop.f32.mrb[42].mxu0 }
 0x3cc   :  { %v12303_v22 = vadd.f32 %v2191_v39, %v11913_v28  ;;  %v2193_v41 = vpop.f32.mrb[43].mxu0 }
 0x3cd   :  { %v12306_v52 = vadd.f32 %v2193_v41, %v11919_v32 }
 0x3ce   :  { %13769 = vst [vmem:[#allocation10_spill] sm:$0xff] %v12303_v22  ;;  %4641 = vrot.lane.b32.xlu1 %v11996_v63, %s9247_s13  ;;  %3631 = vst [vmem:[#allocation2 + $0x1f8] sm:$0xff] %v12303_v22  ;;  %3771 = vrot.lane.b32.xlu0 %v12030_v42, %s9245_s2 }
 0x3cf   :  { %13770 = vst [vmem:[#allocation11_spill] sm:$0xff] %v12306_v52  ;;  %3632 = vst [vmem:[#allocation2 + $0x200] sm:$0xff] %v12306_v52  ;;  %v2197_v44 = vpop.f32.mrb[44].mxu0  ;;  %v4800_v52 = vld [vmem:[#allocation2 + $0x178] sm:$0xff] }
 0x3d0   :  { %v12315_v10 = vadd.f32 %v2197_v44, %v11913_v28  ;;  %v2199_v39 = vpop.f32.mrb[45].mxu0 }
 0x3d1   :  { %v12320_v41 = vadd.f32 %v2199_v39, %v11919_v32 }
 0x3d2   :  { %13771 = vst [vmem:[#allocation12_spill] sm:$0xff] %v12315_v10  ;;  %4921 = vrot.lane.b32.xlu1 %v12317_v18, %s9245_s2  ;;  %3634 = vst [vmem:[#allocation2 + $0x210] sm:$0xff] %v12315_v10  ;;  %3923 = vrot.lane.b32.xlu0 %v12030_v42, %s9246_s12 }
 0x3d3   :  { %13773 = vst [vmem:[#allocation14_spill] sm:$0xff] %v12320_v41  ;;  %3635 = vst [vmem:[#allocation2 + $0x218] sm:$0xff] %v12320_v41  ;;  %v2203_v20 = vpop.f32.mrb[46].mxu0 }
 0x3d4   :  { %v12329_v44 = vadd.f32 %v2203_v20, %v11913_v28  ;;  %v2205_v2 = vpop.f32.mrb[47].mxu0 }
 0x3d5   :  { %v12332_v3 = vadd.f32 %v2205_v2, %v11919_v32 }
 0x3d6   :  { %13774 = vst [vmem:[#allocation15_spill] sm:$0xff] %v12329_v44  ;;  %3769 = vrot.lane.b32.xlu1 %v12006_v7, %s9245_s2  ;;  %3637 = vst [vmem:[#allocation2 + $0x228] sm:$0xff] %v12329_v44  ;;  %4075 = vrot.lane.b32.xlu0 %v12030_v42, %s9247_s13 }
 0x3d7   :  { %13775 = vst [vmem:[#allocation16_spill] sm:$0xff] %v12332_v3  ;;  %3638 = vst [vmem:[#allocation2 + $0x230] sm:$0xff] %v12332_v3  ;;  %v2209_v39 = vpop.f32.mrb[48].mxu0 }
 0x3d8   :  { %v12341_v18 = vadd.f32 %v2209_v39, %v11913_v28  ;;  %v2211_v20 = vpop.f32.mrb[49].mxu0 }
 0x3d9   :  { %v8393_v41 = vadd.f32 %v2211_v20, %v11919_v32 }
 0x3da   :  { %13776 = vst [vmem:[#allocation17_spill] sm:$0xff] %v12341_v18  ;;  %3921 = vrot.lane.b32.xlu1 %v12006_v7, %s9246_s12  ;;  %3640 = vst [vmem:[#allocation2 + $0x240] sm:$0xff] %v12341_v18  ;;  %4341 = vrot.lane.b32.xlu0 %v12042_v9, %s9245_s2 }
 0x3db   :  { %3641 = vst [vmem:[#allocation2 + $0x248] sm:$0xff] %v8393_v41  ;;  %v2215_v2 = vpop.f32.mrb[50].mxu0 }
 0x3dc   :  { %v8394_v42 = vadd.f32 %v2215_v2, %v11913_v28  ;;  %v2217_v3 = vpop.f32.mrb[51].mxu0 }
 0x3dd   :  { %v8395_v44 = vadd.f32 %v2217_v3, %v11919_v32 }
 0x3de   :  { %4073 = vrot.lane.b32.xlu1 %v12006_v7, %s9247_s13  ;;  %3643 = vst [vmem:[#allocation2 + $0x258] sm:$0xff] %v8394_v42  ;;  %4493 = vrot.lane.b32.xlu0 %v12042_v9, %s9246_s12 }
 0x3df   :  { %3644 = vst [vmem:[#allocation2 + $0x260] sm:$0xff] %v8395_v44  ;;  %v2221_v39 = vpop.f32.mrb[52].mxu0 }
 0x3e0   :  { %v8396_v20 = vadd.f32 %v2221_v39, %v11913_v28  ;;  %v2223_v18 = vpop.f32.mrb[53].mxu0 }
 0x3e1   :  { %v8397_v41 = vadd.f32 %v2223_v18, %v11919_v32 }
 0x3e2   :  { %4919 = vrot.lane.b32.xlu1 %v12356_v62, %s9245_s2  ;;  %3646 = vst [vmem:[#allocation2 + $0x270] sm:$0xff] %v8396_v20  ;;  %4647 = vrot.lane.b32.xlu0 %v12060_v43, %s9247_s13 }
 0x3e3   :  { %3647 = vst [vmem:[#allocation2 + $0x278] sm:$0xff] %v8397_v41  ;;  %v2227_v3 = vpop.f32.mrb[54].mxu0 }
 0x3e4   :  { %v8398_v7 = vadd.f32 %v2227_v3, %v11913_v28  ;;  %v2229_v44 = vpop.f32.mrb[55].mxu0 }
 0x3e5   :  { %v8399_v2 = vadd.f32 %v2229_v44, %v11919_v32  ;;  %v12376_v44 = vld [vmem:[#allocation2 + $0x148] sm:$0xff] }
 0x3e6   :  { %4339 = vrot.lane.b32.xlu1 %v12018_v1, %s9245_s2  ;;  %3649 = vst [vmem:[#allocation2 + $0x288] sm:$0xff] %v8398_v7  ;;  %3775 = vrot.lane.b32.xlu0 %v12074_v6, %s9245_s2  ;;  %13778 = vst [vmem:[#allocation19_spill] sm:$0xff] %v12376_v44 }
 0x3e7   :  { %3650 = vst [vmem:[#allocation2 + $0x290] sm:$0xff] %v8399_v2  ;;  %v2233_v18 = vpop.f32.mrb[56].mxu0 }
 0x3e8   :  { %v8400_v42 = vadd.f32 %v2233_v18, %v11913_v28  ;;  %v2235_v39 = vpop.f32.mrb[57].mxu0 }
 0x3e9   :  { %v8401_v20 = vadd.f32 %v2235_v39, %v11919_v32 }
 0x3ea   :  { %4491 = vrot.lane.b32.xlu1 %v12018_v1, %s9246_s12  ;;  %3652 = vst [vmem:[#allocation2 + $0x2a0] sm:$0xff] %v8400_v42  ;;  %3927 = vrot.lane.b32.xlu0 %v12074_v6, %s9246_s12 }
 0x3eb   :  { %3653 = vst [vmem:[#allocation2 + $0x2a8] sm:$0xff] %v8401_v20  ;;  %v2239_v41 = vpop.f32.mrb[58].mxu0  ;;  %v12384_v20 = vld [vmem:[#allocation2 + $0x130] sm:$0xff] }
 0x3ec   :  { %v8402_v3 = vadd.f32 %v2239_v41, %v11913_v28  ;;  %v2241_v7 = vpop.f32.mrb[59].mxu0  ;;  %v3760_v2 = vpop.permute.xlu0 %3759  ;;  %13779 = vst [vmem:[#allocation20_spill] sm:$0xff] %v12384_v20 }
 0x3ed   :  { %v8403_v18 = vadd.f32 %v2241_v7, %v11919_v32  ;;  %v3873_v10 = vmax.f32 %v11924_v45, %v3760_v2 }
 0x3ee   :  { %4925 = vrot.lane.b32.xlu1 %v12376_v44, %s9245_s2  ;;  %3655 = vst [vmem:[#allocation2 + $0x2b8] sm:$0xff] %v8402_v3  ;;  %4079 = vrot.lane.b32.xlu0 %v12074_v6, %s9247_s13 }
 0x3ef   :  { %3656 = vst [vmem:[#allocation2 + $0x2c0] sm:$0xff] %v8403_v18  ;;  %v2245_v1 = vpop.f32.mrb[60].mxu0 }
 0x3f0   :  { %v8404_v42 = vadd.f32 %v2245_v1, %v11913_v28  ;;  %v2247_v39 = vpop.f32.mrb[61].mxu0  ;;  %v3912_v41 = vpop.permute.xlu0 %3911 }
 0x3f1   :  { %v8405_v62 = vadd.f32 %v2247_v39, %v11919_v32  ;;  %v4025_v39 = vmax.f32 %v3873_v10, %v3912_v41 }
 0x3f2   :  { %4923 = vrot.lane.b32.xlu1 %v12384_v20, %s9245_s2  ;;  %3658 = vst [vmem:[#allocation2 + $0x2d0] sm:$0xff] %v8404_v42  ;;  %4345 = vrot.lane.b32.xlu0 %v12080_v4, %s9245_s2 }
 0x3f3   :  { %3659 = vst [vmem:[#allocation2 + $0x2d8] sm:$0xff] %v8405_v62  ;;  %v2251_v6 = vpop.f32.mrb[62].mxu0 }
 0x3f4   :  { %v12391_v3 = vpop.permute.xlu1 %4901  ;;  %v8406_v7 = vadd.f32 %v2251_v6, %v11913_v28  ;;  %v2253_v18 = vpop.f32.mrb[63].mxu0 }
 0x3f5   :  { %v4064_v1 = vpop.permute.xlu0 %4063  ;;  %v8407_v44 = vadd.f32 %v2253_v18, %v11919_v32 }
 0x3f6   :  { %4645 = vrot.lane.b32.xlu1 %v12042_v9, %s9247_s13  ;;  %3661 = vst [vmem:[#allocation2 + $0x2e8] sm:$0xff] %v8406_v7  ;;  %4497 = vrot.lane.b32.xlu0 %v12080_v4, %s9246_s12  ;;  %v4177_v45 = vmax.f32 %v4025_v39, %v4064_v1 }
 0x3f7   :  { %3662 = vst [vmem:[#allocation2 + $0x2f0] sm:$0xff] %v8407_v44  ;;  %v2257_v62 = vpop.f32.mrb[64].mxu0 }
 0x3f8   :  { %v4634_v42 = vpop.permute.xlu1 %4633  ;;  %v8408_v20 = vadd.f32 %v2257_v62, %v11913_v28  ;;  %v2259_v6 = vpop.f32.mrb[65].mxu0 }
 0x3f9   :  { %v4900_v22 = vpop.permute.xlu0 %4899  ;;  %v8409_v18 = vadd.f32 %v2259_v6, %v11919_v32 }
 0x3fa   :  { %4929 = vrot.lane.b32.xlu1 %v4800_v52, %s9245_s2  ;;  %3664 = vst [vmem:[#allocation2 + $0x300] sm:$0xff] %v8408_v20  ;;  %4649 = vrot.lane.b32.xlu0 %v12080_v4, %s9247_s13  ;;  %v4253_v52 = vmax.f32 %v4177_v45, %v11930_v54 }
 0x3fb   :  { %3665 = vst [vmem:[#allocation2 + $0x308] sm:$0xff] %v8409_v18  ;;  %v2263_v9 = vpop.f32.mrb[66].mxu0 }
 0x3fc   :  { %v12405_v44 = vpop.permute.xlu1 %4905  ;;  %v8410_v10 = vadd.f32 %v2263_v9, %v11913_v28  ;;  %v2265_v2 = vpop.f32.mrb[67].mxu0 }
 0x3fd   :  { %v4330_v41 = vpop.permute.xlu0 %4329  ;;  %v8411_v7 = vadd.f32 %v2265_v2, %v11919_v32 }
 0x3fe   :  { %3773 = vrot.lane.b32.xlu1 %v12054_v36, %s9245_s2  ;;  %3667 = vst [vmem:[#allocation2 + $0x318] sm:$0xff] %v8410_v10  ;;  %4651 = vrot.lane.b32.xlu0 %v12098_v61, %s9247_s13  ;;  %v4443_v1 = vmax.f32 %v4253_v52, %v4330_v41 }
 0x3ff   :  { %3668 = vst [vmem:[#allocation2 + $0x320] sm:$0xff] %v8411_v7  ;;  %v2269_v4 = vpop.f32.mrb[68].mxu0 }
 0x400   :  { %v3914_v20 = vpop.permute.xlu1 %3913  ;;  %v8412_v62 = vadd.f32 %v2269_v4, %v11913_v28  ;;  %v2271_v39 = vpop.f32.mrb[69].mxu0 }
 0x401   :  { %v4482_v6 = vpop.permute.xlu0 %4481  ;;  %v8413_v18 = vadd.f32 %v2271_v39, %v11919_v32 }
 0x402   :  { %3925 = vrot.lane.b32.xlu1 %v12054_v36, %s9246_s12  ;;  %v4595_v9 = vmax.f32 %v4443_v1, %v4482_v6  ;;  %3670 = vst [vmem:[#allocation2 + $0x330] sm:$0xff] %v8412_v62  ;;  %3779 = vrot.lane.b32.xlu0 %v12110_v26, %s9245_s2 }
 0x403   :  { %3671 = vst [vmem:[#allocation2 + $0x338] sm:$0xff] %v8413_v18  ;;  %v2275_v54 = vpop.f32.mrb[70].mxu0 }
 0x404   :  { %v4066_v45 = vpop.permute.xlu1 %4065  ;;  %v4747_v10 = vmax.f32 %v4595_v9, %v4634_v42  ;;  %v8414_v2 = vadd.f32 %v2275_v54, %v11913_v28  ;;  %v2277_v41 = vpop.f32.mrb[71].mxu0  ;;  %v12429_v54 = vld [vmem:[#allocation2 + $0x160] sm:$0xff] }
 0x405   :  { %v3762_v7 = vpop.permute.xlu0 %3761  ;;  %v8415_v52 = vadd.f32 %v2277_v41, %v11919_v32 }
 0x406   :  { %4077 = vrot.lane.b32.xlu1 %v12054_v36, %s9247_s13  ;;  %v4823_v4 = vmax.f32 %v4747_v10, %v11980_v17  ;;  %v3874_v1 = vmax.f32 %v11938_v53, %v3762_v7  ;;  %3673 = vst [vmem:[#allocation2 + $0x348] sm:$0xff] %v8414_v2  ;;  %3931 = vrot.lane.b32.xlu0 %v12110_v26, %s9246_s12 }
 0x407   :  { %3674 = vst [vmem:[#allocation2 + $0x350] sm:$0xff] %v8415_v52  ;;  %v2281_v42 = vpop.f32.mrb[72].mxu0 }
 0x408   :  { %v4332_v62 = vpop.permute.xlu1 %4331  ;;  %v4026_v39 = vmax.f32 %v3874_v1, %v3914_v20  ;;  %v5013_v6 = vmax.f32 %v4823_v4, %v4900_v22  ;;  %v8416_v18 = vadd.f32 %v2281_v42, %v11913_v28  ;;  %v2283_v9 = vpop.f32.mrb[73].mxu0 }
 0x409   :  { %v12431_v36 = vpop.permute.xlu0 %4903  ;;  %v8417_v17 = vadd.f32 %v2283_v9, %v11919_v32 }
 0x40a   :  { %4927 = vrot.lane.b32.xlu1 %v12429_v54, %s9245_s2  ;;  %v4178_v53 = vmax.f32 %v4026_v39, %v4066_v45  ;;  %7625 = vmatprep.mubr.msk.f32.mxu1 %vm5062_vm2, %v5013_v6  ;;  %3676 = vst [vmem:[#allocation2 + $0x360] sm:$0xff] %v8416_v18 }
 0x40b   :  { %4083 = vrot.lane.b32.xlu0 %v12110_v26, %s9247_s13  ;;  %3677 = vst [vmem:[#allocation2 + $0x368] sm:$0xff] %v8417_v17  ;;  %v2287_v22 = vpop.f32.mrb[74].mxu0 }
 0x40c   :  { %v4484_v20 = vpop.permute.xlu1 %4483  ;;  %v4254_v10 = vmax.f32 %v4178_v53, %v11944_v50  ;;  %v8418_v2 = vadd.f32 %v2287_v22, %v11913_v28  ;;  %v2289_v41 = vpop.f32.mrb[75].mxu0  ;;  %v12453_v50 = vld [vmem:[#allocation2 + $0x1a8] sm:$0xff]  ;;  %v4804_v53 = vld [vmem:[#allocation2 + $0x1d8] sm:$0xff] }
 0x40d   :  { %v3916_v7 = vpop.permute.xlu0 %3915  ;;  %v8419_v52 = vadd.f32 %v2289_v41, %v11919_v32 }
 0x40e   :  { %4343 = vrot.lane.b32.xlu1 %v12060_v43, %s9245_s2  ;;  %v4444_v45 = vmax.f32 %v4254_v10, %v4332_v62  ;;  %3679 = vst [vmem:[#allocation2 + $0x378] sm:$0xf] %v8418_v2 }
 0x40f   :  { %4501 = vrot.lane.b32.xlu0 %v12118_v23, %s9246_s12  ;;  %3680 = vst [vmem:[#allocation2 + $0x380] sm:$0xf] %v8419_v52 }
 0x410   :  { %v4636_v26 = vpop.permute.xlu1 %4635  ;;  %v4596_v4 = vmax.f32 %v4444_v45, %v4484_v20 }
 0x411   :  { %v4068_v1 = vpop.permute.xlu0 %4067 }
 0x412   :  { %v4748_v42 = vmax.f32 %v4596_v4, %v4636_v26  ;;  %4495 = vrot.lane.b32.xlu1 %v12060_v43, %s9246_s12 }
 0x413   :  { %4653 = vrot.lane.b32.xlu0 %v12118_v23, %s9247_s13 }
 0x414   :  { %v4824_v28 = vmax.f32 %v4748_v42, %v11954_v48  ;;  %v12451_v32 = vpop.permute.xlu1 %4909  ;;  %v12464_v48 = vld [vmem:[#allocation2 + $0x190] sm:$0xff] }
 0x415   :  { %v12455_v62 = vpop.permute.xlu0 %4907 }
 0x416   :  { %v5014_v39 = vmax.f32 %v4824_v28, %v12391_v3  ;;  %4933 = vrot.lane.b32.xlu1 %v12453_v50, %s9245_s2 }
 0x417   :  { %4655 = vrot.lane.b32.xlu0 %v12138_v60, %s9247_s13 }
 0x418   :  { %v3764_v43 = vpop.permute.xlu1 %3763  ;;  %7626 = vmatmul.mubr.msk.f32.vlgmr.msra.gmra.mrb[114].mxu1 %vm5062_vm2, %v5014_v39  ;;  %v12492_v39 = vld [vmem:[#allocation2 + $0x1c0] sm:$0xff] }
 0x419   :  { %v3875_v6 = vmax.f32 %v11952_v57, %v3764_v43  ;;  %v4334_v18 = vpop.permute.xlu0 %4333 }
 0x41a   :  { %4931 = vrot.lane.b32.xlu1 %v12464_v48, %s9245_s2 }
 0x41b   :  { %v4027_v9 = vmax.f32 %v3875_v6, %v3916_v7  ;;  %3783 = vrot.lane.b32.xlu0 %v12150_v40, %s9245_s2 }
 0x41c   :  { %v4638_v3 = vpop.permute.xlu1 %4637 }
 0x41d   :  { %v4179_v17 = vmax.f32 %v4027_v9, %v4068_v1  ;;  %v4486_v22 = vpop.permute.xlu0 %4485 }
 0x41e   :  { %4937 = vrot.lane.b32.xlu1 %v4804_v53, %s9245_s2 }
 0x41f   :  { %v4255_v20 = vmax.f32 %v4179_v17, %v11960_v51  ;;  %3935 = vrot.lane.b32.xlu0 %v12150_v40, %s9246_s12 }
 0x420   :  { %v12474_v57 = vpop.permute.xlu1 %4913 }
 0x421   :  { %v4445_v10 = vmax.f32 %v4255_v20, %v4334_v18  ;;  %v4336_v2 = vpop.permute.xlu0 %4335 }
 0x422   :  { %3777 = vrot.lane.b32.xlu1 %v12092_v12, %s9245_s2 }
 0x423   :  { %v4597_v41 = vmax.f32 %v4445_v10, %v4486_v22  ;;  %4087 = vrot.lane.b32.xlu0 %v12150_v40, %s9247_s13  ;;  %v4806_v10 = vld [vmem:[#allocation2 + $0x208] sm:$0xff] }
 0x424   :  { %v3766_v7 = vpop.permute.xlu1 %3765 }
 0x425   :  { %v4749_v52 = vmax.f32 %v4597_v41, %v4638_v3  ;;  %v4640_v45 = vpop.permute.xlu0 %4639  ;;  %v3876_v4 = vmax.f32 %v11970_v0, %v3766_v7 }
 0x426   :  { %3929 = vrot.lane.b32.xlu1 %v12092_v12, %s9246_s12 }
 0x427   :  { %v4825_v51 = vmax.f32 %v4749_v52, %v12064_v46  ;;  %4505 = vrot.lane.b32.xlu0 %v12156_v58, %s9246_s12 }
 0x428   :  { %v3918_v26 = vpop.permute.xlu1 %3917 }
 0x429   :  { %v5015_v1 = vmax.f32 %v4825_v51, %v12431_v36  ;;  %v3768_v42 = vpop.permute.xlu0 %3767  ;;  %v4028_v40 = vmax.f32 %v3876_v4, %v3918_v26 }
 0x42a   :  { %4081 = vrot.lane.b32.xlu1 %v12092_v12, %s9247_s13  ;;  %v3877_v36 = vmax.f32 %v11988_v38, %v3768_v42  ;;  %v4808_v42 = vld [vmem:[#allocation2 + $0x238] sm:$0xff] }
 0x42b   :  { %7628 = vmatprep.mubr.msk.f32.mxu1 %vm5062_vm2, %v5015_v1  ;;  %4657 = vrot.lane.b32.xlu0 %v12156_v58, %s9247_s13 }
 0x42c   :  { %v4070_v28 = vpop.permute.xlu1 %4069 }
 0x42d   :  { %v4180_v46 = vmax.f32 %v4028_v40, %v4070_v28  ;;  %v3920_v43 = vpop.permute.xlu0 %3919 }
 0x42e   :  { %4935 = vrot.lane.b32.xlu1 %v12492_v39, %s9245_s2  ;;  %v4029_v9 = vmax.f32 %v3877_v36, %v3920_v43  ;;  %v9073_v43 = vld [vmem:[#allocation2 + $0x78] sm:$0xff] }
 0x42f   :  { %v4256_v0 = vmax.f32 %v4180_v46, %v11976_v59  ;;  %4089 = vrot.lane.b32.xlu0 %v12168_v15, %s9247_s13 }
 0x430   :  { %v12499_v12 = vpop.permute.xlu1 %4911 }
 0x431   :  { %v4072_v6 = vpop.permute.xlu0 %4071  ;;  %v4446_v18 = vmax.f32 %v4256_v0, %v4336_v2 }
 0x432   :  { %4347 = vrot.lane.b32.xlu1 %v12098_v61, %s9245_s2  ;;  %v4181_v53 = vmax.f32 %v4029_v9, %v4072_v6 }
 0x433   :  { %4659 = vrot.lane.b32.xlu0 %v12176_v25, %s9247_s13 }
 0x434   :  { %v4488_v3 = vpop.permute.xlu1 %4487  ;;  %v4257_v2 = vmax.f32 %v4181_v53, %v11996_v63 }
 0x435   :  { %v4598_v17 = vmax.f32 %v4446_v18, %v4488_v3  ;;  %v4338_v59 = vpop.permute.xlu0 %4337  ;;  %v12553_v3 = vld [vmem:[#allocation2 + $0x220] sm:$0xff] }
 0x436   :  { %4499 = vrot.lane.b32.xlu1 %v12098_v61, %s9246_s12  ;;  %v4447_v52 = vmax.f32 %v4257_v2, %v4338_v59  ;;  %v9074_v59 = vld [vmem:[#allocation2 + $0x90] sm:$0xff] }
 0x437   :  { %v4750_v22 = vmax.f32 %v4598_v17, %v4640_v45  ;;  %3787 = vrot.lane.b32.xlu0 %v12188_v8, %s9245_s2  ;;  %v12521_v45 = vld [vmem:[#allocation2 + $0x1f0] sm:$0xff] }
 0x438   :  { %v12510_v38 = vpop.permute.xlu1 %4917 }
 0x439   :  { %v4826_v20 = vmax.f32 %v4750_v22, %v11990_v55  ;;  %v4490_v41 = vpop.permute.xlu0 %4489  ;;  %v9075_v22 = vld [vmem:[#allocation2 + $0x80] sm:$0xff] }
 0x43a   :  { %4941 = vrot.lane.b32.xlu1 %v4806_v10, %s9245_s2  ;;  %v4599_v55 = vmax.f32 %v4447_v52, %v4490_v41 }
 0x43b   :  { %v5016_v7 = vmax.f32 %v4826_v20, %v12405_v44  ;;  %3939 = vrot.lane.b32.xlu0 %v12188_v8, %s9246_s12 }
 0x43c   :  { %v12518_v61 = vpop.permute.xlu1 %4915 }
 0x43d   :  { %7629 = vmatmul.mubr.msk.f32.gmra.mrb[116].mxu1 %vm5062_vm2, %v5016_v7  ;;  %v4644_v51 = vpop.permute.xlu0 %4643 }
 0x43e   :  { %4939 = vrot.lane.b32.xlu1 %v12521_v45, %s9245_s2 }
 0x43f   :  { %4091 = vrot.lane.b32.xlu0 %v12188_v8, %s9247_s13 }
 0x440   :  { %v4642_v63 = vpop.permute.xlu1 %4641 }
 0x441   :  { %v4751_v44 = vmax.f32 %v4599_v55, %v4642_v63  ;;  %v3772_v26 = vpop.permute.xlu0 %3771 }
 0x442   :  { %4349 = vrot.lane.b32.xlu1 %v12118_v23, %s9245_s2 }
 0x443   :  { %v4827_v4 = vmax.f32 %v4751_v44, %v12122_v34  ;;  %4509 = vrot.lane.b32.xlu0 %v12194_v29, %s9246_s12  ;;  %v4817_v44 = vld [vmem:[#allocation2 + $0x310] sm:$0xff] }
 0x444   :  { %v12532_v1 = vpop.permute.xlu1 %4921 }
 0x445   :  { %v5017_v40 = vmax.f32 %v4827_v4, %v12455_v62  ;;  %v3924_v28 = vpop.permute.xlu0 %3923 }
 0x446   :  { %4945 = vrot.lane.b32.xlu1 %v4808_v42, %s9245_s2  ;;  %v9076_v42 = vld [vmem:[#allocation2 + $0x98] sm:$0xff] }
 0x447   :  { %7631 = vmatprep.mubr.msk.f32.mxu1 %vm5062_vm2, %v5017_v40  ;;  %4661 = vrot.lane.b32.xlu0 %v12194_v29, %s9247_s13 }
 0x448   :  { %v3770_v8 = vpop.permute.xlu1 %3769 }
 0x449   :  { %v4076_v23 = vpop.permute.xlu0 %4075  ;;  %v3878_v0 = vmax.f32 %v9073_v43, %v3770_v8  ;;  %v4810_v8 = vld [vmem:[#allocation2 + $0x268] sm:$0xff] }
 0x44a   :  { %3781 = vrot.lane.b32.xlu1 %v12132_v19, %s9245_s2 }
 0x44b   :  { %4093 = vrot.lane.b32.xlu0 %v12206_v31, %s9247_s13 }
 0x44c   :  { %v3922_v34 = vpop.permute.xlu1 %3921 }
 0x44d   :  { %v4342_v46 = vpop.permute.xlu0 %4341  ;;  %v4030_v6 = vmax.f32 %v3878_v0, %v3922_v34 }
 0x44e   :  { %3933 = vrot.lane.b32.xlu1 %v12132_v19, %s9246_s12 }
 0x44f   :  { %4663 = vrot.lane.b32.xlu0 %v12212_v21, %s9247_s13 }
 0x450   :  { %v4074_v62 = vpop.permute.xlu1 %4073 }
 0x451   :  { %v4494_v36 = vpop.permute.xlu0 %4493  ;;  %v4182_v9 = vmax.f32 %v4030_v6, %v4074_v62 }
 0x452   :  { %4085 = vrot.lane.b32.xlu1 %v12132_v19, %s9247_s13  ;;  %v3879_v19 = vmax.f32 %v9074_v59, %v3772_v26 }
 0x453   :  { %3791 = vrot.lane.b32.xlu0 %v12224_v35, %s9245_s2  ;;  %v4258_v20 = vmax.f32 %v4182_v9, %v9075_v22 }
 0x454   :  { %v12551_v18 = vpop.permute.xlu1 %4919  ;;  %v4031_v2 = vmax.f32 %v3879_v19, %v3924_v28 }
 0x455   :  { %v12555_v17 = vpop.permute.xlu0 %4647 }
 0x456   :  { %4943 = vrot.lane.b32.xlu1 %v12553_v3, %s9245_s2  ;;  %v4183_v52 = vmax.f32 %v4031_v2, %v4076_v23  ;;  %v4809_v23 = vld [vmem:[#allocation2 + $0x250] sm:$0xff] }
 0x457   :  { %3943 = vrot.lane.b32.xlu0 %v12224_v35, %s9246_s12 }
 0x458   :  { %v4340_v53 = vpop.permute.xlu1 %4339  ;;  %v4259_v40 = vmax.f32 %v4183_v52, %v9076_v42 }
 0x459   :  { %v3776_v10 = vpop.permute.xlu0 %3775  ;;  %v4448_v41 = vmax.f32 %v4258_v20, %v4340_v53  ;;  %v4812_v53 = vld [vmem:[#allocation2 + $0x298] sm:$0xff] }
 0x45a   :  { %4351 = vrot.lane.b32.xlu1 %v12138_v60, %s9245_s2 }
 0x45b   :  { %4095 = vrot.lane.b32.xlu0 %v12224_v35, %s9247_s13 }
 0x45c   :  { %v4492_v7 = vpop.permute.xlu1 %4491 }
 0x45d   :  { %v4600_v55 = vmax.f32 %v4448_v41, %v4492_v7  ;;  %v3928_v63 = vpop.permute.xlu0 %3927  ;;  %v9078_v7 = vld [vmem:[#allocation2 + $0xa8] sm:$0xff] }
 0x45e   :  { %4503 = vrot.lane.b32.xlu1 %v12138_v60, %s9246_s12 }
 0x45f   :  { %v4752_v26 = vmax.f32 %v4600_v55, %v4644_v51  ;;  %4963 = vrot.lane.b32.xlu0 %v4817_v44, %s9245_s2  ;;  %v4449_v51 = vmax.f32 %v4259_v40, %v4342_v46  ;;  %v4811_v55 = vld [vmem:[#allocation2 + $0x280] sm:$0xff] }
 0x460   :  { %v12568_v4 = vpop.permute.xlu1 %4925 }
 0x461   :  { %v4828_v28 = vmax.f32 %v4752_v26, %v12112_v30  ;;  %v4080_v34 = vpop.permute.xlu0 %4079  ;;  %v4601_v43 = vmax.f32 %v4449_v51, %v4494_v36 }
 0x462   :  { %4949 = vrot.lane.b32.xlu1 %v4810_v8, %s9245_s2 }
 0x463   :  { %v5018_v35 = vmax.f32 %v4828_v28, %v12451_v32  ;;  %4513 = vrot.lane.b32.xlu0 %v12230_v14, %s9246_s12 }
 0x464   :  { %v12575_v60 = vpop.permute.xlu1 %4923 }
 0x465   :  { %7632 = vmatmul.mubr.msk.f32.gmra.mrb[118].mxu1 %vm5062_vm2, %v5018_v35  ;;  %v4346_v62 = vpop.permute.xlu0 %4345 }
 0x466   :  { %4947 = vrot.lane.b32.xlu1 %v4809_v23, %s9245_s2 }
 0x467   :  { %4665 = vrot.lane.b32.xlu0 %v12230_v14, %s9247_s13 }
 0x468   :  { %v4646_v30 = vpop.permute.xlu1 %4645 }
 0x469   :  { %v4753_v0 = vmax.f32 %v4601_v43, %v4646_v30  ;;  %v4498_v6 = vpop.permute.xlu0 %4497 }
 0x46a   :  { %4353 = vrot.lane.b32.xlu1 %v12156_v58, %s9245_s2 }
 0x46b   :  { %v4829_v32 = vmax.f32 %v4753_v0, %v12244_v11  ;;  %4097 = vrot.lane.b32.xlu0 %v12242_v27, %s9247_s13  ;;  %v9077_v11 = vld [vmem:[#allocation2 + $0xc0] sm:$0xff] }
 0x46c   :  { %v12586_v46 = vpop.permute.xlu1 %4929 }
 0x46d   :  { %v5019_v9 = vmax.f32 %v4829_v32, %v12499_v12  ;;  %v4650_v36 = vpop.permute.xlu0 %4649  ;;  %v3881_v12 = vmax.f32 %v9077_v11, %v3776_v10  ;;  %v4814_v32 = vld [vmem:[#allocation2 + $0x2c8] sm:$0xff] }
 0x46e   :  { %4953 = vrot.lane.b32.xlu1 %v4812_v53, %s9245_s2 }
 0x46f   :  { %7634 = vmatprep.mubr.msk.f32.mxu1 %vm5062_vm2, %v5019_v9  ;;  %4667 = vrot.lane.b32.xlu0 %v12250_v49, %s9247_s13  ;;  %v4033_v20 = vmax.f32 %v3881_v12, %v3928_v63  ;;  %v9079_v63 = vld [vmem:[#allocation2 + $0xc8] sm:$0xff] }
 0x470   :  { %v3774_v59 = vpop.permute.xlu1 %3773 }
 0x471   :  { %v12593_v58 = vpop.permute.xlu0 %4651  ;;  %v4185_v2 = vmax.f32 %v4033_v20, %v4080_v34  ;;  %v3880_v52 = vmax.f32 %v9078_v7, %v3774_v59  ;;  %v9080_v34 = vld [vmem:[#allocation2 + $0xb0] sm:$0xff]  ;;  %v9081_v7 = vld [vmem:[#allocation2 + $0xd8] sm:$0xff] }
 0x472   :  { %3785 = vrot.lane.b32.xlu1 %v12168_v15, %s9245_s2  ;;  %v4813_v59 = vld [vmem:[#allocation2 + $0x2b0] sm:$0xff] }
 0x473   :  { %3795 = vrot.lane.b32.xlu0 %v12262_v5, %s9245_s2  ;;  %v4261_v26 = vmax.f32 %v4185_v2, %v9079_v63 }
 0x474   :  { %v3926_v19 = vpop.permute.xlu1 %3925 }
 0x475   :  { %v12599_v22 = vpop.permute.xlu0 %3779  ;;  %v4032_v10 = vmax.f32 %v3880_v52, %v3926_v19  ;;  %v4451_v28 = vmax.f32 %v4261_v26, %v4346_v62 }
 0x476   :  { %3937 = vrot.lane.b32.xlu1 %v12168_v15, %s9246_s12 }
 0x477   :  { %3947 = vrot.lane.b32.xlu0 %v12262_v5, %s9246_s12 }
 0x478   :  { %v4078_v41 = vpop.permute.xlu1 %4077 }
 0x479   :  { %v12605_v44 = vpop.permute.xlu0 %3931  ;;  %v4184_v15 = vmax.f32 %v4032_v10, %v4078_v41 }
 0x47a   :  { %4951 = vrot.lane.b32.xlu1 %v4811_v55, %s9245_s2  ;;  %v4815_v55 = vld [vmem:[#allocation2 + $0x2e0] sm:$0xff] }
 0x47b   :  { %4099 = vrot.lane.b32.xlu0 %v12262_v5, %s9247_s13  ;;  %v4260_v35 = vmax.f32 %v4184_v15, %v9080_v34  ;;  %v4603_v5 = vmax.f32 %v4451_v28, %v4498_v6 }
 0x47c   :  { %v12610_v42 = vpop.permute.xlu1 %4927 }
 0x47d   :  { %v12612_v40 = vpop.permute.xlu0 %4083  ;;  %v4755_v43 = vmax.f32 %v4603_v5, %v4650_v36 }
 0x47e   :  { %4355 = vrot.lane.b32.xlu1 %v12176_v25, %s9245_s2 }
 0x47f   :  { %4517 = vrot.lane.b32.xlu0 %v12265_v13, %s9246_s12  ;;  %v4831_v6 = vmax.f32 %v4755_v43, %v12291_v33 }
 0x480   :  { %v4344_v8 = vpop.permute.xlu1 %4343 }
 0x481   :  { %v12618_v51 = vpop.permute.xlu0 %4501  ;;  %v4450_v23 = vmax.f32 %v4260_v35, %v4344_v8  ;;  %v9082_v8 = vld [vmem:[#allocation2 + $0xe0] sm:$0xff] }
 0x482   :  { %4507 = vrot.lane.b32.xlu1 %v12176_v25, %s9246_s12 }
 0x483   :  { %4669 = vrot.lane.b32.xlu0 %v12265_v13, %s9247_s13 }
 0x484   :  { %v4496_v30 = vpop.permute.xlu1 %4495 }
 0x485   :  { %v4602_v0 = vmax.f32 %v4450_v23, %v4496_v30  ;;  %v12624_v9 = vpop.permute.xlu0 %4653  ;;  %v13781_v23 = vld [vmem:[#allocation11_spill] sm:$0xff] }
 0x486   :  { %4957 = vrot.lane.b32.xlu1 %v4814_v32, %s9245_s2 }
 0x487   :  { %v4754_v62 = vmax.f32 %v4602_v0, %v12555_v17  ;;  %4101 = vrot.lane.b32.xlu0 %v12275_v56, %s9247_s13  ;;  %v5021_v17 = vmax.f32 %v4831_v6, %v12518_v61  ;;  %v4818_v0 = vld [vmem:[#allocation2 + $0x328] sm:$0xff] }
 0x488   :  { %v12631_v25 = vpop.permute.xlu1 %4933 }
 0x489   :  { %v4830_v53 = vmax.f32 %v4754_v62, %v12170_v16  ;;  %v12634_v36 = vpop.permute.xlu0 %4655  ;;  %v9083_v62 = vld [vmem:[#allocation2 + $0xf0] sm:$0xff] }
 0x48a   :  { %4955 = vrot.lane.b32.xlu1 %v4813_v59, %s9245_s2  ;;  %v3883_v6 = vmax.f32 %v9083_v62, %v12599_v22  ;;  %v13782_v59 = vld [vmem:[#allocation12_spill] sm:$0xff] }
 0x48b   :  { %v5020_v11 = vmax.f32 %v4830_v53, %v12474_v57  ;;  %4671 = vrot.lane.b32.xlu0 %v12280_v37, %s9247_s13  ;;  %v4816_v57 = vld [vmem:[#allocation2 + $0x2f8] sm:$0xff]  ;;  %v9085_v62 = vld [vmem:[#allocation2 + $0x108] sm:$0xff] }
 0x48c   :  { %v12641_v12 = vpop.permute.xlu1 %4931 }
 0x48d   :  { %7635 = vmatmul.mubr.msk.f32.gmra.mrb[120].mxu1 %vm5062_vm2, %v5020_v11  ;;  %v12644_v33 = vpop.permute.xlu0 %3783  ;;  %v4035_v11 = vmax.f32 %v3883_v6, %v12605_v44  ;;  %v9084_v44 = vld [vmem:[#allocation2 + $0xf8] sm:$0xff] }
 0x48e   :  { %4357 = vrot.lane.b32.xlu1 %v12194_v29, %s9245_s2  ;;  %7637 = vmatprep.mubr.msk.f32.mxu1 %vm5062_vm2, %v5021_v17  ;;  %v13783_v17 = vld [vmem:[#allocation9_spill] sm:$0xff] }
 0x48f   :  { %3799 = vrot.lane.b32.xlu0 %v12289_v24, %s9245_s2 }
 0x490   :  { %v12651_v16 = vpop.permute.xlu1 %4937 }
 0x491   :  { %v12653_v19 = vpop.permute.xlu0 %3935 }
 0x492   :  { %4961 = vrot.lane.b32.xlu1 %v4816_v57, %s9245_s2 }
 0x493   :  { %3951 = vrot.lane.b32.xlu0 %v12289_v24, %s9246_s12 }
 0x494   :  { %v3778_v61 = vpop.permute.xlu1 %3777 }
 0x495   :  { %v12658_v20 = vpop.permute.xlu0 %4087  ;;  %v3882_v52 = vmax.f32 %v9081_v7, %v3778_v61 }
 0x496   :  { %3789 = vrot.lane.b32.xlu1 %v12206_v31, %s9245_s2 }
 0x497   :  { %4103 = vrot.lane.b32.xlu0 %v12289_v24, %s9247_s13 }
 0x498   :  { %v3930_v29 = vpop.permute.xlu1 %3929 }
 0x499   :  { %v12664_v2 = vpop.permute.xlu0 %4505  ;;  %v4034_v63 = vmax.f32 %v3882_v52, %v3930_v29  ;;  %v4187_v29 = vmax.f32 %v4035_v11, %v12612_v40 }
 0x49a   :  { %3941 = vrot.lane.b32.xlu1 %v12206_v31, %s9246_s12  ;;  %v13780_v31 = vld [vmem:[#allocation10_spill] sm:$0xff] }
 0x49b   :  { %4521 = vrot.lane.b32.xlu0 %v12294_v47, %s9246_s12  ;;  %v4263_v7 = vmax.f32 %v4187_v29, %v9084_v44  ;;  %v9086_v29 = vld [vmem:[#allocation2 + $0x110] sm:$0xff] }
 0x49c   :  { %v4082_v41 = vpop.permute.xlu1 %4081 }
 0x49d   :  { %v12670_v10 = vpop.permute.xlu0 %4657  ;;  %v4186_v26 = vmax.f32 %v4034_v63, %v4082_v41 }
 0x49e   :  { %4959 = vrot.lane.b32.xlu1 %v4815_v55, %s9245_s2  ;;  %v13784_v55 = vld [vmem:[#allocation14_spill] sm:$0xff] }
 0x49f   :  { %4673 = vrot.lane.b32.xlu0 %v12294_v47, %s9247_s13  ;;  %v4262_v34 = vmax.f32 %v4186_v26, %v9082_v8  ;;  %v13785_v8 = vld [vmem:[#allocation18_spill] sm:$0xff] }
 0x4a0   :  { %v12675_v24 = vpop.permute.xlu1 %4935 }
 0x4a1   :  { %v12677_v15 = vpop.permute.xlu0 %4089 }
 0x4a2   :  { %4359 = vrot.lane.b32.xlu1 %v12212_v21, %s9245_s2 }
 0x4a3   :  { %4105 = vrot.lane.b32.xlu0 %v13780_v31, %s9247_s13 }
 0x4a4   :  { %v4348_v28 = vpop.permute.xlu1 %4347 }
 0x4a5   :  { %v12683_v35 = vpop.permute.xlu0 %4659  ;;  %v4452_v5 = vmax.f32 %v4262_v34, %v4348_v28 }
 0x4a6   :  { %4511 = vrot.lane.b32.xlu1 %v12212_v21, %s9246_s12 }
 0x4a7   :  { %4675 = vrot.lane.b32.xlu0 %v13781_v23, %s9247_s13 }
 0x4a8   :  { %v4500_v43 = vpop.permute.xlu1 %4499 }
 0x4a9   :  { %v4604_v30 = vmax.f32 %v4452_v5, %v4500_v43  ;;  %v12689_v32 = vpop.permute.xlu0 %3787 }
 0x4aa   :  { %4965 = vrot.lane.b32.xlu1 %v4818_v0, %s9245_s2  ;;  %v13787_v0 = vld [vmem:[#allocation16_spill] sm:$0xff] }
 0x4ab   :  { %v4756_v53 = vmax.f32 %v4604_v30, %v12593_v58  ;;  %3803 = vrot.lane.b32.xlu0 %v13782_v59, %s9245_s2 }
 0x4ac   :  { %v12696_v21 = vpop.permute.xlu1 %4941 }
 0x4ad   :  { %v4832_v57 = vmax.f32 %v4756_v53, %v13783_v17  ;;  %v12700_v61 = vpop.permute.xlu0 %3939 }
 0x4ae   :  { %4361 = vrot.lane.b32.xlu1 %v12230_v14, %s9245_s2 }
 0x4af   :  { %v5022_v22 = vmax.f32 %v4832_v57, %v12510_v38  ;;  %3955 = vrot.lane.b32.xlu0 %v13782_v59, %s9246_s12 }
 0x4b0   :  { %v12708_v58 = vpop.permute.xlu1 %4939 }
 0x4b1   :  { %7638 = vmatmul.mubr.msk.f32.gmra.mrb[122].mxu1 %vm5062_vm2, %v5022_v22  ;;  %v12711_v41 = vpop.permute.xlu0 %4091 }
 0x4b2   :  { %3793 = vrot.lane.b32.xlu1 %v12242_v27, %s9245_s2 }
 0x4b3   :  { %4107 = vrot.lane.b32.xlu0 %v13782_v59, %s9247_s13  ;;  %v13788_v59 = vld [vmem:[#allocation17_spill] sm:$0xff] }
 0x4b4   :  { %v4350_v14 = vpop.permute.xlu1 %4349 }
 0x4b5   :  { %v4453_v40 = vmax.f32 %v4263_v7, %v4350_v14  ;;  %v12717_v38 = vpop.permute.xlu0 %4509 }
 0x4b6   :  { %3945 = vrot.lane.b32.xlu1 %v12242_v27, %s9246_s12 }
 0x4b7   :  { %v4605_v52 = vmax.f32 %v4453_v40, %v12618_v51  ;;  %4525 = vrot.lane.b32.xlu0 %v13784_v55, %s9246_s12 }
 0x4b8   :  { %v12724_v63 = vpop.permute.xlu1 %4945 }
 0x4b9   :  { %v4757_v26 = vmax.f32 %v4605_v52, %v12624_v9  ;;  %v12727_v28 = vpop.permute.xlu0 %4661  ;;  %v13786_v9 = vld [vmem:[#allocation15_spill] sm:$0xff] }
 0x4ba   :  { %4363 = vrot.lane.b32.xlu1 %v12250_v49, %s9245_s2 }
 0x4bb   :  { %v4833_v34 = vmax.f32 %v4757_v26, %v13785_v8  ;;  %4677 = vrot.lane.b32.xlu0 %v13784_v55, %s9247_s13  ;;  %v9087_v55 = vld [vmem:[#allocation2 + $0x120] sm:$0xff] }
 0x4bc   :  { %v3782_v27 = vpop.permute.xlu1 %3781  ;;  %v3885_v26 = vmax.f32 %v9087_v55, %v12644_v33 }
 0x4bd   :  { %v5023_v51 = vmax.f32 %v4833_v34, %v12551_v18  ;;  %v12735_v5 = vpop.permute.xlu0 %4093  ;;  %v3884_v6 = vmax.f32 %v9085_v62, %v3782_v27 }
 0x4be   :  { %4515 = vrot.lane.b32.xlu1 %v12250_v49, %s9246_s12  ;;  %v4037_v27 = vmax.f32 %v3885_v26, %v12653_v19  ;;  %v12797_v19 = vld [vmem:[#allocation2 + $0x258] sm:$0xff] }
 0x4bf   :  { %7640 = vmatprep.mubr.msk.f32.mxu1 %vm5062_vm2, %v5023_v51  ;;  %4109 = vrot.lane.b32.xlu0 %v13786_v9, %s9247_s13  ;;  %v13790_v51 = vld [vmem:[#allocation13_spill] sm:$0xff] }
 0x4c0   :  { %v3934_v43 = vpop.permute.xlu1 %3933 }
 0x4c1   :  { %v12742_v30 = vpop.permute.xlu0 %4663  ;;  %v4036_v49 = vmax.f32 %v3884_v6, %v3934_v43  ;;  %v12805_v6 = vld [vmem:[#allocation2 + $0x260] sm:$0xff] }
 0x4c2   :  { %4365 = vrot.lane.b32.xlu1 %v12265_v13, %s9245_s2 }
 0x4c3   :  { %4679 = vrot.lane.b32.xlu0 %v13787_v0, %s9247_s13 }
 0x4c4   :  { %v4086_v18 = vpop.permute.xlu1 %4085 }
 0x4c5   :  { %v12748_v53 = vpop.permute.xlu0 %3791  ;;  %v4188_v17 = vmax.f32 %v4036_v49, %v4086_v18  ;;  %v9088_v18 = vld [vmem:[#allocation2 + $0x128] sm:$0xff] }
 0x4c6   :  { %3797 = vrot.lane.b32.xlu1 %v12275_v56, %s9245_s2 }
 0x4c7   :  { %3807 = vrot.lane.b32.xlu0 %v13788_v59, %s9245_s2  ;;  %v4264_v22 = vmax.f32 %v4188_v17, %v9086_v29  ;;  %v12817_v29 = vld [vmem:[#allocation2 + $0x270] sm:$0xff] }
 0x4c8   :  { %v12754_v11 = vpop.permute.xlu1 %4943 }
 0x4c9   :  { %v12756_v57 = vpop.permute.xlu0 %3943 }
 0x4ca   :  { %3949 = vrot.lane.b32.xlu1 %v12275_v56, %s9246_s12  ;;  %v12772_v56 = vld [vmem:[#allocation2 + $0x248] sm:$0xff] }
 0x4cb   :  { %3959 = vrot.lane.b32.xlu0 %v13788_v59, %s9246_s12 }
 0x4cc   :  { %v4352_v13 = vpop.permute.xlu1 %4351 }
 0x4cd   :  { %v12762_v44 = vpop.permute.xlu0 %4095  ;;  %v4454_v7 = vmax.f32 %v4264_v22, %v4352_v13  ;;  %v13792_v22 = vld [vmem:[#allocation20_spill] sm:$0xff] }
 0x4ce   :  { %4367 = vrot.lane.b32.xlu1 %v12280_v37, %s9245_s2 }
 0x4cf   :  { %4111 = vrot.lane.b32.xlu0 %v13788_v59, %s9247_s13 }
 0x4d0   :  { %v4504_v14 = vpop.permute.xlu1 %4503 }
 0x4d1   :  { %v4606_v40 = vmax.f32 %v4454_v7, %v4504_v14  ;;  %v12768_v52 = vpop.permute.xlu0 %4963 }
 0x4d2   :  { %13789 = vst [vmem:[#allocation10_spill] sm:$0xff] %v12768_v52  ;;  %4519 = vrot.lane.b32.xlu1 %v12280_v37, %s9246_s12  ;;  %v4189_v37 = vmax.f32 %v4037_v27, %v12658_v20  ;;  %v12839_v27 = vld [vmem:[#allocation2 + $0x218] sm:$0xff] }
 0x4d3   :  { %v4758_v8 = vmax.f32 %v4606_v40, %v12634_v36  ;;  %4529 = vrot.lane.b32.xlu0 %v12772_v56, %s9246_s12  ;;  %v12825_v40 = vld [vmem:[#allocation2 + $0x200] sm:$0xff] }
 0x4d4   :  { %v12778_v34 = vpop.permute.xlu1 %4949 }
 0x4d5   :  { %v4834_v9 = vmax.f32 %v4758_v8, %v13790_v51  ;;  %v12782_v43 = vpop.permute.xlu0 %4513 }
 0x4d6   :  { %4369 = vrot.lane.b32.xlu1 %v12294_v47, %s9245_s2  ;;  %v4265_v47 = vmax.f32 %v4189_v37, %v9088_v18 }
 0x4d7   :  { %v5024_v33 = vmax.f32 %v4834_v9, %v12532_v1  ;;  %4681 = vrot.lane.b32.xlu0 %v12772_v56, %s9247_s13 }
 0x4d8   :  { %v12790_v36 = vpop.permute.xlu1 %4947 }
 0x4d9   :  { %7641 = vmatmul.mubr.msk.f32.gmra.mrb[124].mxu1 %vm5062_vm2, %v5024_v33  ;;  %v12793_v0 = vpop.permute.xlu0 %4665 }
 0x4da   :  { %3801 = vrot.lane.b32.xlu1 %v13780_v31, %s9245_s2 }
 0x4db   :  { %4113 = vrot.lane.b32.xlu0 %v12797_v19, %s9247_s13 }
 0x4dc   :  { %v4354_v1 = vpop.permute.xlu1 %4353 }
 0x4dd   :  { %v4455_v20 = vmax.f32 %v4265_v47, %v4354_v1  ;;  %v12801_v62 = vpop.permute.xlu0 %4097 }
 0x4de   :  { %3953 = vrot.lane.b32.xlu1 %v13780_v31, %s9246_s12 }
 0x4df   :  { %v4607_v49 = vmax.f32 %v4455_v20, %v12664_v2  ;;  %4683 = vrot.lane.b32.xlu0 %v12805_v6, %s9247_s13  ;;  %v12852_v20 = vld [vmem:[#allocation2 + $0x228] sm:$0xff] }
 0x4e0   :  { %v12810_v59 = vpop.permute.xlu1 %4953 }
 0x4e1   :  { %13791 = vst [vmem:[#allocation11_spill] sm:$0xff] %v12810_v59  ;;  %v4759_v17 = vmax.f32 %v4607_v49, %v12670_v10  ;;  %v12813_v13 = vpop.permute.xlu0 %4667  ;;  %v9090_v10 = vld [vmem:[#allocation2 + $0x138] sm:$0xff] }
 0x4e2   :  { %4371 = vrot.lane.b32.xlu1 %v13781_v23, %s9245_s2  ;;  %v12857_v49 = vld [vmem:[#allocation2 + $0x278] sm:$0xff] }
 0x4e3   :  { %v4835_v31 = vmax.f32 %v4759_v17, %v13792_v22  ;;  %3811 = vrot.lane.b32.xlu0 %v12817_v29, %s9245_s2 }
 0x4e4   :  { %v3786_v2 = vpop.permute.xlu1 %3785 }
 0x4e5   :  { %v5025_v7 = vmax.f32 %v4835_v31, %v12575_v60  ;;  %v12823_v14 = vpop.permute.xlu0 %3795  ;;  %v3886_v55 = vmax.f32 %v9090_v10, %v3786_v2  ;;  %v12837_v60 = vld [vmem:[%s13736_s5] ss:$0 sm:$0xff] }
 0x4e6   :  { %4523 = vrot.lane.b32.xlu1 %v12825_v40, %s9246_s12 }
 0x4e7   :  { %7643 = vmatprep.mubr.msk.f32.mxu1 %vm5062_vm2, %v5025_v7  ;;  %3963 = vrot.lane.b32.xlu0 %v12817_v29, %s9246_s12 }
 0x4e8   :  { %v3938_v23 = vpop.permute.xlu1 %3937 }
 0x4e9   :  { %v4038_v26 = vmax.f32 %v3886_v55, %v3938_v23  ;;  %v12832_v8 = vpop.permute.xlu0 %3947  ;;  %v12870_v23 = vld [vmem:[#allocation2 + $0x230] sm:$0xff] }
 0x4ea   :  { %4373 = vrot.lane.b32.xlu1 %v12839_v27, %s9245_s2 }
 0x4eb   :  { %v7627_v51 = vpop.f32.mrb[114].mxu1  ;;  %4115 = vrot.lane.b32.xlu0 %v12817_v29, %s9247_s13  ;;  %v4190_v18 = vmax.f32 %v4038_v26, %v12677_v15  ;;  %v9093_v15 = vld [vmem:[#allocation2 + $0x140] sm:$0xff]  ;;  %v12874_v26 = vld [vmem:[#allocation2 + $0x288] sm:$0xff] }
 0x4ec   :  { %v12845_v9 = vpop.permute.xlu1 %4951  ;;  %v5249_v37 = vadd.f32 %v7627_v51, %v12837_v60  ;;  %v5243_v33 = vpop.f32.mrb[115].mxu1  ;;  %v9095_v51 = vld [vmem:[#allocation2 + $0x150] sm:$0xff] }
 0x4ed   :  { %13793 = vst [vmem:[#allocation12_spill] sm:$0xff] %v12845_v9  ;;  %v5244_v47 = vadd.f32 %v12837_v60, %v5243_v33  ;;  %v12850_v1 = vpop.permute.xlu0 %4099  ;;  %v4266_v22 = vmax.f32 %v4190_v18, %v9093_v15 }
 0x4ee   :  { %3805 = vrot.lane.b32.xlu1 %v12852_v20, %s9245_s2  ;;  %5434 = vst.msk [vmem:[#allocation3 + $0x8] sm:$0xff] %vm5432_vm3, %v5249_v37  ;;  %v3887_v37 = vmax.f32 %v9095_v51, %v12689_v32  ;;  %v9096_v51 = vld [vmem:[#allocation2 + $0x158] sm:$0xff] }
 0x4ef   :  { %5433 = vst.msk [vmem:[#allocation3] sm:$0xff] %vm5432_vm3, %v5244_v47  ;;  %4533 = vrot.lane.b32.xlu0 %v12857_v49, %s9246_s12 }
 0x4f0   :  { %v4356_v17 = vpop.permute.xlu1 %4355  ;;  %v4039_v47 = vmax.f32 %v3887_v37, %v12700_v61 }
 0x4f1   :  { %v12862_v31 = vpop.permute.xlu0 %4517  ;;  %v4456_v2 = vmax.f32 %v4266_v22, %v4356_v17  ;;  %v13795_v17 = vld [vmem:[#allocation19_spill] sm:$0xff] }
 0x4f2   :  { %3957 = vrot.lane.b32.xlu1 %v12852_v20, %s9246_s12  ;;  %v4191_v32 = vmax.f32 %v4039_v47, %v12711_v41 }
 0x4f3   :  { %4685 = vrot.lane.b32.xlu0 %v12857_v49, %s9247_s13 }
 0x4f4   :  { %v4508_v7 = vpop.permute.xlu1 %4507  ;;  %v4267_v37 = vmax.f32 %v4191_v32, %v9096_v51 }
 0x4f5   :  { %v4608_v10 = vmax.f32 %v4456_v2, %v4508_v7  ;;  %v12868_v55 = vpop.permute.xlu0 %4669  ;;  %v12888_v2 = vld [vmem:[#allocation2 + $0x290] sm:$0xff] }
 0x4f6   :  { %4375 = vrot.lane.b32.xlu1 %v12870_v23, %s9245_s2 }
 0x4f7   :  { %v4760_v33 = vmax.f32 %v4608_v10, %v12683_v35  ;;  %4117 = vrot.lane.b32.xlu0 %v12874_v26, %s9247_s13  ;;  %v12901_v10 = vld [vmem:[#allocation2 + $0x2a0] sm:$0xff] }
 0x4f8   :  { %v12880_v18 = vpop.permute.xlu1 %4957  ;;  %13797 = vst [vmem:[#allocation18_spill] sm:$0xff] %v12901_v10 }
 0x4f9   :  { %13794 = vst [vmem:[#allocation9_spill] sm:$0xff] %v12880_v18  ;;  %v4836_v15 = vmax.f32 %v4760_v33, %v13795_v17  ;;  %v12884_v22 = vpop.permute.xlu0 %4101 }
 0x4fa   :  { %4527 = vrot.lane.b32.xlu1 %v12870_v23, %s9246_s12 }
 0x4fb   :  { %v5026_v35 = vmax.f32 %v4836_v15, %v12568_v4  ;;  %4687 = vrot.lane.b32.xlu0 %v12888_v2, %s9247_s13 }
 0x4fc   :  { %v12894_v7 = vpop.permute.xlu1 %4955 }
 0x4fd   :  { %13796 = vst [vmem:[#allocation14_spill] sm:$0xff] %v12894_v7  ;;  %7644 = vmatmul.mubr.msk.f32.gmra.mrb[126].mxu1 %vm5062_vm2, %v5026_v35  ;;  %v12897_v61 = vpop.permute.xlu0 %4671 }
 0x4fe   :  { %4377 = vrot.lane.b32.xlu1 %v12772_v56, %s9245_s2 }
 0x4ff   :  { %3815 = vrot.lane.b32.xlu0 %v12901_v10, %s9245_s2 }
 0x500   :  { %v4358_v4 = vpop.permute.xlu1 %4357 }
 0x501   :  { %v4457_v41 = vmax.f32 %v4267_v37, %v4358_v4  ;;  %v12905_v33 = vpop.permute.xlu0 %3799  ;;  %v12927_v4 = vld [vmem:[#allocation2 + $0x2a8] sm:$0xff] }
 0x502   :  { %3809 = vrot.lane.b32.xlu1 %v12797_v19, %s9245_s2 }
 0x503   :  { %v4609_v47 = vmax.f32 %v4457_v41, %v12717_v38  ;;  %3967 = vrot.lane.b32.xlu0 %v12901_v10, %s9246_s12 }
 0x504   :  { %v12912_v17 = vpop.permute.xlu1 %4961 }
 0x505   :  { %13798 = vst [vmem:[#allocation15_spill] sm:$0xff] %v12912_v17  ;;  %v4761_v15 = vmax.f32 %v4609_v47, %v12727_v28  ;;  %v12915_v32 = vpop.permute.xlu0 %3951  ;;  %v9097_v28 = vld [vmem:[#allocation2 + $0x168] sm:$0xff] }
 0x506   :  { %3961 = vrot.lane.b32.xlu1 %v12797_v19, %s9246_s12 }
 0x507   :  { %v4837_v35 = vmax.f32 %v4761_v15, %v12429_v54  ;;  %4119 = vrot.lane.b32.xlu0 %v12901_v10, %s9247_s13 }
 0x508   :  { %v3790_v51 = vpop.permute.xlu1 %3789 }
 0x509   :  { %v5027_v38 = vmax.f32 %v4837_v35, %v12610_v42  ;;  %v12923_v37 = vpop.permute.xlu0 %4103  ;;  %v3888_v41 = vmax.f32 %v9097_v28, %v3790_v51 }
 0x50a   :  { %4379 = vrot.lane.b32.xlu1 %v12805_v6, %s9245_s2 }
 0x50b   :  { %7646 = vmatprep.mubr.msk.f32.mxu1 %vm5062_vm2, %v5027_v38  ;;  %4537 = vrot.lane.b32.xlu0 %v12927_v4, %s9246_s12 }
 0x50c   :  { %v3942_v54 = vpop.permute.xlu1 %3941 }
 0x50d   :  { %v4040_v47 = vmax.f32 %v3888_v41, %v3942_v54  ;;  %v12932_v15 = vpop.permute.xlu0 %4521  ;;  %v12947_v54 = vld [vmem:[#allocation2 + $0x2b8] sm:$0xff] }
 0x50e   :  { %4531 = vrot.lane.b32.xlu1 %v12805_v6, %s9246_s12 }
 0x50f   :  { %4689 = vrot.lane.b32.xlu0 %v12927_v4, %s9247_s13  ;;  %v4192_v51 = vmax.f32 %v4040_v47, %v12735_v5  ;;  %v9098_v47 = vld [vmem:[#allocation2 + $0x170] sm:$0xff] }
 0x510   :  { %v12938_v42 = vpop.permute.xlu1 %4959  ;;  %v7630_v35 = vpop.f32.mrb[116].mxu1 }
 0x511   :  { %13799 = vst [vmem:[#allocation16_spill] sm:$0xff] %v12938_v42  ;;  %v5259_v38 = vadd.f32 %v7630_v35, %v12837_v60  ;;  %v5253_v28 = vpop.f32.mrb[117].mxu1  ;;  %v12942_v52 = vpop.permute.xlu0 %4673  ;;  %v4268_v35 = vmax.f32 %v4192_v51, %v9098_v47  ;;  %v9099_v42 = vld [vmem:[#allocation2 + $0x180] sm:$0xff]  ;;  %v12967_v51 = vld [vmem:[#allocation2 + $0x2d0] sm:$0xff] }
 0x512   :  { %v5254_v41 = vadd.f32 %v12837_v60, %v5253_v28  ;;  %4381 = vrot.lane.b32.xlu1 %v12857_v49, %s9245_s2  ;;  %v12957_v28 = vld [vmem:[#allocation2 + $0x2c0] sm:$0xff]  ;;  %v3889_v18 = vmax.f32 %v9099_v42, %v12748_v53  ;;  %v9100_v42 = vld [vmem:[#allocation2 + $0x178] sm:$0xff] }
 0x513   :  { %5436 = vst.msk [vmem:[#allocation3 + $0x18] sm:$0xff] %vm5432_vm3, %v5259_v38  ;;  %4121 = vrot.lane.b32.xlu0 %v12947_v54, %s9247_s13 }
 0x514   :  { %5435 = vst.msk [vmem:[#allocation3 + $0x10] sm:$0xff] %vm5432_vm3, %v5254_v41  ;;  %v4360_v5 = vpop.permute.xlu1 %4359  ;;  %v4041_v41 = vmax.f32 %v3889_v18, %v12756_v57  ;;  %v9101_v18 = vld [vmem:[#allocation2 + $0x188] sm:$0xff] }
 0x515   :  { %v12953_v17 = vpop.permute.xlu0 %4105  ;;  %v4458_v7 = vmax.f32 %v4268_v35, %v4360_v5 }
 0x516   :  { %3813 = vrot.lane.b32.xlu1 %v12874_v26, %s9245_s2  ;;  %v4193_v47 = vmax.f32 %v4041_v41, %v12762_v44 }
 0x517   :  { %4691 = vrot.lane.b32.xlu0 %v12957_v28, %s9247_s13 }
 0x518   :  { %v4512_v38 = vpop.permute.xlu1 %4511 }
 0x519   :  { %v4610_v59 = vmax.f32 %v4458_v7, %v4512_v38  ;;  %v12963_v10 = vpop.permute.xlu0 %4675  ;;  %v4269_v7 = vmax.f32 %v4193_v47, %v9101_v18  ;;  %v12995_v47 = vld [vmem:[#allocation2 + $0x2d8] sm:$0xff] }
 0x51a   :  { %3965 = vrot.lane.b32.xlu1 %v12874_v26, %s9246_s12 }
 0x51b   :  { %v4762_v9 = vmax.f32 %v4610_v59, %v12742_v30  ;;  %3819 = vrot.lane.b32.xlu0 %v12967_v51, %s9245_s2 }
 0x51c   :  { %v12973_v53 = vpop.permute.xlu1 %4965 }
 0x51d   :  { %v4838_v5 = vmax.f32 %v4762_v9, %v9100_v42  ;;  %v12975_v57 = vpop.permute.xlu0 %3803 }
 0x51e   :  { %4383 = vrot.lane.b32.xlu1 %v12888_v2, %s9245_s2 }
 0x51f   :  { %v5028_v35 = vmax.f32 %v4838_v5, %v12586_v46  ;;  %3971 = vrot.lane.b32.xlu0 %v12967_v51, %s9246_s12  ;;  %v9102_v5 = vld [vmem:[#allocation2 + $0x198] sm:$0xff] }
 0x520   :  { %v4362_v30 = vpop.permute.xlu1 %4361 }
 0x521   :  { %v4459_v44 = vmax.f32 %v4269_v7, %v4362_v30  ;;  %7647 = vmatmul.mubr.msk.f32.gmra.mrb[128].mxu1 %vm5062_vm2, %v5028_v35  ;;  %v12983_v59 = vpop.permute.xlu0 %3955 }
 0x522   :  { %4535 = vrot.lane.b32.xlu1 %v12888_v2, %s9246_s12 }
 0x523   :  { %v4611_v9 = vmax.f32 %v4459_v44, %v12782_v43  ;;  %4123 = vrot.lane.b32.xlu0 %v12967_v51, %s9247_s13 }
 0x524   :  { %v3794_v38 = vpop.permute.xlu1 %3793 }
 0x525   :  { %v4763_v46 = vmax.f32 %v4611_v9, %v12793_v0  ;;  %v12991_v41 = vpop.permute.xlu0 %4107  ;;  %v3890_v18 = vmax.f32 %v9102_v5, %v3794_v38  ;;  %v9103_v0 = vld [vmem:[#allocation2 + $0x1b0] sm:$0xff]  ;;  %v13015_v5 = vld [vmem:[#allocation2 + $0x2e8] sm:$0xff] }
 0x526   :  { %4385 = vrot.lane.b32.xlu1 %v12927_v4, %s9245_s2  ;;  %v3891_v44 = vmax.f32 %v9103_v0, %v12823_v14  ;;  %v9105_v0 = vld [vmem:[#allocation2 + $0x1b8] sm:$0xff] }
 0x527   :  { %v4839_v42 = vmax.f32 %v4763_v46, %v12464_v48  ;;  %4541 = vrot.lane.b32.xlu0 %v12995_v47, %s9246_s12  ;;  %v9104_v46 = vld [vmem:[#allocation2 + $0x1a0] sm:$0xff] }
 0x528   :  { %v3946_v43 = vpop.permute.xlu1 %3945  ;;  %v4043_v38 = vmax.f32 %v3891_v44, %v12832_v8  ;;  %v13024_v8 = vld [vmem:[#allocation2 + $0x2f0] sm:$0xff] }
 0x529   :  { %v4042_v7 = vmax.f32 %v3890_v18, %v3946_v43  ;;  %v5029_v35 = vmax.f32 %v4839_v42, %v12641_v12  ;;  %v13001_v30 = vpop.permute.xlu0 %4525 }
 0x52a   :  { %3817 = vrot.lane.b32.xlu1 %v12947_v54, %s9245_s2  ;;  %v4195_v14 = vmax.f32 %v4043_v38, %v12850_v1 }
 0x52b   :  { %v4194_v9 = vmax.f32 %v4042_v7, %v12801_v62  ;;  %7649 = vmatprep.mubr.msk.f32.mxu1 %vm5062_vm2, %v5029_v35  ;;  %4693 = vrot.lane.b32.xlu0 %v12995_v47, %s9247_s13 }
 0x52c   :  { %v4364_v48 = vpop.permute.xlu1 %4363  ;;  %v4271_v44 = vmax.f32 %v4195_v14, %v9105_v0 }
 0x52d   :  { %v4270_v12 = vmax.f32 %v4194_v9, %v9104_v46  ;;  %v13011_v42 = vpop.permute.xlu0 %4677  ;;  %v13034_v46 = vld [vmem:[#allocation2 + $0x300] sm:$0xff] }
 0x52e   :  { %3969 = vrot.lane.b32.xlu1 %v12947_v54, %s9246_s12 }
 0x52f   :  { %v4460_v62 = vmax.f32 %v4270_v12, %v4364_v48  ;;  %4125 = vrot.lane.b32.xlu0 %v13015_v5, %s9247_s13 }
 0x530   :  { %v4516_v18 = vpop.permute.xlu1 %4515 }
 0x531   :  { %v4612_v43 = vmax.f32 %v4460_v62, %v4516_v18  ;;  %v13020_v7 = vpop.permute.xlu0 %4109 }
 0x532   :  { %4387 = vrot.lane.b32.xlu1 %v12957_v28, %s9245_s2 }
 0x533   :  { %v4764_v35 = vmax.f32 %v4612_v43, %v12813_v13  ;;  %4695 = vrot.lane.b32.xlu0 %v13024_v8, %s9247_s13 }
 0x534   :  { %v4366_v1 = vpop.permute.xlu1 %4365 }
 0x535   :  { %v4840_v9 = vmax.f32 %v4764_v35, %v12453_v50  ;;  %v4461_v48 = vmax.f32 %v4271_v44, %v4366_v1  ;;  %v13030_v38 = vpop.permute.xlu0 %4679 }
 0x536   :  { %4539 = vrot.lane.b32.xlu1 %v12957_v28, %s9246_s12 }
 0x537   :  { %v4613_v12 = vmax.f32 %v4461_v48, %v12862_v31  ;;  %v5030_v13 = vmax.f32 %v4840_v9, %v12631_v25  ;;  %3823 = vrot.lane.b32.xlu0 %v13034_v46, %s9245_s2  ;;  %v9106_v31 = vld [vmem:[#allocation2 + $0x1c8] sm:$0xff] }
 0x538   :  { %v3798_v14 = vpop.permute.xlu1 %3797  ;;  %v7633_v62 = vpop.f32.mrb[118].mxu1 }
 0x539   :  { %v4765_v18 = vmax.f32 %v4613_v12, %v12868_v55  ;;  %v5269_v50 = vadd.f32 %v7633_v62, %v12837_v60  ;;  %v5263_v43 = vpop.f32.mrb[119].mxu1  ;;  %7650 = vmatmul.mubr.msk.f32.gmra.mrb[130].mxu1 %vm5062_vm2, %v5030_v13  ;;  %v13043_v35 = vpop.permute.xlu0 %3807  ;;  %v3892_v44 = vmax.f32 %v9106_v31, %v3798_v14  ;;  %v9107_v12 = vld [vmem:[#allocation2 + $0x1e0] sm:$0xff] }
 0x53a   :  { %v5264_v0 = vadd.f32 %v12837_v60, %v5263_v43  ;;  %4389 = vrot.lane.b32.xlu1 %v12995_v47, %s9245_s2  ;;  %v13068_v43 = vld [vmem:[#allocation2 + $0x308] sm:$0xff] }
 0x53b   :  { %v4841_v25 = vmax.f32 %v4765_v18, %v12492_v39  ;;  %5438 = vst.msk [vmem:[#allocation3 + $0x28] sm:$0xff] %vm5432_vm3, %v5269_v50  ;;  %3975 = vrot.lane.b32.xlu0 %v13034_v46, %s9246_s12  ;;  %v3893_v39 = vmax.f32 %v9107_v12, %v12905_v33  ;;  %v9108_v18 = vld [vmem:[#allocation2 + $0x1d0] sm:$0xff] }
 0x53c   :  { %5437 = vst.msk [vmem:[#allocation3 + $0x20] sm:$0xff] %vm5432_vm3, %v5264_v0  ;;  %v3950_v55 = vpop.permute.xlu1 %3949 }
 0x53d   :  { %v4044_v1 = vmax.f32 %v3892_v44, %v3950_v55  ;;  %v5031_v9 = vmax.f32 %v4841_v25, %v12675_v24  ;;  %v13054_v48 = vpop.permute.xlu0 %3959  ;;  %v4045_v62 = vmax.f32 %v3893_v39, %v12915_v32  ;;  %v9109_v44 = vld [vmem:[#allocation2 + $0x1e8] sm:$0xff] }
 0x53e   :  { %3821 = vrot.lane.b32.xlu1 %v13015_v5, %s9245_s2 }
 0x53f   :  { %v4196_v13 = vmax.f32 %v4044_v1, %v12884_v22  ;;  %7652 = vmatprep.mubr.msk.f32.mxu1 %vm5062_vm2, %v5031_v9  ;;  %4127 = vrot.lane.b32.xlu0 %v13034_v46, %s9247_s13  ;;  %v4197_v33 = vmax.f32 %v4045_v62, %v12923_v37  ;;  %v9110_v37 = vld [vmem:[#allocation2 + $0x1d8] sm:$0xff] }
 0x540   :  { %v4368_v14 = vpop.permute.xlu1 %4367 }
 0x541   :  { %v4272_v24 = vmax.f32 %v4196_v13, %v9108_v18  ;;  %v13064_v50 = vpop.permute.xlu0 %4111  ;;  %v4273_v55 = vmax.f32 %v4197_v33, %v9109_v44  ;;  %v13084_v13 = vld [vmem:[#allocation2 + $0x318] sm:$0xff]  ;;  %v13096_v33 = vld [vmem:[#allocation2 + $0x320] sm:$0xff]  ;;  %v13106_v44 = vld [vmem:[#allocation2 + $0x330] sm:$0xff] }
 0x542   :  { %3973 = vrot.lane.b32.xlu1 %v13015_v5, %s9246_s12 }
 0x543   :  { %v4462_v22 = vmax.f32 %v4272_v24, %v4368_v14  ;;  %4545 = vrot.lane.b32.xlu0 %v13068_v43, %s9246_s12 }
 0x544   :  { %v4520_v0 = vpop.permute.xlu1 %4519 }
 0x545   :  { %v4614_v25 = vmax.f32 %v4462_v22, %v4520_v0  ;;  %v13073_v31 = vpop.permute.xlu0 %4529 }
 0x546   :  { %4391 = vrot.lane.b32.xlu1 %v13024_v8, %s9245_s2 }
 0x547   :  { %v4766_v32 = vmax.f32 %v4614_v25, %v12897_v61  ;;  %4697 = vrot.lane.b32.xlu0 %v13068_v43, %s9247_s13 }
 0x548   :  { %v4370_v1 = vpop.permute.xlu1 %4369 }
 0x549   :  { %v4842_v9 = vmax.f32 %v4766_v32, %v9110_v37  ;;  %v4463_v12 = vmax.f32 %v4273_v55, %v4370_v1  ;;  %v13080_v39 = vpop.permute.xlu0 %4681  ;;  %v9112_v55 = vld [vmem:[#allocation2 + $0x210] sm:$0xff] }
 0x54a   :  { %4543 = vrot.lane.b32.xlu1 %v13024_v8, %s9246_s12  ;;  %v3895_v1 = vmax.f32 %v9112_v55, %v12975_v57 }
 0x54b   :  { %v5032_v14 = vmax.f32 %v4842_v9, %v12651_v16  ;;  %v4615_v61 = vmax.f32 %v4463_v12, %v12932_v15  ;;  %4129 = vrot.lane.b32.xlu0 %v13084_v13, %s9247_s13  ;;  %v9111_v16 = vld [vmem:[#allocation2 + $0x1f8] sm:$0xff] }
 0x54c   :  { %v3802_v62 = vpop.permute.xlu1 %3801 }
 0x54d   :  { %v4767_v18 = vmax.f32 %v4615_v61, %v12942_v52  ;;  %7653 = vmatmul.mubr.msk.f32.gmra.mrb[132].mxu1 %vm5062_vm2, %v5032_v14  ;;  %v13092_v24 = vpop.permute.xlu0 %4113  ;;  %v3894_v0 = vmax.f32 %v9111_v16, %v3802_v62 }
 0x54e   :  { %4393 = vrot.lane.b32.xlu1 %v13068_v43, %s9245_s2 }
 0x54f   :  { %v4843_v22 = vmax.f32 %v4767_v18, %v12521_v45  ;;  %4699 = vrot.lane.b32.xlu0 %v13096_v33, %s9247_s13 }
 0x550   :  { %v3954_v15 = vpop.permute.xlu1 %3953 }
 0x551   :  { %v4046_v25 = vmax.f32 %v3894_v0, %v3954_v15  ;;  %v5033_v52 = vmax.f32 %v4843_v22, %v12708_v58  ;;  %v13102_v32 = vpop.permute.xlu0 %4683  ;;  %v4047_v58 = vmax.f32 %v3895_v1, %v12983_v59  ;;  %v13134_v15 = vld [vmem:[#allocation2 + $0x338] sm:$0xff] }
 0x552   :  { %3825 = vrot.lane.b32.xlu1 %v13084_v13, %s9245_s2 }
 0x553   :  { %v4198_v45 = vmax.f32 %v4046_v25, %v12953_v17  ;;  %7655 = vmatprep.mubr.msk.f32.mxu1 %vm5062_vm2, %v5033_v52  ;;  %3827 = vrot.lane.b32.xlu0 %v13106_v44, %s9245_s2  ;;  %v4199_v14 = vmax.f32 %v4047_v58, %v12991_v41  ;;  %v9113_v41 = vld [vmem:[#allocation2 + $0x208] sm:$0xff] }
 0x554   :  { %v4372_v37 = vpop.permute.xlu1 %4371 }
 0x555   :  { %v4274_v9 = vmax.f32 %v4198_v45, %v12825_v40  ;;  %v13115_v12 = vpop.permute.xlu0 %3811  ;;  %v4275_v59 = vmax.f32 %v4199_v14, %v12839_v27 }
 0x556   :  { %3977 = vrot.lane.b32.xlu1 %v13084_v13, %s9246_s12 }
 0x557   :  { %v4464_v57 = vmax.f32 %v4274_v9, %v4372_v37  ;;  %3979 = vrot.lane.b32.xlu0 %v13106_v44, %s9246_s12 }
 0x558   :  { %v4524_v17 = vpop.permute.xlu1 %4523 }
 0x559   :  { %v4616_v61 = vmax.f32 %v4464_v57, %v4524_v17  ;;  %v13122_v62 = vpop.permute.xlu0 %3963 }
 0x55a   :  { %4395 = vrot.lane.b32.xlu1 %v13096_v33, %s9245_s2 }
 0x55b   :  { %v4768_v40 = vmax.f32 %v4616_v61, %v12963_v10  ;;  %4131 = vrot.lane.b32.xlu0 %v13106_v44, %s9247_s13  ;;  %v13161_v61 = vld [vmem:[#allocation2 + $0x350] sm:$0xff] }
 0x55c   :  { %v4374_v18 = vpop.permute.xlu1 %4373 }
 0x55d   :  { %v4844_v22 = vmax.f32 %v4768_v40, %v9113_v41  ;;  %v4465_v16 = vmax.f32 %v4275_v59, %v4374_v18  ;;  %v13130_v0 = vpop.permute.xlu0 %4115 }
 0x55e   :  { %4547 = vrot.lane.b32.xlu1 %v13096_v33, %s9246_s12 }
 0x55f   :  { %v5034_v25 = vmax.f32 %v4844_v22, %v12696_v21  ;;  %v4617_v10 = vmax.f32 %v4465_v16, %v13001_v30  ;;  %4549 = vrot.lane.b32.xlu0 %v13134_v15, %s9246_s12  ;;  %v13148_v21 = vld [vmem:[#allocation2 + $0x348] sm:$0xff]  ;;  %v13174_v22 = vld [vmem:[#allocation2 + $0x360] sm:$0xff] }
 0x560   :  { %v3806_v27 = vpop.permute.xlu1 %3805  ;;  %v7636_v52 = vpop.f32.mrb[120].mxu1 }
 0x561   :  { %v4769_v55 = vmax.f32 %v4617_v10, %v13011_v42  ;;  %v5279_v1 = vadd.f32 %v7636_v52, %v12837_v60  ;;  %v5273_v45 = vpop.f32.mrb[121].mxu1  ;;  %7656 = vmatmul.mubr.msk.f32.gmra.mrb[134].mxu1 %vm5062_vm2, %v5034_v25  ;;  %v13143_v37 = vpop.permute.xlu0 %4533  ;;  %v3896_v9 = vmax.f32 %v12852_v20, %v3806_v27 }
 0x562   :  { %v5274_v58 = vadd.f32 %v12837_v60, %v5273_v45  ;;  %4397 = vrot.lane.b32.xlu1 %v13134_v15, %s9245_s2 }
 0x563   :  { %v4845_v30 = vmax.f32 %v4769_v55, %v12553_v3  ;;  %5440 = vst.msk [vmem:[#allocation3 + $0x38] sm:$0xff] %vm5432_vm3, %v5279_v1  ;;  %4133 = vrot.lane.b32.xlu0 %v13148_v21, %s9247_s13  ;;  %v9114_v3 = vld [vmem:[#allocation2 + $0x240] sm:$0xff] }
 0x564   :  { %5439 = vst.msk [vmem:[#allocation3 + $0x30] sm:$0xff] %vm5432_vm3, %v5274_v58  ;;  %v3958_v42 = vpop.permute.xlu1 %3957  ;;  %v3897_v20 = vmax.f32 %v9114_v3, %v13043_v35  ;;  %v13206_v3 = vld [vmem:[#allocation2 + $0x378] sm:$0xf] }
 0x565   :  { %v4048_v14 = vmax.f32 %v3896_v9, %v3958_v42  ;;  %v5035_v57 = vmax.f32 %v4845_v30, %v12754_v11  ;;  %v13157_v17 = vpop.permute.xlu0 %4685  ;;  %v13201_v9 = vld [vmem:[#allocation2 + $0x368] sm:$0xff]  ;;  %v9116_v42 = vld [vmem:[#allocation2 + $0x250] sm:$0xff] }
 0x566   :  { %4701 = vrot.lane.b32.xlu1 %v13134_v15, %s9247_s13  ;;  %v4049_v11 = vmax.f32 %v3897_v20, %v13054_v48 }
 0x567   :  { %v4200_v40 = vmax.f32 %v4048_v14, %v13020_v7  ;;  %7658 = vmatprep.mubr.msk.f32.mxu1 %vm5062_vm2, %v5035_v57  ;;  %4703 = vrot.lane.b32.xlu0 %v13161_v61, %s9247_s13 }
 0x568   :  { %v4376_v59 = vpop.permute.xlu1 %4375  ;;  %v4201_v35 = vmax.f32 %v4049_v11, %v13064_v50  ;;  %v9115_v50 = vld [vmem:[#allocation2 + $0x238] sm:$0xff] }
 0x569   :  { %v4276_v18 = vmax.f32 %v4200_v40, %v12870_v23  ;;  %v13170_v41 = vpop.permute.xlu0 %4117  ;;  %v3899_v40 = vmax.f32 %v12817_v29, %v13115_v12 }
 0x56a   :  { %3829 = vrot.lane.b32.xlu1 %v13148_v21, %s9245_s2  ;;  %v4277_v48 = vmax.f32 %v4201_v35, %v12772_v56 }
 0x56b   :  { %v4466_v7 = vmax.f32 %v4276_v18, %v4376_v59  ;;  %3831 = vrot.lane.b32.xlu0 %v13174_v22, %s9245_s2  ;;  %v4051_v11 = vmax.f32 %v3899_v40, %v13122_v62 }
 0x56c   :  { %v4528_v16 = vpop.permute.xlu1 %4527 }
 0x56d   :  { %v4618_v25 = vmax.f32 %v4466_v7, %v4528_v16  ;;  %v13179_v10 = vpop.permute.xlu0 %4687  ;;  %v4203_v35 = vmax.f32 %v4051_v11, %v13130_v0  ;;  %v13228_v7 = vld [vmem:[#allocation2 + $0x340] sm:$0xff] }
 0x56e   :  { %3981 = vrot.lane.b32.xlu1 %v13148_v21, %s9246_s12 }
 0x56f   :  { %v4770_v23 = vmax.f32 %v4618_v25, %v13030_v38  ;;  %3983 = vrot.lane.b32.xlu0 %v13174_v22, %s9246_s12  ;;  %v4279_v62 = vmax.f32 %v4203_v35, %v12857_v49 }
 0x570   :  { %v4378_v27 = vpop.permute.xlu1 %4377 }
 0x571   :  { %v4846_v52 = vmax.f32 %v4770_v23, %v9115_v50  ;;  %v4467_v55 = vmax.f32 %v4277_v48, %v4378_v27  ;;  %v13187_v1 = vpop.permute.xlu0 %3815  ;;  %v9117_v23 = vld [vmem:[#allocation2 + $0x268] sm:$0xff] }
 0x572   :  { %4399 = vrot.lane.b32.xlu1 %v13161_v61, %s9245_s2 }
 0x573   :  { %v5036_v45 = vmax.f32 %v4846_v52, %v12724_v63  ;;  %v4619_v58 = vmax.f32 %v4467_v55, %v13073_v31  ;;  %4135 = vrot.lane.b32.xlu0 %v13174_v22, %s9247_s13  ;;  %v13239_v55 = vld [vmem:[#allocation2 + $0x380] sm:$0xf] }
 0x574   :  { %v3810_v56 = vpop.permute.xlu1 %3809 }
 0x575   :  { %v4771_v38 = vmax.f32 %v4619_v58, %v13080_v39  ;;  %7659 = vmatmul.mubr.msk.f32.gmra.mrb[136].mxu1 %vm5062_vm2, %v5036_v45  ;;  %v13197_v30 = vpop.permute.xlu0 %3967  ;;  %v3898_v63 = vmax.f32 %v12797_v19, %v3810_v56 }
 0x576   :  { %4551 = vrot.lane.b32.xlu1 %v13161_v61, %s9246_s12 }
 0x577   :  { %v4847_v14 = vmax.f32 %v4771_v38, %v9116_v42  ;;  %4401 = vrot.lane.b32.xlu0 %v13201_v9, %s9245_s2 }
 0x578   :  { %v3962_v31 = vpop.permute.xlu1 %3961 }
 0x579   :  { %v4050_v57 = vmax.f32 %v3898_v63, %v3962_v31  ;;  %v5037_v39 = vmax.f32 %v4847_v14, %v12790_v36  ;;  %v13209_v20 = vpop.permute.xlu0 %4119 }
 0x57a   :  { %3833 = vrot.lane.b32.xlu1 %v13206_v3, %s9245_s2 }
 0x57b   :  { %v4202_v59 = vmax.f32 %v4050_v57, %v13092_v24  ;;  %7661 = vmatprep.mubr.msk.f32.mxu1 %vm5062_vm2, %v5037_v39  ;;  %4553 = vrot.lane.b32.xlu0 %v13201_v9, %s9246_s12  ;;  %v13263_v39 = vld [vmem:[#allocation2 + $0x358] sm:$0xff] }
 0x57c   :  { %v4380_v19 = vpop.permute.xlu1 %4379 }
 0x57d   :  { %v4278_v36 = vmax.f32 %v4202_v59, %v12805_v6  ;;  %v13221_v18 = vpop.permute.xlu0 %4537 }
 0x57e   :  { %3985 = vrot.lane.b32.xlu1 %v13206_v3, %s9246_s12 }
 0x57f   :  { %v4468_v29 = vmax.f32 %v4278_v36, %v4380_v19  ;;  %4137 = vrot.lane.b32.xlu0 %v13206_v3, %s9247_s13  ;;  %v13801_v19 = vld [vmem:[#allocation18_spill] sm:$0xff] }
 0x580   :  { %v4532_v24 = vpop.permute.xlu1 %4531  ;;  %v3901_v11 = vmax.f32 %v13801_v19, %v13187_v1 }
 0x581   :  { %v4620_v12 = vmax.f32 %v4468_v29, %v4532_v24  ;;  %v13230_v16 = vpop.permute.xlu0 %4689  ;;  %v13274_v24 = vld [vmem:[#allocation2 + $0x388] sm:$0xf] }
 0x582   :  { %4967 = vrot.lane.b32.xlu1 %v13228_v7, %s9245_s2  ;;  %v4053_v35 = vmax.f32 %v3901_v11, %v13197_v30  ;;  %v9119_v30 = vld [vmem:[#allocation2 + $0x298] sm:$0xff] }
 0x583   :  { %v4772_v6 = vmax.f32 %v4620_v12, %v13102_v32  ;;  %4705 = vrot.lane.b32.xlu0 %v13201_v9, %s9247_s13 }
 0x584   :  { %v4382_v0 = vpop.permute.xlu1 %4381  ;;  %v7639_v25 = vpop.f32.mrb[122].mxu1 }
 0x585   :  { %v4848_v48 = vmax.f32 %v4772_v6, %v9117_v23  ;;  %v4469_v27 = vmax.f32 %v4279_v62, %v4382_v0  ;;  %v5289_v50 = vadd.f32 %v7639_v25, %v12837_v60  ;;  %v5283_v52 = vpop.f32.mrb[123].mxu1  ;;  %v13241_v45 = vpop.permute.xlu0 %4121  ;;  %v4205_v6 = vmax.f32 %v4053_v35, %v13209_v20 }
 0x586   :  { %v5284_v58 = vadd.f32 %v12837_v60, %v5283_v52  ;;  %4403 = vrot.lane.b32.xlu1 %v13239_v55, %s9245_s2  ;;  %v13802_v52 = vld [vmem:[#allocation11_spill] sm:$0xff] }
 0x587   :  { %v5038_v49 = vmax.f32 %v4848_v48, %v12778_v34  ;;  %v4621_v32 = vmax.f32 %v4469_v27, %v13143_v37  ;;  %5442 = vst.msk [vmem:[#allocation3 + $0x48] sm:$0xff] %vm5432_vm3, %v5289_v50  ;;  %4707 = vrot.lane.b32.xlu0 %v13239_v55, %s9247_s13  ;;  %v13258_v34 = vld [vmem:[#allocation2 + $0x370] sm:$0xff]  ;;  %v9118_v37 = vld [vmem:[#allocation2 + $0x280] sm:$0xff]  ;;  %v4281_v23 = vmax.f32 %v4205_v6, %v12927_v4 }
 0x588   :  { %5441 = vst.msk [vmem:[#allocation3 + $0x40] sm:$0xff] %vm5432_vm3, %v5284_v58  ;;  %v3814_v56 = vpop.permute.xlu1 %3813 }
 0x589   :  { %v4773_v38 = vmax.f32 %v4621_v32, %v13157_v17  ;;  %7662 = vmatmul.mubr.msk.f32.gmra.mrb[138].mxu1 %vm5062_vm2, %v5038_v49  ;;  %v13254_v42 = vpop.permute.xlu0 %4691  ;;  %v3900_v63 = vmax.f32 %v12874_v26, %v3814_v56  ;;  %v13800_v17 = vld [vmem:[#allocation12_spill] sm:$0xff] }
 0x58a   :  { %4555 = vrot.lane.b32.xlu1 %v13239_v55, %s9246_s12 }
 0x58b   :  { %v4849_v14 = vmax.f32 %v4773_v38, %v9118_v37  ;;  %4971 = vrot.lane.b32.xlu0 %v13258_v34, %s9245_s2  ;;  %v9120_v38 = vld [vmem:[#allocation2 + $0x2b0] sm:$0xff] }
 0x58c   :  { %v3966_v31 = vpop.permute.xlu1 %3965 }
 0x58d   :  { %v4052_v57 = vmax.f32 %v3900_v63, %v3966_v31  ;;  %v5039_v40 = vmax.f32 %v4849_v14, %v13800_v17  ;;  %v3820_v59 = vpop.permute.xlu0 %3819  ;;  %v13803_v63 = vld [vmem:[#allocation14_spill] sm:$0xff] }
 0x58e   :  { %4969 = vrot.lane.b32.xlu1 %v13263_v39, %s9245_s2  ;;  %v3903_v17 = vmax.f32 %v12967_v51, %v3820_v59  ;;  %v9121_v59 = vld [vmem:[#allocation2 + $0x2c8] sm:$0xff] }
 0x58f   :  { %v4204_v36 = vmax.f32 %v4052_v57, %v13170_v41  ;;  %7664 = vmatprep.mubr.msk.f32.mxu1 %vm5062_vm2, %v5039_v40 }
 0x590   :  { %v4384_v26 = vpop.permute.xlu1 %4383 }
 0x591   :  { %v4280_v29 = vmax.f32 %v4204_v36, %v12888_v2  ;;  %v3972_v12 = vpop.permute.xlu0 %3971 }
 0x592   :  { %4973 = vrot.lane.b32.xlu1 %v13274_v24, %s9245_s2 }
 0x593   :  { %v4470_v62 = vmax.f32 %v4280_v29, %v4384_v26 }
 0x594   :  { %v4536_v0 = vpop.permute.xlu1 %4535 }
 0x595   :  { %v4622_v1 = vmax.f32 %v4470_v62, %v4536_v0  ;;  %v4124_v25 = vpop.permute.xlu0 %4123 }
 0x597   :  { %v4774_v41 = vmax.f32 %v4622_v1, %v13179_v10 }
 0x598   :  { %v4386_v48 = vpop.permute.xlu1 %4385 }
 0x599   :  { %v4850_v27 = vmax.f32 %v4774_v41, %v9119_v30  ;;  %v4471_v2 = vmax.f32 %v4281_v23, %v4386_v48  ;;  %v4542_v50 = vpop.permute.xlu0 %4541 }
 0x59b   :  { %v5040_v58 = vmax.f32 %v4850_v27, %v13802_v52  ;;  %v4623_v49 = vmax.f32 %v4471_v2, %v13221_v18  ;;  %v9122_v2 = vld [vmem:[#allocation2 + $0x2e0] sm:$0xff] }
 0x59c   :  { %v3818_v32 = vpop.permute.xlu1 %3817 }
 0x59d   :  { %v4775_v20 = vmax.f32 %v4623_v49, %v13230_v16  ;;  %7665 = vmatmul.mubr.msk.f32.gmra.mrb[140].mxu1 %vm5062_vm2, %v5040_v58  ;;  %v4694_v56 = vpop.permute.xlu0 %4693  ;;  %v3902_v10 = vmax.f32 %v12947_v54, %v3818_v32  ;;  %v4055_v16 = vmax.f32 %v3903_v17, %v3972_v12 }
 0x59f   :  { %v4851_v37 = vmax.f32 %v4775_v20, %v9120_v38  ;;  %v4207_v36 = vmax.f32 %v4055_v16, %v4124_v25  ;;  %v13804_v25 = vld [vmem:[#allocation9_spill] sm:$0xff]  ;;  %v13805_v20 = vld [vmem:[#allocation16_spill] sm:$0xff] }
 0x5a0   :  { %v3970_v4 = vpop.permute.xlu1 %3969 }
 0x5a1   :  { %v4054_v14 = vmax.f32 %v3902_v10, %v3970_v4  ;;  %v5041_v31 = vmax.f32 %v4851_v37, %v13803_v63  ;;  %v4126_v57 = vpop.permute.xlu0 %4125  ;;  %v4283_v62 = vmax.f32 %v4207_v36, %v12995_v47 }
 0x5a3   :  { %v4206_v40 = vmax.f32 %v4054_v14, %v13241_v45  ;;  %7667 = vmatprep.mubr.msk.f32.mxu1 %vm5062_vm2, %v5041_v31 }
 0x5a4   :  { %v4388_v18 = vpop.permute.xlu1 %4387 }
 0x5a5   :  { %v4282_v19 = vmax.f32 %v4206_v40, %v12957_v28  ;;  %v4696_v11 = vpop.permute.xlu0 %4695 }
 0x5a7   :  { %v4472_v26 = vmax.f32 %v4282_v19, %v4388_v18 }
 0x5a8   :  { %v4540_v35 = vpop.permute.xlu1 %4539 }
 0x5a9   :  { %v4624_v54 = vmax.f32 %v4472_v26, %v4540_v35  ;;  %v3824_v29 = vpop.permute.xlu0 %3823  ;;  %v9123_v26 = vld [vmem:[#allocation2 + $0x2f8] sm:$0xff] }
 0x5ab   :  { %v4776_v6 = vmax.f32 %v4624_v54, %v13254_v42  ;;  %v13806_v54 = vld [vmem:[#allocation15_spill] sm:$0xff] }
 0x5ac   :  { %v4390_v0 = vpop.permute.xlu1 %4389  ;;  %v7642_v51 = vpop.f32.mrb[124].mxu1 }
 0x5ad   :  { %v4852_v45 = vmax.f32 %v4776_v6, %v9121_v59  ;;  %v4473_v1 = vmax.f32 %v4283_v62, %v4390_v0  ;;  %v5299_v41 = vadd.f32 %v7642_v51, %v12837_v60  ;;  %v5293_v12 = vpop.f32.mrb[125].mxu1  ;;  %v3976_v23 = vpop.permute.xlu0 %3975  ;;  %v9124_v51 = vld [vmem:[#allocation2 + $0x310] sm:$0xff] }
 0x5ae   :  { %v5294_v28 = vadd.f32 %v12837_v60, %v5293_v12 }
 0x5af   :  { %v5042_v48 = vmax.f32 %v4852_v45, %v13804_v25  ;;  %v4625_v30 = vmax.f32 %v4473_v1, %v4542_v50  ;;  %5444 = vst.msk [vmem:[#allocation3 + $0x58] sm:$0xff] %vm5432_vm3, %v5299_v41  ;;  %v3905_v50 = vmax.f32 %v13034_v46, %v3824_v29  ;;  %v13807_v1 = vld [vmem:[#allocation10_spill] sm:$0xff] }
 0x5b0   :  { %5443 = vst.msk [vmem:[#allocation3 + $0x50] sm:$0xff] %vm5432_vm3, %v5294_v28  ;;  %v3822_v42 = vpop.permute.xlu1 %3821 }
 0x5b1   :  { %v4777_v47 = vmax.f32 %v4625_v30, %v4694_v56  ;;  %7668 = vmatmul.mubr.msk.f32.gmra.mrb[142].mxu1 %vm5062_vm2, %v5042_v48  ;;  %v4128_v27 = vpop.permute.xlu0 %4127  ;;  %v3904_v58 = vmax.f32 %v13015_v5, %v3822_v42  ;;  %v4057_v14 = vmax.f32 %v3905_v50, %v3976_v23 }
 0x5b3   :  { %v4853_v52 = vmax.f32 %v4777_v47, %v9122_v2  ;;  %v4209_v17 = vmax.f32 %v4057_v14, %v4128_v27 }
 0x5b4   :  { %v3974_v49 = vpop.permute.xlu1 %3973 }
 0x5b5   :  { %v4056_v32 = vmax.f32 %v3904_v58, %v3974_v49  ;;  %v5043_v38 = vmax.f32 %v4853_v52, %v13805_v20  ;;  %v4546_v37 = vpop.permute.xlu0 %4545  ;;  %v4285_v19 = vmax.f32 %v4209_v17, %v13068_v43  ;;  %v9125_v20 = vld [vmem:[#allocation2 + $0x328] sm:$0xff] }
 0x5b7   :  { %v4208_v10 = vmax.f32 %v4056_v32, %v4126_v57  ;;  %7670 = vmatprep.mubr.msk.f32.mxu1 %vm5062_vm2, %v5043_v38 }
 0x5b8   :  { %v4392_v4 = vpop.permute.xlu1 %4391 }
 0x5b9   :  { %v4284_v56 = vmax.f32 %v4208_v10, %v13024_v8  ;;  %v4698_v63 = vpop.permute.xlu0 %4697 }
 0x5bb   :  { %v4474_v31 = vmax.f32 %v4284_v56, %v4392_v4 }
 0x5bc   :  { %v4544_v40 = vpop.permute.xlu1 %4543 }
 0x5bd   :  { %v4626_v18 = vmax.f32 %v4474_v31, %v4544_v40  ;;  %v4130_v5 = vpop.permute.xlu0 %4129 }
 0x5bf   :  { %v4778_v16 = vmax.f32 %v4626_v18, %v4696_v11 }
 0x5c0   :  { %v4394_v36 = vpop.permute.xlu1 %4393 }
 0x5c1   :  { %v4854_v35 = vmax.f32 %v4778_v16, %v9123_v26  ;;  %v4475_v46 = vmax.f32 %v4285_v19, %v4394_v36  ;;  %v4700_v57 = vpop.permute.xlu0 %4699 }
 0x5c3   :  { %v5044_v29 = vmax.f32 %v4854_v35, %v13806_v54  ;;  %v4627_v6 = vmax.f32 %v4475_v46, %v4546_v37 }
 0x5c4   :  { %v3826_v62 = vpop.permute.xlu1 %3825 }
 0x5c5   :  { %v4779_v0 = vmax.f32 %v4627_v6, %v4698_v63  ;;  %7671 = vmatmul.mubr.msk.f32.gmra.mrb[144].mxu1 %vm5062_vm2, %v5044_v29  ;;  %v3828_v8 = vpop.permute.xlu0 %3827  ;;  %v3906_v45 = vmax.f32 %v13084_v13, %v3826_v62 }
 0x5c6   :  { %v3907_v14 = vmax.f32 %v13106_v44, %v3828_v8 }
 0x5c7   :  { %v4855_v59 = vmax.f32 %v4779_v0, %v9124_v51 }
 0x5c8   :  { %v3978_v11 = vpop.permute.xlu1 %3977 }
 0x5c9   :  { %v5045_v43 = vmax.f32 %v4855_v59, %v13807_v1  ;;  %v4058_v41 = vmax.f32 %v3906_v45, %v3978_v11  ;;  %v3980_v12 = vpop.permute.xlu0 %3979 }
 0x5cb   :  { %v4210_v23 = vmax.f32 %v4058_v41, %v4130_v5  ;;  %7673 = vmatprep.mubr.msk.f32.mxu1 %vm5062_vm2, %v5045_v43  ;;  %v13328_v41 = vld [vmem:[%s13736_s5] ss:$0 sm:$0xff] }
 0x5cc   :  { %v4396_v28 = vpop.permute.xlu1 %4395 }
 0x5cd   :  { %v4286_v25 = vmax.f32 %v4210_v23, %v13096_v33  ;;  %v4132_v48 = vpop.permute.xlu0 %4131 }
 0x5cf   :  { %v4476_v30 = vmax.f32 %v4286_v25, %v4396_v28 }
 0x5d0   :  { %v4548_v42 = vpop.permute.xlu1 %4547  ;;  %v7645_v47 = vpop.f32.mrb[126].mxu1 }
 0x5d1   :  { %v4628_v27 = vmax.f32 %v4476_v30, %v4548_v42  ;;  %v5309_v2 = vadd.f32 %v7645_v47, %v12837_v60  ;;  %v5303_v52 = vpop.f32.mrb[127].mxu1  ;;  %v4550_v13 = vpop.permute.xlu0 %4549 }
 0x5d2   :  { %v5304_v58 = vadd.f32 %v12837_v60, %v5303_v52  ;;  %v4059_v60 = vmax.f32 %v3907_v14, %v3980_v12 }
 0x5d3   :  { %v4780_v49 = vmax.f32 %v4628_v27, %v4700_v57  ;;  %5446 = vst.msk [vmem:[#allocation3 + $0x68] sm:$0xff] %vm5432_vm3, %v5309_v2 }
 0x5d4   :  { %5445 = vst.msk [vmem:[#allocation3 + $0x60] sm:$0xff] %vm5432_vm3, %v5304_v58  ;;  %v4398_v32 = vpop.permute.xlu1 %4397  ;;  %v4211_v31 = vmax.f32 %v4059_v60, %v4132_v48 }
 0x5d5   :  { %v4856_v38 = vmax.f32 %v4780_v49, %v9125_v20  ;;  %v4134_v33 = vpop.permute.xlu0 %4133 }
 0x5d6   :  { %v4287_v18 = vmax.f32 %v4211_v31, %v13134_v15 }
 0x5d7   :  { %v5046_v37 = vmax.f32 %v4856_v38, %v12973_v53 }
 0x5d8   :  { %v4702_v50 = vpop.permute.xlu1 %4701  ;;  %v4477_v19 = vmax.f32 %v4287_v18, %v4398_v32 }
 0x5d9   :  { %7674 = vmatmul.mubr.msk.f32.gmra.mrb[146].mxu1 %vm5062_vm2, %v5046_v37  ;;  %v4704_v10 = vpop.permute.xlu0 %4703 }
 0x5da   :  { %v4629_v35 = vmax.f32 %v4477_v19, %v4550_v13 }
 0x5dc   :  { %v3830_v4 = vpop.permute.xlu1 %3829  ;;  %v4781_v6 = vmax.f32 %v4629_v35, %v4702_v50 }
 0x5dd   :  { %v3832_v56 = vpop.permute.xlu0 %3831  ;;  %v3908_v5 = vmax.f32 %v13148_v21, %v3830_v4 }
 0x5de   :  { %v3909_v57 = vmax.f32 %v13174_v22, %v3832_v56  ;;  %v4857_v45 = vmax.f32 %v4781_v6, %v13228_v7 }
 0x5e0   :  { %v3982_v63 = vpop.permute.xlu1 %3981 }
 0x5e1   :  { %v3984_v17 = vpop.permute.xlu0 %3983  ;;  %v4060_v53 = vmax.f32 %v3908_v5, %v3982_v63 }
 0x5e2   :  { %v4061_v29 = vmax.f32 %v3909_v57, %v3984_v17  ;;  %v13363_v57 = vld [vmem:[%s13735_s4] sm:$0xff] }
 0x5e3   :  { %v4212_v46 = vmax.f32 %v4060_v53, %v4134_v33 }
 0x5e4   :  { %v4400_v40 = vpop.permute.xlu1 %4399 }
 0x5e5   :  { %v4136_v16 = vpop.permute.xlu0 %4135  ;;  %v4288_v62 = vmax.f32 %v4212_v46, %v13161_v61 }
 0x5e6   :  { %v4213_v15 = vmax.f32 %v4061_v29, %v4136_v16 }
 0x5e7   :  { %v4478_v59 = vmax.f32 %v4288_v62, %v4400_v40 }
 0x5e8   :  { %v4552_v36 = vpop.permute.xlu1 %4551  ;;  %v4289_v11 = vmax.f32 %v4213_v15, %v13201_v9 }
 0x5e9   :  { %v4402_v26 = vpop.permute.xlu0 %4401  ;;  %v4630_v25 = vmax.f32 %v4478_v59, %v4552_v36 }
 0x5ea   :  { %v4479_v9 = vmax.f32 %v4289_v11, %v4402_v26 }
 0x5eb   :  { %v4782_v47 = vmax.f32 %v4630_v25, %v4704_v10 }
 0x5ec   :  { %v3834_v44 = vpop.permute.xlu1 %3833 }
 0x5ed   :  { %v4554_v54 = vpop.permute.xlu0 %4553  ;;  %v3910_v0 = vmax.f32 %v13206_v3, %v3834_v44  ;;  %v4858_v58 = vmax.f32 %v4782_v47, %v13263_v39  ;;  %v13368_v44 = vld [vmem:[%s13735_s4 + $0x8] sm:$0x3]  ;;  %s13399_s4 = smov 0  }
 0x5ee   :  { %v4631_v42 = vmax.f32 %v4479_v9, %v4554_v54 }
 0x5f0   :  { %v3986_v8 = vpop.permute.xlu1 %3985 }
 0x5f1   :  { %v4062_v21 = vmax.f32 %v3910_v0, %v3986_v8  ;;  %v4138_v51 = vpop.permute.xlu0 %4137 }
 0x5f3   :  { %v4214_v12 = vmax.f32 %v4062_v21, %v4138_v51 }
 0x5f4   :  { %v4968_v1 = vpop.permute.xlu1 %4967  ;;  %v7648_v43 = vpop.f32.mrb[128].mxu1 }
 0x5f5   :  { %v5047_v22 = vmax.f32 %v4857_v45, %v4968_v1  ;;  %v5319_v61 = vadd.f32 %v13328_v41, %v7648_v43  ;;  %v5313_v3 = vpop.f32.mrb[129].mxu1  ;;  %v4706_v23 = vpop.permute.xlu0 %4705  ;;  %v4290_v48 = vmax.f32 %v4214_v12, %v13239_v55 }
 0x5f6   :  { %v5314_v28 = vadd.f32 %v13328_v41, %v5313_v3  ;;  %v4783_v52 = vmax.f32 %v4631_v42, %v4706_v23  ;;  %v13397_v42 = vmov 0.0  }
 0x5f7   :  { %5448 = vst.msk [vmem:[#allocation3 + $0x78] sm:$0xff] %vm5432_vm3, %v5319_v61  ;;  %7676 = vmatprep.mubr.msk.f32.mxu1 %vm5062_vm2, %v5047_v22 }
 0x5f8   :  { %5447 = vst.msk [vmem:[#allocation3 + $0x70] sm:$0xff] %vm5432_vm3, %v5314_v28  ;;  %v4404_v7 = vpop.permute.xlu1 %4403  ;;  %v4859_v38 = vmax.f32 %v4783_v52, %v13258_v34 }
 0x5f9   :  { %v4708_v30 = vpop.permute.xlu0 %4707  ;;  %v4480_v27 = vmax.f32 %v4290_v48, %v4404_v7 }
 0x5fc   :  { %v4556_v2 = vpop.permute.xlu1 %4555 }
 0x5fd   :  { %v4632_v13 = vmax.f32 %v4480_v27, %v4556_v2  ;;  %v4972_v32 = vpop.permute.xlu0 %4971 }
 0x5fe   :  { %v5049_v37 = vmax.f32 %v4859_v38, %v4972_v32 }
 0x5ff   :  { %v4784_v49 = vmax.f32 %v4632_v13, %v4708_v30  ;;  %v13395_v30 = vmov 0.0  }
 0x600   :  { %v4970_v20 = vpop.permute.xlu1 %4969 }
 0x601   :  { %v5048_v33 = vmax.f32 %v4858_v58, %v4970_v20  ;;  %v4860_v55 = vmax.f32 %v4784_v49, %v13274_v24 }
 0x603   :  { %7677 = vmatmul.mubr.msk.f32.gmra.mrb[148].mxu1 %vm5062_vm2, %v5048_v33 }
 0x604   :  { %v4974_v50 = vpop.permute.xlu1 %4973  ;;  %7679 = vmatprep.mubr.msk.f32.mxu1 %vm5062_vm2, %v5049_v37 }
 0x605   :  { %v5050_v10 = vmax.f32 %v4860_v55, %v4974_v50 }
 0x607   :  { %7680 = vmatmul.mubr.msk.f32.gmra.mrb[150].mxu1 %vm5062_vm2, %v5050_v10 }
 0x60c   :  { %v7651_v4 = vpop.f32.mrb[130].mxu1 }
 0x60d   :  { %v5329_v39 = vadd.f32 %v13328_v41, %v7651_v4  ;;  %v5323_v14 = vpop.f32.mrb[131].mxu1 }
 0x60e   :  { %v5324_v56 = vadd.f32 %v13328_v41, %v5323_v14 }
 0x60f   :  { %5450 = vst.msk [vmem:[#allocation3 + $0x88] sm:$0xff] %vm5432_vm3, %v5329_v39 }
 0x610   :  { %5449 = vst.msk [vmem:[#allocation3 + $0x80] sm:$0xff] %vm5432_vm3, %v5324_v56 }
 0x620   :  { %v7654_v34 = vpop.f32.mrb[132].mxu1 }
 0x621   :  { %v5339_v60 = vadd.f32 %v13328_v41, %v7654_v34  ;;  %v5333_v24 = vpop.f32.mrb[133].mxu1 }
 0x622   :  { %v5334_v63 = vadd.f32 %v13328_v41, %v5333_v24 }
 0x623   :  { %5452 = vst.msk [vmem:[#allocation3 + $0x98] sm:$0xff] %vm5432_vm3, %v5339_v60 }
 0x624   :  { %5451 = vst.msk [vmem:[#allocation3 + $0x90] sm:$0xff] %vm5432_vm3, %v5334_v63 }
 0x634   :  { %v7657_v31 = vpop.f32.mrb[134].mxu1 }
 0x635   :  { %v5349_v17 = vadd.f32 %v13328_v41, %v7657_v31  ;;  %v5343_v40 = vpop.f32.mrb[135].mxu1 }
 0x636   :  { %v5344_v18 = vadd.f32 %v13328_v41, %v5343_v40 }
 0x637   :  { %5454 = vst.msk [vmem:[#allocation3 + $0xa8] sm:$0xff] %vm5432_vm3, %v5349_v17 }
 0x638   :  { %5453 = vst.msk [vmem:[#allocation3 + $0xa0] sm:$0xff] %vm5432_vm3, %v5344_v18 }
 0x648   :  { %v7660_v5 = vpop.f32.mrb[136].mxu1 }
 0x649   :  { %v5359_v16 = vadd.f32 %v13328_v41, %v7660_v5  ;;  %v5353_v19 = vpop.f32.mrb[137].mxu1 }
 0x64a   :  { %v5354_v53 = vadd.f32 %v13328_v41, %v5353_v19 }
 0x64b   :  { %5456 = vst.msk [vmem:[#allocation3 + $0xb8] sm:$0xff] %vm5432_vm3, %v5359_v16 }
 0x64c   :  { %5455 = vst.msk [vmem:[#allocation3 + $0xb0] sm:$0xff] %vm5432_vm3, %v5354_v53 }
 0x65c   :  { %v7663_v36 = vpop.f32.mrb[138].mxu1 }
 0x65d   :  { %v5369_v26 = vadd.f32 %v13328_v41, %v7663_v36  ;;  %v5363_v35 = vpop.f32.mrb[139].mxu1 }
 0x65e   :  { %v5364_v46 = vadd.f32 %v13328_v41, %v5363_v35 }
 0x65f   :  { %5458 = vst.msk [vmem:[#allocation3 + $0xc8] sm:$0xff] %vm5432_vm3, %v5369_v26 }
 0x660   :  { %5457 = vst.msk [vmem:[#allocation3 + $0xc0] sm:$0xff] %vm5432_vm3, %v5364_v46 }
 0x670   :  { %v7666_v54 = vpop.f32.mrb[140].mxu1 }
 0x671   :  { %v5379_v29 = vadd.f32 %v13328_v41, %v7666_v54  ;;  %v5373_v6 = vpop.f32.mrb[141].mxu1 }
 0x672   :  { %v5374_v62 = vadd.f32 %v13328_v41, %v5373_v6 }
 0x673   :  { %5460 = vst.msk [vmem:[#allocation3 + $0xd8] sm:$0xff] %vm5432_vm3, %v5379_v29 }
 0x674   :  { %5459 = vst.msk [vmem:[#allocation3 + $0xd0] sm:$0xff] %vm5432_vm3, %v5374_v62 }
 0x684   :  { %v7669_v0 = vpop.f32.mrb[142].mxu1 }
 0x685   :  { %v5389_v15 = vadd.f32 %v13328_v41, %v7669_v0  ;;  %v5383_v8 = vpop.f32.mrb[143].mxu1 }
 0x686   :  { %v5384_v21 = vadd.f32 %v13328_v41, %v5383_v8 }
 0x687   :  { %5462 = vst.msk [vmem:[#allocation3 + $0xe8] sm:$0xff] %vm5432_vm3, %v5389_v15 }
 0x688   :  { %5461 = vst.msk [vmem:[#allocation3 + $0xe0] sm:$0xff] %vm5432_vm3, %v5384_v21 }
 0x698   :  { %v7672_v51 = vpop.f32.mrb[144].mxu1 }
 0x699   :  { %v5399_v59 = vadd.f32 %v13328_v41, %v7672_v51  ;;  %v5393_v45 = vpop.f32.mrb[145].mxu1 }
 0x69a   :  { %v5394_v11 = vadd.f32 %v13328_v41, %v5393_v45 }
 0x69b   :  { %5464 = vst.msk [vmem:[#allocation3 + $0xf8] sm:$0xff] %vm5432_vm3, %v5399_v59 }
 0x69c   :  { %5463 = vst.msk [vmem:[#allocation3 + $0xf0] sm:$0xff] %vm5432_vm3, %v5394_v11 }
 0x6ac   :  { %v7675_v1 = vpop.f32.mrb[146].mxu1 }
 0x6ad   :  { %v5409_v43 = vadd.f32 %v13328_v41, %v7675_v1  ;;  %v5403_v22 = vpop.f32.mrb[147].mxu1 }
 0x6ae   :  { %v5404_v61 = vadd.f32 %v13328_v41, %v5403_v22 }
 0x6af   :  { %5466 = vst.msk [vmem:[#allocation3 + $0x108] sm:$0xff] %vm5432_vm3, %v5409_v43 }
 0x6b0   :  { %5465 = vst.msk [vmem:[#allocation3 + $0x100] sm:$0xff] %vm5432_vm3, %v5404_v61 }
 0x6d6   :  { %v7678_v3 = vpop.f32.mrb[148].mxu1 }
 0x6d7   :  { %v5419_v12 = vadd.f32 %v13328_v41, %v7678_v3  ;;  %v5413_v23 = vpop.f32.mrb[149].mxu1 }
 0x6d8   :  { %v5414_v28 = vadd.f32 %v13328_v41, %v5413_v23 }
 0x6d9   :  { %5468 = vst.msk [vmem:[#allocation3 + $0x118] sm:$0xff] %vm5432_vm3, %v5419_v12 }
 0x6da   :  { %5467 = vst.msk [vmem:[#allocation3 + $0x110] sm:$0xff] %vm5432_vm3, %v5414_v28  ;;  %v7681_v25 = vpop.f32.mrb[150].mxu1 }
 0x6db   :  { %v5429_v9 = vadd.f32 %v13328_v41, %v7681_v25  ;;  %v5423_v7 = vpop.f32.mrb[151].mxu1 }
 0x6dc   :  { %v5424_v48 = vadd.f32 %v13328_v41, %v5423_v7 }
 0x6dd   :  { %5471 = vst.msk [vmem:[#allocation3 + $0x128] sm:$0xf] %vm5470_vm4, %v5429_v9 }
 0x6de   :  { %5469 = vst.msk [vmem:[#allocation3 + $0x120] sm:$0xff] %vm5432_vm3, %v5424_v48 }
 0x6df LB: > { %vm5492_vm5 = vcmask 1041408   ;;  %v13408_v41 = vpack.c.bf16 %v13368_v44, %v13363_v57  ;;  %v9248_v47 = vmov 0.0|0.0   ;;  %s9249_s27 = smov 98   ;;  %vm9250_vm6 = vmmov 1   ;;  %s5483_s28 = smul.u32 10, %s9229_s4  ;;  %s9229_s4 = sphi %s13399_s4, %s5479_s4   ;;  %v9225_v42 = vphi %v13397_v42, %v6020_v42   ;;  %v9221_v30 = vphi %v13395_v30, %v6014_v30  }
 0x6e0   : > { %8237 = vmatprep.subr.bf16.mxu0 %v9248_v47  ;;  %8241 = vmatprep.subr.bf16.mxu1 %v9248_v47  ;;  %vm13411_vm7 = vmpackc.low %vm5492_vm5, %vm9250_vm6  ;;  %vm9251_vm8 = vmmov 0   ;;  %v9252_v2 = vmov 0.0   ;;  %vm5489_vm9 = vcmask 80896   ;;  %s9253_s30 = smov 108   ;;  %s9254_s0 = smov 10   ;;  %vm5597_vm10 = vcmask 74752  }
 0x6e1   : > { %5487 = vrot.lane.b32.xlu0 %v9225_v42, %s9249_s27  ;;  %7686 = vmatprep.mubr.msk.f32.mxu0 %vm9251_vm8, %v9252_v2  ;;  %s13434_s29 = scalar_lea.vmem [#allocation3], %s5483_s28  ;;  %s9255_s11 = smov 20  }
 0x6e2   : > { %8240 = vmatpush3.bf16.msk.msra.mxu0 %vm13411_vm7, %v13408_v41  ;;  %8244 = vmatpush3.bf16.msk.msra.mxu1 %vm13411_vm7, %v13408_v41  ;;  %s13443_s2 = scalar_lea.vmem [#allocation4], %s5483_s28  ;;  %s5479_s4 = sadd.s32 1, %s9229_s4  }
 0x6e3   : > { %7693 = vmatprep.mubr.msk.f32.mxu1 %vm9251_vm8, %v9252_v2  ;;  %8245 = vmatprep.subr.bf16.mxu0 %v9248_v47  ;;  %p5476_p0 = scmp.ge.s32.totalorder %s5479_s4, 30  }
 0x6e4   : > { %8249 = vmatprep.subr.bf16.mxu1 %v9248_v47  ;;  %s13500_s12 = smov (%p5476_p0), 0  }
 0x6e5   : > { %v5485_v13 = vld [vmem:[%s13434_s29] sm:$0x3]  ;;  %v7290_v63 = vld [vmem:[%s13434_s29 + $0x2] sm:$0x3]  ;;  %v7297_v15 = vld [vmem:[%s13434_s29 + $0x4] sm:$0x3] }
 0x6e6   : > { %v7304_v48 = vld [vmem:[%s13434_s29 + $0x6] sm:$0x3] }
 0x753   : > { %v5488_v52 = vpop.permute.xlu0 %5487 }
 0x754   : > { %7687 = vmatmul.mubr.msk.f32.vlgmr.msra.gmra.mrb[0].mxu0 %vm5489_vm9, %v5488_v52 }
 0x755   : > { %8248 = vmatpush3.bf16.msk.msra.mxu0 %vm13411_vm7, %v13408_v41  ;;  %7700 = vmatprep.mubr.msk.f32.mxu0 %vm9251_vm8, %v9252_v2 }
 0x756   : > { %8253 = vmatprep.subr.bf16.mxu0 %v9248_v47 }
 0x827   : > { %v5562_v58 = vpop.f32.mrb[0].mxu0 }
 0x828   : > { %v5566_v49 = vadd.f32 %v5562_v58, %v5485_v13  ;;  %v7688_v32 = vpop.f32.mrb[1].mxu0 }
 0x82a   : > { %9127 = vtanh.f32 %v5566_v49  ;;  %v7287_v38 = vmul.f32 -1.442695, %v5566_v49 }
 0x82c   : > { %9129 = vpow2.f32 %v7287_v38 }
 0x834   : > { %v9128_v20 = vpop.eup %9127 }
 0x835   : > { %5576 = vrot.lane.b32.xlu0 %v9128_v20, %s9253_s30 }
 0x836   : > { %v9130_v33 = vpop.eup %9129 }
 0x837   : > { %v5570_v37 = vadd.f32 1.0, %v9130_v33 }
 0x839   : > { %9131 = vrcp.f32 %v5570_v37 }
 0x843   : > { %v9132_v55 = vpop.eup %9131 }
 0x844   : > { %v5574_v4 = vmul.f32 %v9221_v30, %v9132_v55 }
 0x8a7   : > { %v5577_v50 = vpop.permute.xlu0 %5576 }
 0x8a8   : > { %v5579_v10 = vmul.f32 %v9132_v55, %v5577_v50 }
 0x8aa   : > { %5581 = vrot.lane.b32.xlu1 %v5579_v10, %s9254_s0 }
 0x91c   : > { %v5582_v39 = vpop.permute.xlu1 %5581 }
 0x91d   : > { %v5584_v14 = vadd.f32 %v5582_v39, %v5574_v4  ;;  %v7311_v4 = vld [vmem:[%s13434_s29 + $0x8] sm:$0x3] }
 0x91f   : > { %9133 = vtanh.f32 %v5584_v14 }
 0x929   : > { %v9134_v56 = vpop.eup %9133 }
 0x92a   : > { %5587 = vrot.lane.b32.xlu1 %v9134_v56, %s9255_s11 }
 0x99c   : > { %v5588_v34 = vpop.permute.xlu1 %5587 }
 0x99d   : > { %v5590_v60 = vmul.f32 %v9132_v55, %v5588_v34 }
 0x99f   : > { %5592 = vrot.lane.b32.xlu0 %v5590_v60, %s9249_s27 }
 0xa11   : > { %v5593_v24 = vpop.permute.xlu0 %5592 }
 0xa12   : > { %5598 = vst.msk [vmem:[%s13443_s2] sm:$0x3] %vm5597_vm10, %v5593_v24  ;;  %7694 = vmatmul.mubr.msk.f32.vlgmr.msra.gmra.mrb[0].mxu1 %vm5489_vm9, %v5593_v24 }
 0xa13   : > { %8252 = vmatpush3.bf16.msk.msra.mxu1 %vm13411_vm7, %v13408_v41  ;;  %7707 = vmatprep.mubr.msk.f32.mxu1 %vm9251_vm8, %v9252_v2 }
 0xae5   : > { %v5671_v31 = vpop.f32.mrb[0].mxu1 }
 0xae6   : > { %v5675_v17 = vadd.f32 %v7290_v63, %v5671_v31  ;;  %v7695_v40 = vpop.f32.mrb[1].mxu1 }
 0xae8   : > { %9135 = vtanh.f32 %v5675_v17  ;;  %v7293_v5 = vmul.f32 -1.442695, %v5675_v17 }
 0xaea   : > { %9137 = vpow2.f32 %v7293_v5 }
 0xaf2   : > { %v9136_v18 = vpop.eup %9135 }
 0xaf3   : > { %5685 = vrot.lane.b32.xlu1 %v9136_v18, %s9253_s30 }
 0xaf4   : > { %v9138_v16 = vpop.eup %9137 }
 0xaf5   : > { %v5679_v19 = vadd.f32 1.0, %v9138_v16 }
 0xaf7   : > { %9139 = vrcp.f32 %v5679_v19 }
 0xb01   : > { %v9140_v53 = vpop.eup %9139 }
 0xb02   : > { %v5683_v35 = vmul.f32 %v9140_v53, %v5584_v14 }
 0xb65   : > { %v5686_v36 = vpop.permute.xlu1 %5685 }
 0xb66   : > { %v5688_v26 = vmul.f32 %v9140_v53, %v5686_v36  ;;  %v13496_v36 = vmov (%p5476_p0), 0.0  }
 0xb68   : > { %5690 = vrot.lane.b32.xlu0 %v5688_v26, %s9254_s0  ;;  %v13498_v26 = vmov (%p5476_p0), 0.0  }
 0xbda   : > { %v5691_v46 = vpop.permute.xlu0 %5690 }
 0xbdb   : > { %v5693_v54 = vadd.f32 %v5691_v46, %v5683_v35 }
 0xbdd   : > { %9141 = vtanh.f32 %v5693_v54 }
 0xbe7   : > { %v9142_v29 = vpop.eup %9141 }
 0xbe8   : > { %5696 = vrot.lane.b32.xlu1 %v9142_v29, %s9255_s11 }
 0xc5a   : > { %v5697_v6 = vpop.permute.xlu1 %5696 }
 0xc5b   : > { %v5699_v62 = vmul.f32 %v9140_v53, %v5697_v6 }
 0xc5d   : > { %5701 = vrot.lane.b32.xlu0 %v5699_v62, %s9249_s27 }
 0xccf   : > { %v5702_v0 = vpop.permute.xlu0 %5701 }
 0xcd0   : > { %7295 = vst.msk [vmem:[%s13443_s2 + $0x2] sm:$0x3] %vm5597_vm10, %v5702_v0  ;;  %7701 = vmatmul.mubr.msk.f32.vlgmr.msra.gmra.mrb[2].mxu0 %vm5489_vm9, %v5702_v0 }
 0xcd1   : > { %8256 = vmatpush3.bf16.msk.msra.mxu0 %vm13411_vm7, %v13408_v41  ;;  %7714 = vmatprep.mubr.msk.f32.mxu0 %vm9251_vm8, %v9252_v2 }
 0xda3   : > { %v5778_v8 = vpop.f32.mrb[2].mxu0 }
 0xda4   : > { %v5782_v21 = vadd.f32 %v7297_v15, %v5778_v8  ;;  %v7702_v51 = vpop.f32.mrb[3].mxu0 }
 0xda6   : > { %9143 = vtanh.f32 %v5782_v21  ;;  %v7300_v45 = vmul.f32 -1.442695, %v5782_v21 }
 0xda8   : > { %9145 = vpow2.f32 %v7300_v45 }
 0xdb0   : > { %v9144_v59 = vpop.eup %9143 }
 0xdb1   : > { %5792 = vrot.lane.b32.xlu1 %v9144_v59, %s9253_s30 }
 0xdb2   : > { %v9146_v11 = vpop.eup %9145 }
 0xdb3   : > { %v5786_v1 = vadd.f32 1.0, %v9146_v11 }
 0xdb5   : > { %9147 = vrcp.f32 %v5786_v1 }
 0xdbf   : > { %v9148_v43 = vpop.eup %9147 }
 0xdc0   : > { %v5790_v3 = vmul.f32 %v9148_v43, %v5693_v54 }
 0xe23   : > { %v5793_v22 = vpop.permute.xlu1 %5792 }
 0xe24   : > { %v5795_v61 = vmul.f32 %v9148_v43, %v5793_v22 }
 0xe26   : > { %5797 = vrot.lane.b32.xlu0 %v5795_v61, %s9254_s0 }
 0xe98   : > { %v5798_v12 = vpop.permute.xlu0 %5797 }
 0xe99   : > { %v5800_v23 = vadd.f32 %v5798_v12, %v5790_v3 }
 0xe9b   : > { %9149 = vtanh.f32 %v5800_v23 }
 0xea5   : > { %v9150_v28 = vpop.eup %9149 }
 0xea6   : > { %5803 = vrot.lane.b32.xlu1 %v9150_v28, %s9255_s11 }
 0xf18   : > { %v5804_v25 = vpop.permute.xlu1 %5803 }
 0xf19   : > { %v5806_v9 = vmul.f32 %v9148_v43, %v5804_v25 }
 0xf1b   : > { %5808 = vrot.lane.b32.xlu0 %v5806_v9, %s9249_s27 }
 0xf8d   : > { %v5809_v7 = vpop.permute.xlu0 %5808 }
 0xf8e   : > { %7302 = vst.msk [vmem:[%s13443_s2 + $0x4] sm:$0x3] %vm5597_vm10, %v5809_v7  ;;  %7708 = vmatmul.mubr.msk.f32.vlgmr.msra.gmra.mrb[2].mxu1 %vm5489_vm9, %v5809_v7 }
0x1061   : > { %v5885_v30 = vpop.f32.mrb[2].mxu1 }
0x1062   : > { %v5889_v42 = vadd.f32 %v7304_v48, %v5885_v30  ;;  %v7709_v41 = vpop.f32.mrb[3].mxu1 }
0x1064   : > { %9151 = vtanh.f32 %v5889_v42  ;;  %v7307_v2 = vmul.f32 -1.442695, %v5889_v42 }
0x1066   : > { %9153 = vpow2.f32 %v7307_v2 }
0x106e   : > { %v9152_v47 = vpop.eup %9151 }
0x106f   : > { %5899 = vrot.lane.b32.xlu1 %v9152_v47, %s9253_s30 }
0x1070   : > { %v9154_v52 = vpop.eup %9153 }
0x1071   : > { %v5893_v13 = vadd.f32 1.0, %v9154_v52 }
0x1073   : > { %9155 = vrcp.f32 %v5893_v13 }
0x107d   : > { %v9156_v58 = vpop.eup %9155 }
0x107e   : > { %v5897_v20 = vmul.f32 %v9156_v58, %v5800_v23 }
0x10e1   : > { %v5900_v49 = vpop.permute.xlu1 %5899 }
0x10e2   : > { %v5902_v32 = vmul.f32 %v9156_v58, %v5900_v49 }
0x10e4   : > { %5904 = vrot.lane.b32.xlu0 %v5902_v32, %s9254_s0 }
0x1156   : > { %v5905_v38 = vpop.permute.xlu0 %5904 }
0x1157   : > { %v5907_v33 = vadd.f32 %v5905_v38, %v5897_v20 }
0x1159   : > { %9157 = vtanh.f32 %v5907_v33 }
0x1163   : > { %v9158_v37 = vpop.eup %9157 }
0x1164   : > { %5910 = vrot.lane.b32.xlu1 %v9158_v37, %s9255_s11 }
0x11d6   : > { %v5911_v55 = vpop.permute.xlu1 %5910 }
0x11d7   : > { %v5913_v50 = vmul.f32 %v9156_v58, %v5911_v55 }
0x11d9   : > { %5915 = vrot.lane.b32.xlu0 %v5913_v50, %s9249_s27 }
0x124b   : > { %v5916_v10 = vpop.permute.xlu0 %5915 }
0x124c   : > { %7309 = vst.msk [vmem:[%s13443_s2 + $0x6] sm:$0x3] %vm5597_vm10, %v5916_v10  ;;  %7715 = vmatmul.mubr.msk.f32.vlgmr.msra.gmra.mrb[4].mxu0 %vm5489_vm9, %v5916_v10 }
0x131f   : > { %v5992_v39 = vpop.f32.mrb[4].mxu0 }
0x1320   : > { %v5996_v14 = vadd.f32 %v7311_v4, %v5992_v39  ;;  %v7716_v56 = vpop.f32.mrb[5].mxu0 }
0x1322   : > { %9159 = vtanh.f32 %v5996_v14  ;;  %v7314_v60 = vmul.f32 -1.442695, %v5996_v14 }
0x1324   : > { %9161 = vpow2.f32 %v7314_v60 }
0x132c   : > { %v9160_v34 = vpop.eup %9159 }
0x132d   : > { %6006 = vrot.lane.b32.xlu1 %v9160_v34, %s9253_s30 }
0x132e   : > { %v9162_v24 = vpop.eup %9161 }
0x132f   : > { %v6000_v63 = vadd.f32 1.0, %v9162_v24 }
0x1331   : > { %9163 = vrcp.f32 %v6000_v63 }
0x133b   : > { %v9164_v31 = vpop.eup %9163 }
0x133c   : > { %v6004_v18 = vmul.f32 %v9164_v31, %v5907_v33 }
0x139f   : > { %v6007_v17 = vpop.permute.xlu1 %6006 }
0x13a0   : > { %v6009_v40 = vmul.f32 %v9164_v31, %v6007_v17 }
0x13a2   : > { %6011 = vrot.lane.b32.xlu0 %v6009_v40, %s9254_s0 }
0x1414   : > { %v6012_v5 = vpop.permute.xlu0 %6011 }
0x1415   : > { %v6014_v30 = vadd.f32 %v6012_v5, %v6004_v18  }
0x1417   : > { %9165 = vtanh.f32 %v6014_v30 }
0x1421   : > { %v9166_v16 = vpop.eup %9165 }
0x1422   : > { %6017 = vrot.lane.b32.xlu1 %v9166_v16, %s9255_s11 }
0x1494   : > { %v6018_v19 = vpop.permute.xlu1 %6017 }
0x1495   : > { %v6020_v42 = vmul.f32 %v9164_v31, %v6018_v19  }
0x1497   : > { %6022 = vrot.lane.b32.xlu0 %v6020_v42, %s9249_s27 }
0x1504   :  { %5478 = sbr.rel (!%p5476_p0) target bundleno = 1759 (0x6df), region = 104 }
0x1509   : > { %v6023_v53 = vpop.permute.xlu0 %6022 }
0x150a   : > { %7316 = vst.msk [vmem:[%s13443_s2 + $0x8] sm:$0x3] %vm5597_vm10, %v6023_v53 }
0x150b LB: > { %v9256_v35 = vmov 0.0   ;;  %s7416_s13 = smul.u32 320, %s9241_s12  ;;  %s9241_s12 = sphi %s13500_s12, %s6032_s12   ;;  %v9237_v26 = vphi %v13498_v26, %v13811_v26   ;;  %v9233_v36 = vphi %v13496_v36, %v13810_v36  }
0x150c   : > { %6121 = vmatprep.mubr.f32.mxu1 %v9256_v35  ;;  %6586 = vmatprep.mubr.f32.mxu0 %v9256_v35  ;;  %s7317_s14 = smul.u32 20, %s9241_s12  ;;  %s6032_s12 = sadd.s32 1, %s9241_s12  }
0x150d   : > { %s13518_s17 = scalar_lea.vmem %s13737_s6, %s7416_s13  ;;  %p6029_p1 = scmp.ge.s32.totalorder %s6032_s12, 15  }
0x150e   : > { %v6043_v57 = vld [vmem:[%s13518_s17 + $0x8] sm:$0xff]  ;;  %v6045_v44 = vld [vmem:[%s13518_s17 + $0x18] sm:$0x3]  ;;  %v6042_v6 = vld [vmem:[%s13518_s17] sm:$0xff]  ;;  %s13528_s18 = scalar_lea.vmem [#allocation4], %s7317_s14  ;;  %vm7007_vm11 = vcmask (%p6029_p1), 179200  }
0x150f   : > { %v7367_v46 = vld [vmem:[%s13518_s17 + $0xa8] sm:$0xff]  ;;  %v8257_v54 = vpack.c.bf16 %v6045_v44, %v6043_v57  ;;  %v7369_v29 = vld [vmem:[%s13518_s17 + $0xb8] sm:$0x3]  ;;  %v6044_v62 = vld [vmem:[%s13518_s17 + $0x10] sm:$0x3]  ;;  %vm7011_vm12 = vcmask (%p6029_p1), 1045504  }
0x1510   : > { %v8287_v0 = vpack.c.bf16 %v7369_v29, %v7367_v46  ;;  %v8260_v15 = vpack.c.bf16 %v6044_v62, %v6042_v6  ;;  %v7366_v8 = vld [vmem:[%s13518_s17 + $0xa0] sm:$0xff]  ;;  %v7368_v21 = vld [vmem:[%s13518_s17 + $0xb0] sm:$0x3]  ;;  %v7327_v45 = vld [vmem:[%s13518_s17 + $0x28] sm:$0xff]  ;;  %vm7085_vm13 = vcmask (%p6029_p1), 66560  }
0x1511   : > { %v6038_v51 = vld [vmem:[%s13528_s18] sm:$0x3]  ;;  %8259 = vmatprep.subr.msk.bf16.mxu1 %vm13411_vm7, %v8257_v54  ;;  %v8290_v59 = vpack.c.bf16 %v7368_v21, %v7366_v8  ;;  %v7329_v11 = vld [vmem:[%s13518_s17 + $0x38] sm:$0x3]  ;;  %v7364_v1 = vld [vmem:[%s13528_s18 + $0xa] sm:$0x3] }
0x1512   : > { %8289 = vmatprep.subr.msk.bf16.mxu0 %vm13411_vm7, %v8287_v0  ;;  %8262 = vmatpush1.bf16.msk.msra.mxu1 %vm13411_vm7, %v8260_v15  ;;  %v8263_v43 = vpack.c.bf16 %v7329_v11, %v7327_v45  ;;  %v7326_v22 = vld [vmem:[%s13518_s17 + $0x20] sm:$0xff]  ;;  %v7328_v61 = vld [vmem:[%s13518_s17 + $0x30] sm:$0x3]  ;;  %v7377_v3 = vld [vmem:[%s13518_s17 + $0xc8] sm:$0xff] }
0x1513   : > { %8292 = vmatpush1.bf16.msk.msra.mxu0 %vm13411_vm7, %v8290_v59  ;;  %v8266_v12 = vpack.c.bf16 %v7328_v61, %v7326_v22  ;;  %v7379_v23 = vld [vmem:[%s13518_s17 + $0xd8] sm:$0x3]  ;;  %v7376_v28 = vld [vmem:[%s13518_s17 + $0xc0] sm:$0xff]  ;;  %v7378_v25 = vld [vmem:[%s13518_s17 + $0xd0] sm:$0x3] }
0x1514   : > { %8265 = vmatprep.subr.msk.bf16.mxu1 %vm13411_vm7, %v8263_v43  ;;  %v8293_v9 = vpack.c.bf16 %v7379_v23, %v7377_v3  ;;  %v8296_v7 = vpack.c.bf16 %v7378_v25, %v7376_v28  ;;  %v7337_v48 = vld [vmem:[%s13518_s17 + $0x48] sm:$0xff]  ;;  %v7339_v30 = vld [vmem:[%s13518_s17 + $0x58] sm:$0x3]  ;;  %v7336_v2 = vld [vmem:[%s13518_s17 + $0x40] sm:$0xff] }
0x1515   : > { %7322 = vmatmul.mubr.msk.f32.vlgmr.msra.gmra.mrb[0].mxu1 %vm5489_vm9, %v6038_v51  ;;  %v8269_v42 = vpack.c.bf16 %v7339_v30, %v7337_v48  ;;  %v7387_v41 = vld [vmem:[%s13518_s17 + $0xe8] sm:$0xff]  ;;  %v7389_v47 = vld [vmem:[%s13518_s17 + $0xf8] sm:$0x3]  ;;  %v7338_v52 = vld [vmem:[%s13518_s17 + $0x50] sm:$0x3] }
0x1516   : > { %7372 = vmatmul.mubr.msk.f32.vlgmr.msra.gmra.mrb[0].mxu0 %vm5489_vm9, %v7364_v1  ;;  %8268 = vmatpush1.bf16.msk.msra.mxu1 %vm13411_vm7, %v8266_v12  ;;  %v8299_v13 = vpack.c.bf16 %v7389_v47, %v7387_v41  ;;  %v7386_v58 = vld [vmem:[%s13518_s17 + $0xe0] sm:$0xff]  ;;  %v7388_v49 = vld [vmem:[%s13518_s17 + $0xf0] sm:$0x3]  ;;  %v7347_v32 = vld [vmem:[%s13518_s17 + $0x68] sm:$0xff]  ;;  %v8272_v33 = vpack.c.bf16 %v7338_v52, %v7336_v2 }
0x1517   : > { %8295 = vmatprep.subr.msk.bf16.mxu0 %vm13411_vm7, %v8293_v9  ;;  %6214 = vmatprep.mubr.f32.mxu1 %v9256_v35  ;;  %v7349_v20 = vld [vmem:[%s13518_s17 + $0x78] sm:$0x3]  ;;  %v7324_v38 = vld [vmem:[%s13528_s18 + $0x2] sm:$0x3]  ;;  %v7397_v37 = vld [vmem:[%s13518_s17 + $0x108] sm:$0xff]  ;;  %v8302_v10 = vpack.c.bf16 %v7388_v49, %v7386_v58 }
0x1518   : > { %8298 = vmatpush1.bf16.msk.msra.mxu0 %vm13411_vm7, %v8296_v7  ;;  %6679 = vmatprep.mubr.f32.mxu0 %v9256_v35  ;;  %v7399_v55 = vld [vmem:[%s13518_s17 + $0x118] sm:$0x3]  ;;  %v7374_v50 = vld [vmem:[%s13528_s18 + $0xc] sm:$0x3]  ;;  %v8275_v4 = vpack.c.bf16 %v7349_v20, %v7347_v32  ;;  %v7346_v14 = vld [vmem:[%s13518_s17 + $0x60] sm:$0xff] }
0x1519   : > { %8271 = vmatprep.subr.msk.bf16.mxu1 %vm13411_vm7, %v8269_v42  ;;  %8301 = vmatprep.subr.msk.bf16.mxu0 %vm13411_vm7, %v8299_v13  ;;  %v8305_v39 = vpack.c.bf16 %v7399_v55, %v7397_v37  ;;  %v7348_v56 = vld [vmem:[%s13518_s17 + $0x70] sm:$0x3]  ;;  %v7396_v34 = vld [vmem:[%s13518_s17 + $0x100] sm:$0xff]  ;;  %v7357_v24 = vld [vmem:[%s13518_s17 + $0x88] sm:$0xff] }
0x151a   : > { %v7398_v60 = vld [vmem:[%s13518_s17 + $0x110] sm:$0x3]  ;;  %v7359_v63 = vld [vmem:[%s13518_s17 + $0x98] sm:$0x3]  ;;  %v7334_v31 = vld [vmem:[%s13528_s18 + $0x4] sm:$0x3]  ;;  %v8278_v17 = vpack.c.bf16 %v7348_v56, %v7346_v14 }
0x151b   : > { %v7407_v40 = vld [vmem:[%s13518_s17 + $0x128] sm:$0xff]  ;;  %v7409_v18 = vld [vmem:[%s13518_s17 + $0x138] sm:$0x3]  ;;  %v8308_v16 = vpack.c.bf16 %v7398_v60, %v7396_v34  ;;  %v8281_v19 = vpack.c.bf16 %v7359_v63, %v7357_v24  ;;  %v7356_v57 = vld [vmem:[%s13518_s17 + $0x80] sm:$0xff]  ;;  %v13816_v60 = vmov (%p6029_p1), 0.0  }
0x151c   : > { %v7384_v5 = vld [vmem:[%s13528_s18 + $0xe] sm:$0x3]  ;;  %v8311_v53 = vpack.c.bf16 %v7409_v18, %v7407_v40  ;;  %v7358_v44 = vld [vmem:[%s13518_s17 + $0x90] sm:$0x3]  ;;  %v7406_v46 = vld [vmem:[%s13518_s17 + $0x120] sm:$0xff] }
0x151d   : > { %7332 = vmatmul.mubr.msk.f32.vlgmr.msra.gmra.mrb[0].mxu1 %vm5489_vm9, %v7324_v38  ;;  %v7408_v54 = vld [vmem:[%s13518_s17 + $0x130] sm:$0x3]  ;;  %v7344_v29 = vld [vmem:[%s13528_s18 + $0x6] sm:$0x3]  ;;  %v8284_v6 = vpack.c.bf16 %v7358_v44, %v7356_v57  ;;  %v7354_v15 = vld [vmem:[%s13528_s18 + $0x8] sm:$0x3] }
0x151e   : > { %7382 = vmatmul.mubr.msk.f32.vlgmr.msra.gmra.mrb[0].mxu0 %vm5489_vm9, %v7374_v50  ;;  %8274 = vmatpush1.bf16.msk.msra.mxu1 %vm13411_vm7, %v8272_v33  ;;  %v7394_v62 = vld [vmem:[%s13528_s18 + $0x10] sm:$0x3]  ;;  %v8314_v0 = vpack.c.bf16 %v7408_v54, %v7406_v46  ;;  %v7404_v8 = vld [vmem:[%s13528_s18 + $0x12] sm:$0x3]  ;;  %v6982_v61 = vld [vmem:[%s13739_s8 + $0x8] sm:$0xff] (%p6029_p1) }
0x151f   : > { %8304 = vmatpush1.bf16.msk.msra.mxu0 %vm13411_vm7, %v8302_v10  ;;  %6307 = vmatprep.mubr.f32.mxu1 %v9256_v35  ;;  %v6983_v3 = vld [vmem:[%s13739_s8 + $0x10] sm:$0xff] (%p6029_p1)  ;;  %v6984_v23 = vld [vmem:[%s13739_s8 + $0x18] sm:$0xff] (%p6029_p1)  ;;  %v6986_v28 = vld [vmem:[%s13739_s8 + $0x28] sm:$0xff] (%p6029_p1) }
0x1520   : > { %6772 = vmatprep.mubr.f32.mxu0 %v9256_v35  ;;  %8277 = vmatprep.subr.msk.bf16.mxu1 %vm13411_vm7, %v8275_v4  ;;  %v8321_v27 = vpack.c.bf16 (%p6029_p1), %v6984_v23, %v6983_v3  ;;  %v6967_v25 = vld [vmem:[%s13738_s7] sm:$0x3] (%p6029_p1)  ;;  %v13813_v7 = vld [vmem:[#allocation8_spill] sm:$0xff] (%p6029_p1)  ;;  %v6988_v41 = vld [vmem:[%s13739_s8 + $0x38] sm:$0xff] (%p6029_p1) }
0x1521   : > { %8307 = vmatprep.subr.msk.bf16.mxu0 %vm13411_vm7, %v8305_v39  ;;  %v13814_v48 = vsub.s32 (%p6029_p1), 1, %v13813_v7  ;;  %v6987_v42 = vld [vmem:[%s13739_s8 + $0x30] sm:$0xff] (%p6029_p1)  ;;  %v6989_v52 = vld [vmem:[%s13739_s8 + $0x40] sm:$0xff] (%p6029_p1)  ;;  %v6990_v13 = vld [vmem:[%s13739_s8 + $0x48] sm:$0xff] (%p6029_p1)  ;;  %v13815_v56 = vsub.s32 (%p6029_p1), 0, %v13813_v7 }
0x1522   :  { %v8327_v2 = vpack.c.bf16 (%p6029_p1), %v6988_v41, %v6987_v42  ;;  %v8330_v58 = vpack.c.bf16 (%p6029_p1), %v6990_v13, %v6989_v52  ;;  %v6991_v49 = vld [vmem:[%s13739_s8 + $0x50] sm:$0xff] (%p6029_p1)  ;;  %v6992_v32 = vld [vmem:[%s13739_s8 + $0x58] sm:$0xff] (%p6029_p1)  ;;  %v6993_v38 = vld [vmem:[%s13739_s8 + $0x60] sm:$0xff] (%p6029_p1) }
0x1523   :  { %v6976_v30 = vrot.slane (%p6029_p1), %v6967_v25, %v13814_v48  ;;  %v8333_v20 = vpack.c.bf16 (%p6029_p1), %v6992_v32, %v6991_v49  ;;  %v6994_v33 = vld [vmem:[%s13739_s8 + $0x68] sm:$0xff] (%p6029_p1)  ;;  %v6995_v55 = vld [vmem:[%s13739_s8 + $0x70] sm:$0xff] (%p6029_p1)  ;;  %v6996_v50 = vld [vmem:[%s13739_s8 + $0x78] sm:$0xff] (%p6029_p1)  ;;  %v6972_v34 = vrot.slane (%p6029_p1), %v6967_v25, %v13815_v56 }
0x1524   :  { %v8336_v37 = vpack.c.bf16 (%p6029_p1), %v6994_v33, %v6993_v38  ;;  %v8339_v10 = vpack.c.bf16 (%p6029_p1), %v6996_v50, %v6995_v55  ;;  %v6997_v4 = vld [vmem:[%s13739_s8 + $0x80] sm:$0xff] (%p6029_p1)  ;;  %v6998_v39 = vld [vmem:[%s13739_s8 + $0x88] sm:$0xff] (%p6029_p1)  ;;  %v6999_v24 = vld [vmem:[%s13739_s8 + $0x90] sm:$0x3f] (%p6029_p1) }
0x1525   : > { %7342 = vmatmul.mubr.msk.f32.vlgmr.msra.gmra.mrb[0].mxu1 %vm5489_vm9, %v7334_v31  ;;  %v8342_v14 = vpack.c.bf16 (%p6029_p1), %v6998_v39, %v6997_v4  ;;  %v7413_v31 = vld [vmem:[%s13740_s9] ss:$0 sm:$0xff] (%p6029_p1) }
0x1526   : > { %7392 = vmatmul.mubr.msk.f32.vlgmr.msra.gmra.mrb[0].mxu0 %vm5489_vm9, %v7384_v5  ;;  %8280 = vmatpush1.bf16.msk.msra.mxu1 %vm13411_vm7, %v8278_v17 }
0x1527   : > { %8310 = vmatpush1.bf16.msk.msra.mxu0 %vm13411_vm7, %v8308_v16  ;;  %6400 = vmatprep.mubr.f32.mxu1 %v9256_v35 }
0x1528   : > { %6865 = vmatprep.mubr.f32.mxu0 %v9256_v35  ;;  %8283 = vmatprep.subr.msk.bf16.mxu1 %vm13411_vm7, %v8281_v19 }
0x1529   : > { %8313 = vmatprep.subr.msk.bf16.mxu0 %vm13411_vm7, %v8311_v53 }
0x152d   : > { %7352 = vmatmul.mubr.msk.f32.vlgmr.msra.gmra.mrb[0].mxu1 %vm5489_vm9, %v7344_v29 }
0x152e   : > { %7402 = vmatmul.mubr.msk.f32.vlgmr.msra.gmra.mrb[0].mxu0 %vm5489_vm9, %v7394_v62  ;;  %8286 = vmatpush1.bf16.msk.msra.mxu1 %vm13411_vm7, %v8284_v6 }
0x152f   : > { %8316 = vmatpush1.bf16.msk.msra.mxu0 %vm13411_vm7, %v8314_v0  ;;  %6493 = vmatprep.mubr.f32.mxu1 %v9256_v35 }
0x1530   : > { %6958 = vmatprep.mubr.f32.mxu0 %v9256_v35  ;;  %v13812_v35 = vmov (%p6029_p1), 0.0|0.0  }
0x1531   :  { %8317 = vmatprep.subr.bf16.mxu0 (%p6029_p1), %v13812_v35 }
0x1535   : > { %7362 = vmatmul.mubr.msk.f32.vlgmr.msra.gmra.mrb[0].mxu1 %vm5489_vm9, %v7354_v15 }
0x1536   : > { %7412 = vmatmul.mubr.msk.f32.vlgmr.msra.gmra.mrb[0].mxu0 %vm5489_vm9, %v7404_v8 }
0x1608   : > { %v6495_v21 = vpop.f32.mrb[0].mxu1  ;;  %6031 = sbr.rel (!%p6029_p1) target bundleno = 5387 (0x150b), region = 115 }
0x1609   : > { %v8990_v51 = vadd.f32 %v9237_v26, %v6495_v21  ;;  %v6960_v59 = vpop.f32.mrb[0].mxu0  ;;  %v6497_v45 = vpop.f32.mrb[1].mxu1 }
0x160a   : > { %v8992_v11 = vadd.f32 %v9233_v36, %v6497_v45  ;;  %v6962_v1 = vpop.f32.mrb[1].mxu0 }
0x160b   : > { %v8991_v43 = vadd.f32 %v8990_v51, %v6960_v59  }
0x160c   : > { %v8993_v22 = vadd.f32 %v8992_v11, %v6962_v1  }
0x160d   : > { %v13811_v26 = vmov %v8991_v43  ;;  %v6979_v63 = vadd.f32 (%p6029_p1), %v8991_v43, %v6972_v34 }
0x160e   : > { %v13810_v36 = vmov %v8993_v22  ;;  %v6981_v26 = vld [vmem:[%s13739_s8] sm:$0xff] (%p6029_p1)  ;;  %v6980_v47 = vadd.f32 (%p6029_p1), %v8993_v22, %v6976_v30 }
0x160f   :  { %v8318_v12 = vpack.c.bf16 %v6982_v61, %v6981_v26  ;;  %v6985_v36 = vld [vmem:[%s13739_s8 + $0x20] sm:$0xff]  ;;  %s9257_s8 = smov [#allocation5]  }
0x1610   :  { %v8324_v9 = vpack.c.bf16 %v6986_v28, %v6985_v36  ;;  %7415 = vmatprep.mubr.msk.f32.mxu0 %vm7007_vm11, %v6980_v47  ;;  %s7104_s28 = sshll.u32 %s9257_s8, 4  ;;  %s7105_s28 = int_to_ptr.vmem [resolvable:$true] %s7104_s28 }
0x1611   :  { %8319 = vmatpush1.bf16.msra.mxu0 %v8318_v12  ;;  %s9171_s9 = scalar_lea.vmem %s7105_s28, 32  ;;  %p9176_p3 = scmp.lt.s32.totalorder %s7105_s28, %s7105_s28 }
0x1612   :  { %8320 = vmatprep.subr.bf16.mxu0 %v13812_v35  ;;  %p9172_p2 = scmp.ne.s32.totalorder %s7105_s28, %s9171_s9  ;;  %p9177_p4 = scmp.lt.s32.totalorder %s9171_s9, %s9171_s9 }
0x1614   :  { %p9178_p5 = por %p9177_p4, %p9176_p3 }
0x1615   :  { %8322 = vmatpush1.bf16.msra.mxu0 %v8321_v27 }
0x1616   :  { %8323 = vmatprep.subr.bf16.mxu0 %v13812_v35  ;;  %p9179_p6 = pnand %p9178_p5, %p9172_p2 }
0x1619   :  { %8325 = vmatpush1.bf16.msra.mxu0 %v8324_v9 }
0x161a   :  { %8326 = vmatprep.subr.bf16.mxu0 %v13812_v35 }
0x161d   :  { %8328 = vmatpush1.bf16.msra.mxu0 %v8327_v2 }
0x161e   :  { %8329 = vmatprep.subr.bf16.mxu0 %v13812_v35 }
0x1621   :  { %8331 = vmatpush1.bf16.msra.mxu0 %v8330_v58 }
0x1622   :  { %8332 = vmatprep.subr.bf16.mxu0 %v13812_v35 }
0x1625   :  { %8334 = vmatpush1.bf16.msra.mxu0 %v8333_v20 }
0x1626   :  { %8335 = vmatprep.subr.bf16.mxu0 %v13812_v35 }
0x1629   :  { %8337 = vmatpush1.bf16.msra.mxu0 %v8336_v37 }
0x162a   :  { %8338 = vmatprep.subr.bf16.mxu0 %v13812_v35 }
0x162d   :  { %8340 = vmatpush1.bf16.msra.mxu0 %v8339_v10 }
0x162e   :  { %8341 = vmatprep.subr.bf16.mxu0 %v13812_v35 }
0x1631   :  { %8343 = vmatpush1.bf16.msra.mxu0 %v8342_v14 }
0x1632   :  { %7051 = vmatprep.subr.mxu0 %v13816_v60 }
0x1635   :  { %7414 = vmatpush1.msk.msra.mxu0 %vm7011_vm12, %v6999_v24 }
0x1636   :  { %7080 = vmatmul.mubr.f32.vlgmr.msra.gmra.mrb[0].mxu0 %v6979_v63 }
0x1709   :  { %v7081_v17 = vpop.f32.mrb[0].mxu0 }
0x170a   :  { %v7082_v40 = vadd.f32 %v7413_v31, %v7081_v17  ;;  %v7083_v18 = vpop.f32.mrb[1].mxu0 }
0x170c   :  { %v7086_v5 = vsel %vm7085_vm13, %v7082_v40, -inf }
0x170d   :  { %7087 = vmax.xlane.f32.xlu0 %v7086_v5 }
0x179a   :  { %v7088_v16 = vpop.xlane.xlu0 %7087 }
0x179b   :  { %v7089_v19 = vsub.f32 %v7082_v40, %v7088_v16 }
0x179d   :  { %v7090_v53 = vmul.f32 1.442695, %v7089_v19 }
0x179f   :  { %9167 = vpow2.f32 %v7090_v53 }
0x17a9   :  { %v9168_v57 = vpop.eup %9167 }
0x17aa   :  { %v7092_v44 = vsel %vm7085_vm13, %v9168_v57, 0.0 }
0x17ab   :  { %7093 = vadd.xlane.f32.xlu0 %v7092_v44 }
0x1838   :  { %v7094_v46 = vpop.xlane.xlu0 %7093 }
0x1839   :  { %9169 = vrcp.f32 %v7094_v46 }
0x1843   :  { %v9170_v54 = vpop.eup %9169 }
0x1844   :  { %v7096_v29 = vmul.f32 %v9170_v54, %v9168_v57 }
0x1846   :  { %7097 = vst.msk [vmem:[#allocation5] sm:$0x3] %vm7085_vm13, %v7096_v29 }
0x1847   :  { %9182 = shalt.err (!%p9179_p6)
}
0x1848   :  { %s9183_s0 = scalar_lea.hbm %s13741_s10, 32 }
0x1849   :  { %p9184_p7 = scmp.ne.s32.totalorder %s13741_s10, %s9183_s0  ;;  %p9187_p8 = scmp.lt.u32.totalorder %s9183_s0, %s13741_s10 }
0x184b   :  { %p9189_p9 = pnand %p9187_p8, %p9184_p7 }
0x184d   :  { %9192 = shalt.err (!%p9189_p9)
}
0x184e   :  { %7107 = dma.vmem_to_hbm [thread:$0]  %s7105_s28, 32, %s13741_s10, [#allocation6]  }
0x184f   :  { %9217 = dma.done.wait [#allocation6], 32  }
0x1850   :  { %9218 = vsyncadd [#allocation6], 4294967264 }
0x1851   :  { %7111 = vsyncpa [#allocation6], 1 }

</bundles_post_ra>
